<compile_context>
chip_gen: v5e
topology: v5e:2x2
jax: 0.10.0
libtpu: 0.0.40
codegen_flags: <defaults>
</compile_context>

<pallas_src>
import jax
import jax.numpy as jnp
from jax import lax
from jax.experimental import pallas as pl
from jax.experimental.pallas import tpu as pltpu

# Classic LeNet5 configuration implied by the module (img 28, 5x5/1 convs,
# 2x2/2 pools, 1 input channel).
KERNEL_SIZE = 5
IMG_SIZE = 28
C_IN = 1
C1, C2 = 6, 16
CONV1_OUT = IMG_SIZE - KERNEL_SIZE + 1          # 24
POOL1_OUT = CONV1_OUT // 2                      # 12
CONV2_OUT = POOL1_OUT - KERNEL_SIZE + 1         # 8
POOL2_OUT = CONV2_OUT // 2                      # 4
FC_IN = C2 * POOL2_OUT * POOL2_OUT              # 256
FC1, FC2, FC3 = 120, 84, 10
LANES = 128
P1_LANES = C1 * CONV1_OUT                       # 144 (conv1/pool1 lane width)
H2_LANES = C2 * CONV2_OUT                       # 128 (conv2/pool2 lane width)


# ----------------------------------------------------------------------------
# In-kernel helpers (unambiguous circular shifts via concatenate)
# ----------------------------------------------------------------------------
def _shift_rows(a, k):
    """out[r, :] = a[r + k, :] (circular); k is a static python int >= 0."""
    if k == 0:
        return a
    return jnp.concatenate([a[k:, :], a[:k, :]], axis=0)


def _shift_lanes(a, k):
    """out[:, l] = a[:, l + k] (circular); k is a static python int >= 0."""
    if k == 0:
        return a
    return jnp.concatenate([a[:, k:], a[:, :k]], axis=1)


# ----------------------------------------------------------------------------
# Fused LeNet5 kernel: one grid step = one block of Bt images
# ----------------------------------------------------------------------------
def _lenet5_kernel(x_ref, w1_ref, b1_ref, w2_ref, b2_ref,
                   wf1_ref, bf1_ref, wf2_ref, bf2_ref, wf3_ref, bf3_ref,
                   o_ref):
    f32 = jnp.float32
    x = x_ref[...]                                   # (Bt*28, 28): row = b*28+y
    bt = x.shape[0] // IMG_SIZE

    # ---- conv1 + relu: banded matmul over W, 5 vertical taps folded into K.
    # lhs1 column i*28 + x_in holds x[b, y+i, x_in]; garbage rows (y >= 24,
    # possibly cross-image after the circular shift) are never read downstream.
    lhs1 = jnp.concatenate([_shift_rows(x, i) for i in range(KERNEL_SIZE)],
                           axis=1)                   # (Bt*28, 140)
    h1 = jnp.maximum(
        jnp.dot(lhs1, w1_ref[...], preferred_element_type=f32) + b1_ref[...],
        0.0)                                         # (Bt*28, 144): lane = co*24 + x

    # ---- pool1 (2x2 / 2): shift+max, values kept at even rows / even x lanes.
    hv = jnp.maximum(h1, _shift_rows(h1, 1))
    p1 = jnp.maximum(hv, _shift_lanes(hv, 1))        # valid @ row b*28+2t, lane c*24+2s

    # ---- conv2 + relu: banded matmul, vertical taps are row-shifts of 2*i
    # (rows stay un-compacted); even-lane selection is folded into w2.
    lhs2 = jnp.concatenate([_shift_rows(p1, 2 * i) for i in range(KERNEL_SIZE)],
                           axis=1)                   # (Bt*28, 720)
    h2 = jnp.maximum(
        jnp.dot(lhs2, w2_ref[...], preferred_element_type=f32) + b2_ref[...],
        0.0)                                         # (Bt*28, 128): lane = co2*8 + x2,
                                                     # valid @ rows b*28 + 2*y2

    # ---- pool2 (2x2 / 2): valid @ rows b*28 + 4*t2, lanes co2*8 + 2*s2.
    h2v = jnp.maximum(h2, _shift_rows(h2, 2))
    p2 = jnp.maximum(h2v, _shift_lanes(h2v, 1))      # (Bt*28, 128)

    # ---- gather the 4 valid rows per image -> (Bt, 512) fc1 operand.
    # (lane-preserving reshape: last dim stays 128)
    p3 = p2.reshape(bt, IMG_SIZE, LANES)             # (Bt, 28, 128)
    a2 = jnp.concatenate([p3[:, 4 * t, :] for t in range(POOL2_OUT)],
                         axis=1)                     # (Bt, 512)

    # ---- fc1 + relu, fc2 + relu, fc3: batched, lane-dense (Bt, 128) matmuls.
    y = jnp.maximum(
        jnp.dot(a2, wf1_ref[...], preferred_element_type=f32) + bf1_ref[...], 0.0)
    y = jnp.maximum(
        jnp.dot(y, wf2_ref[...], preferred_element_type=f32) + bf2_ref[...], 0.0)
    y = jnp.dot(y, wf3_ref[...], preferred_element_type=f32) + bf3_ref[...]
    o_ref[...] = y                                   # (Bt, 128), logits in lanes 0..9


# ----------------------------------------------------------------------------
# One-time parameter preparation (banded / reordered / zero-padded weights)
# ----------------------------------------------------------------------------
def prepare_params(p):
    f32 = jnp.float32
    K = KERNEL_SIZE

    # conv1: W1[i*28 + x_in, co*24 + x_out] = conv1_w[co, 0, i, x_in - x_out]
    xi = jnp.arange(IMG_SIZE)[:, None]
    xo = jnp.arange(CONV1_OUT)[None, :]
    d = xi - xo
    m = (d >= 0) & (d < K)
    dc = jnp.clip(d, 0, K - 1)
    w1 = p["conv1_w"].astype(f32)[:, 0, :, :]                    # (6, 5, 5) [co, i, j]
    band1 = jnp.where(m[None, None], w1[:, :, dc], 0.0)          # (6, 5, 28, 24)
    w1f = band1.transpose(1, 2, 0, 3).reshape(K * IMG_SIZE, P1_LANES)     # (140, 144)
    b1f = jnp.repeat(p["conv1_b"].astype(f32), CONV1_OUT)[None, :]        # (1, 144)

    # conv2: input lanes are c*24 + 2*x_in (pool1 values live on even lanes),
    # W2[i*144 + c*24 + 2*x_in, co2*8 + x_out] = conv2_w[co2, c, i, x_in - x_out]
    xi2 = jnp.arange(POOL1_OUT)[:, None]
    xo2 = jnp.arange(CONV2_OUT)[None, :]
    d2 = xi2 - xo2
    m2 = (d2 >= 0) & (d2 < K)
    dc2 = jnp.clip(d2, 0, K - 1)
    w2 = p["conv2_w"].astype(f32)                                # (16, 6, 5, 5)
    band2 = jnp.where(m2[None, None, None], w2[:, :, :, dc2], 0.0)   # (16,6,5,12,8)
    band2 = band2.transpose(2, 1, 3, 0, 4)                       # (5,6,12,16,8)
    w2e = jnp.zeros((K, C1, POOL1_OUT, 2, C2, CONV2_OUT), f32)
    w2e = w2e.at[:, :, :, 0].set(band2)                          # even lanes only
    w2f = w2e.reshape(K * P1_LANES, H2_LANES)                    # (720, 128)
    b2f = jnp.repeat(p["conv2_b"].astype(f32), CONV2_OUT)[None, :]        # (1, 128)

    # fc1: a2 column = t2*128 + co2*8 + 2*s2  <->  torch feature co2*16 + t2*4 + s2
    wq = p["fc1_w"].astype(f32).reshape(FC1, C2, POOL2_OUT, POOL2_OUT)
    wq = wq.transpose(2, 1, 3, 0)                                # (4, 16, 4, 120)
    wf1 = jnp.zeros((POOL2_OUT, C2, POOL2_OUT, 2, LANES), f32)
    wf1 = wf1.at[:, :, :, 0, :FC1].set(wq)
    wf1 = wf1.reshape(POOL2_OUT * LANES, LANES)                  # (512, 128)
    bf1 = jnp.zeros((1, LANES), f32).at[0, :FC1].set(p["fc1_b"].astype(f32))

    wf2 = jnp.zeros((LANES, LANES), f32).at[:FC1, :FC2].set(p["fc2_w"].astype(f32).T)
    bf2 = jnp.zeros((1, LANES), f32).at[0, :FC2].set(p["fc2_b"].astype(f32))
    wf3 = jnp.zeros((LANES, LANES), f32).at[:FC2, :FC3].set(p["fc3_w"].astype(f32).T)
    bf3 = jnp.zeros((1, LANES), f32).at[0, :FC3].set(p["fc3_b"].astype(f32))

    return {"w1": w1f, "b1": b1f, "w2": w2f, "b2": b2f,
            "wf1": wf1, "bf1": bf1, "wf2": wf2, "bf2": bf2,
            "wf3": wf3, "bf3": bf3}


# ----------------------------------------------------------------------------
# Forward pass (single fused pallas_call, batch-blocked "parallel" grid)
# ----------------------------------------------------------------------------
def lenet5_forward(x, pp, block_b=32):
    B = x.shape[0]
    bt = block_b if B >= block_b else 8            # batch block (images / grid step)
    bp = -(-B // bt) * bt                          # batch padded to a multiple of bt

    x2 = x.astype(jnp.float32).reshape(B * IMG_SIZE, IMG_SIZE)   # (B*28, 28), 3 KiB/img
    if bp != B:
        x2 = jnp.pad(x2, ((0, (bp - B) * IMG_SIZE), (0, 0)))

    def const2d(shape):
        return pl.BlockSpec(shape, lambda b: (0, 0))

    in_specs = [pl.BlockSpec((bt * IMG_SIZE, IMG_SIZE), lambda b: (b, 0))]
    in_specs += [const2d(pp[k].shape) for k in
                 ("w1", "b1", "w2", "b2", "wf1", "bf1", "wf2", "bf2", "wf3", "bf3")]

    out = pl.pallas_call(
        _lenet5_kernel,
        out_shape=jax.ShapeDtypeStruct((bp, LANES), jnp.float32),
        grid=(bp // bt,),
        in_specs=in_specs,
        out_specs=pl.BlockSpec((bt, LANES), lambda b: (b, 0)),
        compiler_params=pltpu.CompilerParams(
            dimension_semantics=("parallel",),
            vmem_limit_bytes=48 * 1024 * 1024,
        ),
    )(x2, pp["w1"], pp["b1"], pp["w2"], pp["b2"],
      pp["wf1"], pp["bf1"], pp["wf2"], pp["bf2"], pp["wf3"], pp["bf3"])
    return out[:B, :FC3]                           # (B, 10)


# ----------------------------------------------------------------------------
# Pure-JAX reference (mirrors the PyTorch module) for a correctness check
# ----------------------------------------------------------------------------
def lenet5_reference(x, p):
    dn = ("NCHW", "OIHW", "NCHW")
    y = lax.conv_general_dilated(x, p["conv1_w"], (1, 1), "VALID", dimension_numbers=dn)
    y = jnp.maximum(y + p["conv1_b"][None, :, None, None], 0.0)
    y = lax.reduce_window(y, -jnp.inf, lax.max, (1, 1, 2, 2), (1, 1, 2, 2), "VALID")
    y = lax.conv_general_dilated(y, p["conv2_w"], (1, 1), "VALID", dimension_numbers=dn)
    y = jnp.maximum(y + p["conv2_b"][None, :, None, None], 0.0)
    y = lax.reduce_window(y, -jnp.inf, lax.max, (1, 1, 2, 2), (1, 1, 2, 2), "VALID")
    y = y.reshape(x.shape[0], -1)
    y = jnp.maximum(y @ p["fc1_w"].T + p["fc1_b"], 0.0)
    y = jnp.maximum(y @ p["fc2_w"].T + p["fc2_b"], 0.0)
    return y @ p["fc3_w"].T + p["fc3_b"]


# ----------------------------------------------------------------------------
# Deterministic PyTorch-default-like parameters
# ----------------------------------------------------------------------------
def init_params(key):
    def uni(k, shape, fan_in):
        bound = 1.0 / float(fan_in) ** 0.5
        return jax.random.uniform(k, shape, jnp.float32, -bound, bound)

    ks = jax.random.split(key, 10)
    kk = KERNEL_SIZE
    return {
        "conv1_w": uni(ks[0], (C1, C_IN, kk, kk), C_IN * kk * kk),
        "conv1_b": uni(ks[1], (C1,), C_IN * kk * kk),
        "conv2_w": uni(ks[2], (C2, C1, kk, kk), C1 * kk * kk),
        "conv2_b": uni(ks[3], (C2,), C1 * kk * kk),
        "fc1_w":   uni(ks[4], (FC1, FC_IN), FC_IN),
        "fc1_b":   uni(ks[5], (FC1,), FC_IN),
        "fc2_w":   uni(ks[6], (FC2, FC1), FC1),
        "fc2_b":   uni(ks[7], (FC2,), FC1),
        "fc3_w":   uni(ks[8], (FC3, FC2), FC2),
        "fc3_b":   uni(ks[9], (FC3,), FC2),
    }


if __name__ == "__main__":
    key = jax.random.PRNGKey(0)
    k_x, k_p = jax.random.split(key)
    x = jax.random.normal(k_x, (2, C_IN, IMG_SIZE, IMG_SIZE), jnp.float32)
    params = init_params(k_p)
    prepped = prepare_params(params)               # one-time weight layout prep

    fwd = jax.jit(lenet5_forward)
    out = jax.block_until_ready(fwd(x, prepped))
    assert out.shape == (2, FC3) and out.dtype == jnp.float32

    with jax.default_matmul_precision("highest"):
        ref = lenet5_reference(x, params)
    # loose tolerance only to stay robust to MXU f32 matmul pass choices
    assert bool(jnp.allclose(out, ref, rtol=5e-2, atol=5e-2))
    print("KERNEL_OK")
</pallas_src>

<mosaic_0001>
module attributes {stable_mosaic.version = 11 : i64} {
  func.func @_lenet5_kernel(%arg0: i32, %arg1: memref<224x28xf32, #tpu.memory_space<vmem>>, %arg2: memref<140x144xf32, #tpu.memory_space<vmem>>, %arg3: memref<1x144xf32, #tpu.memory_space<vmem>>, %arg4: memref<720x128xf32, #tpu.memory_space<vmem>>, %arg5: memref<1x128xf32, #tpu.memory_space<vmem>>, %arg6: memref<512x128xf32, #tpu.memory_space<vmem>>, %arg7: memref<1x128xf32, #tpu.memory_space<vmem>>, %arg8: memref<128x128xf32, #tpu.memory_space<vmem>>, %arg9: memref<1x128xf32, #tpu.memory_space<vmem>>, %arg10: memref<128x128xf32, #tpu.memory_space<vmem>>, %arg11: memref<1x128xf32, #tpu.memory_space<vmem>>, %arg12: memref<8x128xf32, #tpu.memory_space<vmem>>) attributes {dimension_semantics = [#tpu.dimension_semantics<parallel>], iteration_bounds = array<i64: 1>, scalar_prefetch = 0 : i64, scratch_operands = 0 : i64, tpu.core_type = #tpu.core_type<tc>, window_params = [{transform_indices = @transform_0, window_bounds = array<i64: 224, 28>}, {pipeline_mode = #tpu.pipeline_mode<synchronous>, transform_indices = @transform_1, window_bounds = array<i64: 140, 144>}, {pipeline_mode = #tpu.pipeline_mode<synchronous>, transform_indices = @transform_2, window_bounds = array<i64: 1, 144>}, {pipeline_mode = #tpu.pipeline_mode<synchronous>, transform_indices = @transform_3, window_bounds = array<i64: 720, 128>}, {pipeline_mode = #tpu.pipeline_mode<synchronous>, transform_indices = @transform_4, window_bounds = array<i64: 1, 128>}, {pipeline_mode = #tpu.pipeline_mode<synchronous>, transform_indices = @transform_5, window_bounds = array<i64: 512, 128>}, {pipeline_mode = #tpu.pipeline_mode<synchronous>, transform_indices = @transform_6, window_bounds = array<i64: 1, 128>}, {pipeline_mode = #tpu.pipeline_mode<synchronous>, transform_indices = @transform_7, window_bounds = array<i64: 128, 128>}, {pipeline_mode = #tpu.pipeline_mode<synchronous>, transform_indices = @transform_8, window_bounds = array<i64: 1, 128>}, {pipeline_mode = #tpu.pipeline_mode<synchronous>, transform_indices = @transform_9, window_bounds = array<i64: 128, 128>}, {pipeline_mode = #tpu.pipeline_mode<synchronous>, transform_indices = @transform_10, window_bounds = array<i64: 1, 128>}, {transform_indices = @transform_11, window_bounds = array<i64: 8, 128>}]} {
    %c0 = arith.constant 0 : index
    %c0_0 = arith.constant 0 : index
    %0 = vector.load %arg1[%c0, %c0_0] : memref<224x28xf32, #tpu.memory_space<vmem>>, vector<224x28xf32>
    %1 = vector.extract_strided_slice %0 {offsets = [1, 0], sizes = [223, 28], strides = [1, 1]} : vector<224x28xf32> to vector<223x28xf32>
    %2 = vector.extract_strided_slice %0 {offsets = [0, 0], sizes = [1, 28], strides = [1, 1]} : vector<224x28xf32> to vector<1x28xf32>
    %3 = tpu.concatenate %1, %2 in 0 : vector<223x28xf32>, vector<1x28xf32> -> vector<224x28xf32>
    %4 = vector.extract_strided_slice %0 {offsets = [2, 0], sizes = [222, 28], strides = [1, 1]} : vector<224x28xf32> to vector<222x28xf32>
    %5 = vector.extract_strided_slice %0 {offsets = [0, 0], sizes = [2, 28], strides = [1, 1]} : vector<224x28xf32> to vector<2x28xf32>
    %6 = tpu.concatenate %4, %5 in 0 : vector<222x28xf32>, vector<2x28xf32> -> vector<224x28xf32>
    %7 = vector.extract_strided_slice %0 {offsets = [3, 0], sizes = [221, 28], strides = [1, 1]} : vector<224x28xf32> to vector<221x28xf32>
    %8 = vector.extract_strided_slice %0 {offsets = [0, 0], sizes = [3, 28], strides = [1, 1]} : vector<224x28xf32> to vector<3x28xf32>
    %9 = tpu.concatenate %7, %8 in 0 : vector<221x28xf32>, vector<3x28xf32> -> vector<224x28xf32>
    %10 = vector.extract_strided_slice %0 {offsets = [4, 0], sizes = [220, 28], strides = [1, 1]} : vector<224x28xf32> to vector<220x28xf32>
    %11 = vector.extract_strided_slice %0 {offsets = [0, 0], sizes = [4, 28], strides = [1, 1]} : vector<224x28xf32> to vector<4x28xf32>
    %12 = tpu.concatenate %10, %11 in 0 : vector<220x28xf32>, vector<4x28xf32> -> vector<224x28xf32>
    %13 = tpu.concatenate %0, %3, %6, %9, %12 in 1 : vector<224x28xf32>, vector<224x28xf32>, vector<224x28xf32>, vector<224x28xf32>, vector<224x28xf32> -> vector<224x140xf32>
    %c0_1 = arith.constant 0 : index
    %c0_2 = arith.constant 0 : index
    %14 = vector.load %arg2[%c0_1, %c0_2] : memref<140x144xf32, #tpu.memory_space<vmem>>, vector<140x144xf32>
    %cst = arith.constant dense<0.000000e+00> : vector<224x144xf32>
    %15 = tpu.matmul %13, %14, %cst {dimension_numbers = #tpu.dot_dimension_numbers<[1], [0], [0], [1], [0, 0, 1, 1], [], []>} : vector<224x140xf32>, vector<140x144xf32>, vector<224x144xf32> -> vector<224x144xf32>
    %c0_3 = arith.constant 0 : index
    %c0_4 = arith.constant 0 : index
    %16 = vector.load %arg3[%c0_3, %c0_4] : memref<1x144xf32, #tpu.memory_space<vmem>>, vector<1x144xf32>
    %17 = vector.broadcast %16 : vector<1x144xf32> to vector<224x144xf32>
    %18 = arith.addf %15, %17 : vector<224x144xf32>
    %cst_5 = arith.constant 0.000000e+00 : f32
    %19 = vector.broadcast %cst_5 : f32 to vector<224x144xf32>
    %20 = arith.maximumf %18, %19 : vector<224x144xf32>
    %21 = vector.extract_strided_slice %20 {offsets = [1, 0], sizes = [223, 144], strides = [1, 1]} : vector<224x144xf32> to vector<223x144xf32>
    %22 = vector.extract_strided_slice %20 {offsets = [0, 0], sizes = [1, 144], strides = [1, 1]} : vector<224x144xf32> to vector<1x144xf32>
    %23 = tpu.concatenate %21, %22 in 0 : vector<223x144xf32>, vector<1x144xf32> -> vector<224x144xf32>
    %24 = arith.maximumf %20, %23 : vector<224x144xf32>
    %25 = vector.extract_strided_slice %24 {offsets = [0, 1], sizes = [224, 143], strides = [1, 1]} : vector<224x144xf32> to vector<224x143xf32>
    %26 = vector.extract_strided_slice %24 {offsets = [0, 0], sizes = [224, 1], strides = [1, 1]} : vector<224x144xf32> to vector<224x1xf32>
    %27 = tpu.concatenate %25, %26 in 1 : vector<224x143xf32>, vector<224x1xf32> -> vector<224x144xf32>
    %28 = arith.maximumf %24, %27 : vector<224x144xf32>
    %29 = vector.extract_strided_slice %28 {offsets = [2, 0], sizes = [222, 144], strides = [1, 1]} : vector<224x144xf32> to vector<222x144xf32>
    %30 = vector.extract_strided_slice %28 {offsets = [0, 0], sizes = [2, 144], strides = [1, 1]} : vector<224x144xf32> to vector<2x144xf32>
    %31 = tpu.concatenate %29, %30 in 0 : vector<222x144xf32>, vector<2x144xf32> -> vector<224x144xf32>
    %32 = vector.extract_strided_slice %28 {offsets = [4, 0], sizes = [220, 144], strides = [1, 1]} : vector<224x144xf32> to vector<220x144xf32>
    %33 = vector.extract_strided_slice %28 {offsets = [0, 0], sizes = [4, 144], strides = [1, 1]} : vector<224x144xf32> to vector<4x144xf32>
    %34 = tpu.concatenate %32, %33 in 0 : vector<220x144xf32>, vector<4x144xf32> -> vector<224x144xf32>
    %35 = vector.extract_strided_slice %28 {offsets = [6, 0], sizes = [218, 144], strides = [1, 1]} : vector<224x144xf32> to vector<218x144xf32>
    %36 = vector.extract_strided_slice %28 {offsets = [0, 0], sizes = [6, 144], strides = [1, 1]} : vector<224x144xf32> to vector<6x144xf32>
    %37 = tpu.concatenate %35, %36 in 0 : vector<218x144xf32>, vector<6x144xf32> -> vector<224x144xf32>
    %38 = vector.extract_strided_slice %28 {offsets = [8, 0], sizes = [216, 144], strides = [1, 1]} : vector<224x144xf32> to vector<216x144xf32>
    %39 = vector.extract_strided_slice %28 {offsets = [0, 0], sizes = [8, 144], strides = [1, 1]} : vector<224x144xf32> to vector<8x144xf32>
    %40 = tpu.concatenate %38, %39 in 0 : vector<216x144xf32>, vector<8x144xf32> -> vector<224x144xf32>
    %41 = tpu.concatenate %28, %31, %34, %37, %40 in 1 : vector<224x144xf32>, vector<224x144xf32>, vector<224x144xf32>, vector<224x144xf32>, vector<224x144xf32> -> vector<224x720xf32>
    %c0_6 = arith.constant 0 : index
    %c0_7 = arith.constant 0 : index
    %42 = vector.load %arg4[%c0_6, %c0_7] : memref<720x128xf32, #tpu.memory_space<vmem>>, vector<720x128xf32>
    %cst_8 = arith.constant dense<0.000000e+00> : vector<224x128xf32>
    %43 = tpu.matmul %41, %42, %cst_8 {dimension_numbers = #tpu.dot_dimension_numbers<[1], [0], [0], [1], [0, 0, 1, 1], [], []>} : vector<224x720xf32>, vector<720x128xf32>, vector<224x128xf32> -> vector<224x128xf32>
    %c0_9 = arith.constant 0 : index
    %c0_10 = arith.constant 0 : index
    %44 = vector.load %arg5[%c0_9, %c0_10] : memref<1x128xf32, #tpu.memory_space<vmem>>, vector<1x128xf32>
    %45 = vector.broadcast %44 : vector<1x128xf32> to vector<224x128xf32>
    %46 = arith.addf %43, %45 : vector<224x128xf32>
    %cst_11 = arith.constant 0.000000e+00 : f32
    %47 = vector.broadcast %cst_11 : f32 to vector<224x128xf32>
    %48 = arith.maximumf %46, %47 : vector<224x128xf32>
    %49 = vector.extract_strided_slice %48 {offsets = [2, 0], sizes = [222, 128], strides = [1, 1]} : vector<224x128xf32> to vector<222x128xf32>
    %50 = vector.extract_strided_slice %48 {offsets = [0, 0], sizes = [2, 128], strides = [1, 1]} : vector<224x128xf32> to vector<2x128xf32>
    %51 = tpu.concatenate %49, %50 in 0 : vector<222x128xf32>, vector<2x128xf32> -> vector<224x128xf32>
    %52 = arith.maximumf %48, %51 : vector<224x128xf32>
    %53 = vector.extract_strided_slice %52 {offsets = [0, 1], sizes = [224, 127], strides = [1, 1]} : vector<224x128xf32> to vector<224x127xf32>
    %54 = vector.extract_strided_slice %52 {offsets = [0, 0], sizes = [224, 1], strides = [1, 1]} : vector<224x128xf32> to vector<224x1xf32>
    %55 = tpu.concatenate %53, %54 in 1 : vector<224x127xf32>, vector<224x1xf32> -> vector<224x128xf32>
    %56 = arith.maximumf %52, %55 : vector<224x128xf32>
    %57 = vector.shape_cast %56 : vector<224x128xf32> to vector<8x28x128xf32>
    %58 = vector.extract_strided_slice %57 {offsets = [0, 0, 0], sizes = [8, 1, 128], strides = [1, 1, 1]} : vector<8x28x128xf32> to vector<8x1x128xf32>
    %59 = vector.shape_cast %58 : vector<8x1x128xf32> to vector<8x128xf32>
    %60 = vector.extract_strided_slice %57 {offsets = [0, 4, 0], sizes = [8, 1, 128], strides = [1, 1, 1]} : vector<8x28x128xf32> to vector<8x1x128xf32>
    %61 = vector.shape_cast %60 : vector<8x1x128xf32> to vector<8x128xf32>
    %62 = vector.extract_strided_slice %57 {offsets = [0, 8, 0], sizes = [8, 1, 128], strides = [1, 1, 1]} : vector<8x28x128xf32> to vector<8x1x128xf32>
    %63 = vector.shape_cast %62 : vector<8x1x128xf32> to vector<8x128xf32>
    %64 = vector.extract_strided_slice %57 {offsets = [0, 12, 0], sizes = [8, 1, 128], strides = [1, 1, 1]} : vector<8x28x128xf32> to vector<8x1x128xf32>
    %65 = vector.shape_cast %64 : vector<8x1x128xf32> to vector<8x128xf32>
    %66 = tpu.concatenate %59, %61, %63, %65 in 1 : vector<8x128xf32>, vector<8x128xf32>, vector<8x128xf32>, vector<8x128xf32> -> vector<8x512xf32>
    %c0_12 = arith.constant 0 : index
    %c0_13 = arith.constant 0 : index
    %67 = vector.load %arg6[%c0_12, %c0_13] : memref<512x128xf32, #tpu.memory_space<vmem>>, vector<512x128xf32>
    %cst_14 = arith.constant dense<0.000000e+00> : vector<8x128xf32>
    %68 = tpu.matmul %66, %67, %cst_14 {dimension_numbers = #tpu.dot_dimension_numbers<[1], [0], [0], [1], [0, 0, 1, 1], [], []>} : vector<8x512xf32>, vector<512x128xf32>, vector<8x128xf32> -> vector<8x128xf32>
    %c0_15 = arith.constant 0 : index
    %c0_16 = arith.constant 0 : index
    %69 = vector.load %arg7[%c0_15, %c0_16] : memref<1x128xf32, #tpu.memory_space<vmem>>, vector<1x128xf32>
    %70 = vector.broadcast %69 : vector<1x128xf32> to vector<8x128xf32>
    %71 = arith.addf %68, %70 : vector<8x128xf32>
    %cst_17 = arith.constant 0.000000e+00 : f32
    %72 = vector.broadcast %cst_17 : f32 to vector<8x128xf32>
    %73 = arith.maximumf %71, %72 : vector<8x128xf32>
    %c0_18 = arith.constant 0 : index
    %c0_19 = arith.constant 0 : index
    %74 = vector.load %arg8[%c0_18, %c0_19] : memref<128x128xf32, #tpu.memory_space<vmem>>, vector<128x128xf32>
    %cst_20 = arith.constant dense<0.000000e+00> : vector<8x128xf32>
    %75 = tpu.matmul %73, %74, %cst_20 {dimension_numbers = #tpu.dot_dimension_numbers<[1], [0], [0], [1], [0, 0, 1, 1], [], []>} : vector<8x128xf32>, vector<128x128xf32>, vector<8x128xf32> -> vector<8x128xf32>
    %c0_21 = arith.constant 0 : index
    %c0_22 = arith.constant 0 : index
    %76 = vector.load %arg9[%c0_21, %c0_22] : memref<1x128xf32, #tpu.memory_space<vmem>>, vector<1x128xf32>
    %77 = vector.broadcast %76 : vector<1x128xf32> to vector<8x128xf32>
    %78 = arith.addf %75, %77 : vector<8x128xf32>
    %cst_23 = arith.constant 0.000000e+00 : f32
    %79 = vector.broadcast %cst_23 : f32 to vector<8x128xf32>
    %80 = arith.maximumf %78, %79 : vector<8x128xf32>
    %c0_24 = arith.constant 0 : index
    %c0_25 = arith.constant 0 : index
    %81 = vector.load %arg10[%c0_24, %c0_25] : memref<128x128xf32, #tpu.memory_space<vmem>>, vector<128x128xf32>
    %cst_26 = arith.constant dense<0.000000e+00> : vector<8x128xf32>
    %82 = tpu.matmul %80, %81, %cst_26 {dimension_numbers = #tpu.dot_dimension_numbers<[1], [0], [0], [1], [0, 0, 1, 1], [], []>} : vector<8x128xf32>, vector<128x128xf32>, vector<8x128xf32> -> vector<8x128xf32>
    %c0_27 = arith.constant 0 : index
    %c0_28 = arith.constant 0 : index
    %83 = vector.load %arg11[%c0_27, %c0_28] : memref<1x128xf32, #tpu.memory_space<vmem>>, vector<1x128xf32>
    %84 = vector.broadcast %83 : vector<1x128xf32> to vector<8x128xf32>
    %85 = arith.addf %82, %84 : vector<8x128xf32>
    %c0_29 = arith.constant 0 : index
    %c0_30 = arith.constant 0 : index
    %86 = vector.load %arg12[%c0_29, %c0_30] : memref<8x128xf32, #tpu.memory_space<vmem>>, vector<8x128xf32>
    tpu.vector_store %arg12[%c0_29, %c0_30], %85 {strides = array<i32>} : memref<8x128xf32, #tpu.memory_space<vmem>>, vector<8x128xf32>,
    return
  }
  func.func @transform_0(%arg0: i32) -> (i32, i32) {
    %c0_i32 = arith.constant 0 : i32
    %c0_i32_0 = arith.constant 0 : i32
    return %arg0, %c0_i32 : i32, i32
  }
  func.func @transform_1(%arg0: i32) -> (i32, i32) {
    %c0_i32 = arith.constant 0 : i32
    %c0_i32_0 = arith.constant 0 : i32
    %c0_i32_1 = arith.constant 0 : i32
    return %c0_i32, %c0_i32_0 : i32, i32
  }
  func.func @transform_2(%arg0: i32) -> (i32, i32) {
    %c0_i32 = arith.constant 0 : i32
    %c0_i32_0 = arith.constant 0 : i32
    %c0_i32_1 = arith.constant 0 : i32
    return %c0_i32, %c0_i32_0 : i32, i32
  }
  func.func @transform_3(%arg0: i32) -> (i32, i32) {
    %c0_i32 = arith.constant 0 : i32
    %c0_i32_0 = arith.constant 0 : i32
    %c0_i32_1 = arith.constant 0 : i32
    return %c0_i32, %c0_i32_0 : i32, i32
  }
  func.func @transform_4(%arg0: i32) -> (i32, i32) {
    %c0_i32 = arith.constant 0 : i32
    %c0_i32_0 = arith.constant 0 : i32
    %c0_i32_1 = arith.constant 0 : i32
    return %c0_i32, %c0_i32_0 : i32, i32
  }
  func.func @transform_5(%arg0: i32) -> (i32, i32) {
    %c0_i32 = arith.constant 0 : i32
    %c0_i32_0 = arith.constant 0 : i32
    %c0_i32_1 = arith.constant 0 : i32
    return %c0_i32, %c0_i32_0 : i32, i32
  }
  func.func @transform_6(%arg0: i32) -> (i32, i32) {
    %c0_i32 = arith.constant 0 : i32
    %c0_i32_0 = arith.constant 0 : i32
    %c0_i32_1 = arith.constant 0 : i32
    return %c0_i32, %c0_i32_0 : i32, i32
  }
  func.func @transform_7(%arg0: i32) -> (i32, i32) {
    %c0_i32 = arith.constant 0 : i32
    %c0_i32_0 = arith.constant 0 : i32
    %c0_i32_1 = arith.constant 0 : i32
    return %c0_i32, %c0_i32_0 : i32, i32
  }
  func.func @transform_8(%arg0: i32) -> (i32, i32) {
    %c0_i32 = arith.constant 0 : i32
    %c0_i32_0 = arith.constant 0 : i32
    %c0_i32_1 = arith.constant 0 : i32
    return %c0_i32, %c0_i32_0 : i32, i32
  }
  func.func @transform_9(%arg0: i32) -> (i32, i32) {
    %c0_i32 = arith.constant 0 : i32
    %c0_i32_0 = arith.constant 0 : i32
    %c0_i32_1 = arith.constant 0 : i32
    return %c0_i32, %c0_i32_0 : i32, i32
  }
  func.func @transform_10(%arg0: i32) -> (i32, i32) {
    %c0_i32 = arith.constant 0 : i32
    %c0_i32_0 = arith.constant 0 : i32
    %c0_i32_1 = arith.constant 0 : i32
    return %c0_i32, %c0_i32_0 : i32, i32
  }
  func.func @transform_11(%arg0: i32) -> (i32, i32) {
    %c0_i32 = arith.constant 0 : i32
    %c0_i32_0 = arith.constant 0 : i32
    return %arg0, %c0_i32 : i32, i32
  }
}

</mosaic_0001>

<bundles_post_ra>
// kernel: lenet5_forward.1
= control target key start
LH: loop header
LB: loop body
LE: loop exit
PB: predicated region body
PF: predicated region fallthrough
CT: control target
= control target key end

     0   :  { %16 = vsyncpa [#allocation3], 0  ;;  %s10233_s0 = inlined_call_operand.vmem [shape: f32[224,28], index: 0, kind: input, shape index: {}]   ;;  %s10234_s1 = inlined_call_operand.hbm [shape: f32[140,144], index: 1, kind: input, shape index: {}]   ;;  %s10235_s2 = inlined_call_operand.vmem [shape: f32[1,144], index: 2, kind: input, shape index: {}]   ;;  %s10236_s3 = inlined_call_operand.hbm [shape: f32[720,128], index: 3, kind: input, shape index: {}]   ;;  %s10237_s4 = inlined_call_operand.vmem [shape: f32[1,128], index: 4, kind: input, shape index: {}]   ;;  %s10238_s5 = inlined_call_operand.hbm [shape: f32[512,128], index: 5, kind: input, shape index: {}]   ;;  %s10239_s6 = inlined_call_operand.vmem [shape: f32[1,128], index: 6, kind: input, shape index: {}]   ;;  %s10240_s7 = inlined_call_operand.vmem [shape: f32[128,128], index: 7, kind: input, shape index: {}]   ;;  %s10241_s8 = inlined_call_operand.vmem [shape: f32[1,128], index: 8, kind: input, shape index: {}]   ;;  %s10242_s9 = inlined_call_operand.vmem [shape: f32[128,128], index: 9, kind: input, shape index: {}]   ;;  %s10243_s10 = inlined_call_operand.vmem [shape: f32[1,128], index: 10, kind: input, shape index: {}]   ;;  %s10244_s11 = inlined_call_operand.vmem [shape: f32[8,128], index: 11, kind: output, shape index: {}]  }
   0x1   :  { %17 = vsyncpa [#allocation5], 0  ;;  %s39_s19 = sshll.u32 %s10236_s3, 4  ;;  %s5587_s20 = smov [#allocation4]   ;;  %s40_s19 = int_to_ptr.hbm [resolvable:$true] %s39_s19 }
   0x2   :  { %s41_s21 = sshll.u32 %s5587_s20, 4  ;;  %s24_s24 = sshll.u32 %s10234_s1, 4  ;;  %s42_s21 = int_to_ptr.vmem [resolvable:$true] %s41_s21  ;;  %s25_s24 = int_to_ptr.hbm [resolvable:$true] %s24_s24 }
   0x3   :  { %s5588_s25 = smov 128   ;;  %s5589_s26 = smov 8  }
   0x4   :  { %47 = dma.hbm_to_vmem [thread:$0]  %s40_s19, 11520, %s42_s21, [#allocation5], %s5588_s25, %s5588_s25, %s5589_s26  }
   0x5   :  { %s5590_s27 = smov [#allocation2]   ;;  %s5591_s29 = smov 256  }
   0x6   :  { %s26_s28 = sshll.u32 %s5590_s27, 4  ;;  %s5592_s30 = smov 16   ;;  %s27_s28 = int_to_ptr.vmem [resolvable:$true] %s26_s28 }
   0x7   :  { %32 = dma.hbm_to_vmem [thread:$0]  %s25_s24, 4608, %s27_s28, [#allocation3], %s5591_s29, %s5591_s29, %s5592_s30  }
   0x8   :  { %s54_s13 = sshll.u32 %s10238_s5, 4  ;;  %s5593_s14 = smov [#allocation6]   ;;  %s55_s13 = int_to_ptr.hbm [resolvable:$true] %s54_s13 }
   0x9   :  { %s56_s15 = sshll.u32 %s5593_s14, 4  ;;  %s57_s15 = int_to_ptr.vmem [resolvable:$true] %s56_s15 }
   0xa   :  { %62 = dma.hbm_to_vmem [thread:$0]  %s55_s13, 8192, %s57_s15, [#allocation5], %s5588_s25, %s5588_s25, %s5589_s26  }
   0xb   :  { %5583 = dma.done.wait [#allocation3], 4608  }
   0xc   :  { %5584 = vsyncadd [#allocation3], 4294962688 }
   0xd   :  { %5585 = dma.done.wait [#allocation5], 19712  }
   0xe   :  { %5586 = vsyncadd [#allocation5], 4294947584  ;;  %v5676_v0 = vld [vmem:[%s10233_s0] sm:$0xff]  ;;  %v5681_v1 = vld [vmem:[%s10233_s0 + $0x8] sm:$0xff]  ;;  %vm141_vm0 = vcmask 1046528   ;;  %vm259_vm1 = vcmask 1044480  }
   0xf   :  { %v5686_v2 = vld [vmem:[%s10233_s0 + $0x10] sm:$0xff]  ;;  %v142_v3 = vrot.slane %v5676_v0, 1  ;;  %v143_v4 = vrot.slane %v5681_v1, 1  ;;  %v260_v6 = vrot.slane %v5676_v0, 3  ;;  %v261_v7 = vrot.slane %v5681_v1, 3  ;;  %s5594_s20 = smov 28  }
  0x10   :  { %v145_v5 = vrot.slane %v5686_v2, 1  ;;  %v263_v8 = vrot.slane %v5686_v2, 3  ;;  %v201_v9 = vrot.slane %v5676_v0, 2  ;;  %v202_v12 = vrot.slane %v5681_v1, 2  ;;  %s5595_s21 = smov 84   ;;  %v5716_v22 = vld [vmem:[%s10233_s0 + $0x18] sm:$0xff] }
  0x11   :  { %v144_v10 = vsel %vm141_vm0, %v142_v3, %v143_v4  ;;  %v204_v13 = vrot.slane %v5686_v2, 2  ;;  %v262_v15 = vsel %vm259_vm1, %v260_v6, %v261_v7  ;;  %vm200_vm2 = vcmask 1045504   ;;  %v5721_v23 = vld [vmem:[%s10233_s0 + $0x20] sm:$0xff]  ;;  %s5596_s26 = smov 112   ;;  %s5597_s27 = smov 56   ;;  %v5746_v41 = vld [vmem:[%s10233_s0 + $0x28] sm:$0xff] }
  0x12   :  { %v146_v11 = vsel %vm141_vm0, %v143_v4, %v145_v5  ;;  %v264_v16 = vsel %vm259_vm1, %v261_v7, %v263_v8  ;;  %v203_v18 = vsel %vm200_vm2, %v201_v9, %v202_v12  ;;  %v319_v20 = vrot.slane %v5676_v0, 4  ;;  %v5751_v42 = vld [vmem:[%s10233_s0 + $0x30] sm:$0xff]  ;;  %v5779_v4 = vld [vmem:[%s10233_s0 + $0x38] sm:$0xff]  ;;  %s5602_s19 = smov 48  }
  0x13   :  { %v4836_v14 = vpack.i.bf16 %v146_v11, %v144_v10  ;;  %v4846_v17 = vpack.i.bf16 %v264_v16, %v262_v15  ;;  %v205_v19 = vsel %vm200_vm2, %v202_v12, %v204_v13  ;;  %v320_v21 = vrot.slane %v5681_v1, 4 }
  0x14   :  { %v322_v24 = vrot.slane %v5686_v2, 4  ;;  %vm318_vm3 = vcmask 1043456   ;;  %v4841_v25 = vpack.i.bf16 %v205_v19, %v203_v18  ;;  %v206_v27 = vrot.slane %v5716_v22, 2 }
  0x15   :  { %4837 = vrot.lane.b32.xlu0 %v4836_v14, %s5594_s20  ;;  %4847 = vrot.lane.b32.xlu1 %v4846_v17, %s5595_s21  ;;  %v208_v28 = vrot.slane %v5721_v23, 2  ;;  %v149_v29 = vrot.slane %v5721_v23, 1  ;;  %v147_v30 = vrot.slane %v5716_v22, 1  ;;  %v321_v31 = vsel %vm318_vm3, %v319_v20, %v320_v21 }
  0x16   :  { %v323_v26 = vsel %vm318_vm3, %v320_v21, %v322_v24  ;;  %v265_v32 = vrot.slane %v5716_v22, 3  ;;  %v267_v33 = vrot.slane %v5721_v23, 3  ;;  %v207_v36 = vsel %vm200_vm2, %v204_v13, %v206_v27 }
  0x17   :  { %635 = vrot.lane.b32.xlu2 %v323_v26, %s5596_s26  ;;  %v148_v34 = vsel %vm141_vm0, %v145_v5, %v147_v30  ;;  %v150_v35 = vsel %vm141_vm0, %v147_v30, %v149_v29  ;;  %v209_v37 = vsel %vm200_vm2, %v206_v27, %v208_v28  ;;  %v151_v45 = vrot.slane %v5746_v41, 1  ;;  %v5784_v5 = vld [vmem:[%s10233_s0 + $0x40] sm:$0xff] }
  0x18   :  { %v4851_v38 = vpack.i.bf16 %v150_v35, %v148_v34  ;;  %v266_v39 = vsel %vm259_vm1, %v263_v8, %v265_v32  ;;  %v268_v40 = vsel %vm259_vm1, %v265_v32, %v267_v33  ;;  %v4856_v43 = vpack.i.bf16 %v209_v37, %v207_v36  ;;  %v864_v34 = vld [vmem:[#allocation2 + $0xf8] sm:$0xff]  ;;  %v5817_v35 = vld [vmem:[%s10233_s0 + $0x50] sm:$0xff] }
  0x19   :  { %v4861_v44 = vpack.i.bf16 %v268_v40, %v266_v39  ;;  %v153_v46 = vrot.slane %v5751_v42, 1  ;;  %v324_v47 = vrot.slane %v5716_v22, 4  ;;  %v326_v48 = vrot.slane %v5721_v23, 4  ;;  %1140 = vmatpush.msra.mxu2 %v864_v34 }
  0x1a   :  { %v152_v49 = vsel %vm141_vm0, %v149_v29, %v151_v45  ;;  %v210_v52 = vrot.slane %v5746_v41, 2  ;;  %v212_v53 = vrot.slane %v5751_v42, 2  ;;  %v269_v56 = vrot.slane %v5746_v41, 3 }
  0x1b   :  { %v154_v50 = vsel %vm141_vm0, %v151_v45, %v153_v46  ;;  %v325_v51 = vsel %vm318_vm3, %v322_v24, %v324_v47  ;;  %v327_v54 = vsel %vm318_vm3, %v324_v47, %v326_v48  ;;  %v271_v57 = vrot.slane %v5751_v42, 3 }
  0x1c   :  { %v4866_v55 = vpack.i.bf16 %v154_v50, %v152_v49  ;;  %v211_v58 = vsel %vm200_vm2, %v208_v28, %v210_v52  ;;  %v213_v59 = vsel %vm200_vm2, %v210_v52, %v212_v53  ;;  %v270_v60 = vsel %vm259_vm1, %v267_v33, %v269_v56  ;;  %v863_v33 = vld [vmem:[#allocation2 + $0xf0] sm:$0xff]  ;;  %v862_v52 = vld [vmem:[#allocation2 + $0xe8] sm:$0xff] }
  0x1d   :  { %4842 = vrot.lane.b32.xlu0 %v4841_v25, %s5597_s27  ;;  %633 = vrot.lane.b32.xlu1 %v321_v31, %s5596_s26  ;;  %v272_v61 = vsel %vm259_vm1, %v269_v56, %v271_v57  ;;  %v4871_v62 = vpack.i.bf16 %v213_v59, %v211_v58  ;;  %v328_v63 = vrot.slane %v5746_v41, 4  ;;  %v155_v8 = vrot.slane %v5779_v4, 1  ;;  %v5812_v31 = vld [vmem:[%s10233_s0 + $0x48] sm:$0xff]  ;;  %v5841_v56 = vld [vmem:[%s10233_s0 + $0x58] sm:$0xff]  ;;  %v857_v59 = vld [vmem:[#allocation2 + $0xc0] sm:$0xff] }
  0x1e   :  { %v4876_v7 = vpack.i.bf16 %v272_v61, %v270_v60  ;;  %v157_v10 = vrot.slane %v5784_v5, 1  ;;  %v214_v12 = vrot.slane %v5779_v4, 2  ;;  %v216_v13 = vrot.slane %v5784_v5, 2  ;;  %938 = vmatpush.msra.mxu0 %v863_v33  ;;  %1141 = vmatpush.msra.mxu2 %v862_v52  ;;  %v5846_v58 = vld [vmem:[%s10233_s0 + $0x60] sm:$0xff]  ;;  %v858_v60 = vld [vmem:[#allocation2 + $0xc8] sm:$0xff] }
  0x1f   :  { %4852 = vrot.lane.b32.xlu2 %v4851_v38, %s5594_s20  ;;  %v329_v11 = vsel %vm318_vm3, %v326_v48, %v328_v63  ;;  %v330_v14 = vrot.slane %v5751_v42, 4  ;;  %v156_v15 = vsel %vm141_vm0, %v153_v46, %v155_v8  ;;  %v273_v21 = vrot.slane %v5779_v4, 3 }
  0x20   :  { %v158_v16 = vsel %vm141_vm0, %v155_v8, %v157_v10  ;;  %v215_v17 = vsel %vm200_vm2, %v212_v53, %v214_v12  ;;  %v217_v18 = vsel %vm200_vm2, %v214_v12, %v216_v13  ;;  %v275_v25 = vrot.slane %v5784_v5, 3  ;;  %v859_v53 = vld [vmem:[#allocation2 + $0xd0] sm:$0xff] }
  0x21   :  { %v331_v19 = vsel %vm318_vm3, %v328_v63, %v330_v14  ;;  %v4881_v24 = vpack.i.bf16 %v158_v16, %v156_v15  ;;  %v4886_v26 = vpack.i.bf16 %v217_v18, %v215_v17  ;;  %v274_v27 = vsel %vm259_vm1, %v271_v57, %v273_v21  ;;  %v860_v57 = vld [vmem:[#allocation2 + $0xd8] sm:$0xff]  ;;  %v855_v63 = vld [vmem:[#allocation2 + $0xb0] sm:$0xff] }
  0x22   :  { %v276_v28 = vsel %vm259_vm1, %v273_v21, %v275_v25  ;;  %v332_v29 = vrot.slane %v5779_v4, 4  ;;  %v334_v30 = vrot.slane %v5784_v5, 4  ;;  %v159_v36 = vrot.slane %v5812_v31, 1  ;;  %1142 = vmatpush.msra.mxu2 %v860_v57  ;;  %v851_v15 = vld [vmem:[#allocation2 + $0x90] sm:$0xff]  ;;  %v852_v21 = vld [vmem:[#allocation2 + $0x98] sm:$0xff] }
  0x23   :  { %v4891_v32 = vpack.i.bf16 %v276_v28, %v274_v27  ;;  %v161_v37 = vrot.slane %v5817_v35, 1  ;;  %v218_v40 = vrot.slane %v5812_v31, 2  ;;  %v279_v45 = vrot.slane %v5817_v35, 3 }
  0x24   :  { %v335_v38 = vsel %vm318_vm3, %v332_v29, %v334_v30  ;;  %v333_v39 = vsel %vm318_vm3, %v330_v14, %v332_v29  ;;  %v160_v46 = vsel %vm141_vm0, %v157_v10, %v159_v36  ;;  %v165_v8 = vrot.slane %v5846_v58, 1  ;;  %1143 = vmatpush.msra.mxu2 %v858_v60  ;;  %v856_v10 = vld [vmem:[#allocation2 + $0xb8] sm:$0xff]  ;;  %v854_v14 = vld [vmem:[#allocation2 + $0xa8] sm:$0xff] }
  0x25   :  { %4857 = vrot.lane.b32.xlu0 %v4856_v43, %s5597_s27  ;;  %4862 = vrot.lane.b32.xlu1 %v4861_v44, %s5595_s21  ;;  %v220_v43 = vrot.slane %v5817_v35, 2  ;;  %v277_v44 = vrot.slane %v5812_v31, 3  ;;  %v162_v47 = vsel %vm141_vm0, %v159_v36, %v161_v37  ;;  %v219_v48 = vsel %vm200_vm2, %v216_v13, %v218_v40  ;;  %v853_v13 = vld [vmem:[#allocation2 + $0xa0] sm:$0xff]  ;;  %v848_v36 = vld [vmem:[#allocation2 + $0x78] sm:$0xff] }
  0x26   :  { %v4896_v50 = vpack.i.bf16 %v162_v47, %v160_v46  ;;  %v338_v12 = vrot.slane %v5817_v35, 4  ;;  %1144 = vmatpush.msra.mxu2 %v856_v10  ;;  %v281_v29 = vrot.slane %v5841_v56, 3  ;;  %v846_v10 = vld [vmem:[#allocation2 + $0x68] sm:$0xff]  ;;  %vm717_vm4 = vcmask 228352  }
  0x27   :  { %637 = vrot.lane.b32.xlu2 %v325_v51, %s5596_s26  ;;  %v221_v49 = vsel %vm200_vm2, %v218_v40, %v220_v43  ;;  %v861_v51 = vld [vmem:[#allocation2 + $0xe0] sm:$0xff]  ;;  %v340_v40 = vrot.slane %v5841_v56, 4  ;;  %vm746_vm5 = vcmask 457728   ;;  %vm775_vm6 = vcmask 687104  }
  0x28   :  { %939 = vmatpush.msra.mxu0 %v861_v51  ;;  %v4901_v61 = vpack.i.bf16 %v221_v49, %v219_v48  ;;  %1145 = vmatpush.msra.mxu2 %v854_v14  ;;  %v342_v51 = vrot.slane %v5846_v58, 4  ;;  %v842_v14 = vld [vmem:[#allocation2 + $0x48] sm:$0xff]  ;;  %vm804_vm7 = vcmask 916480   ;;  %vm875_vm8 = vcmask 97280  }
  0x29   :  { %v341_v48 = vsel %vm318_vm3, %v338_v12, %v340_v40  ;;  %vm1848_vm9 = vcmask 1039360   ;;  %vm2017_vm10 = vcmask 121856   ;;  %vm2390_vm11 = vcmask 1041408  }
  0x2a   :  { %940 = vmatpush.msra.mxu0 %v859_v53  ;;  %1146 = vmatpush.msra.mxu2 %v852_v21  ;;  %v343_v57 = vsel %vm318_vm3, %v340_v40, %v342_v51  ;;  %vm2621_vm12 = vcmask 130048   ;;  %vm2820_vm13 = vcmask 261120   ;;  %vm3216_vm14 = vcmask 523264  }
  0x2b   :  { %vm3019_vm15 = vcmask 392192  }
  0x2c   :  { %941 = vmatpush.msra.mxu0 %v857_v59 }
  0x2d   :  { %639 = vrot.lane.b32.xlu0 %v327_v54, %s5596_s26  ;;  %4867 = vrot.lane.b32.xlu1 %v4866_v55, %s5594_s20  ;;  %v278_v54 = vsel %vm259_vm1, %v275_v25, %v277_v44  ;;  %v280_v55 = vsel %vm259_vm1, %v277_v44, %v279_v45  ;;  %v224_v25 = vrot.slane %v5846_v58, 2  ;;  %v5883_v44 = vld [vmem:[%s10233_s0 + $0x70] sm:$0xff] }
  0x2e   :  { %942 = vmatpush.msra.mxu0 %v855_v63  ;;  %v169_v47 = vrot.slane %v5883_v44, 1  ;;  %v346_v63 = vrot.slane %v5883_v44, 4 }
  0x2f   :  { %4872 = vrot.lane.b32.xlu2 %v4871_v62, %s5597_s27  ;;  %v4906_v62 = vpack.i.bf16 %v280_v55, %v278_v54 }
  0x30   :  { %943 = vmatpush.msra.mxu0 %v853_v13  ;;  %v841_v13 = vld [vmem:[#allocation2 + $0x40] sm:$0xff] }
  0x32   :  { %944 = vmatpush.msra.mxu0 %v851_v15 }
  0x35   :  { %4877 = vrot.lane.b32.xlu0 %v4876_v7, %s5595_s21  ;;  %641 = vrot.lane.b32.xlu1 %v329_v11, %s5596_s26  ;;  %v163_v7 = vrot.slane %v5841_v56, 1  ;;  %v336_v11 = vrot.slane %v5812_v31, 4 }
  0x37   :  { %643 = vrot.lane.b32.xlu2 %v331_v19, %s5596_s26  ;;  %v164_v16 = vsel %vm141_vm0, %v161_v37, %v163_v7  ;;  %v166_v17 = vsel %vm141_vm0, %v163_v7, %v165_v8  ;;  %v337_v18 = vsel %vm318_vm3, %v334_v30, %v336_v11  ;;  %v222_v19 = vrot.slane %v5841_v56, 2  ;;  %v847_v30 = vld [vmem:[#allocation2 + $0x70] sm:$0xff]  ;;  %v5914_v7 = vld [vmem:[%s10233_s0 + $0x80] sm:$0xff] }
  0x38   :  { %v339_v27 = vsel %vm318_vm3, %v336_v11, %v338_v12  ;;  %v4911_v28 = vpack.i.bf16 %v166_v17, %v164_v16  ;;  %v282_v37 = vsel %vm259_vm1, %v279_v45, %v281_v29  ;;  %v843_v11 = vld [vmem:[#allocation2 + $0x50] sm:$0xff]  ;;  %v844_v12 = vld [vmem:[#allocation2 + $0x58] sm:$0xff]  ;;  %v232_v17 = vrot.slane %v5914_v7, 2 }
  0x39   :  { %v223_v33 = vsel %vm200_vm2, %v220_v43, %v222_v19  ;;  %v225_v34 = vsel %vm200_vm2, %v222_v19, %v224_v25  ;;  %v5878_v43 = vld [vmem:[%s10233_s0 + $0x68] sm:$0xff]  ;;  %v287_v19 = vrot.slane %v5883_v44, 3 }
  0x3a   :  { %v167_v45 = vrot.slane %v5878_v43, 1  ;;  %v226_v49 = vrot.slane %v5878_v43, 2 }
  0x3c   :  { %v168_v52 = vsel %vm141_vm0, %v165_v8, %v167_v45  ;;  %v170_v53 = vsel %vm141_vm0, %v167_v45, %v169_v47  ;;  %v227_v54 = vsel %vm200_vm2, %v224_v25, %v226_v49  ;;  %v845_v8 = vld [vmem:[#allocation2 + $0x60] sm:$0xff]  ;;  %v839_v25 = vld [vmem:[#allocation2 + $0x30] sm:$0xff] }
  0x3d   :  { %4882 = vrot.lane.b32.xlu0 %v4881_v24, %s5594_s20  ;;  %4887 = vrot.lane.b32.xlu1 %v4886_v26, %s5597_s27  ;;  %v849_v24 = vld [vmem:[#allocation2 + $0x80] sm:$0xff]  ;;  %v850_v26 = vld [vmem:[#allocation2 + $0x88] sm:$0xff]  ;;  %v4926_v59 = vpack.i.bf16 %v170_v53, %v168_v52 }
  0x3e   :  { %945 = vmatpush.msra.mxu0 %v849_v24  ;;  %1147 = vmatpush.msra.mxu2 %v850_v26  ;;  %v291_v24 = vrot.slane %v5914_v7, 3  ;;  %v840_v26 = vld [vmem:[#allocation2 + $0x38] sm:$0xff]  ;;  %v834_v52 = vld [vmem:[#allocation2 + $0x8] sm:$0xff] }
  0x3f   :  { %4892 = vrot.lane.b32.xlu2 %v4891_v32, %s5595_s21  ;;  %v283_v32 = vrot.slane %v5846_v58, 3 }
  0x40   :  { %946 = vmatpush.msra.mxu0 %v847_v30  ;;  %1148 = vmatpush.msra.mxu2 %v848_v36  ;;  %v838_v36 = vld [vmem:[#allocation2 + $0x28] sm:$0xff] }
  0x42   :  { %947 = vmatpush.msra.mxu0 %v845_v8  ;;  %1149 = vmatpush.msra.mxu2 %v846_v10 }
  0x44   :  { %948 = vmatpush.msra.mxu0 %v843_v11  ;;  %1150 = vmatpush.msra.mxu2 %v844_v12 }
  0x45   :  { %645 = vrot.lane.b32.xlu0 %v333_v39, %s5596_s26  ;;  %647 = vrot.lane.b32.xlu1 %v335_v38, %s5596_s26  ;;  %v284_v38 = vsel %vm259_vm1, %v281_v29, %v283_v32  ;;  %v4916_v39 = vpack.i.bf16 %v225_v34, %v223_v33  ;;  %v285_v29 = vrot.slane %v5878_v43, 3  ;;  %v837_v34 = vld [vmem:[#allocation2 + $0x20] sm:$0xff] }
  0x46   :  { %v4921_v46 = vpack.i.bf16 %v284_v38, %v282_v37  ;;  %949 = vmatpush.msra.mxu0 %v841_v13  ;;  %1151 = vmatpush.msra.mxu2 %v842_v14  ;;  %v835_v37 = vld [vmem:[#allocation2 + $0x10] sm:$0xff]  ;;  %v836_v38 = vld [vmem:[#allocation2 + $0x18] sm:$0xff] }
  0x47   :  { %4897 = vrot.lane.b32.xlu2 %v4896_v50, %s5594_s20  ;;  %v228_v50 = vrot.slane %v5883_v44, 2  ;;  %v288_v40 = vsel %vm259_vm1, %v285_v29, %v287_v19 }
  0x48   :  { %950 = vmatpush.msra.mxu0 %v839_v25  ;;  %1152 = vmatpush.msra.mxu2 %v840_v26 }
  0x49   :  { %v229_v55 = vsel %vm200_vm2, %v226_v49, %v228_v50  ;;  %v5941_v49 = vld [vmem:[%s10233_s0 + $0x88] sm:$0xff] }
  0x4a   :  { %v4931_v60 = vpack.i.bf16 %v229_v55, %v227_v54  ;;  %951 = vmatpush.msra.mxu0 %v837_v34  ;;  %1153 = vmatpush.msra.mxu2 %v838_v36  ;;  %v175_v53 = vrot.slane %v5941_v49, 1  ;;  %v867_v55 = vld [vmem:[#allocation2 + $0x110] sm:$0xf]  ;;  %v293_v13 = vrot.slane %v5941_v49, 3  ;;  %v352_v26 = vrot.slane %v5941_v49, 4 }
  0x4b   :  { %4816 = vmatpush.msk.msra.mxu1 %vm318_vm3, %v867_v55 }
  0x4c   :  { %952 = vmatpush.msra.mxu0 %v835_v37  ;;  %1154 = vmatpush.msra.mxu2 %v836_v38 }
  0x4d   :  { %4902 = vrot.lane.b32.xlu0 %v4901_v61, %s5597_s27  ;;  %4907 = vrot.lane.b32.xlu1 %v4906_v62, %s5595_s21  ;;  %v344_v61 = vrot.slane %v5878_v43, 4  ;;  %v5908_v62 = vld [vmem:[%s10233_s0 + $0x78] sm:$0xff] }
  0x4e   :  { %v230_v16 = vrot.slane %v5908_v62, 2  ;;  %v289_v21 = vrot.slane %v5908_v62, 3  ;;  %1155 = vmatpush.msra.mxu2 %v834_v52  ;;  %v171_v10 = vrot.slane %v5908_v62, 1 }
  0x4f   :  { %649 = vrot.lane.b32.xlu2 %v337_v18, %s5596_s26  ;;  %v345_v15 = vsel %vm318_vm3, %v342_v51, %v344_v61  ;;  %v347_v18 = vsel %vm318_vm3, %v344_v61, %v346_v63 }
  0x50   :  { %v290_v30 = vsel %vm259_vm1, %v287_v19, %v289_v21  ;;  %v292_v33 = vsel %vm259_vm1, %v289_v21, %v291_v24  ;;  %v294_v21 = vsel %vm259_vm1, %v291_v24, %v293_v13 }
  0x51   :  { %v4951_v51 = vpack.i.bf16 %v292_v33, %v290_v30 }
  0x55   :  { %651 = vrot.lane.b32.xlu0 %v339_v27, %s5596_s26  ;;  %4912 = vrot.lane.b32.xlu1 %v4911_v28, %s5594_s20  ;;  %v231_v27 = vsel %vm200_vm2, %v228_v50, %v230_v16  ;;  %v233_v28 = vsel %vm200_vm2, %v230_v16, %v232_v17  ;;  %v5946_v50 = vld [vmem:[%s10233_s0 + $0x90] sm:$0xff] }
  0x56   :  { %v177_v54 = vrot.slane %v5946_v50, 1  ;;  %v295_v14 = vrot.slane %v5946_v50, 3  ;;  %v236_v33 = vrot.slane %v5946_v50, 2 }
  0x57   :  { %4917 = vrot.lane.b32.xlu2 %v4916_v39, %s5597_s27  ;;  %v286_v39 = vsel %vm259_vm1, %v283_v32, %v285_v29  ;;  %v173_v32 = vrot.slane %v5914_v7, 1 }
  0x58   :  { %v4936_v45 = vpack.i.bf16 %v288_v40, %v286_v39  ;;  %v178_v8 = vsel %vm141_vm0, %v175_v53, %v177_v54  ;;  %v296_v25 = vsel %vm259_vm1, %v293_v13, %v295_v14  ;;  %v6028_v13 = vld [vmem:[%s10233_s0 + $0xa8] sm:$0xff] }
  0x59   :  { %v176_v61 = vsel %vm141_vm0, %v173_v32, %v175_v53  ;;  %v174_v16 = vsel %vm141_vm0, %v171_v10, %v173_v32 }
  0x5a   :  { %v4956_v12 = vpack.i.bf16 %v178_v8, %v176_v61  ;;  %v354_v8 = vrot.slane %v5946_v50, 4 }
  0x5d   :  { %4922 = vrot.lane.b32.xlu0 %v4921_v46, %s5595_s21  ;;  %653 = vrot.lane.b32.xlu1 %v341_v48, %s5596_s26  ;;  %v4946_v46 = vpack.i.bf16 %v233_v28, %v231_v27  ;;  %v833_v48 = vld [vmem:[#allocation2] sm:$0xff]  ;;  %v4966_v28 = vpack.i.bf16 %v296_v25, %v294_v21 }
  0x5e   :  { %953 = vmatpush.msra.mxu0 %v833_v48  ;;  %v5988_v27 = vld [vmem:[%s10233_s0 + $0xa0] sm:$0xff] }
  0x5f   :  { %655 = vrot.lane.b32.xlu2 %v343_v57, %s5596_s26  ;;  %v868_v57 = vld [vmem:[#allocation2 + $0x118] sm:$0xf]  ;;  %v181_v29 = vrot.slane %v5988_v27, 1  ;;  %v240_v36 = vrot.slane %v5988_v27, 2 }
  0x60   :  { %4730 = vmatpush.msk.msrb.mxu0 %vm318_vm3, %v867_v55  ;;  %4759 = vmatpush.msk.msrb.mxu2 %vm318_vm3, %v868_v57 }
  0x61   :  { %4818 = vmatpush.msk.msra.mxu3 %vm318_vm3, %v868_v57 }
  0x65   :  { %4927 = vrot.lane.b32.xlu0 %v4926_v59, %s5594_s20  ;;  %4932 = vrot.lane.b32.xlu1 %v4931_v60, %s5597_s27  ;;  %v348_v59 = vrot.slane %v5908_v62, 4  ;;  %v350_v60 = vrot.slane %v5914_v7, 4 }
  0x67   :  { %4937 = vrot.lane.b32.xlu2 %v4936_v45, %s5595_s21  ;;  %v351_v11 = vsel %vm318_vm3, %v348_v59, %v350_v60  ;;  %v353_v30 = vsel %vm318_vm3, %v350_v60, %v352_v26  ;;  %v349_v37 = vsel %vm318_vm3, %v346_v63, %v348_v59  ;;  %v234_v63 = vrot.slane %v5941_v49, 2 }
  0x68   :  { %v358_v60 = vrot.slane %v5988_v27, 4 }
  0x69   :  { %v235_v53 = vsel %vm200_vm2, %v232_v17, %v234_v63 }
  0x6d   :  { %657 = vrot.lane.b32.xlu0 %v345_v15, %s5596_s26  ;;  %659 = vrot.lane.b32.xlu1 %v347_v18, %s5596_s26  ;;  %v172_v15 = vsel %vm141_vm0, %v169_v47, %v171_v10  ;;  %v5983_v47 = vld [vmem:[%s10233_s0 + $0x98] sm:$0xff] }
  0x6e   :  { %v4941_v19 = vpack.i.bf16 %v174_v16, %v172_v15  ;;  %v179_v24 = vrot.slane %v5983_v47, 1  ;;  %v238_v34 = vrot.slane %v5983_v47, 2  ;;  %v356_v59 = vrot.slane %v5983_v47, 4  ;;  %v6033_v15 = vld [vmem:[%s10233_s0 + $0xb0] sm:$0xff] }
  0x70   :  { %4942 = vrot.lane.b32.xlu2 %v4941_v19, %s5594_s20  ;;  %v180_v39 = vsel %vm141_vm0, %v177_v54, %v179_v24  ;;  %v182_v40 = vsel %vm141_vm0, %v179_v24, %v181_v29  ;;  %v239_v45 = vsel %vm200_vm2, %v236_v33, %v238_v34  ;;  %v241_v48 = vsel %vm200_vm2, %v238_v34, %v240_v36 }
  0x71   :  { %v5970_v18 = vpop.permute.xlu2 %635  ;;  %v4971_v52 = vpack.i.bf16 %v182_v40, %v180_v39  ;;  %v4976_v32 = vpack.i.bf16 %v241_v48, %v239_v45  ;;  %v237_v54 = vsel %vm200_vm2, %v234_v63, %v236_v33  ;;  %v242_v33 = vrot.slane %v6028_v13, 2 }
  0x72   :  { %v4961_v55 = vpack.i.bf16 %v237_v54, %v235_v53  ;;  %v244_v34 = vrot.slane %v6033_v15, 2  ;;  %v355_v40 = vsel %vm318_vm3, %v352_v26, %v354_v8  ;;  %v301_v45 = vrot.slane %v6028_v13, 3 }
  0x73   :  { %v303_v48 = vrot.slane %v6033_v15, 3  ;;  %v243_v26 = vsel %vm200_vm2, %v240_v36, %v242_v33 }
  0x74   :  { %v245_v53 = vsel %vm200_vm2, %v242_v33, %v244_v34 }
  0x75   :  { %4947 = vrot.lane.b32.xlu0 %v4946_v46, %s5597_s27  ;;  %4952 = vrot.lane.b32.xlu1 %v4951_v51, %s5595_s21 }
  0x78   :  { %661 = vrot.lane.b32.xlu2 %v349_v37, %s5596_s26 }
  0x79   :  { %v6000_v38 = vpop.permute.xlu2 %4852 }
  0x7a   :  { %v4854_v63 = vunpack.i.l.bf16 %v6000_v38 }
  0x7c   :  { %v720_v36 = vsel %vm717_vm4, %v5686_v2, %v4854_v63  ;;  %v360_v2 = vrot.slane %v6028_v13, 4 }
  0x7d   :  { %663 = vrot.lane.b32.xlu0 %v351_v11, %s5596_s26  ;;  %4957 = vrot.lane.b32.xlu1 %v4956_v12, %s5594_s20 }
  0x80   :  { %4962 = vrot.lane.b32.xlu2 %v4961_v55, %s5597_s27 }
  0x81   :  { %v6023_v12 = vpop.permute.xlu2 %637 }
  0x85   :  { %4967 = vrot.lane.b32.xlu0 %v4966_v28, %s5595_s21  ;;  %665 = vrot.lane.b32.xlu1 %v353_v30, %s5596_s26  ;;  %v359_v28 = vsel %vm318_vm3, %v356_v59, %v358_v60  ;;  %v357_v30 = vsel %vm318_vm3, %v354_v8, %v356_v59  ;;  %v4991_v8 = vpack.i.bf16 %v245_v53, %v243_v26 }
  0x87   :  { %v4838_v46 = vpop.permute.xlu0 %4837  ;;  %v4848_v51 = vpop.permute.xlu1 %4847 }
  0x88   :  { %v4839_v57 = vunpack.i.l.bf16 %v4838_v46  ;;  %v4840_v17 = vunpack.i.h.bf16 %v4838_v46  ;;  %v4849_v16 = vunpack.i.l.bf16 %v4848_v51  ;;  %v299_v46 = vrot.slane %v5988_v27, 3  ;;  %667 = vrot.lane.b32.xlu2 %v355_v40, %s5596_s26  ;;  %v6096_v40 = vld [vmem:[%s10233_s0 + $0xc0] sm:$0xff] }
  0x89   :  { %v189_v63 = vrot.slane %v6096_v40, 1 }
  0x8a   :  { %v718_v19 = vsel %vm717_vm4, %v5676_v0, %v4839_v57  ;;  %v719_v39 = vsel %vm717_vm4, %v5681_v1, %v4840_v17  ;;  %v302_v54 = vsel %vm259_vm1, %v299_v46, %v301_v45 }
  0x8d   :  { %4972 = vrot.lane.b32.xlu0 %v4971_v52, %s5594_s20  ;;  %4977 = vrot.lane.b32.xlu1 %v4976_v32, %s5597_s27  ;;  %v4850_v52 = vunpack.i.h.bf16 %v4848_v51  ;;  %v304_v51 = vsel %vm259_vm1, %v301_v45, %v303_v48 }
  0x8e   :  { %v4996_v17 = vpack.i.bf16 %v304_v51, %v302_v54 }
  0x8f   :  { %v4843_v61 = vpop.permute.xlu0 %4842  ;;  %v6021_v11 = vpop.permute.xlu1 %633 }
  0x90   :  { %v4844_v10 = vunpack.i.l.bf16 %v4843_v61  ;;  %v4845_v21 = vunpack.i.h.bf16 %v4843_v61  ;;  %v6067_v61 = vpop.permute.xlu2 %4872 }
  0x92   :  { %v747_v25 = vsel %vm746_vm5, %v718_v19, %v4844_v10  ;;  %v748_v32 = vsel %vm746_vm5, %v719_v39, %v4845_v21  ;;  %v297_v19 = vrot.slane %v5983_v47, 3  ;;  %v4855_v21 = vunpack.i.h.bf16 %v6000_v38  ;;  %v6091_v39 = vld [vmem:[%s10233_s0 + $0xb8] sm:$0xff] }
  0x93   :  { %v776_v24 = vsel %vm775_vm6, %v747_v25, %v4849_v16  ;;  %v777_v57 = vsel %vm775_vm6, %v748_v32, %v4850_v52  ;;  %v185_v52 = vrot.slane %v6033_v15, 1 }
  0x94   :  { %v805_v37 = vsel %vm804_vm7, %v776_v24, %v6021_v11  ;;  %v806_v10 = vsel %vm804_vm7, %v777_v57, %v5970_v18  ;;  %v362_v24 = vrot.slane %v6033_v15, 4  ;;  %v300_v33 = vsel %vm259_vm1, %v297_v19, %v299_v46 }
  0x95   :  { %954 = vmatmul.f32.vlgmr.msra.gmra.mxu0 %v805_v37  ;;  %1156 = vmatmul.f32.vlgmr.msra.gmra.mxu2 %v805_v37  ;;  %v721_v32 = vsel %vm717_vm4, %v5716_v22, %v4855_v21  ;;  %v865_v22 = vld [vmem:[#allocation2 + $0x100] sm:$0xff] }
  0x96   :  { %671 = vrot.lane.b32.xlu1 %v359_v28, %s5596_s26  ;;  %669 = vrot.lane.b32.xlu0 %v357_v30, %s5596_s26  ;;  %v298_v30 = vsel %vm259_vm1, %v295_v14, %v297_v19  ;;  %v187_v14 = vrot.slane %v6091_v39, 1  ;;  %v363_v26 = vsel %vm318_vm3, %v360_v2, %v362_v24 }
  0x97   :  { %v4858_v1 = vpop.permute.xlu0 %4857  ;;  %v4863_v55 = vpop.permute.xlu1 %4862  ;;  %v4981_v38 = vpack.i.bf16 %v300_v33, %v298_v30  ;;  %4817 = vmatpush.msra.mxu1 %v865_v22  ;;  %1054 = vmatpush.msrb.mxu0 %v865_v22  ;;  %v183_v33 = vrot.slane %v6028_v13, 1  ;;  %v6159_v22 = vld [vmem:[%s10233_s0 + $0xc8] sm:$0xff] }
  0x98   :  { %v4859_v59 = vunpack.i.l.bf16 %v4858_v1  ;;  %v4864_v16 = vunpack.i.l.bf16 %v4863_v55  ;;  %v4860_v46 = vunpack.i.h.bf16 %v4858_v1  ;;  %v188_v53 = vsel %vm141_vm0, %v185_v52, %v187_v14  ;;  %v6111_v51 = vpop.permute.xlu2 %643 }
  0x99   :  { %4982 = vrot.lane.b32.xlu2 %v4981_v38, %s5595_s21  ;;  %v190_v1 = vsel %vm141_vm0, %v187_v14, %v189_v63  ;;  %v4865_v57 = vunpack.i.h.bf16 %v4863_v55  ;;  %v4874_v38 = vunpack.i.l.bf16 %v6067_v61 }
  0x9a   :  { %v749_v25 = vsel %vm746_vm5, %v720_v36, %v4859_v59  ;;  %v5001_v59 = vpack.i.bf16 %v190_v1, %v188_v53  ;;  %v307_v36 = vrot.slane %v6096_v40, 3 }
  0x9b   :  { %v778_v45 = vsel %vm775_vm6, %v749_v25, %v4864_v16 }
  0x9c   :  { %v807_v54 = vsel %vm804_vm7, %v778_v45, %v6023_v12 }
  0x9d   :  { %957 = vmatmul.f32.gmra.mxu0 %v806_v10  ;;  %1159 = vmatmul.f32.gmra.mxu2 %v806_v10  ;;  %v750_v10 = vsel %vm746_vm5, %v721_v32, %v4860_v46  ;;  %v186_v46 = vsel %vm141_vm0, %v183_v33, %v185_v52 }
  0x9e   :  { %4992 = vrot.lane.b32.xlu0 %v4991_v8, %s5597_s27  ;;  %4997 = vrot.lane.b32.xlu1 %v4996_v17, %s5595_s21  ;;  %v866_v8 = vld [vmem:[#allocation2 + $0x108] sm:$0xff]  ;;  %v305_v17 = vrot.slane %v6091_v39, 3  ;;  %v779_v30 = vsel %vm775_vm6, %v750_v10, %v4865_v57  ;;  %v4875_v10 = vunpack.i.h.bf16 %v6067_v61 }
  0x9f   :  { %v6078_v28 = vpop.permute.xlu0 %639  ;;  %v6086_v37 = vpop.permute.xlu1 %4867  ;;  %4819 = vmatpush.msra.mxu3 %v866_v8  ;;  %1256 = vmatpush.msrb.mxu2 %v866_v8  ;;  %v6164_v8 = vld [vmem:[%s10233_s0 + $0xd0] sm:$0xff] }
  0xa0   :  { %v4869_v16 = vunpack.i.l.bf16 %v6086_v37  ;;  %v306_v55 = vsel %vm259_vm1, %v303_v48, %v305_v17  ;;  %v308_v21 = vsel %vm259_vm1, %v305_v17, %v307_v36  ;;  %v184_v48 = vsel %vm141_vm0, %v181_v29, %v183_v33 }
  0xa1   :  { %v5011_v45 = vpack.i.bf16 %v308_v21, %v306_v55  ;;  %v808_v32 = vsel %vm804_vm7, %v779_v30, %v6078_v28  ;;  %v4986_v53 = vpack.i.bf16 %v186_v46, %v184_v48  ;;  %v4870_v29 = vunpack.i.h.bf16 %v6086_v37 }
  0xa2   :  { %v722_v14 = vsel %vm717_vm4, %v5721_v23, %v4869_v16  ;;  %v248_v37 = vrot.slane %v6096_v40, 2  ;;  %v250_v17 = vrot.slane %v6159_v22, 2  ;;  %v252_v16 = vrot.slane %v6164_v8, 2 }
  0xa3   :  { %v751_v57 = vsel %vm746_vm5, %v722_v14, %v4874_v38  ;;  %4987 = vrot.lane.b32.xlu2 %v4986_v53, %s5594_s20  ;;  %v191_v55 = vrot.slane %v6159_v22, 1  ;;  %v723_v21 = vsel %vm717_vm4, %v5746_v41, %v4870_v29  ;;  %v193_v33 = vrot.slane %v6164_v8, 1 }
  0xa4   :  { %v251_v30 = vsel %vm200_vm2, %v248_v37, %v250_v17  ;;  %v253_v14 = vsel %vm200_vm2, %v250_v17, %v252_v16  ;;  %v361_v41 = vsel %vm318_vm3, %v358_v60, %v360_v2  ;;  %v246_v2 = vrot.slane %v6091_v39, 2 }
  0xa5   :  { %960 = vmatmul.f32.gmra.mxu0 %v807_v54  ;;  %1162 = vmatmul.f32.gmra.mxu2 %v807_v54  ;;  %v364_v54 = vrot.slane %v6091_v39, 4  ;;  %v192_v61 = vsel %vm141_vm0, %v189_v63, %v191_v55  ;;  %v5021_v46 = vpack.i.bf16 %v253_v14, %v251_v30 }
  0xa6   :  { %675 = vrot.lane.b32.xlu0 %v363_v26, %s5596_s26  ;;  %5002 = vrot.lane.b32.xlu1 %v5001_v59, %s5594_s20  ;;  %v6141_v26 = vpop.permute.xlu2 %4892  ;;  %v249_v17 = vsel %vm200_vm2, %v246_v2, %v248_v37 }
  0xa7   :  { %v4878_v19 = vpop.permute.xlu0 %4877  ;;  %v6128_v25 = vpop.permute.xlu1 %641  ;;  %v365_v23 = vsel %vm318_vm3, %v362_v24, %v364_v54  ;;  %v4894_v14 = vunpack.i.l.bf16 %v6141_v26 }
  0xa8   :  { %v4879_v1 = vunpack.i.l.bf16 %v4878_v19  ;;  %v4880_v48 = vunpack.i.h.bf16 %v4878_v19 }
  0xaa   :  { %v780_v24 = vsel %vm775_vm6, %v751_v57, %v4879_v1  ;;  %v752_v1 = vsel %vm746_vm5, %v723_v21, %v4875_v10  ;;  %v368_v10 = vrot.slane %v6159_v22, 4 }
  0xab   :  { %v809_v38 = vsel %vm804_vm7, %v780_v24, %v6128_v25  ;;  %673 = vrot.lane.b32.xlu2 %v361_v41, %s5596_s26  ;;  %v781_v60 = vsel %vm775_vm6, %v752_v1, %v4880_v48  ;;  %v247_v24 = vsel %vm200_vm2, %v244_v34, %v246_v2 }
  0xac   :  { %v810_v21 = vsel %vm804_vm7, %v781_v60, %v6111_v51  ;;  %v5006_v30 = vpack.i.bf16 %v249_v17, %v247_v24  ;;  %v4895_v24 = vunpack.i.h.bf16 %v6141_v26 }
  0xad   :  { %963 = vmatmul.f32.gmra.mxu0 %v808_v32  ;;  %1165 = vmatmul.f32.gmra.mxu2 %v808_v32  ;;  %v194_v32 = vsel %vm141_vm0, %v191_v55, %v193_v33  ;;  %v370_v55 = vrot.slane %v6164_v8, 4 }
  0xae   :  { %5012 = vrot.lane.b32.xlu0 %v5011_v45, %s5595_s21  ;;  %677 = vrot.lane.b32.xlu1 %v365_v23, %s5596_s26  ;;  %v6178_v45 = vpop.permute.xlu2 %4897  ;;  %v5016_v63 = vpack.i.bf16 %v194_v32, %v192_v61  ;;  %v6238_v32 = vld [vmem:[%s10233_s0 + $0xd8] sm:$0xff] }
  0xaf   :  { %v6151_v52 = vpop.permute.xlu0 %4882  ;;  %v6154_v59 = vpop.permute.xlu1 %4887 }
  0xb0   :  { %v4884_v53 = vunpack.i.l.bf16 %v6151_v52  ;;  %v4889_v23 = vunpack.i.l.bf16 %v6154_v59  ;;  %v4885_v48 = vunpack.i.h.bf16 %v6151_v52  ;;  %v254_v52 = vrot.slane %v6238_v32, 2 }
  0xb1   :  { %v4890_v1 = vunpack.i.h.bf16 %v6154_v59 }
  0xb2   :  { %v724_v29 = vsel %vm717_vm4, %v5751_v42, %v4884_v53  ;;  %v371_v42 = vsel %vm318_vm3, %v368_v10, %v370_v55  ;;  %v255_v60 = vsel %vm200_vm2, %v252_v16, %v254_v52  ;;  %v258_v2 = vsel %vm200_vm2, %v254_v52, %v201_v9 }
  0xb3   :  { %v753_v34 = vsel %vm746_vm5, %v724_v29, %v4889_v23  ;;  %5007 = vrot.lane.b32.xlu2 %v5006_v30, %s5597_s27  ;;  %v5036_v29 = vpack.i.bf16 %v258_v2, %v255_v60  ;;  %v313_v16 = vrot.slane %v6238_v32, 3  ;;  %v4899_v9 = vunpack.i.l.bf16 %v6178_v45 }
  0xb4   :  { %v782_v53 = vsel %vm775_vm6, %v753_v34, %v4894_v14  ;;  %v372_v34 = vrot.slane %v6238_v32, 4  ;;  %v309_v52 = vrot.slane %v6159_v22, 3 }
  0xb5   :  { %966 = vmatmul.f32.gmra.mxu0 %v809_v38  ;;  %1168 = vmatmul.f32.gmra.mxu2 %v809_v38  ;;  %v366_v38 = vrot.slane %v6096_v40, 4  ;;  %v317_v26 = vsel %vm259_vm1, %v313_v16, %v260_v6  ;;  %v726_v6 = vsel %vm717_vm4, %v5784_v5, %v4899_v9 }
  0xb6   :  { %5022 = vrot.lane.b32.xlu1 %v5021_v46, %s5597_s27  ;;  %5017 = vrot.lane.b32.xlu0 %v5016_v63, %s5594_s20  ;;  %v6224_v37 = vpop.permute.xlu2 %649  ;;  %v725_v63 = vsel %vm717_vm4, %v5779_v4, %v4885_v48  ;;  %v311_v4 = vrot.slane %v6164_v8, 3  ;;  %v310_v60 = vsel %vm259_vm1, %v307_v36, %v309_v52 }
  0xb7   :  { %v6195_v19 = vpop.permute.xlu0 %645  ;;  %v6198_v57 = vpop.permute.xlu1 %647  ;;  %v369_v61 = vsel %vm318_vm3, %v366_v38, %v368_v10  ;;  %v367_v59 = vsel %vm318_vm3, %v364_v54, %v366_v38  ;;  %v754_v17 = vsel %vm746_vm5, %v725_v63, %v4890_v1  ;;  %v4900_v63 = vunpack.i.h.bf16 %v6178_v45 }
  0xb8   :  { %4738 = vmatmul.msk.f32.vlgmr.msra.gmra.mxu1 %vm875_vm8, %v6198_v57  ;;  %4767 = vmatmul.msk.f32.vlgmr.msra.gmra.mxu3 %vm875_vm8, %v6198_v57  ;;  %v811_v23 = vsel %vm804_vm7, %v782_v53, %v6195_v19  ;;  %v783_v38 = vsel %vm775_vm6, %v754_v17, %v4895_v24  ;;  %v376_v53 = vsel %vm318_vm3, %v372_v34, %v319_v20 }
  0xb9   :  { %v727_v45 = vsel %vm717_vm4, %v5812_v31, %v4900_v63 }
  0xbb   :  { %679 = vrot.lane.b32.xlu2 %v367_v59, %s5596_s26 }
  0xbd   :  { %969 = vmatmul.f32.gmra.mxu0 %v810_v21  ;;  %1171 = vmatmul.f32.gmra.mxu2 %v810_v21  ;;  %v314_v21 = vsel %vm259_vm1, %v311_v4, %v313_v16 }
  0xbe   :  { %683 = vrot.lane.b32.xlu1 %v371_v42, %s5596_s26  ;;  %681 = vrot.lane.b32.xlu0 %v369_v61, %s5596_s26  ;;  %v5041_v54 = vpack.i.bf16 %v317_v26, %v314_v21  ;;  %v6275_v42 = vpop.permute.xlu2 %4917  ;;  %v812_v61 = vsel %vm804_vm7, %v783_v38, %v6198_v57  ;;  %v312_v57 = vsel %vm259_vm1, %v309_v52, %v311_v4  ;;  %vm4430_vm1 = vcmask 1041409  }
  0xbf   :  { %v6229_v41 = vpop.permute.xlu0 %4902  ;;  %v6232_v46 = vpop.permute.xlu1 %4907  ;;  %v4919_v31 = vunpack.i.l.bf16 %v6275_v42  ;;  %v4920_v0 = vunpack.i.h.bf16 %v6275_v42 }
  0xc0   :  { %4739 = vmatmul.msk.f32.gmra.mxu1 %vm875_vm8, %v6224_v37  ;;  %4768 = vmatmul.msk.f32.gmra.mxu3 %vm875_vm8, %v6224_v37  ;;  %v4904_v14 = vunpack.i.l.bf16 %v6229_v41  ;;  %v4909_v48 = vunpack.i.l.bf16 %v6232_v46  ;;  %v4905_v20 = vunpack.i.h.bf16 %v6229_v41  ;;  %v4910_v59 = vunpack.i.h.bf16 %v6232_v46 }
  0xc2   :  { %v755_v1 = vsel %vm746_vm5, %v726_v6, %v4904_v14  ;;  %v756_v4 = vsel %vm746_vm5, %v727_v45, %v4905_v20 }
  0xc3   :  { %v785_v41 = vsel %vm775_vm6, %v756_v4, %v4910_v59 }
  0xc5   :  { %972 = vmatmul.f32.gmra.mxu0 %v811_v23  ;;  %1174 = vmatmul.f32.gmra.mxu2 %v811_v23  ;;  %v5026_v23 = vpack.i.bf16 %v312_v57, %v310_v60 }
  0xc6   :  { %5037 = vrot.lane.b32.xlu0 %v5036_v29, %s5597_s27  ;;  %5042 = vrot.lane.b32.xlu1 %v5041_v54, %s5595_s21  ;;  %v784_v29 = vsel %vm775_vm6, %v755_v1, %v4909_v48  ;;  %v656_v24 = vpop.permute.xlu2 %655  ;;  %s5601_s27 = smov 64  }
  0xc7   :  { %v652_v10 = vpop.permute.xlu0 %651  ;;  %v6268_v30 = vpop.permute.xlu1 %4912  ;;  %5027 = vrot.lane.b32.xlu2 %v5026_v23, %s5595_s21  ;;  %v813_v36 = vsel %vm804_vm7, %v784_v29, %v6224_v37  ;;  %v195_v37 = vrot.slane %v6238_v32, 1  ;;  %s5599_s21 = smov 127  }
  0xc8   :  { %4740 = vmatmul.msk.f32.gmra.mxu1 %vm875_vm8, %v652_v10  ;;  %4769 = vmatmul.msk.f32.gmra.mxu3 %vm875_vm8, %v652_v10  ;;  %v4914_v16 = vunpack.i.l.bf16 %v6268_v30  ;;  %v814_v21 = vsel %vm804_vm7, %v785_v41, %v652_v10  ;;  %v4915_v48 = vunpack.i.h.bf16 %v6268_v30  ;;  %v373_v30 = vsel %vm318_vm3, %v370_v55, %v372_v34 }
  0xc9   :  { %v196_v54 = vsel %vm141_vm0, %v193_v33, %v195_v37  ;;  %v199_v38 = vsel %vm141_vm0, %v195_v37, %v142_v3 }
  0xca   :  { %v728_v46 = vsel %vm717_vm4, %v5817_v35, %v4914_v16  ;;  %v5031_v6 = vpack.i.bf16 %v199_v38, %v196_v54  ;;  %v729_v3 = vsel %vm717_vm4, %v5841_v56, %v4915_v48 }
  0xcb   :  { %v758_v63 = vsel %vm746_vm5, %v729_v3, %v4920_v0 }
  0xcd   :  { %975 = vmatmul.f32.gmra.mxu0 %v812_v61  ;;  %1177 = vmatmul.f32.gmra.mxu2 %v812_v61  ;;  %v757_v61 = vsel %vm746_vm5, %v728_v46, %v4919_v31 }
  0xce   :  { %687 = vrot.lane.b32.xlu0 %v376_v53, %s5596_s26  ;;  %v4938_v26 = vpop.permute.xlu2 %4937 }
  0xcf   :  { %v4923_v5 = vpop.permute.xlu0 %4922  ;;  %v654_v2 = vpop.permute.xlu1 %653  ;;  %5032 = vrot.lane.b32.xlu2 %v5031_v6, %s5594_s20  ;;  %v4939_v55 = vunpack.i.l.bf16 %v4938_v26  ;;  %v4940_v16 = vunpack.i.h.bf16 %v4938_v26 }
  0xd0   :  { %4741 = vmatmul.msk.f32.gmra.mxu1 %vm875_vm8, %v654_v2  ;;  %4770 = vmatmul.msk.f32.gmra.mxu3 %vm875_vm8, %v654_v2  ;;  %v4924_v14 = vunpack.i.l.bf16 %v4923_v5  ;;  %v4925_v1 = vunpack.i.h.bf16 %v4923_v5 }
  0xd2   :  { %v786_v10 = vsel %vm775_vm6, %v757_v61, %v4924_v14  ;;  %v787_v42 = vsel %vm775_vm6, %v758_v63, %v4925_v1 }
  0xd3   :  { %v815_v33 = vsel %vm804_vm7, %v786_v10, %v654_v2  ;;  %v816_v2 = vsel %vm804_vm7, %v787_v42, %v656_v24 }
  0xd5   :  { %978 = vmatmul.f32.gmra.mxu0 %v813_v36  ;;  %1180 = vmatmul.f32.gmra.mxu2 %v813_v36 }
  0xd6   :  { %v4943_v52 = vpop.permute.xlu2 %4942 }
  0xd7   :  { %v4928_v17 = vpop.permute.xlu0 %4927  ;;  %v4933_v9 = vpop.permute.xlu1 %4932  ;;  %685 = vrot.lane.b32.xlu2 %v373_v30, %s5596_s26  ;;  %v4945_v14 = vunpack.i.h.bf16 %v4943_v52  ;;  %s5600_s26 = smov 32  }
  0xd8   :  { %4742 = vmatmul.msk.f32.gmra.mxu1 %vm875_vm8, %v656_v24  ;;  %4771 = vmatmul.msk.f32.gmra.mxu3 %vm875_vm8, %v656_v24  ;;  %v4929_v60 = vunpack.i.l.bf16 %v4928_v17  ;;  %v4934_v56 = vunpack.i.l.bf16 %v4933_v9  ;;  %v4930_v20 = vunpack.i.h.bf16 %v4928_v17  ;;  %v4935_v36 = vunpack.i.h.bf16 %v4933_v9 }
  0xd9   :  { %v4944_v17 = vunpack.i.l.bf16 %v4943_v52 }
  0xda   :  { %v730_v5 = vsel %vm717_vm4, %v5846_v58, %v4929_v60  ;;  %v731_v58 = vsel %vm717_vm4, %v5878_v43, %v4930_v20 }
  0xdb   :  { %v759_v34 = vsel %vm746_vm5, %v730_v5, %v4934_v56  ;;  %v760_v41 = vsel %vm746_vm5, %v731_v58, %v4935_v36  ;;  %v732_v43 = vsel %vm717_vm4, %v5883_v44, %v4944_v17  ;;  %v733_v44 = vsel %vm717_vm4, %v5908_v62, %v4945_v14 }
  0xdc   :  { %v788_v45 = vsel %vm775_vm6, %v759_v34, %v4939_v55  ;;  %v789_v31 = vsel %vm775_vm6, %v760_v41, %v4940_v16 }
  0xdd   :  { %981 = vmatmul.f32.gmra.mxu0 %v814_v21  ;;  %1183 = vmatmul.f32.gmra.mxu2 %v814_v21 }
  0xde   :  { %v662_v29 = vpop.permute.xlu2 %661 }
  0xdf   :  { %v658_v35 = vpop.permute.xlu0 %657  ;;  %v660_v53 = vpop.permute.xlu1 %659 }
  0xe0   :  { %4743 = vmatmul.msk.f32.gmra.mxu1 %vm875_vm8, %v658_v35  ;;  %4772 = vmatmul.msk.f32.gmra.mxu3 %vm875_vm8, %v658_v35  ;;  %v817_v24 = vsel %vm804_vm7, %v788_v45, %v658_v35  ;;  %v818_v46 = vsel %vm804_vm7, %v789_v31, %v660_v53 }
  0xe5   :  { %984 = vmatmul.f32.gmra.mxu0 %v815_v33  ;;  %1186 = vmatmul.f32.gmra.mxu2 %v815_v33 }
  0xe6   :  { %v4963_v37 = vpop.permute.xlu2 %4962 }
  0xe7   :  { %v4948_v57 = vpop.permute.xlu0 %4947  ;;  %v4953_v23 = vpop.permute.xlu1 %4952  ;;  %v4964_v52 = vunpack.i.l.bf16 %v4963_v37 }
  0xe8   :  { %4744 = vmatmul.msk.f32.gmra.mxu1 %vm875_vm8, %v660_v53  ;;  %4773 = vmatmul.msk.f32.gmra.mxu3 %vm875_vm8, %v660_v53  ;;  %v4949_v9 = vunpack.i.l.bf16 %v4948_v57  ;;  %v4954_v26 = vunpack.i.l.bf16 %v4953_v23  ;;  %v4950_v61 = vunpack.i.h.bf16 %v4948_v57  ;;  %v4955_v0 = vunpack.i.h.bf16 %v4953_v23 }
  0xea   :  { %v761_v54 = vsel %vm746_vm5, %v732_v43, %v4949_v9  ;;  %v762_v3 = vsel %vm746_vm5, %v733_v44, %v4950_v61 }
  0xeb   :  { %v790_v6 = vsel %vm775_vm6, %v761_v54, %v4954_v26  ;;  %v791_v53 = vsel %vm775_vm6, %v762_v3, %v4955_v0 }
  0xec   :  { %v819_v48 = vsel %vm804_vm7, %v790_v6, %v662_v29 }
  0xed   :  { %987 = vmatmul.f32.gmra.mxu0 %v816_v2  ;;  %1189 = vmatmul.f32.gmra.mxu2 %v816_v2  ;;  %v4965_v2 = vunpack.i.h.bf16 %v4963_v37 }
  0xee   :  { %v668_v35 = vpop.permute.xlu2 %667 }
  0xef   :  { %v664_v59 = vpop.permute.xlu0 %663  ;;  %v4958_v4 = vpop.permute.xlu1 %4957 }
  0xf0   :  { %4745 = vmatmul.msk.f32.gmra.mxu1 %vm875_vm8, %v662_v29  ;;  %4774 = vmatmul.msk.f32.gmra.mxu3 %vm875_vm8, %v662_v29  ;;  %v4959_v33 = vunpack.i.l.bf16 %v4958_v4  ;;  %v820_v30 = vsel %vm804_vm7, %v791_v53, %v664_v59  ;;  %v4960_v57 = vunpack.i.h.bf16 %v4958_v4 }
  0xf2   :  { %v734_v62 = vsel %vm717_vm4, %v5914_v7, %v4959_v33  ;;  %v735_v7 = vsel %vm717_vm4, %v5941_v49, %v4960_v57 }
  0xf3   :  { %v763_v42 = vsel %vm746_vm5, %v734_v62, %v4964_v52  ;;  %v764_v45 = vsel %vm746_vm5, %v735_v7, %v4965_v2 }
  0xf5   :  { %990 = vmatmul.f32.gmra.mxu0 %v817_v24  ;;  %1192 = vmatmul.f32.gmra.mxu2 %v817_v24 }
  0xf6   :  { %v4983_v63 = vpop.permute.xlu2 %4982 }
  0xf7   :  { %v4968_v21 = vpop.permute.xlu0 %4967  ;;  %v666_v38 = vpop.permute.xlu1 %665  ;;  %v4984_v31 = vunpack.i.l.bf16 %v4983_v63  ;;  %v4985_v61 = vunpack.i.h.bf16 %v4983_v63 }
  0xf8   :  { %4746 = vmatmul.msk.f32.gmra.mxu1 %vm875_vm8, %v664_v59  ;;  %4775 = vmatmul.msk.f32.gmra.mxu3 %vm875_vm8, %v664_v59  ;;  %v4969_v60 = vunpack.i.l.bf16 %v4968_v21  ;;  %v4970_v20 = vunpack.i.h.bf16 %v4968_v21 }
  0xfa   :  { %v792_v5 = vsel %vm775_vm6, %v763_v42, %v4969_v60  ;;  %v793_v24 = vsel %vm775_vm6, %v764_v45, %v4970_v20 }
  0xfb   :  { %v821_v55 = vsel %vm804_vm7, %v792_v5, %v666_v38  ;;  %v822_v41 = vsel %vm804_vm7, %v793_v24, %v668_v35 }
  0xfd   :  { %993 = vmatmul.f32.gmra.mxu0 %v818_v46  ;;  %1195 = vmatmul.f32.gmra.mxu2 %v818_v46 }
  0xfe   :  { %v4988_v29 = vpop.permute.xlu2 %4987 }
  0xff   :  { %v4973_v10 = vpop.permute.xlu0 %4972  ;;  %v4978_v1 = vpop.permute.xlu1 %4977  ;;  %v4990_v63 = vunpack.i.h.bf16 %v4988_v29 }
 0x100   :  { %4747 = vmatmul.msk.f32.gmra.mxu1 %vm875_vm8, %v666_v38  ;;  %4776 = vmatmul.msk.f32.gmra.mxu3 %vm875_vm8, %v666_v38  ;;  %v4974_v36 = vunpack.i.l.bf16 %v4973_v10  ;;  %v4979_v59 = vunpack.i.l.bf16 %v4978_v1  ;;  %v4975_v43 = vunpack.i.h.bf16 %v4973_v10  ;;  %v4980_v26 = vunpack.i.h.bf16 %v4978_v1 }
 0x101   :  { %v739_v57 = vsel %vm717_vm4, %v6028_v13, %v4990_v63 }
 0x102   :  { %v736_v16 = vsel %vm717_vm4, %v5946_v50, %v4974_v36  ;;  %v737_v54 = vsel %vm717_vm4, %v5983_v47, %v4975_v43 }
 0x103   :  { %v765_v9 = vsel %vm746_vm5, %v736_v16, %v4979_v59  ;;  %v766_v44 = vsel %vm746_vm5, %v737_v54, %v4980_v26 }
 0x104   :  { %v794_v21 = vsel %vm775_vm6, %v765_v9, %v4984_v31  ;;  %v795_v10 = vsel %vm775_vm6, %v766_v44, %v4985_v61 }
 0x105   :  { %996 = vmatmul.f32.gmra.mxu0 %v819_v48  ;;  %1198 = vmatmul.f32.gmra.mxu2 %v819_v48  ;;  %v4989_v48 = vunpack.i.l.bf16 %v4988_v29 }
 0x106   :  { %v674_v37 = vpop.permute.xlu2 %673 }
 0x107   :  { %v738_v3 = vsel %vm717_vm4, %v5988_v27, %v4989_v48 }
 0x108   :  { %4748 = vmatmul.msk.f32.gmra.mxu1 %vm875_vm8, %v668_v35  ;;  %4777 = vmatmul.msk.f32.gmra.mxu3 %vm875_vm8, %v668_v35  ;;  %v670_v56 = vpop.permute.xlu0 %669  ;;  %v672_v34 = vpop.permute.xlu1 %671 }
 0x109   :  { %v823_v38 = vsel %vm804_vm7, %v794_v21, %v670_v56  ;;  %v824_v53 = vsel %vm804_vm7, %v795_v10, %v672_v34 }
 0x10d   :  { %999 = vmatmul.f32.gmra.mxu0 %v820_v30  ;;  %1201 = vmatmul.f32.gmra.mxu2 %v820_v30 }
 0x10e   :  { %v5008_v33 = vpop.permute.xlu2 %5007 }
 0x10f   :  { %v5009_v13 = vunpack.i.l.bf16 %v5008_v33  ;;  %v5010_v54 = vunpack.i.h.bf16 %v5008_v33  ;;  %v869_v33 = vld [vmem:[%s10235_s2] sm:$0x3]  ;;  %s5598_s2 = smov 15  }
 0x110   :  { %4749 = vmatmul.msk.f32.gmra.mxu1 %vm875_vm8, %v670_v56  ;;  %4778 = vmatmul.msk.f32.gmra.mxu3 %vm875_vm8, %v670_v56  ;;  %v4993_v4 = vpop.permute.xlu0 %4992  ;;  %v4998_v17 = vpop.permute.xlu1 %4997 }
 0x111   :  { %v4994_v47 = vunpack.i.l.bf16 %v4993_v4  ;;  %v4999_v1 = vunpack.i.l.bf16 %v4998_v17  ;;  %v4995_v27 = vunpack.i.h.bf16 %v4993_v4  ;;  %v5000_v7 = vunpack.i.h.bf16 %v4998_v17 }
 0x112   :  { %v6374_v23 = vpop.f32.mrf.mxu0 }
 0x113   :  { %v767_v62 = vsel %vm746_vm5, %v738_v3, %v4994_v47 }
 0x114   :  { %v796_v42 = vsel %vm775_vm6, %v767_v62, %v4999_v1 }
 0x115   :  { %1002 = vmatmul.f32.gmra.mxu0 %v821_v55  ;;  %1204 = vmatmul.f32.gmra.mxu2 %v821_v55  ;;  %v825_v5 = vsel %vm804_vm7, %v796_v42, %v674_v37 }
 0x116   :  { %v680_v55 = vpop.permute.xlu2 %679 }
 0x118   :  { %v6380_v58 = vpop.f32.mrf.mxu2  ;;  %4750 = vmatmul.msk.f32.gmra.mxu1 %vm875_vm8, %v672_v34  ;;  %4779 = vmatmul.msk.f32.gmra.mxu3 %vm875_vm8, %v672_v34  ;;  %v676_v14 = vpop.permute.xlu0 %675  ;;  %v768_v34 = vsel %vm746_vm5, %v739_v57, %v4995_v27 }
 0x119   :  { %v6401_v6 = vpop.permute.xlu1 %5002  ;;  %v797_v36 = vsel %vm775_vm6, %v768_v34, %v5000_v7 }
 0x11a   :  { %v6385_v49 = vpop.f32.mrf.mxu0  ;;  %v5004_v20 = vunpack.i.l.bf16 %v6401_v6  ;;  %v826_v4 = vsel %vm804_vm7, %v797_v36, %v676_v14  ;;  %v5005_v21 = vunpack.i.h.bf16 %v6401_v6 }
 0x11c   :  { %v740_v59 = vsel %vm717_vm4, %v6033_v15, %v5004_v20 }
 0x11d   :  { %1005 = vmatmul.f32.gmra.mxu0 %v822_v41  ;;  %1207 = vmatmul.f32.gmra.mxu2 %v822_v41  ;;  %v769_v9 = vsel %vm746_vm5, %v740_v59, %v5009_v13 }
 0x120   :  { %v6391_v46 = vpop.f32.mrf.mxu2  ;;  %4751 = vmatmul.msk.f32.gmra.mxu1 %vm875_vm8, %v674_v37  ;;  %4780 = vmatmul.msk.f32.gmra.mxu3 %vm875_vm8, %v674_v37  ;;  %v5013_v52 = vpop.permute.xlu0 %5012 }
 0x121   :  { %v678_v30 = vpop.permute.xlu1 %677  ;;  %v5014_v41 = vunpack.i.l.bf16 %v5013_v52  ;;  %v6443_v31 = vpop.permute.xlu2 %5027  ;;  %v5015_v48 = vunpack.i.h.bf16 %v5013_v52 }
 0x122   :  { %v6396_v50 = vpop.f32.mrf.mxu0 }
 0x123   :  { %v798_v15 = vsel %vm775_vm6, %v769_v9, %v5014_v41 }
 0x124   :  { %v827_v61 = vsel %vm804_vm7, %v798_v15, %v678_v30 }
 0x125   :  { %1008 = vmatmul.f32.gmra.mxu0 %v823_v38  ;;  %1210 = vmatmul.f32.gmra.mxu2 %v823_v38 }
 0x128   :  { %v6404_v35 = vpop.f32.mrf.mxu2  ;;  %4752 = vmatmul.msk.f32.gmra.mxu1 %vm875_vm8, %v676_v14  ;;  %4781 = vmatmul.msk.f32.gmra.mxu3 %vm875_vm8, %v676_v14  ;;  %v6425_v2 = vpop.permute.xlu0 %5017  ;;  %v741_v14 = vsel %vm717_vm4, %v6091_v39, %v5005_v21 }
 0x129   :  { %v6441_v17 = vpop.permute.xlu1 %5022  ;;  %v770_v6 = vsel %vm746_vm5, %v741_v14, %v5010_v54  ;;  %v6462_v47 = vpop.permute.xlu2 %5032  ;;  %v5019_v3 = vunpack.i.l.bf16 %v6425_v2  ;;  %v5020_v36 = vunpack.i.h.bf16 %v6425_v2 }
 0x12a   :  { %v6409_v0 = vpop.f32.mrf.mxu0  ;;  %v799_v1 = vsel %vm775_vm6, %v770_v6, %v5015_v48  ;;  %v5024_v52 = vunpack.i.l.bf16 %v6441_v17  ;;  %v5025_v41 = vunpack.i.h.bf16 %v6441_v17  ;;  %v5034_v17 = vunpack.i.l.bf16 %v6462_v47 }
 0x12b   :  { %v742_v63 = vsel %vm717_vm4, %v6096_v40, %v5019_v3  ;;  %v828_v42 = vsel %vm804_vm7, %v799_v1, %v680_v55  ;;  %v743_v2 = vsel %vm717_vm4, %v6159_v22, %v5020_v36 }
 0x12c   :  { %v771_v7 = vsel %vm746_vm5, %v742_v63, %v5024_v52  ;;  %v772_v6 = vsel %vm746_vm5, %v743_v2, %v5025_v41 }
 0x12d   :  { %1011 = vmatmul.f32.gmra.mxu0 %v824_v53  ;;  %1213 = vmatmul.f32.gmra.mxu2 %v824_v53 }
 0x130   :  { %v6415_v60 = vpop.f32.mrf.mxu2  ;;  %4753 = vmatmul.msk.f32.gmra.mxu1 %vm875_vm8, %v678_v30  ;;  %4782 = vmatmul.msk.f32.gmra.mxu3 %vm875_vm8, %v678_v30  ;;  %v682_v43 = vpop.permute.xlu0 %681  ;;  %v6474_v30 = vperm.slane %v869_v33, 0 }
 0x131   :  { %v684_v53 = vpop.permute.xlu1 %683  ;;  %v6489_v40 = vpop.permute.xlu2 %685 }
 0x132   :  { %v6420_v56 = vpop.f32.mrf.mxu0 }
 0x135   :  { %1014 = vmatmul.f32.gmra.mxu0 %v825_v5  ;;  %1216 = vmatmul.f32.gmra.mxu2 %v825_v5  ;;  %v1077_v29 = vpop.f32.mrf.mxu1  ;;  %v5029_v5 = vunpack.i.l.bf16 %v6443_v31 }
 0x138   :  { %v6429_v45 = vpop.f32.mrf.mxu2  ;;  %4754 = vmatmul.msk.f32.gmra.mxu1 %vm875_vm8, %v680_v55  ;;  %4783 = vmatmul.msk.f32.gmra.mxu3 %vm875_vm8, %v680_v55  ;;  %v6484_v34 = vpop.permute.xlu0 %5037  ;;  %v6491_v55 = vperm.slane %v869_v33, 1 }
 0x139   :  { %v5039_v63 = vunpack.i.l.bf16 %v6484_v34 }
 0x13a   :  { %v6434_v24 = vpop.f32.mrf.mxu0 }
 0x13b   :  { %v6439_v16 = vpop.f32.mrf.mxu3 }
 0x13d   :  { %1017 = vmatmul.f32.gmra.mxu0 %v826_v4  ;;  %1219 = vmatmul.f32.gmra.mxu2 %v826_v4  ;;  %v1080_v37 = vpop.f32.mrf.mxu1  ;;  %v800_v4 = vsel %vm775_vm6, %v771_v7, %v5029_v5 }
 0x140   :  { %v6447_v26 = vpop.f32.mrf.mxu2  ;;  %4755 = vmatmul.msk.f32.gmra.mxu1 %vm875_vm8, %v682_v43  ;;  %4784 = vmatmul.msk.f32.gmra.mxu3 %vm875_vm8, %v682_v43  ;;  %v6512_v52 = vpop.permute.xlu0 %687 }
 0x142   :  { %v6452_v38 = vpop.f32.mrf.mxu0 }
 0x143   :  { %v6457_v44 = vpop.f32.mrf.mxu3 }
 0x145   :  { %1020 = vmatmul.f32.gmra.mxu0 %v827_v61  ;;  %1222 = vmatmul.f32.gmra.mxu2 %v827_v61  ;;  %v6460_v10 = vpop.f32.mrf.mxu1  ;;  %v5030_v61 = vunpack.i.h.bf16 %v6443_v31 }
 0x148   :  { %v6468_v39 = vpop.f32.mrf.mxu2  ;;  %4756 = vmatmul.msk.f32.gmra.mxu1 %vm875_vm8, %v684_v53  ;;  %4785 = vmatmul.msk.f32.gmra.mxu3 %vm875_vm8, %v684_v53 }
 0x14a   :  { %v976_v62 = vpop.f32.mrf.mxu0 }
 0x14b   :  { %v6479_v27 = vpop.f32.mrf.mxu3  ;;  %v977_v57 = vadd.f32 %v976_v62, %v6474_v30 }
 0x14d   :  { %1023 = vmatmul.f32.gmra.mxu0 %v828_v42  ;;  %1225 = vmatmul.f32.gmra.mxu2 %v828_v42  ;;  %v6486_v20 = vpop.f32.mrf.mxu1  ;;  %v1078_v59 = vadd.f32 %v1077_v29, %v977_v57  ;;  %v829_v29 = vsel %vm804_vm7, %v800_v4, %v682_v43  ;;  %v5043_v57 = vpop.permute.xlu1 %5042 }
 0x14e   :  { %v5044_v2 = vunpack.i.l.bf16 %v5043_v57 }
 0x14f   :  { %v1356_v14 = vmax.f32 %v1078_v59, 0.0 }
 0x150   :  { %v1178_v13 = vpop.f32.mrf.mxu2  ;;  %4757 = vmatmul.msk.f32.gmra.mxu1 %vm875_vm8, %v6489_v40  ;;  %4786 = vmatmul.msk.f32.gmra.mxu3 %vm875_vm8, %v6489_v40 }
 0x151   :  { %v1179_v21 = vadd.f32 %v1178_v13, %v6491_v55  ;;  %v6514_v43 = vrot.slane %v1356_v14, 1 }
 0x152   :  { %v979_v9 = vpop.f32.mrf.mxu0 }
 0x153   :  { %v980_v15 = vadd.f32 %v979_v9, %v6474_v30  ;;  %v6504_v54 = vpop.f32.mrf.mxu3  ;;  %v1280_v22 = vadd.f32 %v6439_v16, %v1179_v21  ;;  %v744_v16 = vsel %vm717_vm4, %v6164_v8, %v5034_v17 }
 0x155   :  { %v1081_v48 = vadd.f32 %v1080_v37, %v980_v15  ;;  %1026 = vmatmul.f32.gmra.mxu0 %v829_v29  ;;  %1228 = vmatmul.f32.gmra.mxu2 %v829_v29  ;;  %v6509_v3 = vpop.f32.mrf.mxu1  ;;  %v801_v37 = vsel %vm775_vm6, %v772_v6, %v5030_v61  ;;  %v1357_v5 = vmax.f32 %v1280_v22, 0.0  ;;  %v5035_v15 = vunpack.i.h.bf16 %v6462_v47 }
 0x156   :  { %v830_v59 = vsel %vm804_vm7, %v801_v37, %v684_v53  ;;  %v5040_v22 = vunpack.i.h.bf16 %v6484_v34  ;;  %v5045_v34 = vunpack.i.h.bf16 %v5043_v57 }
 0x157   :  { %v1358_v33 = vmax.f32 %v1081_v48, 0.0  ;;  %v6542_v21 = vrot.slane %v1357_v5, 1  ;;  %v745_v37 = vsel %vm717_vm4, %v6238_v32, %v5035_v15  ;;  %vm4436_vm4 = vcmask 1044484  }
 0x158   :  { %v1181_v1 = vpop.f32.mrf.mxu2  ;;  %4758 = vmatmul.msk.f32.gmra.mxu1 %vm875_vm8, %v6512_v52  ;;  %4787 = vmatmul.msk.f32.gmra.mxu3 %vm875_vm8, %v6512_v52 }
 0x159   :  { %v1484_v62 = vrot.slane %v1358_v33, 1  ;;  %v1182_v31 = vadd.f32 %v1181_v1, %v6491_v55 }
 0x15a   :  { %v982_v42 = vpop.f32.mrf.mxu0 }
 0x15b   :  { %v1283_v7 = vadd.f32 %v6457_v44, %v1182_v31  ;;  %v983_v36 = vadd.f32 %v982_v42, %v6474_v30  ;;  %v1485_v13 = vsel %vm141_vm0, %v6514_v43, %v1484_v62  ;;  %v6532_v41 = vpop.f32.mrf.mxu3  ;;  %v773_v44 = vsel %vm746_vm5, %v744_v16, %v5039_v63 }
 0x15c   :  { %v6530_v4 = vmax.f32 %v1356_v14, %v1485_v13  ;;  %v802_v6 = vsel %vm775_vm6, %v773_v44, %v5044_v2 }
 0x15d   :  { %v1359_v9 = vmax.f32 %v1283_v7, 0.0  ;;  %v1084_v8 = vadd.f32 %v6460_v10, %v983_v36  ;;  %1029 = vmatmul.f32.gmra.mxu0 %v830_v59  ;;  %1231 = vmatmul.f32.gmra.mxu2 %v830_v59  ;;  %v6540_v53 = vpop.f32.mrf.mxu1  ;;  %v831_v42 = vsel %vm804_vm7, %v802_v6, %v6489_v40 }
 0x15e   :  { %1947 = vrot.lane.b32.xlu1 %v6530_v4, %s5598_s2  ;;  %1764 = vrot.lane.b32.xlu2 %v6530_v4, %s5599_s21 }
 0x15f   :  { %v1486_v10 = vrot.slane %v1359_v9, 1  ;;  %v1360_v29 = vmax.f32 %v1084_v8, 0.0 }
 0x160   :  { %v1184_v14 = vpop.f32.mrf.mxu2 }
 0x161   :  { %v1488_v61 = vrot.slane %v1360_v29, 1  ;;  %v1185_v48 = vadd.f32 %v1184_v14, %v6491_v55  ;;  %v1487_v17 = vsel %vm141_vm0, %v6542_v21, %v1486_v10 }
 0x162   :  { %v985_v1 = vpop.f32.mrf.mxu0  ;;  %v6550_v31 = vmax.f32 %v1357_v5, %v1487_v17 }
 0x163   :  { %v1286_v47 = vadd.f32 %v6479_v27, %v1185_v48  ;;  %v986_v16 = vadd.f32 %v985_v1, %v6474_v30  ;;  %v1489_v63 = vsel %vm141_vm0, %v1484_v62, %v1488_v61  ;;  %v1294_v32 = vpop.f32.mrf.mxu3  ;;  %v774_v27 = vsel %vm746_vm5, %v745_v37, %v5040_v22 }
 0x164   :  { %1766 = vrot.lane.b32.xlu0 %v6550_v31, %s5599_s21  ;;  %v6561_v7 = vmax.f32 %v1358_v33, %v1489_v63  ;;  %v803_v8 = vsel %vm775_vm6, %v774_v27, %v5045_v34  ;;  %vm4438_vm5 = vcmask 1045509   ;;  %vm4440_vm6 = vcmask 1046534  }
 0x165   :  { %v1361_v5 = vmax.f32 %v1286_v47, 0.0  ;;  %v1087_v36 = vadd.f32 %v6486_v20, %v986_v16  ;;  %1032 = vmatmul.f32.gmra.mxu0 %v831_v42  ;;  %1234 = vmatmul.f32.gmra.mxu2 %v831_v42  ;;  %v1095_v62 = vpop.f32.mrf.mxu1  ;;  %v832_v17 = vsel %vm804_vm7, %v803_v8, %v6512_v52  ;;  %vm4442_vm7 = vcmask 1047559  }
 0x166   :  { %1949 = vrot.lane.b32.xlu1 %v6561_v7, %s5598_s2  ;;  %1768 = vrot.lane.b32.xlu2 %v6561_v7, %s5599_s21 }
 0x167   :  { %v1490_v13 = vrot.slane %v1361_v5, 1  ;;  %v1362_v40 = vmax.f32 %v1087_v36, 0.0 }
 0x168   :  { %v1187_v33 = vpop.f32.mrf.mxu2 }
 0x169   :  { %v1492_v59 = vrot.slane %v1362_v40, 1  ;;  %v1188_v57 = vadd.f32 %v1187_v33, %v6491_v55  ;;  %v1491_v20 = vsel %vm141_vm0, %v1486_v10, %v1490_v13 }
 0x16a   :  { %v988_v2 = vpop.f32.mrf.mxu0  ;;  %v6572_v44 = vmax.f32 %v1359_v9, %v1491_v20 }
 0x16b   :  { %v1289_v15 = vadd.f32 %v6504_v54, %v1188_v57  ;;  %v989_v14 = vadd.f32 %v988_v2, %v6474_v30  ;;  %v1493_v48 = vsel %vm141_vm0, %v1488_v61, %v1492_v59  ;;  %v1297_v1 = vpop.f32.mrf.mxu3 }
 0x16c   :  { %1770 = vrot.lane.b32.xlu0 %v6572_v44, %s5599_s21  ;;  %v6581_v6 = vmax.f32 %v1360_v29, %v1493_v48 }
 0x16d   :  { %v1363_v10 = vmax.f32 %v1289_v15, 0.0  ;;  %v1090_v22 = vadd.f32 %v6509_v3, %v989_v14  ;;  %1035 = vmatmul.f32.gmra.mxu0 %v832_v17  ;;  %1237 = vmatmul.f32.gmra.mxu2 %v832_v17  ;;  %v1098_v37 = vpop.f32.mrf.mxu1 }
 0x16e   :  { %1951 = vrot.lane.b32.xlu2 %v6581_v6, %s5598_s2 }
 0x16f   :  { %v1494_v54 = vrot.slane %v1363_v10, 1  ;;  %v1364_v9 = vmax.f32 %v1090_v22, 0.0 }
 0x170   :  { %v1190_v61 = vpop.f32.mrf.mxu2 }
 0x171   :  { %v1496_v47 = vrot.slane %v1364_v9, 1  ;;  %v1191_v16 = vadd.f32 %v1190_v61, %v6491_v55  ;;  %v1495_v52 = vsel %vm141_vm0, %v1490_v13, %v1494_v54 }
 0x172   :  { %v991_v29 = vpop.f32.mrf.mxu0  ;;  %v6588_v63 = vmax.f32 %v1361_v5, %v1495_v52 }
 0x173   :  { %v1292_v3 = vadd.f32 %v6532_v41, %v1191_v16  ;;  %v992_v42 = vadd.f32 %v991_v29, %v6474_v30  ;;  %v1497_v34 = vsel %vm141_vm0, %v1492_v59, %v1496_v47  ;;  %v1300_v57 = vpop.f32.mrf.mxu3 }
 0x174   :  { %1772 = vrot.lane.b32.xlu0 %v6581_v6, %s5599_s21  ;;  %1774 = vrot.lane.b32.xlu1 %v6588_v63, %s5599_s21  ;;  %v6597_v36 = vmax.f32 %v1362_v40, %v1497_v34 }
 0x175   :  { %v1365_v27 = vmax.f32 %v1292_v3, 0.0  ;;  %v1093_v13 = vadd.f32 %v6540_v53, %v992_v42  ;;  %4731 = vmatmul.msk.f32.vlgmr.msrb.gmra.mxu0 %vm875_vm8, %v6021_v11  ;;  %4760 = vmatmul.msk.f32.vlgmr.msrb.gmra.mxu2 %vm875_vm8, %v6021_v11  ;;  %v1101_v53 = vpop.f32.mrf.mxu1 }
 0x176   :  { %1953 = vrot.lane.b32.xlu2 %v6597_v36, %s5598_s2 }
 0x177   :  { %v1498_v41 = vrot.slane %v1365_v27, 1  ;;  %v1366_v5 = vmax.f32 %v1093_v13, 0.0 }
 0x178   :  { %v1193_v33 = vpop.f32.mrf.mxu2 }
 0x179   :  { %v1194_v59 = vadd.f32 %v1193_v33, %v6491_v55  ;;  %v1499_v40 = vsel %vm141_vm0, %v1494_v54, %v1498_v41  ;;  %v1500_v2 = vrot.slane %v1366_v5, 1 }
 0x17a   :  { %v994_v20 = vpop.f32.mrf.mxu0  ;;  %v6608_v8 = vmax.f32 %v1363_v10, %v1499_v40 }
 0x17b   :  { %v1295_v15 = vadd.f32 %v1294_v32, %v1194_v59  ;;  %v995_v14 = vadd.f32 %v994_v20, %v6474_v30  ;;  %v1501_v32 = vsel %vm141_vm0, %v1496_v47, %v1500_v2  ;;  %v1303_v34 = vpop.f32.mrf.mxu3 }
 0x17c   :  { %1776 = vrot.lane.b32.xlu0 %v6597_v36, %s5599_s21  ;;  %1778 = vrot.lane.b32.xlu1 %v6608_v8, %s5599_s21  ;;  %v6622_v52 = vmax.f32 %v1364_v9, %v1501_v32 }
 0x17d   :  { %v1367_v11 = vmax.f32 %v1295_v15, 0.0  ;;  %v1096_v48 = vadd.f32 %v1095_v62, %v995_v14  ;;  %4732 = vmatmul.msk.f32.gmra.mxu0 %vm875_vm8, %v5970_v18  ;;  %4761 = vmatmul.msk.f32.gmra.mxu2 %vm875_vm8, %v5970_v18  ;;  %v1104_v18 = vpop.f32.mrf.mxu1 }
 0x17f   :  { %v1502_v17 = vrot.slane %v1367_v11, 1  ;;  %v1368_v10 = vmax.f32 %v1096_v48, 0.0 }
 0x180   :  { %v1196_v22 = vpop.f32.mrf.mxu2 }
 0x181   :  { %v1197_v54 = vadd.f32 %v1196_v22, %v6491_v55  ;;  %v1503_v61 = vsel %vm141_vm0, %v1498_v41, %v1502_v17  ;;  %v1504_v62 = vrot.slane %v1368_v10, 1 }
 0x182   :  { %v997_v16 = vpop.f32.mrf.mxu0  ;;  %v6624_v29 = vmax.f32 %v1365_v27, %v1503_v61 }
 0x183   :  { %v1298_v3 = vadd.f32 %v1297_v1, %v1197_v54  ;;  %v998_v42 = vadd.f32 %v997_v16, %v6474_v30  ;;  %v1505_v1 = vsel %vm141_vm0, %v1500_v2, %v1504_v62 }
 0x184   :  { %1955 = vrot.lane.b32.xlu0 %v6622_v52, %s5598_s2  ;;  %1780 = vrot.lane.b32.xlu1 %v6622_v52, %s5599_s21 }
 0x185   :  { %v1369_v47 = vmax.f32 %v1298_v3, 0.0  ;;  %v1099_v13 = vadd.f32 %v1098_v37, %v998_v42  ;;  %1782 = vrot.lane.b32.xlu2 %v6624_v29, %s5599_s21  ;;  %4733 = vmatmul.msk.f32.gmra.mxu0 %vm875_vm8, %v6023_v12  ;;  %v6640_v37 = vmax.f32 %v1366_v5, %v1505_v1  ;;  %v1306_v5 = vpop.f32.mrf.mxu3 }
 0x186   :  { %4762 = vmatmul.msk.f32.gmra.mxu2 %vm875_vm8, %v6023_v12 }
 0x187   :  { %v1506_v9 = vrot.slane %v1369_v47, 1  ;;  %v1370_v27 = vmax.f32 %v1099_v13, 0.0 }
 0x188   :  { %v1199_v41 = vpop.f32.mrf.mxu2 }
 0x189   :  { %v1200_v33 = vadd.f32 %v1199_v41, %v6491_v55  ;;  %v1507_v59 = vsel %vm141_vm0, %v1502_v17, %v1506_v9  ;;  %v1508_v48 = vrot.slane %v1370_v27, 1 }
 0x18a   :  { %v1000_v40 = vpop.f32.mrf.mxu0  ;;  %v6642_v20 = vmax.f32 %v1367_v11, %v1507_v59 }
 0x18b   :  { %v1301_v15 = vadd.f32 %v1300_v57, %v1200_v33  ;;  %v1001_v14 = vadd.f32 %v1000_v40, %v6474_v30  ;;  %v1107_v57 = vpop.f32.mrf.mxu1  ;;  %v1509_v22 = vsel %vm141_vm0, %v1504_v62, %v1508_v48 }
 0x18c   :  { %1957 = vrot.lane.b32.xlu0 %v6640_v37, %s5598_s2  ;;  %1784 = vrot.lane.b32.xlu1 %v6640_v37, %s5599_s21  ;;  %v6661_v13 = vmax.f32 %v1368_v10, %v1509_v22 }
 0x18d   :  { %v1371_v12 = vmax.f32 %v1301_v15, 0.0  ;;  %v1102_v2 = vadd.f32 %v1101_v53, %v1001_v14  ;;  %1786 = vrot.lane.b32.xlu2 %v6642_v20, %s5599_s21  ;;  %4734 = vmatmul.msk.f32.gmra.mxu0 %vm875_vm8, %v6078_v28 }
 0x18e   :  { %4763 = vmatmul.msk.f32.gmra.mxu2 %vm875_vm8, %v6078_v28 }
 0x18f   :  { %v1510_v11 = vrot.slane %v1371_v12, 1  ;;  %v1372_v17 = vmax.f32 %v1102_v2, 0.0 }
 0x190   :  { %v1202_v32 = vpop.f32.mrf.mxu2 }
 0x191   :  { %v1203_v54 = vadd.f32 %v1202_v32, %v6491_v55  ;;  %v1511_v53 = vsel %vm141_vm0, %v1506_v9, %v1510_v11  ;;  %v1512_v1 = vrot.slane %v1372_v17, 1 }
 0x192   :  { %v1003_v61 = vpop.f32.mrf.mxu0  ;;  %v6658_v16 = vmax.f32 %v1369_v47, %v1511_v53  ;;  %v1309_v47 = vpop.f32.mrf.mxu3 }
 0x193   :  { %v1304_v3 = vadd.f32 %v1303_v34, %v1203_v54  ;;  %v1004_v42 = vadd.f32 %v1003_v61, %v6474_v30  ;;  %v1513_v9 = vsel %vm141_vm0, %v1508_v48, %v1512_v1  ;;  %v1110_v33 = vpop.f32.mrf.mxu1 }
 0x194   :  { %10535 = vst [vmem:[#allocation9_spill] sm:$0xff] %v6658_v16  ;;  %1790 = vrot.lane.b32.xlu0 %v6658_v16, %s5599_s21  ;;  %v6677_v22 = vmax.f32 %v1370_v27, %v1513_v9 }
 0x195   :  { %v1373_v28 = vmax.f32 %v1304_v3, 0.0  ;;  %v1105_v41 = vadd.f32 %v1104_v18, %v1004_v42  ;;  %1788 = vrot.lane.b32.xlu2 %v6661_v13, %s5599_s21  ;;  %4735 = vmatmul.msk.f32.gmra.mxu0 %vm875_vm8, %v6128_v25 }
 0x196   :  { %4764 = vmatmul.msk.f32.gmra.mxu2 %vm875_vm8, %v6128_v25 }
 0x197   :  { %v1514_v62 = vrot.slane %v1373_v28, 1  ;;  %v1374_v34 = vmax.f32 %v1105_v41, 0.0 }
 0x198   :  { %v1205_v10 = vpop.f32.mrf.mxu2 }
 0x199   :  { %v1206_v59 = vadd.f32 %v1205_v10, %v6491_v55  ;;  %v1515_v18 = vsel %vm141_vm0, %v1510_v11, %v1514_v62  ;;  %v1516_v14 = vrot.slane %v1374_v34, 1 }
 0x19a   :  { %v1006_v40 = vpop.f32.mrf.mxu0  ;;  %v6674_v15 = vmax.f32 %v1371_v12, %v1515_v18  ;;  %v1312_v53 = vpop.f32.mrf.mxu3 }
 0x19b   :  { %v1307_v2 = vadd.f32 %v1306_v5, %v1206_v59  ;;  %v1007_v32 = vadd.f32 %v1006_v40, %v6474_v30  ;;  %v1517_v5 = vsel %vm141_vm0, %v1512_v1, %v1516_v14  ;;  %v1113_v41 = vpop.f32.mrf.mxu1 }
 0x19c   :  { %10536 = vst [vmem:[#allocation10_spill] sm:$0xff] %v6674_v15  ;;  %1794 = vrot.lane.b32.xlu0 %v6674_v15, %s5599_s21  ;;  %v6690_v3 = vmax.f32 %v1372_v17, %v1517_v5 }
 0x19d   :  { %v1375_v25 = vmax.f32 %v1307_v2, 0.0  ;;  %v1108_v54 = vadd.f32 %v1107_v57, %v1007_v32  ;;  %1792 = vrot.lane.b32.xlu2 %v6677_v22, %s5599_s21  ;;  %4736 = vmatmul.msk.f32.gmra.mxu0 %vm875_vm8, %v6111_v51 }
 0x19e   :  { %4765 = vmatmul.msk.f32.gmra.mxu2 %vm875_vm8, %v6111_v51 }
 0x19f   :  { %v1518_v48 = vrot.slane %v1375_v25, 1  ;;  %v1376_v12 = vmax.f32 %v1108_v54, 0.0 }
 0x1a0   :  { %v1208_v27 = vpop.f32.mrf.mxu2 }
 0x1a1   :  { %v1209_v11 = vadd.f32 %v1208_v27, %v6491_v55  ;;  %v1519_v61 = vsel %vm141_vm0, %v1514_v62, %v1518_v48  ;;  %v1520_v10 = vrot.slane %v1376_v12, 1 }
 0x1a2   :  { %v1009_v57 = vpop.f32.mrf.mxu0  ;;  %v6692_v42 = vmax.f32 %v1373_v28, %v1519_v61 }
 0x1a3   :  { %v1310_v9 = vadd.f32 %v1309_v47, %v1209_v11  ;;  %v1010_v51 = vadd.f32 %v1009_v57, %v6474_v30  ;;  %v1521_v62 = vsel %vm141_vm0, %v1516_v14, %v1520_v10  ;;  %v1315_v11 = vpop.f32.mrf.mxu3 }
 0x1a4   :  { %10537 = vst [vmem:[#allocation11_spill] sm:$0xff] %v6692_v42  ;;  %1796 = vrot.lane.b32.xlu0 %v6690_v3, %s5599_s21  ;;  %1798 = vrot.lane.b32.xlu1 %v6692_v42, %s5599_s21  ;;  %v6706_v32 = vmax.f32 %v1374_v34, %v1521_v62 }
 0x1a5   :  { %v1377_v1 = vmax.f32 %v1310_v9, 0.0  ;;  %v1111_v59 = vadd.f32 %v1110_v33, %v1010_v51  ;;  %4737 = vmatmul.msk.f32.gmra.mxu0 %vm875_vm8, %v6195_v19 }
 0x1a6   :  { %4766 = vmatmul.msk.f32.gmra.mxu2 %vm875_vm8, %v6195_v19  ;;  %v1116_v19 = vpop.f32.mrf.mxu1 }
 0x1a7   :  { %v1522_v17 = vrot.slane %v1377_v1, 1  ;;  %v1378_v28 = vmax.f32 %v1111_v59, 0.0 }
 0x1a8   :  { %v1211_v47 = vpop.f32.mrf.mxu2 }
 0x1a9   :  { %v1212_v18 = vadd.f32 %v1211_v47, %v6491_v55  ;;  %v1523_v40 = vsel %vm141_vm0, %v1518_v48, %v1522_v17  ;;  %v1524_v33 = vrot.slane %v1378_v28, 1 }
 0x1aa   :  { %v1012_v2 = vpop.f32.mrf.mxu0  ;;  %v6708_v54 = vmax.f32 %v1375_v25, %v1523_v40 }
 0x1ab   :  { %v1313_v5 = vadd.f32 %v1312_v53, %v1212_v18  ;;  %v1013_v27 = vadd.f32 %v1012_v2, %v6474_v30  ;;  %v1525_v34 = vsel %vm141_vm0, %v1520_v10, %v1524_v33  ;;  %v1318_v2 = vpop.f32.mrf.mxu3 }
 0x1ac   :  { %10538 = vst [vmem:[#allocation12_spill] sm:$0xff] %v6708_v54  ;;  %1800 = vrot.lane.b32.xlu0 %v6706_v32, %s5599_s21  ;;  %1802 = vrot.lane.b32.xlu1 %v6708_v54, %s5599_s21  ;;  %v6718_v59 = vmax.f32 %v1376_v12, %v1525_v34 }
 0x1ad   :  { %v1379_v14 = vmax.f32 %v1313_v5, 0.0  ;;  %v1114_v61 = vadd.f32 %v1113_v41, %v1013_v27 }
 0x1ae   :  { %v1119_v5 = vpop.f32.mrf.mxu1 }
 0x1af   :  { %v1526_v48 = vrot.slane %v1379_v14, 1  ;;  %v1380_v57 = vmax.f32 %v1114_v61, 0.0 }
 0x1b0   :  { %v1214_v25 = vpop.f32.mrf.mxu2 }
 0x1b1   :  { %v1215_v9 = vadd.f32 %v1214_v25, %v6491_v55  ;;  %v1527_v53 = vsel %vm141_vm0, %v1522_v17, %v1526_v48  ;;  %v1528_v47 = vrot.slane %v1380_v57, 1 }
 0x1b2   :  { %v1015_v51 = vpop.f32.mrf.mxu0  ;;  %v6720_v62 = vmax.f32 %v1377_v1, %v1527_v53 }
 0x1b3   :  { %v1316_v18 = vadd.f32 %v1315_v11, %v1215_v9  ;;  %v1016_v40 = vadd.f32 %v1015_v51, %v6474_v30  ;;  %v1529_v12 = vsel %vm141_vm0, %v1524_v33, %v1528_v47 }
 0x1b4   :  { %10539 = vst [vmem:[#allocation13_spill] sm:$0xff] %v6720_v62  ;;  %1804 = vrot.lane.b32.xlu1 %v6718_v59, %s5599_s21  ;;  %1806 = vrot.lane.b32.xlu2 %v6720_v62, %s5599_s21  ;;  %v6730_v25 = vmax.f32 %v1378_v28, %v1529_v12 }
 0x1b5   :  { %v1381_v41 = vmax.f32 %v1316_v18, 0.0  ;;  %v1117_v10 = vadd.f32 %v1116_v19, %v1016_v40 }
 0x1b7   :  { %v1530_v17 = vrot.slane %v1381_v41, 1  ;;  %v1382_v27 = vmax.f32 %v1117_v10, 0.0  ;;  %v6750_v10 = vpop.f32.mrf.mxu1 }
 0x1b8   :  { %v1217_v1 = vpop.f32.mrf.mxu2 }
 0x1b9   :  { %v1218_v61 = vadd.f32 %v1217_v1, %v6491_v55  ;;  %v1531_v11 = vsel %vm141_vm0, %v1526_v48, %v1530_v17  ;;  %v1532_v53 = vrot.slane %v1382_v27, 1  ;;  %v1321_v48 = vpop.f32.mrf.mxu3 }
 0x1ba   :  { %v1018_v34 = vpop.f32.mrf.mxu0  ;;  %v6732_v9 = vmax.f32 %v1379_v14, %v1531_v11 }
 0x1bb   :  { %v6734_v51 = vadd.f32 %v1318_v2, %v1218_v61  ;;  %v1019_v19 = vadd.f32 %v1018_v34, %v6474_v30  ;;  %v1533_v40 = vsel %vm141_vm0, %v1528_v47, %v1532_v53 }
 0x1bc   :  { %10540 = vst [vmem:[#allocation14_spill] sm:$0xff] %v6732_v9  ;;  %1808 = vrot.lane.b32.xlu1 %v6730_v25, %s5599_s21  ;;  %1810 = vrot.lane.b32.xlu2 %v6732_v9, %s5599_s21  ;;  %v6760_v61 = vmax.f32 %v1380_v57, %v1533_v40 }
 0x1bd   :  { %v10246_v33 = vmax.f32 %v6734_v51, 0.0  ;;  %v6742_v18 = vadd.f32 %v1119_v5, %v1019_v19 }
 0x1be   :  { %10541 = vst [vmem:[#allocation15_spill] sm:$0xff] %v6760_v61 }
 0x1bf   :  { %v6746_v28 = vrot.slane %v10246_v33, 1  ;;  %v10245_v14 = vmax.f32 %v6742_v18, 0.0  ;;  %v1125_v9 = vpop.f32.mrf.mxu1 }
 0x1c0   :  { %v1220_v2 = vpop.f32.mrf.mxu2 }
 0x1c1   :  { %v6754_v12 = vrot.slane %v10245_v14, 1  ;;  %v1535_v5 = vsel %vm141_vm0, %v1530_v17, %v6746_v28  ;;  %v1221_v34 = vadd.f32 %v1220_v2, %v6491_v55  ;;  %v1324_v16 = vpop.f32.mrf.mxu3 }
 0x1c2   :  { %v6758_v1 = vpop.f32.mrf.mxu0  ;;  %v6762_v11 = vmax.f32 %v1381_v41, %v1535_v5  ;;  %v1765_v5 = vpop.permute.xlu2 %1764 }
 0x1c3   :  { %v1537_v47 = vsel %vm141_vm0, %v1532_v53, %v6754_v12  ;;  %v1322_v14 = vadd.f32 %v1321_v48, %v1221_v34 }
 0x1c4   :  { %10542 = vst [vmem:[#allocation16_spill] sm:$0xff] %v6762_v11  ;;  %1812 = vrot.lane.b32.xlu2 %v6760_v61, %s5599_s21  ;;  %v6769_v19 = vmax.f32 %v1382_v27, %v1537_v47 }
 0x1c5   :  { %v1385_v40 = vmax.f32 %v1322_v14, 0.0 }
 0x1c7   :  { %v6776_v62 = vrot.slane %v1385_v40, 1 }
 0x1c8   :  { %v1223_v33 = vpop.f32.mrf.mxu2 }
 0x1c9   :  { %v1224_v17 = vadd.f32 %v1223_v33, %v6491_v55 }
 0x1ca   :  { %v1024_v57 = vpop.f32.mrf.mxu0  ;;  %v1769_v15 = vpop.permute.xlu2 %1768 }
 0x1cb   :  { %v6772_v41 = vadd.f32 %v1324_v16, %v1224_v17  ;;  %v1025_v53 = vadd.f32 %v1024_v57, %v6474_v30  ;;  %v1128_v17 = vpop.f32.mrf.mxu1 }
 0x1cd   :  { %10543 = vst [vmem:[#allocation17_spill] sm:$0xff] %v6772_v41  ;;  %v10253_v2 = vmax.f32 %v6772_v41, 0.0  ;;  %v1126_v34 = vadd.f32 %v1125_v9, %v1025_v53 }
 0x1cf   :  { %v6780_v27 = vrot.slane %v10253_v2, 1  ;;  %v1388_v54 = vmax.f32 %v1126_v34, 0.0 }
 0x1d0   :  { %v6782_v48 = vpop.f32.mrf.mxu2  ;;  %v1948_v57 = vpop.permute.xlu1 %1947 }
 0x1d1   :  { %10544 = vst [vmem:[#allocation18_spill] sm:$0xff] %v6780_v27  ;;  %v1543_v33 = vsel %vm141_vm0, %v6776_v62, %v6780_v27  ;;  %v6795_v9 = vrot.slane %v1388_v54, 1 }
 0x1d2   :  { %v1027_v16 = vpop.f32.mrf.mxu0  ;;  %v6787_v14 = vmax.f32 %v1385_v40, %v1543_v33  ;;  %v1952_v27 = vpop.permute.xlu2 %1951 }
 0x1d3   :  { %v1028_v47 = vadd.f32 %v1027_v16, %v6474_v30 }
 0x1d4   :  { %10545 = vst [vmem:[#allocation19_spill] sm:$0xff] %v6787_v14 }
 0x1d5   :  { %v6790_v42 = vadd.f32 %v1128_v17, %v1028_v47 }
 0x1d6   :  { %v1767_v2 = vpop.permute.xlu0 %1766 }
 0x1d7   :  { %10546 = vst [vmem:[#allocation20_spill] sm:$0xff] %v6790_v42  ;;  %v10258_v61 = vmax.f32 %v6790_v42, 0.0  ;;  %v1856_v16 = vsel %vm1848_vm9, %v1765_v5, %v1767_v2 }
 0x1d8   :  { %v6793_v41 = vpop.f32.mrf.mxu2  ;;  %v1950_v47 = vpop.permute.xlu1 %1949  ;;  %v6813_v14 = vmax.f32 %v6530_v4, %v1856_v16 }
 0x1d9   :  { %10547 = vst [vmem:[#allocation21_spill] sm:$0xff] %v6793_v41  ;;  %v6799_v53 = vrot.slane %v10258_v61, 1  ;;  %v2025_v41 = vsel %vm2017_vm10, %v1767_v2, %v1948_v57 }
 0x1da   :  { %v6801_v40 = vpop.f32.mrf.mxu0  ;;  %v6824_v5 = vmax.f32 %v6550_v31, %v2025_v41  ;;  %v10262_v57 = vrot.slane %v6813_v14, 4 }
 0x1db   :  { %10548 = vst [vmem:[#allocation22_spill] sm:$0xff] %v6799_v53  ;;  %v1549_v34 = vsel %vm141_vm0, %v6795_v9, %v6799_v53 }
 0x1dc   :  { %10549 = vst [vmem:[#allocation23_spill] sm:$0xff] %v6801_v40  ;;  %v6806_v33 = vmax.f32 %v1388_v54, %v1549_v34 }
 0x1de   :  { %v1771_v17 = vpop.permute.xlu0 %1770 }
 0x1df   :  { %v1857_v42 = vsel %vm1848_vm9, %v1769_v15, %v1771_v17  ;;  %v2026_v61 = vsel %vm2017_vm10, %v1771_v17, %v1950_v47 }
 0x1e0   :  { %v6816_v40 = vmax.f32 %v6561_v7, %v1857_v42  ;;  %v6818_v53 = vpop.f32.mrf.mxu2  ;;  %v6821_v54 = vmax.f32 %v6572_v44, %v2026_v61  ;;  %v10264_v7 = vrot.slane %v6824_v5, 4 }
 0x1e2   :  { %10550 = vst [vmem:[#allocation24_spill] sm:$0xff] %v6816_v40  ;;  %v6826_v2 = vpop.f32.mrf.mxu0  ;;  %v10263_v15 = vrot.slane %v6816_v40, 4  ;;  %v10265_v4 = vrot.slane %v6821_v54, 4 }
 0x1e3   :  { %10551 = vst [vmem:[#allocation25_spill] sm:$0xff] %v6821_v54 }
 0x1e4   :  { %10552 = vst [vmem:[#allocation26_spill] sm:$0xff] %v6826_v2  ;;  %v6837_v44 = vsel %vm318_vm3, %v10262_v57, %v10263_v15  ;;  %v6851_v47 = vsel %vm318_vm3, %v10264_v7, %v10265_v4  ;;  %v1954_v57 = vpop.permute.xlu2 %1953 }
 0x1e5   :  { %10553 = vst [vmem:[#allocation27_spill] sm:$0xff] %v6837_v44 }
 0x1e6   :  { %v1773_v34 = vpop.permute.xlu0 %1772  ;;  %v1775_v16 = vpop.permute.xlu1 %1774  ;;  %10554 = vst [vmem:[#allocation28_spill] sm:$0xff] %v6851_v47  ;;  %v10561_v47 = vrot.slane %v6821_v54, 6 }
 0x1e7   :  { %v1858_v31 = vsel %vm1848_vm9, %v1773_v34, %v1775_v16  ;;  %v2027_v42 = vsel %vm2017_vm10, %v1775_v16, %v1952_v27  ;;  %v10269_v16 = vrot.slane %v6816_v40, 6 }
 0x1e8   :  { %v6842_v61 = vmax.f32 %v6581_v6, %v1858_v31  ;;  %v6844_v41 = vpop.f32.mrf.mxu2  ;;  %v6854_v17 = vmax.f32 %v6588_v63, %v2027_v42 }
 0x1ea   :  { %10555 = vst [vmem:[#allocation29_spill] sm:$0xff] %v6854_v17  ;;  %v6858_v27 = vpop.f32.mrf.mxu0  ;;  %v10268_v6 = vrot.slane %v6842_v61, 6  ;;  %v2192_v31 = vrot.slane %v6842_v61, 2  ;;  %v10560_v7 = vrot.slane %v6854_v17, 6 }
 0x1eb   :  { %10556 = vst [vmem:[#allocation30_spill] sm:$0xff] %v6858_v27 }
 0x1ec   :  { %v6869_v63 = vsel %vm2390_vm11, %v10269_v16, %v10268_v6  ;;  %v6884_v27 = vsel %vm2390_vm11, %v10561_v47, %v10560_v7  ;;  %v10280_v47 = vrot.slane %v6842_v61, 4 }
 0x1ed   :  { %10557 = vst [vmem:[#allocation31_spill] sm:$0xff] %v6869_v63 }
 0x1ee   :  { %v1777_v15 = vpop.permute.xlu0 %1776  ;;  %v1779_v2 = vpop.permute.xlu1 %1778  ;;  %10562 = vst [vmem:[#allocation34_spill] sm:$0xff] %v6884_v27  ;;  %v10279_v27 = vrot.slane %v6854_v17, 4 }
 0x1ef   :  { %v1859_v42 = vsel %vm1848_vm9, %v1777_v15, %v1779_v2  ;;  %v2028_v34 = vsel %vm2017_vm10, %v1779_v2, %v1954_v57  ;;  %v1783_v15 = vpop.permute.xlu2 %1782  ;;  %v10276_v57 = vrot.slane %v6816_v40, 2 }
 0x1f0   :  { %v6874_v4 = vmax.f32 %v6597_v36, %v1859_v42  ;;  %v6876_v44 = vpop.f32.mrf.mxu2  ;;  %v6889_v2 = vmax.f32 %v6608_v8, %v2028_v34  ;;  %v956_v8 = vadd.f32 %v6374_v23, %v6474_v30 }
 0x1f1   :  { %10559 = vst [vmem:[#allocation33_spill] sm:$0xff] %v6876_v44  ;;  %v2193_v54 = vsel %vm200_vm2, %v10276_v57, %v2192_v31 }
 0x1f2   :  { %10558 = vst [vmem:[#allocation32_spill] sm:$0xff] %v6874_v4  ;;  %v1056_v36 = vpop.f32.mrf.mxu0  ;;  %v10277_v42 = vrot.slane %v6874_v4, 2  ;;  %v10278_v16 = vrot.slane %v6889_v2, 4  ;;  %v10564_v40 = vrot.slane %v6874_v4, 4 }
 0x1f3   :  { %10563 = vst [vmem:[#allocation35_spill] sm:$0xff] %v6889_v2 }
 0x1f4   :  { %v2197_v7 = vsel %vm200_vm2, %v2192_v31, %v10277_v42  ;;  %v6910_v57 = vsel %vm318_vm3, %v10280_v47, %v10564_v40  ;;  %v1057_v31 = vadd.f32 %v1056_v36, %v956_v8  ;;  %v6926_v40 = vsel %vm318_vm3, %v10279_v27, %v10278_v16 }
 0x1f5   :  { %v5046_v34 = vpack.i.bf16 %v2197_v7, %v2193_v54  ;;  %10565 = vst [vmem:[#allocation36_spill] sm:$0xff] %v6910_v57  ;;  %v10286_v8 = vrot.slane %v6889_v2, 6  ;;  %v1161_v47 = vadd.f32 %v6391_v46, %v6491_v55  ;;  %v962_v16 = vadd.f32 %v6396_v50, %v6474_v30 }
 0x1f6   :  { %v1956_v6 = vpop.permute.xlu0 %1955  ;;  %v1781_v63 = vpop.permute.xlu1 %1780  ;;  %10568 = vst [vmem:[#allocation39_spill] sm:$0xff] %v6926_v40 }
 0x1f7   :  { %v2029_v42 = vsel %vm2017_vm10, %v1783_v15, %v1956_v6  ;;  %v1860_v44 = vsel %vm1848_vm9, %v1781_v63, %v1783_v15  ;;  %5047 = vrot.lane.b32.xlu2 %v5046_v34, %s5592_s30  ;;  %v959_v6 = vadd.f32 %v6385_v49, %v6474_v30  ;;  %v1158_v15 = vadd.f32 %v6380_v58, %v6491_v55 }
 0x1f8   :  { %v6916_v23 = vmax.f32 %v6624_v29, %v2029_v42  ;;  %v6919_v54 = vmax.f32 %v6622_v52, %v1860_v44  ;;  %v1258_v7 = vpop.f32.mrf.mxu2  ;;  %v1342_v29 = vmax.f32 %v1057_v31, 0.0  ;;  %v1787_v44 = vpop.permute.xlu2 %1786  ;;  %v10282_v42 = vrot.slane %v6874_v4, 6 }
 0x1f9   :  { %v1259_v27 = vadd.f32 %v1258_v7, %v1158_v15 }
 0x1fa   :  { %10566 = vst [vmem:[#allocation37_spill] sm:$0xff] %v6916_v23  ;;  %v1059_v63 = vpop.f32.mrf.mxu0  ;;  %v10281_v52 = vrot.slane %v6919_v54, 6  ;;  %v10285_v34 = vrot.slane %v6916_v23, 6  ;;  %v6954_v7 = vrot.slane %v1342_v29, 1 }
 0x1fb   :  { %10567 = vst [vmem:[#allocation38_spill] sm:$0xff] %v6919_v54  ;;  %v1060_v36 = vadd.f32 %v1059_v63, %v959_v6  ;;  %v1343_v40 = vmax.f32 %v1259_v27, 0.0  ;;  %v10294_v27 = vrot.slane %v6919_v54, 4 }
 0x1fc   :  { %v6945_v6 = vsel %vm2390_vm11, %v10282_v42, %v10281_v52  ;;  %v6952_v63 = vsel %vm2390_vm11, %v10286_v8, %v10285_v34  ;;  %10571 = vst [vmem:[#allocation42_spill] sm:$0xff] %v6954_v7 }
 0x1fd   :  { %v1344_v49 = vmax.f32 %v1060_v36, 0.0  ;;  %10569 = vst [vmem:[#allocation40_spill] sm:$0xff] %v6945_v6 }
 0x1fe   :  { %v1958_v58 = vpop.permute.xlu0 %1957  ;;  %v1785_v31 = vpop.permute.xlu1 %1784  ;;  %10570 = vst [vmem:[#allocation41_spill] sm:$0xff] %v6952_v63 }
 0x1ff   :  { %v1455_v15 = vrot.slane %v1344_v49, 1  ;;  %v2030_v46 = vsel %vm2017_vm10, %v1787_v44, %v1958_v58  ;;  %v1861_v36 = vsel %vm1848_vm9, %v1785_v31, %v1787_v44 }
 0x200   :  { %v6961_v52 = vmax.f32 %v6642_v20, %v2030_v46  ;;  %v6964_v42 = vmax.f32 %v6640_v37, %v1861_v36  ;;  %v1261_v57 = vpop.f32.mrf.mxu2 }
 0x201   :  { %v1262_v34 = vadd.f32 %v1261_v57, %v1161_v47  ;;  %v1456_v8 = vsel %vm141_vm0, %v6954_v7, %v1455_v15  ;;  %v10298_v57 = vrot.slane %v6916_v23, 4  ;;  %v6981_v47 = vrot.slane %v1343_v40, 1 }
 0x202   :  { %10572 = vst [vmem:[#allocation43_spill] sm:$0xff] %v6961_v52  ;;  %v1062_v2 = vpop.f32.mrf.mxu0  ;;  %v6970_v44 = vmax.f32 %v1342_v29, %v1456_v8  ;;  %v10293_v46 = vrot.slane %v6964_v42, 4  ;;  %v10297_v37 = vrot.slane %v6961_v52, 4  ;;  %v10577_v63 = vrot.slane %v6964_v42, 2 }
 0x203   :  { %v1345_v31 = vmax.f32 %v1262_v34, 0.0  ;;  %v1063_v20 = vadd.f32 %v1062_v2, %v962_v16  ;;  %10573 = vst [vmem:[#allocation44_spill] sm:$0xff] %v6981_v47  ;;  %v2200_v16 = vrot.slane %v6919_v54, 2  ;;  %v1789_v2 = vpop.permute.xlu2 %1788 }
 0x204   :  { %1933 = vrot.lane.b32.xlu0 %v6970_v44, %s5598_s2  ;;  %1736 = vrot.lane.b32.xlu1 %v6970_v44, %s5599_s21  ;;  %v6991_v36 = vsel %vm318_vm3, %v10294_v27, %v10293_v46  ;;  %v6998_v58 = vsel %vm318_vm3, %v10298_v57, %v10297_v37  ;;  %v1164_v46 = vadd.f32 %v6404_v35, %v6491_v55  ;;  %v10306_v37 = vrot.slane %v6964_v42, 6 }
 0x205   :  { %v1458_v29 = vrot.slane %v1345_v31, 1  ;;  %v1346_v8 = vmax.f32 %v1063_v20, 0.0  ;;  %10575 = vst [vmem:[#allocation46_spill] sm:$0xff] %v6991_v36  ;;  %v2205_v17 = vsel %vm200_vm2, %v2200_v16, %v10577_v63 }
 0x206   :  { %v6984_v34 = vpop.permute.xlu0 %1790  ;;  %10576 = vst [vmem:[#allocation47_spill] sm:$0xff] %v6998_v58 }
 0x207   :  { %10574 = vst [vmem:[#allocation45_spill] sm:$0xff] %v6984_v34  ;;  %v1460_v20 = vrot.slane %v1346_v8, 1  ;;  %v1862_v50 = vsel %vm1848_vm9, %v1789_v2, %v6984_v34  ;;  %v1459_v6 = vsel %vm141_vm0, %v6981_v47, %v1458_v29  ;;  %v965_v2 = vadd.f32 %v6409_v0, %v6474_v30 }
 0x208   :  { %v7010_v27 = vmax.f32 %v6661_v13, %v1862_v50  ;;  %v7012_v52 = vmax.f32 %v1343_v40, %v1459_v6  ;;  %v10579_v34 = vrot.slane %v6874_v4, 2 }
 0x209   :  { %v1264_v57 = vpop.f32.mrf.mxu2  ;;  %v1461_v63 = vsel %vm141_vm0, %v1455_v15, %v1460_v20 }
 0x20a   :  { %10578 = vst [vmem:[#allocation48_spill] sm:$0xff] %v7010_v27  ;;  %v2201_v23 = vsel %vm200_vm2, %v10579_v34, %v2200_v16  ;;  %v1265_v54 = vadd.f32 %v1264_v57, %v1164_v46  ;;  %v1065_v35 = vpop.f32.mrf.mxu0  ;;  %1738 = vrot.lane.b32.xlu2 %v7012_v52, %s5599_s21  ;;  %v7024_v6 = vmax.f32 %v1344_v49, %v1461_v63  ;;  %v10305_v0 = vrot.slane %v7010_v27, 6 }
 0x20b   :  { %v5051_v40 = vpack.i.bf16 %v2205_v17, %v2201_v23  ;;  %v1066_v50 = vadd.f32 %v1065_v35, %v965_v2  ;;  %v968_v16 = vadd.f32 %v6420_v56, %v6474_v30 }
 0x20c   :  { %v1347_v36 = vmax.f32 %v1265_v54, 0.0  ;;  %1935 = vrot.lane.b32.xlu1 %v7024_v6, %s5598_s2  ;;  %v7036_v17 = vsel %vm2390_vm11, %v10306_v37, %v10305_v0  ;;  %v1167_v54 = vadd.f32 %v6415_v60, %v6491_v55  ;;  %v1793_v0 = vpop.permute.xlu2 %1792 }
 0x20d   :  { %5052 = vrot.lane.b32.xlu0 %v5051_v40, %s5592_s30  ;;  %v1348_v15 = vmax.f32 %v1066_v50, 0.0  ;;  %10580 = vst [vmem:[#allocation49_spill] sm:$0xff] %v7036_v17 }
 0x20e   :  { %v1462_v23 = vrot.slane %v1347_v36, 1  ;;  %v7038_v49 = vpop.permute.xlu0 %1794 }
 0x20f   :  { %10581 = vst [vmem:[#allocation50_spill] sm:$0xff] %v7038_v49  ;;  %v1464_v46 = vrot.slane %v1348_v15, 1  ;;  %v1863_v17 = vsel %vm1848_vm9, %v1793_v0, %v7038_v49 }
 0x210   :  { %v1463_v57 = vsel %vm141_vm0, %v1458_v29, %v1462_v23 }
 0x211   :  { %v1267_v34 = vpop.f32.mrf.mxu2  ;;  %v1465_v2 = vsel %vm141_vm0, %v1460_v20, %v1464_v46  ;;  %v7046_v63 = vmax.f32 %v1345_v31, %v1463_v57  ;;  %v7061_v20 = vmax.f32 %v6677_v22, %v1863_v17  ;;  %v1170_v57 = vadd.f32 %v6429_v45, %v6491_v55 }
 0x212   :  { %v1268_v35 = vadd.f32 %v1267_v34, %v1167_v54  ;;  %v1068_v40 = vpop.f32.mrf.mxu0  ;;  %v7048_v50 = vmax.f32 %v1346_v8, %v1465_v2  ;;  %v971_v34 = vadd.f32 %v6434_v24, %v6474_v30 }
 0x213   :  { %v1069_v37 = vadd.f32 %v1068_v40, %v968_v16  ;;  %v10311_v45 = vrot.slane %v7061_v20, 6  ;;  %v10318_v24 = vrot.slane %v7061_v20, 2 }
 0x214   :  { %v1349_v60 = vmax.f32 %v1268_v35, 0.0  ;;  %1744 = vrot.lane.b32.xlu2 %v7048_v50, %s5599_s21  ;;  %1742 = vrot.lane.b32.xlu1 %v7046_v63, %s5599_s21 }
 0x215   :  { %1740 = vrot.lane.b32.xlu0 %v7024_v6, %s5599_s21  ;;  %v1350_v56 = vmax.f32 %v1069_v37, 0.0 }
 0x216   :  { %v1466_v31 = vrot.slane %v1349_v60, 1  ;;  %v1797_v29 = vpop.permute.xlu0 %1796  ;;  %v7058_v8 = vpop.permute.xlu1 %1798 }
 0x217   :  { %10582 = vst [vmem:[#allocation51_spill] sm:$0xff] %v7058_v8  ;;  %v1468_v54 = vrot.slane %v1350_v56, 1  ;;  %v1864_v0 = vsel %vm1848_vm9, %v1797_v29, %v7058_v8 }
 0x218   :  { %v7068_v16 = vmax.f32 %v6690_v3, %v1864_v0  ;;  %v1467_v37 = vsel %vm141_vm0, %v1462_v23, %v1466_v31 }
 0x219   :  { %v1270_v2 = vpop.f32.mrf.mxu2  ;;  %v1469_v35 = vsel %vm141_vm0, %v1464_v46, %v1468_v54  ;;  %v7074_v17 = vmax.f32 %v1347_v36, %v1467_v37 }
 0x21a   :  { %10583 = vst [vmem:[#allocation52_spill] sm:$0xff] %v7068_v16  ;;  %v1271_v40 = vadd.f32 %v1270_v2, %v1170_v57  ;;  %v1071_v58 = vpop.f32.mrf.mxu0  ;;  %v7076_v49 = vmax.f32 %v1348_v15, %v1469_v35  ;;  %v10310_v0 = vrot.slane %v7068_v16, 6  ;;  %v2208_v57 = vrot.slane %v7010_v27, 2 }
 0x21b   :  { %v1072_v29 = vadd.f32 %v1071_v58, %v971_v34  ;;  %v1173_v2 = vadd.f32 %v6447_v26, %v6491_v55 }
 0x21c   :  { %v1351_v8 = vmax.f32 %v1271_v40, 0.0  ;;  %1939 = vrot.lane.b32.xlu2 %v7076_v49, %s5598_s2  ;;  %1937 = vrot.lane.b32.xlu1 %v7048_v50, %s5598_s2  ;;  %v7092_v58 = vsel %vm2390_vm11, %v10311_v45, %v10310_v0  ;;  %v974_v0 = vadd.f32 %v6452_v38, %v6474_v30 }
 0x21d   :  { %1746 = vrot.lane.b32.xlu0 %v7074_v17, %s5599_s21  ;;  %v1352_v36 = vmax.f32 %v1072_v29, 0.0  ;;  %10584 = vst [vmem:[#allocation53_spill] sm:$0xff] %v7092_v58  ;;  %v2213_v29 = vsel %vm200_vm2, %v2208_v57, %v10318_v24  ;;  %v10325_v24 = vrot.slane %v7068_v16, 4 }
 0x21e   :  { %v1470_v15 = vrot.slane %v1351_v8, 1  ;;  %v1801_v23 = vpop.permute.xlu0 %1800  ;;  %v7094_v46 = vpop.permute.xlu1 %1802 }
 0x21f   :  { %10585 = vst [vmem:[#allocation54_spill] sm:$0xff] %v7094_v46  ;;  %v1472_v37 = vrot.slane %v1352_v36, 1  ;;  %v1865_v34 = vsel %vm1848_vm9, %v1801_v23, %v7094_v46 }
 0x220   :  { %v7102_v35 = vmax.f32 %v6706_v32, %v1865_v34  ;;  %v1471_v40 = vsel %vm141_vm0, %v1466_v31, %v1470_v15  ;;  %v10587_v34 = vrot.slane %v6964_v42, 2 }
 0x221   :  { %v1273_v45 = vpop.f32.mrf.mxu2  ;;  %v7110_v58 = vmax.f32 %v1349_v60, %v1471_v40  ;;  %v1473_v23 = vsel %vm141_vm0, %v1468_v54, %v1472_v37 }
 0x222   :  { %10586 = vst [vmem:[#allocation55_spill] sm:$0xff] %v7102_v35  ;;  %v1274_v46 = vadd.f32 %v1273_v45, %v1173_v2  ;;  %v1074_v27 = vpop.f32.mrf.mxu0  ;;  %v7113_v26 = vmax.f32 %v1350_v56, %v1473_v23  ;;  %v2209_v31 = vsel %vm200_vm2, %v10587_v34, %v2208_v57  ;;  %v10321_v4 = vrot.slane %v7102_v35, 4  ;;  %v7132_v56 = vpop.permute.xlu2 %1806 }
 0x223   :  { %v1075_v47 = vadd.f32 %v1074_v27, %v974_v0  ;;  %v5056_v7 = vpack.i.bf16 %v2213_v29, %v2209_v31  ;;  %v10324_v31 = vrot.slane %v7102_v35, 6 }
 0x224   :  { %v1353_v38 = vmax.f32 %v1274_v46, 0.0  ;;  %1750 = vrot.lane.b32.xlu2 %v7110_v58, %s5599_s21  ;;  %v7130_v27 = vsel %vm318_vm3, %v10325_v24, %v10321_v4 }
 0x225   :  { %1752 = vrot.lane.b32.xlu0 %v7113_v26, %s5599_s21  ;;  %v1354_v60 = vmax.f32 %v1075_v47, 0.0  ;;  %5057 = vrot.lane.b32.xlu1 %v5056_v7, %s5592_s30  ;;  %10588 = vst [vmem:[#allocation56_spill] sm:$0xff] %v7130_v27  ;;  %v1176_v47 = vadd.f32 %v6468_v39, %v6491_v55 }
 0x226   :  { %v1474_v54 = vrot.slane %v1353_v38, 1  ;;  %v1805_v45 = vpop.permute.xlu1 %1804 }
 0x227   :  { %v1476_v0 = vrot.slane %v1354_v60, 1  ;;  %v1866_v46 = vsel %vm1848_vm9, %v1805_v45, %v7132_v56 }
 0x228   :  { %v7139_v7 = vmax.f32 %v6718_v59, %v1866_v46  ;;  %v1475_v57 = vsel %vm141_vm0, %v1470_v15, %v1474_v54 }
 0x229   :  { %v1276_v2 = vpop.f32.mrf.mxu2  ;;  %v1477_v40 = vsel %vm141_vm0, %v1472_v37, %v1476_v0  ;;  %v7143_v29 = vmax.f32 %v1351_v8, %v1475_v57  ;;  %v1022_v57 = vadd.f32 %v6758_v1, %v6474_v30  ;;  %v2216_v1 = vrot.slane %v7068_v16, 2 }
 0x22a   :  { %10589 = vst [vmem:[#allocation57_spill] sm:$0xff] %v7139_v7  ;;  %v1277_v23 = vadd.f32 %v1276_v2, %v1176_v47  ;;  %v7145_v34 = vmax.f32 %v1352_v36, %v1477_v40  ;;  %v10322_v45 = vrot.slane %v7139_v7, 6  ;;  %v1481_v36 = vsel %vm141_vm0, %v1476_v0, %v6514_v43  ;;  %v3400_v47 = vld [vmem:[#allocation4 + $0x78] sm:$0xff]  ;;  %v3395_v40 = vld [vmem:[#allocation4 + $0x50] sm:$0xff] }
 0x22b   :  { %v7167_v46 = vmax.f32 %v1354_v60, %v1481_v36  ;;  %3536 = vmatpush.msrb.mxu1 %v3400_v47  ;;  %v3398_v60 = vld [vmem:[#allocation4 + $0x68] sm:$0xff]  ;;  %v2220_v2 = vrot.slane %v7102_v35, 2  ;;  %v3392_v47 = vld [vmem:[#allocation4 + $0x38] sm:$0xff] }
 0x22c   :  { %v1355_v4 = vmax.f32 %v1277_v23, 0.0  ;;  %1941 = vrot.lane.b32.xlu2 %v7113_v26, %s5598_s2  ;;  %v7160_v39 = vsel %vm2390_vm11, %v10324_v31, %v10322_v45  ;;  %v3394_v23 = vld [vmem:[#allocation4 + $0x48] sm:$0xff] }
 0x22d   :  { %1943 = vrot.lane.b32.xlu0 %v7145_v34, %s5598_s2  ;;  %1748 = vrot.lane.b32.xlu1 %v7076_v49, %s5599_s21  ;;  %10590 = vst [vmem:[#allocation58_spill] sm:$0xff] %v7160_v39 }
 0x22e   :  { %v1478_v8 = vrot.slane %v1355_v4, 1 }
 0x230   :  { %v1479_v15 = vsel %vm141_vm0, %v1474_v54, %v1478_v8  ;;  %v1483_v43 = vsel %vm141_vm0, %v1478_v8, %v6542_v21  ;;  %v3397_v54 = vld [vmem:[#allocation4 + $0x60] sm:$0xff]  ;;  %v3396_v21 = vld [vmem:[#allocation4 + $0x58] sm:$0xff] }
 0x231   :  { %v7165_v37 = vmax.f32 %v1353_v38, %v1479_v15  ;;  %v7177_v0 = vmax.f32 %v1355_v4, %v1483_v43  ;;  %v3399_v38 = vld [vmem:[#allocation4 + $0x70] sm:$0xff]  ;;  %v1123_v4 = vadd.f32 %v6750_v10, %v1022_v57  ;;  %v3393_v8 = vld [vmem:[#allocation4 + $0x40] sm:$0xff]  ;;  %v2221_v10 = vsel %vm200_vm2, %v2216_v1, %v2220_v2 }
 0x232   :  { %3537 = vmatpush.msrb.mxu1 %v3399_v38  ;;  %v1539_v15 = vsel %vm141_vm0, %v6746_v28, %v6776_v62  ;;  %v10591_v43 = vrot.slane %v7061_v20, 2  ;;  %v3391_v57 = vld [vmem:[#allocation4 + $0x30] sm:$0xff]  ;;  %v3390_v62 = vld [vmem:[#allocation4 + $0x28] sm:$0xff]  ;;  %v3389_v28 = vld [vmem:[#allocation4 + $0x20] sm:$0xff] }
 0x233   :  { %v1386_v36 = vmax.f32 %v1123_v4, 0.0 }
 0x234   :  { %1756 = vrot.lane.b32.xlu2 %v7145_v34, %s5599_s21  ;;  %3538 = vmatpush.msrb.mxu1 %v3398_v60  ;;  %v2217_v38 = vsel %vm200_vm2, %v10591_v43, %v2216_v1  ;;  %v3385_v43 = vld [vmem:[#allocation4] sm:$0xff] }
 0x235   :  { %1945 = vrot.lane.b32.xlu0 %v7167_v46, %s5598_s2  ;;  %1754 = vrot.lane.b32.xlu1 %v7143_v29, %s5599_s21  ;;  %v5066_v60 = vpack.i.bf16 %v2221_v10, %v2217_v38  ;;  %v7216_v10 = vpop.permute.xlu2 %1810 }
 0x236   :  { %3539 = vmatpush.msrb.mxu1 %v3397_v54 }
 0x238   :  { %3540 = vmatpush.msrb.mxu1 %v3396_v21  ;;  %v1540_v21 = vrot.slane %v1386_v36, 1 }
 0x23a   :  { %3541 = vmatpush.msrb.mxu1 %v3395_v40  ;;  %v1541_v4 = vsel %vm141_vm0, %v6754_v12, %v1540_v21  ;;  %v3388_v40 = vld [vmem:[#allocation4 + $0x18] sm:$0xff] }
 0x23c   :  { %1762 = vrot.lane.b32.xlu2 %v7177_v0, %s5599_s21  ;;  %3542 = vmatpush.msrb.mxu1 %v3394_v23  ;;  %v1809_v23 = vpop.permute.xlu1 %1808 }
 0x23d   :  { %1758 = vrot.lane.b32.xlu0 %v7165_v37, %s5599_s21  ;;  %1760 = vrot.lane.b32.xlu1 %v7167_v46, %s5599_s21 }
 0x23e   :  { %3543 = vmatpush.msrb.mxu1 %v3393_v8  ;;  %v3387_v8 = vld [vmem:[#allocation4 + $0x10] sm:$0xff] }
 0x240   :  { %3544 = vmatpush.msrb.mxu1 %v3392_v47  ;;  %v1545_v47 = vsel %vm141_vm0, %v1540_v21, %v6795_v9 }
 0x241   :  { %v7227_v38 = vmax.f32 %v1386_v36, %v1545_v47 }
 0x242   :  { %3545 = vmatpush.msrb.mxu1 %v3391_v57  ;;  %v7233_v57 = vpop.permute.xlu2 %1812 }
 0x244   :  { %1816 = vrot.lane.b32.xlu2 %v6769_v19, %s5599_s21  ;;  %3546 = vmatpush.msrb.mxu1 %v3390_v62 }
 0x245   :  { %1814 = vrot.lane.b32.xlu0 %v6762_v11, %s5599_s21  ;;  %1959 = vrot.lane.b32.xlu1 %v6661_v13, %s5598_s2  ;;  %v10592_v13 = vmax.f32 %v6734_v51, 0.0  ;;  %v10594_v51 = vmax.f32 %v6742_v18, 0.0  ;;  %v3386_v18 = vld [vmem:[#allocation4 + $0x8] sm:$0xff] }
 0x246   :  { %3547 = vmatpush.msrb.mxu1 %v3389_v28 }
 0x247   :  { %v7205_v54 = vmax.f32 %v10592_v13, %v1539_v15  ;;  %v7214_v1 = vmax.f32 %v10594_v51, %v1541_v4  ;;  %v1867_v15 = vsel %vm1848_vm9, %v1809_v23, %v7216_v10  ;;  %v2224_v13 = vrot.slane %v7139_v7, 2 }
 0x248   :  { %3548 = vmatpush.msrb.mxu1 %v3388_v40  ;;  %v7223_v12 = vmax.f32 %v6730_v25, %v1867_v15 }
 0x249   :  { %10593 = vst [vmem:[#allocation59_spill] sm:$0xff] %v7205_v54  ;;  %v2225_v9 = vsel %vm200_vm2, %v2220_v2, %v2224_v13 }
 0x24a   :  { %3549 = vmatpush.msrb.mxu1 %v3387_v8  ;;  %10595 = vst [vmem:[#allocation60_spill] sm:$0xff] %v7223_v12 }
 0x24c   :  { %5067 = vrot.lane.b32.xlu2 %v5066_v60, %s5592_s30  ;;  %3550 = vmatpush.msrb.mxu1 %v3386_v18  ;;  %v10330_v60 = vrot.slane %v7223_v12, 2 }
 0x24d   :  { %1818 = vrot.lane.b32.xlu0 %v7205_v54, %s5599_s21  ;;  %v10613_v54 = vld [vmem:[#allocation21_spill] sm:$0xff] }
 0x24e   :  { %3551 = vmatpush.msrb.mxu1 %v3385_v43  ;;  %v2229_v62 = vsel %vm200_vm2, %v2224_v13, %v10330_v60  ;;  %v1230_v11 = vadd.f32 %v10613_v54, %v6491_v55 }
 0x24f   :  { %v5076_v21 = vpack.i.bf16 %v2229_v62, %v2225_v9 }
 0x251   :  { %v7240_v36 = vpop.permute.xlu2 %5047 }
 0x252   :  { %10596 = vst [vmem:[#allocation61_spill] sm:$0xff] %v7240_v36 }
 0x255   :  { %1820 = vrot.lane.b32.xlu0 %v7214_v1, %s5599_s21 }
 0x25d   :  { %1824 = vrot.lane.b32.xlu0 %v7227_v38, %s5599_s21 }
 0x264   :  { %v1739_v28 = vpop.permute.xlu2 %1738 }
 0x265   :  { %5077 = vrot.lane.b32.xlu0 %v5076_v21, %s5592_s30 }
 0x26e   :  { %v1745_v40 = vpop.permute.xlu2 %1744 }
 0x276   :  { %v1934_v4 = vpop.permute.xlu0 %1933  ;;  %v1737_v23 = vpop.permute.xlu1 %1736 }
 0x277   :  { %v1849_v51 = vsel %vm1848_vm9, %v1737_v23, %v1739_v28  ;;  %v1940_v2 = vpop.permute.xlu2 %1939  ;;  %v2018_v18 = vsel %vm2017_vm10, %v1739_v28, %v1934_v4 }
 0x278   :  { %v7244_v8 = vmax.f32 %v6970_v44, %v1849_v51  ;;  %v7251_v62 = vmax.f32 %v7012_v52, %v2018_v18 }
 0x27a   :  { %10597 = vst [vmem:[#allocation62_spill] sm:$0xff] %v7244_v8  ;;  %3552 = vmatmul.f32.vlgmr.msrb.gmra.mxu1 %v7244_v8  ;;  %v10323_v4 = vrot.slane %v7244_v8, 6  ;;  %v10326_v18 = vrot.slane %v7251_v62, 6 }
 0x27b   :  { %10599 = vst [vmem:[#allocation64_spill] sm:$0xff] %v7251_v62 }
 0x27e   :  { %v1936_v47 = vpop.permute.xlu1 %1935 }
 0x27f   :  { %v7247_v15 = vpop.permute.xlu0 %5052  ;;  %v1751_v51 = vpop.permute.xlu2 %1750 }
 0x280   :  { %10598 = vst [vmem:[#allocation63_spill] sm:$0xff] %v7247_v15 }
 0x286   :  { %v1743_v13 = vpop.permute.xlu1 %1742 }
 0x287   :  { %v1741_v43 = vpop.permute.xlu0 %1740  ;;  %v2019_v21 = vsel %vm2017_vm10, %v1743_v13, %v1936_v47 }
 0x288   :  { %v1850_v9 = vsel %vm1848_vm9, %v1741_v43, %v1743_v13  ;;  %v7259_v23 = vmax.f32 %v7046_v63, %v2019_v21  ;;  %v2021_v63 = vsel %vm2017_vm10, %v1751_v51, %v1940_v2 }
 0x289   :  { %v7256_v44 = vmax.f32 %v7024_v6, %v1850_v9  ;;  %v7290_v31 = vmax.f32 %v7110_v58, %v2021_v63 }
 0x28a   :  { %v10327_v52 = vrot.slane %v7259_v23, 6 }
 0x28b   :  { %3555 = vmatmul.f32.gmra.mxu1 %v7256_v44  ;;  %v10328_v28 = vrot.slane %v7256_v44, 6  ;;  %v2159_v2 = vrot.slane %v7256_v44, 2 }
 0x28c   :  { %v7279_v43 = vsel %vm2390_vm11, %v10326_v18, %v10327_v52  ;;  %v10329_v18 = vrot.slane %v7244_v8, 2  ;;  %v10334_v52 = vrot.slane %v7256_v44, 4 }
 0x28d   :  { %v7271_v6 = vsel %vm2390_vm11, %v10323_v4, %v10328_v28  ;;  %10601 = vst [vmem:[#allocation66_spill] sm:$0xff] %v7279_v43 }
 0x28e   :  { %10600 = vst [vmem:[#allocation65_spill] sm:$0xff] %v7271_v6  ;;  %v1938_v9 = vpop.permute.xlu1 %1937  ;;  %v2160_v58 = vsel %vm200_vm2, %v10329_v18, %v2159_v2 }
 0x28f   :  { %v1747_v47 = vpop.permute.xlu0 %1746 }
 0x290   :  { %v1851_v13 = vsel %vm1848_vm9, %v1745_v40, %v1747_v47  ;;  %v2020_v4 = vsel %vm2017_vm10, %v1747_v47, %v1938_v9  ;;  %v10336_v9 = vrot.slane %v7290_v31, 6 }
 0x291   :  { %v7285_v45 = vmax.f32 %v7048_v50, %v1851_v13  ;;  %v7293_v24 = vmax.f32 %v7074_v17, %v2020_v4  ;;  %v10333_v4 = vrot.slane %v7259_v23, 4 }
 0x293   :  { %v2164_v40 = vrot.slane %v7285_v45, 2  ;;  %v10331_v21 = vrot.slane %v7285_v45, 4  ;;  %3558 = vmatmul.f32.gmra.mxu1 %v7285_v45  ;;  %v10337_v50 = vrot.slane %v7293_v24, 6  ;;  %v10332_v47 = vrot.slane %v7293_v24, 4 }
 0x295   :  { %v2165_v17 = vsel %vm200_vm2, %v2159_v2, %v2164_v40  ;;  %v7312_v63 = vsel %vm318_vm3, %v10334_v52, %v10331_v21  ;;  %v7320_v18 = vsel %vm318_vm3, %v10333_v4, %v10332_v47  ;;  %v1942_v21 = vpop.permute.xlu2 %1941  ;;  %v1327_v47 = vpop.f32.mrf.mxu3 }
 0x296   :  { %10602 = vst [vmem:[#allocation67_spill] sm:$0xff] %v7312_v63  ;;  %v5061_v13 = vpack.i.bf16 %v2165_v17, %v2160_v58  ;;  %v7332_v58 = vsel %vm2390_vm11, %v10337_v50, %v10336_v9  ;;  %v1227_v17 = vadd.f32 %v6782_v48, %v6491_v55  ;;  %v10342_v48 = vrot.slane %v7285_v45, 6 }
 0x297   :  { %v1753_v28 = vpop.permute.xlu0 %1752  ;;  %10603 = vst [vmem:[#allocation68_spill] sm:$0xff] %v7320_v18  ;;  %v7322_v2 = vpop.permute.xlu1 %5057 }
 0x298   :  { %10604 = vst [vmem:[#allocation69_spill] sm:$0xff] %v7322_v2  ;;  %5062 = vrot.lane.b32.xlu1 %v5061_v13, %s5592_s30  ;;  %v7336_v4 = vadd.f32 %v1327_v47, %v1227_v17  ;;  %v10607_v17 = vld [vmem:[#allocation23_spill] sm:$0xff] }
 0x299   :  { %10605 = vst [vmem:[#allocation70_spill] sm:$0xff] %v7332_v58  ;;  %v10608_v2 = vld [vmem:[#allocation19_spill] sm:$0xff] }
 0x29a   :  { %v10343_v9 = vmax.f32 %v7336_v4, 0.0 }
 0x29d   :  { %v1757_v47 = vpop.permute.xlu2 %1756 }
 0x29f   :  { %v1944_v52 = vpop.permute.xlu0 %1943  ;;  %v1749_v6 = vpop.permute.xlu1 %1748 }
 0x2a0   :  { %1961 = vrot.lane.b32.xlu1 %v6677_v22, %s5598_s2  ;;  %v1852_v13 = vsel %vm1848_vm9, %v1749_v6, %v1751_v51  ;;  %v1330_v6 = vpop.f32.mrf.mxu3 }
 0x2a1   :  { %v7342_v60 = vmax.f32 %v7076_v49, %v1852_v13  ;;  %v7357_v49 = vrot.slane %v10343_v9, 1  ;;  %v1031_v13 = vadd.f32 %v10607_v17, %v6474_v30  ;;  %v10609_v17 = vld [vmem:[#allocation18_spill] sm:$0xff] }
 0x2a3   :  { %3561 = vmatmul.f32.gmra.mxu1 %v7342_v60  ;;  %v10341_v50 = vrot.slane %v7342_v60, 6  ;;  %v2168_v18 = vrot.slane %v7342_v60, 2  ;;  %v1547_v58 = vsel %vm141_vm0, %v10609_v17, %v7357_v49 }
 0x2a5   :  { %v7353_v22 = vsel %vm2390_vm11, %v10342_v48, %v10341_v50  ;;  %v2169_v17 = vsel %vm200_vm2, %v2164_v40, %v2168_v18 }
 0x2a6   :  { %10606 = vst [vmem:[#allocation71_spill] sm:$0xff] %v7353_v22  ;;  %v1131_v22 = vpop.f32.mrf.mxu1 }
 0x2a7   :  { %v1946_v51 = vpop.permute.xlu0 %1945  ;;  %v1755_v43 = vpop.permute.xlu1 %1754  ;;  %v7377_v15 = vadd.f32 %v1131_v22, %v1031_v13  ;;  %v10353_v13 = vrot.slane %v7290_v31, 4 }
 0x2a8   :  { %1822 = vrot.lane.b32.xlu1 %v10608_v2, %s5599_s21  ;;  %v1853_v63 = vsel %vm1848_vm9, %v1753_v28, %v1755_v43  ;;  %v2022_v50 = vsel %vm2017_vm10, %v1755_v43, %v1942_v21  ;;  %v3416_v43 = vld [vmem:[#allocation4 + $0xf8] sm:$0xff] }
 0x2a9   :  { %v7368_v48 = vmax.f32 %v7113_v26, %v1853_v63  ;;  %v7371_v9 = vmax.f32 %v7143_v29, %v2022_v50  ;;  %3637 = vmatpush.msrb.mxu3 %v3416_v43  ;;  %v10352_v26 = vrot.slane %v7342_v60, 4  ;;  %v10610_v50 = vld [vmem:[#allocation17_spill] sm:$0xff] }
 0x2aa   :  { %v10611_v63 = vmax.f32 %v10610_v50, 0.0  ;;  %v1763_v50 = vpop.permute.xlu2 %1762 }
 0x2ab   :  { %3564 = vmatmul.f32.gmra.mxu1 %v7368_v48  ;;  %v2172_v28 = vrot.slane %v7368_v48, 2  ;;  %v10351_v29 = vrot.slane %v7368_v48, 4  ;;  %v10615_v54 = vrot.slane %v7371_v9, 4 }
 0x2ac   :  { %v7386_v2 = vmax.f32 %v10611_v63, %v1547_v58  ;;  %v10354_v58 = vmax.f32 %v7377_v15, 0.0 }
 0x2ad   :  { %v2173_v22 = vsel %vm200_vm2, %v2168_v18, %v2172_v28  ;;  %v7398_v21 = vsel %vm318_vm3, %v10352_v26, %v10351_v29 }
 0x2ae   :  { %10612 = vst [vmem:[#allocation23_spill] sm:$0xff] %v7386_v2  ;;  %v5071_v36 = vpack.i.bf16 %v2173_v22, %v2169_v17  ;;  %v7410_v17 = vsel %vm318_vm3, %v10353_v13, %v10615_v54  ;;  %v2024_v22 = vsel %vm2017_vm10, %v1763_v50, %v1946_v51  ;;  %v10618_v13 = vld [vmem:[#allocation22_spill] sm:$0xff] }
 0x2af   :  { %v1759_v43 = vpop.permute.xlu0 %1758  ;;  %10614 = vst [vmem:[#allocation18_spill] sm:$0xff] %v7398_v21  ;;  %v1761_v63 = vpop.permute.xlu1 %1760  ;;  %v7428_v51 = vmax.f32 %v7177_v0, %v2024_v22 }
 0x2b0   :  { %v1854_v40 = vsel %vm1848_vm9, %v1757_v47, %v1759_v43  ;;  %v2023_v18 = vsel %vm2017_vm10, %v1759_v43, %v1944_v52  ;;  %1826 = vrot.lane.b32.xlu1 %v7386_v2, %s5599_s21  ;;  %10616 = vst [vmem:[#allocation17_spill] sm:$0xff] %v7410_v17  ;;  %v1855_v47 = vsel %vm1848_vm9, %v1761_v63, %v1763_v50 }
 0x2b1   :  { %v7414_v29 = vmax.f32 %v7145_v34, %v1854_v40  ;;  %5072 = vrot.lane.b32.xlu2 %v5071_v36, %s5592_s30  ;;  %v7421_v43 = vmax.f32 %v7165_v37, %v2023_v18  ;;  %v7424_v26 = vmax.f32 %v7167_v46, %v1855_v47  ;;  %v7432_v50 = vadd.f32 %v1330_v6, %v1230_v11  ;;  %v1333_v37 = vpop.f32.mrf.mxu3  ;;  %v3415_v11 = vld [vmem:[#allocation4 + $0xf0] sm:$0xff] }
 0x2b2   :  { %v7436_v36 = vrot.slane %v10354_v58, 1  ;;  %v10357_v6 = vrot.slane %v7428_v51, 4  ;;  %3638 = vmatpush.msrb.mxu3 %v3415_v11  ;;  %v1817_v2 = vpop.permute.xlu2 %1816 }
 0x2b3   :  { %10617 = vst [vmem:[#allocation21_spill] sm:$0xff] %v7424_v26  ;;  %v2176_v54 = vrot.slane %v7414_v29, 2  ;;  %3567 = vmatmul.f32.gmra.mxu1 %v7414_v29  ;;  %v2180_v34 = vrot.slane %v7424_v26, 2  ;;  %v10356_v18 = vrot.slane %v7414_v29, 4  ;;  %v10358_v0 = vrot.slane %v7421_v43, 4 }
 0x2b4   :  { %v10355_v63 = vrot.slane %v7424_v26, 4  ;;  %v10627_v21 = vrot.slane %v7424_v26, 6 }
 0x2b5   :  { %v2177_v40 = vsel %vm200_vm2, %v2172_v28, %v2176_v54  ;;  %v2181_v46 = vsel %vm200_vm2, %v2176_v54, %v2180_v34  ;;  %v10362_v28 = vrot.slane %v7414_v29, 6  ;;  %v10365_v54 = vrot.slane %v7421_v43, 6 }
 0x2b6   :  { %v5081_v47 = vpack.i.bf16 %v2181_v46, %v2177_v40  ;;  %v1553_v40 = vsel %vm141_vm0, %v10618_v13, %v7436_v36  ;;  %v7463_v58 = vsel %vm318_vm3, %v10356_v18, %v10355_v63  ;;  %v10366_v13 = vrot.slane %v7371_v9, 6 }
 0x2b7   :  { %v7443_v22 = vpop.permute.xlu0 %1814  ;;  %10619 = vst [vmem:[#allocation22_spill] sm:$0xff] %v7463_v58  ;;  %v1233_v63 = vadd.f32 %v6818_v53, %v6491_v55  ;;  %v1236_v18 = vadd.f32 %v6844_v41, %v6491_v55  ;;  %v10623_v41 = vld [vmem:[#allocation20_spill] sm:$0xff] }
 0x2b8   :  { %1828 = vrot.lane.b32.xlu1 %v6806_v33, %s5599_s21  ;;  %5082 = vrot.lane.b32.xlu0 %v5081_v47, %s5592_s30  ;;  %v10363_v47 = vrot.slane %v7368_v48, 6  ;;  %v7496_v53 = vsel %vm2390_vm11, %v10366_v13, %v10365_v54  ;;  %v10624_v46 = vmax.f32 %v10623_v41, 0.0  ;;  %v10629_v41 = vrot.slane %v6824_v5, 6 }
 0x2b9   :  { %1963 = vrot.lane.b32.xlu2 %v6690_v3, %s5598_s2  ;;  %v7470_v3 = vsel %vm318_vm3, %v10358_v0, %v10357_v6  ;;  %v1336_v52 = vpop.f32.mrf.mxu3  ;;  %10622 = vst [vmem:[#allocation74_spill] sm:$0xff] %v7496_v53  ;;  %v10625_v6 = vmax.f32 %v7432_v50, 0.0  ;;  %v1334_v0 = vadd.f32 %v1333_v37, %v1233_v63 }
 0x2ba   :  { %10620 = vst [vmem:[#allocation72_spill] sm:$0xff] %v7470_v3  ;;  %v7489_v11 = vsel %vm2390_vm11, %v10363_v47, %v10362_v28  ;;  %v7500_v58 = vmax.f32 %v10624_v46, %v1553_v40  ;;  %v10626_v47 = vrot.slane %v6813_v14, 6  ;;  %v10630_v40 = vrot.slane %v7428_v51, 6 }
 0x2bb   :  { %3570 = vmatmul.f32.gmra.mxu1 %v7424_v26  ;;  %10621 = vst [vmem:[#allocation73_spill] sm:$0xff] %v7489_v11  ;;  %v1550_v3 = vrot.slane %v10625_v6, 1  ;;  %v1337_v13 = vadd.f32 %v1336_v52, %v1236_v18  ;;  %v1868_v52 = vsel %vm1848_vm9, %v7233_v57, %v7443_v22  ;;  %v1134_v57 = vpop.f32.mrf.mxu1 }
 0x2bc   :  { %v7513_v54 = vsel %vm2390_vm11, %v10627_v21, %v10626_v47  ;;  %v7520_v46 = vsel %vm2390_vm11, %v10630_v40, %v10629_v41  ;;  %v2184_v21 = vrot.slane %v6813_v14, 2  ;;  %v3414_v47 = vld [vmem:[#allocation4 + $0xe8] sm:$0xff] }
 0x2bd   :  { %10628 = vst [vmem:[#allocation20_spill] sm:$0xff] %v7513_v54  ;;  %3639 = vmatpush.msrb.mxu3 %v3414_v47  ;;  %v1395_v41 = vmax.f32 %v1337_v13, 0.0  ;;  %v1551_v11 = vsel %vm141_vm0, %v7357_v49, %v1550_v3  ;;  %v10634_v47 = vld [vmem:[#allocation15_spill] sm:$0xff]  ;;  %v10637_v13 = vmax.f32 %v7336_v4, 0.0 }
 0x2be   :  { %10631 = vst [vmem:[#allocation75_spill] sm:$0xff] %v7520_v46  ;;  %v2185_v63 = vsel %vm200_vm2, %v2180_v34, %v2184_v21  ;;  %v7548_v54 = vmax.f32 %v10634_v47, %v1868_v52 }
 0x2bf   :  { %v7506_v28 = vpop.permute.xlu0 %1818  ;;  %v7555_v26 = vmax.f32 %v10637_v13, %v1551_v11  ;;  %v1558_v17 = vrot.slane %v1395_v41, 1  ;;  %v10638_v11 = vld [vmem:[#allocation30_spill] sm:$0xff] }
 0x2c0   :  { %v1869_v6 = vsel %vm1848_vm9, %v1817_v2, %v7506_v28  ;;  %1832 = vrot.lane.b32.xlu1 %v7500_v58, %s5599_s21  ;;  %1967 = vrot.lane.b32.xlu0 %v6718_v59, %s5598_s2  ;;  %v10632_v2 = vld [vmem:[#allocation26_spill] sm:$0xff]  ;;  %v10633_v59 = vld [vmem:[#allocation33_spill] sm:$0xff]  ;;  %v1037_v52 = vadd.f32 %v10638_v11, %v6474_v30 }
 0x2c1   :  { %1965 = vrot.lane.b32.xlu2 %v6706_v32, %s5598_s2  ;;  %v1034_v37 = vadd.f32 %v10632_v2, %v6474_v30  ;;  %v7539_v18 = vmax.f32 %v6769_v19, %v1869_v6  ;;  %v1393_v32 = vmax.f32 %v1334_v0, 0.0  ;;  %v1239_v40 = vadd.f32 %v10633_v59, %v6491_v55  ;;  %v10635_v2 = vld [vmem:[#allocation24_spill] sm:$0xff]  ;;  %v1339_v0 = vpop.f32.mrf.mxu3 }
 0x2c2   :  { %v10636_v46 = vrot.slane %v10635_v2, 2 }
 0x2c3   :  { %3573 = vmatmul.f32.gmra.mxu1 %v6813_v14  ;;  %v1135_v34 = vadd.f32 %v1134_v57, %v1034_v37  ;;  %v10374_v55 = vrot.slane %v7539_v18, 2  ;;  %v1554_v59 = vrot.slane %v1393_v32, 1  ;;  %v1340_v49 = vadd.f32 %v1339_v0, %v1239_v40  ;;  %v3413_v40 = vld [vmem:[#allocation4 + $0xe0] sm:$0xff] }
 0x2c4   :  { %v2189_v6 = vsel %vm200_vm2, %v2184_v21, %v10636_v46  ;;  %v2232_v46 = vrot.slane %v7548_v54, 2  ;;  %3640 = vmatpush.msrb.mxu3 %v3413_v40  ;;  %v10640_v0 = vmax.f32 %v7432_v50, 0.0  ;;  %v10644_v40 = vld [vmem:[#allocation42_spill] sm:$0xff] }
 0x2c5   :  { %v5086_v53 = vpack.i.bf16 %v2189_v6, %v2185_v63  ;;  %v1394_v21 = vmax.f32 %v1135_v34, 0.0  ;;  %v1397_v37 = vmax.f32 %v1340_v49, 0.0  ;;  %v1559_v63 = vsel %vm141_vm0, %v1554_v59, %v1558_v17  ;;  %v1137_v34 = vpop.f32.mrf.mxu1 }
 0x2c6   :  { %v2237_v4 = vsel %vm200_vm2, %v2232_v46, %v10374_v55  ;;  %v7579_v30 = vmax.f32 %v1393_v32, %v1559_v63  ;;  %v1138_v11 = vadd.f32 %v1137_v34, %v1037_v52  ;;  %v10643_v63 = vld [vmem:[#allocation32_spill] sm:$0xff]  ;;  %v3407_v34 = vld [vmem:[#allocation4 + $0xb0] sm:$0xff] }
 0x2c7   :  { %v1556_v49 = vrot.slane %v1394_v21, 1  ;;  %v1562_v55 = vrot.slane %v1397_v37, 1 }
 0x2c8   :  { %5087 = vrot.lane.b32.xlu1 %v5086_v53, %s5592_s30  ;;  %1969 = vrot.lane.b32.xlu0 %v6730_v25, %s5598_s2  ;;  %v1555_v53 = vsel %vm141_vm0, %v1550_v3, %v1554_v59  ;;  %v10639_v25 = vrot.slane %v7223_v12, 2  ;;  %10641 = vst [vmem:[#allocation26_spill] sm:$0xff] %v7579_v30  ;;  %v1396_v3 = vmax.f32 %v1138_v11, 0.0  ;;  %v3412_v59 = vld [vmem:[#allocation4 + $0xd8] sm:$0xff]  ;;  %v3406_v11 = vld [vmem:[#allocation4 + $0xa8] sm:$0xff] }
 0x2c9   :  { %1830 = vrot.lane.b32.xlu2 %v7555_v26, %s5599_s21  ;;  %v7577_v13 = vmax.f32 %v10640_v0, %v1555_v53  ;;  %v1557_v50 = vsel %vm141_vm0, %v7436_v36, %v1556_v49  ;;  %v1563_v32 = vsel %vm141_vm0, %v1558_v17, %v1562_v55  ;;  %3641 = vmatpush.msrb.mxu3 %v3412_v59  ;;  %v3411_v36 = vld [vmem:[#allocation4 + $0xd0] sm:$0xff]  ;;  %v3410_v17 = vld [vmem:[#allocation4 + $0xc8] sm:$0xff] }
 0x2ca   :  { %v2233_v57 = vsel %vm200_vm2, %v10639_v25, %v2232_v46  ;;  %v10642_v46 = vmax.f32 %v7377_v15, 0.0  ;;  %v7594_v52 = vmax.f32 %v1395_v41, %v1563_v32  ;;  %v1560_v53 = vrot.slane %v1396_v3, 1  ;;  %v3409_v25 = vld [vmem:[#allocation4 + $0xc0] sm:$0xff]  ;;  %v10645_v0 = vld [vmem:[#allocation44_spill] sm:$0xff] }
 0x2cb   :  { %3576 = vmatmul.f32.gmra.mxu1 %v10635_v2  ;;  %v5091_v6 = vpack.i.bf16 %v2237_v4, %v2233_v57  ;;  %3642 = vmatpush.msrb.mxu3 %v3411_v36  ;;  %v3408_v57 = vld [vmem:[#allocation4 + $0xb8] sm:$0xff]  ;;  %v3402_v59 = vld [vmem:[#allocation4 + $0x88] sm:$0xff]  ;;  %v10649_v36 = vrot.slane %v7256_v44, 4 }
 0x2cc   :  { %v7592_v4 = vmax.f32 %v10642_v46, %v1557_v50  ;;  %v1561_v15 = vsel %vm141_vm0, %v1556_v49, %v1560_v53  ;;  %v1622_v41 = vsel %vm141_vm0, %v1560_v53, %v10644_v40  ;;  %v1623_v49 = vsel %vm141_vm0, %v1562_v55, %v10645_v0  ;;  %v3404_v50 = vld [vmem:[#allocation4 + $0x98] sm:$0xff]  ;;  %v3401_v55 = vld [vmem:[#allocation4 + $0x80] sm:$0xff] }
 0x2cd   :  { %3643 = vmatpush.msrb.mxu3 %v3410_v17  ;;  %v7619_v32 = vmax.f32 %v1397_v37, %v1623_v49  ;;  %v10648_v37 = vld [vmem:[#allocation48_spill] sm:$0xff]  ;;  %v10376_v46 = vrot.slane %v7244_v8, 4  ;;  %v10375_v53 = vrot.slane %v7251_v62, 4  ;;  %vm3479_vm0 = vcmask 654336  }
 0x2cf   :  { %3644 = vmatpush.msrb.mxu3 %v3409_v25  ;;  %10647 = vst [vmem:[#allocation33_spill] sm:$0xff] %v7619_v32  ;;  %v2276_v17 = vsel %vm318_vm3, %v10376_v46, %v10649_v36  ;;  %v7645_v25 = vpop.permute.xlu1 %1959 }
 0x2d0   :  { %5092 = vrot.lane.b32.xlu1 %v5091_v6, %s5592_s30  ;;  %1838 = vrot.lane.b32.xlu0 %v7579_v30, %s5599_s21  ;;  %v7608_v6 = vmax.f32 %v1396_v3, %v1622_v41  ;;  %v3405_v3 = vld [vmem:[#allocation4 + $0xa0] sm:$0xff] }
 0x2d1   :  { %1834 = vrot.lane.b32.xlu2 %v7577_v13, %s5599_s21  ;;  %3645 = vmatpush.msrb.mxu3 %v3408_v57  ;;  %v7647_v57 = vpop.permute.xlu2 %5067 }
 0x2d2   :  { %10651 = vst [vmem:[#allocation15_spill] sm:$0xff] %v7647_v57 }
 0x2d3   :  { %3579 = vmatmul.f32.gmra.mxu1 %v6842_v61  ;;  %3646 = vmatpush.msrb.mxu3 %v3407_v34 }
 0x2d5   :  { %3647 = vmatpush.msrb.mxu3 %v3406_v11  ;;  %v10654_v11 = vrot.slane %v7285_v45, 6 }
 0x2d7   :  { %3648 = vmatpush.msrb.mxu3 %v3405_v3  ;;  %v10655_v3 = vrot.slane %v7256_v44, 6 }
 0x2d8   :  { %1971 = vrot.lane.b32.xlu1 %v10634_v47, %s5598_s2  ;;  %1842 = vrot.lane.b32.xlu0 %v7594_v52, %s5599_s21  ;;  %v7606_v47 = vmax.f32 %v1394_v21, %v1561_v15  ;;  %v10646_v21 = vld [vmem:[#allocation38_spill] sm:$0xff]  ;;  %v10650_v15 = vrot.slane %v7259_v23, 4 }
 0x2d9   :  { %1836 = vrot.lane.b32.xlu2 %v7592_v4, %s5599_s21  ;;  %3649 = vmatpush.msrb.mxu3 %v3404_v50  ;;  %v2398_v50 = vsel %vm2390_vm11, %v10655_v3, %v10654_v11  ;;  %v10658_v11 = vld [vmem:[#allocation50_spill] sm:$0xff] }
 0x2da   :  { %v2279_v40 = vsel %vm318_vm3, %v10375_v53, %v10650_v15  ;;  %v10659_v53 = vld [vmem:[#allocation51_spill] sm:$0xff] }
 0x2db   :  { %3582 = vmatmul.f32.gmra.mxu1 %v10643_v63  ;;  %v5116_v41 = vpack.i.bf16 %v2279_v40, %v2276_v17  ;;  %v1821_v17 = vpop.permute.xlu0 %1820 }
 0x2e0   :  { %1973 = vrot.lane.b32.xlu1 %v6769_v19, %s5598_s2  ;;  %1844 = vrot.lane.b32.xlu0 %v7608_v6, %s5599_s21  ;;  %v3403_v19 = vld [vmem:[#allocation4 + $0x90] sm:$0xff] }
 0x2e1   :  { %1840 = vrot.lane.b32.xlu2 %v7606_v47, %s5599_s21  ;;  %3650 = vmatpush.msrb.mxu3 %v3403_v19  ;;  %v10656_v19 = vrot.slane %v7293_v24, 6 }
 0x2e3   :  { %3585 = vmatmul.f32.gmra.mxu1 %v10646_v21  ;;  %3651 = vmatpush.msrb.mxu3 %v3402_v59  ;;  %v10657_v59 = vrot.slane %v7259_v23, 6 }
 0x2e5   :  { %3652 = vmatpush.msrb.mxu3 %v3401_v55  ;;  %v2400_v55 = vsel %vm2390_vm11, %v10657_v59, %v10656_v19  ;;  %v10660_v59 = vld [vmem:[#allocation10_spill] sm:$0xff] }
 0x2e6   :  { %v5136_v15 = vpack.i.bf16 %v2400_v55, %v2398_v50  ;;  %v10661_v50 = vrot.slane %v7342_v60, 4  ;;  %v10662_v55 = vrot.slane %v7285_v45, 4 }
 0x2e8   :  { %1846 = vrot.lane.b32.xlu1 %v7619_v32, %s5599_s21  ;;  %1977 = vrot.lane.b32.xlu0 %v7227_v38, %s5598_s2  ;;  %v10679_v32 = vrot.slane %v7539_v18, 2 }
 0x2eb   :  { %3588 = vmatmul.f32.gmra.mxu1 %v6964_v42 }
 0x2f0   :  { %1981 = vrot.lane.b32.xlu0 %v7500_v58, %s5598_s2 }
 0x2f3   :  { %3591 = vmatmul.f32.gmra.mxu1 %v10648_v37 }
 0x2f8   :  { %1985 = vrot.lane.b32.xlu0 %v7606_v47, %s5598_s2 }
 0x2fb   :  { %3594 = vmatmul.f32.gmra.mxu1 %v7061_v20 }
 0x300   :  { %5117 = vrot.lane.b32.xlu0 %v5116_v41, %s5600_s26 }
 0x303   :  { %3597 = vmatmul.f32.gmra.mxu1 %v7068_v16 }
 0x308   :  { %3104 = vrot.lane.b32.xlu0 %v7256_v44, %s5601_s27 }
 0x30a   :  { %v7652_v34 = vpop.permute.xlu1 %5062 }
 0x30b   :  { %10652 = vst [vmem:[#allocation30_spill] sm:$0xff] %v7652_v34  ;;  %v7654_v0 = vpop.permute.xlu2 %5072  ;;  %v10377_v49 = vunpack.i.l.bf16 %v7652_v34  ;;  %3600 = vmatmul.f32.gmra.mxu1 %v7102_v35  ;;  %v10378_v40 = vunpack.i.h.bf16 %v7652_v34 }
 0x30c   :  { %10653 = vst [vmem:[#allocation32_spill] sm:$0xff] %v7654_v0  ;;  %v10670_v34 = vunpack.i.l.bf16 %v7654_v0 }
 0x30d   :  { %v3273_v36 = vsel %vm2621_vm12, %v7251_v62, %v10377_v49 }
 0x30e   :  { %3653 = vmatmul.f32.vlgmr.msrb.gmra.mxu3 %v3273_v36  ;;  %v2285_v36 = vsel %vm318_vm3, %v10662_v55, %v10661_v50  ;;  %v1825_v55 = vpop.permute.xlu0 %1824 }
 0x310   :  { %5137 = vrot.lane.b32.xlu0 %v5136_v15, %s5602_s19  ;;  %v10663_v15 = vld [vmem:[#allocation11_spill] sm:$0xff] }
 0x312   :  { %v1962_v44 = vpop.permute.xlu1 %1961 }
 0x313   :  { %v1964_v41 = vpop.permute.xlu2 %1963  ;;  %v2032_v3 = vsel %vm2017_vm10, %v10658_v11, %v1962_v44  ;;  %3603 = vmatmul.f32.gmra.mxu1 %v7139_v7  ;;  %v3274_v44 = vsel %vm2621_vm12, %v7259_v23, %v10378_v40 }
 0x314   :  { %v2033_v19 = vsel %vm2017_vm10, %v10659_v53, %v1964_v41  ;;  %v7679_v46 = vmax.f32 %v10660_v59, %v2032_v3  ;;  %v10664_v53 = vrot.slane %v7290_v31, 4  ;;  %v10665_v41 = vrot.slane %v7293_v24, 4 }
 0x315   :  { %v7688_v49 = vmax.f32 %v10663_v15, %v2033_v19  ;;  %v10669_v19 = vld [vmem:[#allocation12_spill] sm:$0xff] }
 0x316   :  { %3656 = vmatmul.f32.gmra.mxu3 %v3274_v44  ;;  %v2287_v11 = vsel %vm318_vm3, %v10665_v41, %v10664_v53  ;;  %v10384_v3 = vrot.slane %v7679_v46, 6  ;;  %v10676_v41 = vrot.slane %v7371_v9, 6 }
 0x317   :  { %v5141_v59 = vpack.i.bf16 %v2287_v11, %v2285_v36  ;;  %v10383_v50 = vrot.slane %v7688_v49, 6  ;;  %v10668_v11 = vld [vmem:[#allocation54_spill] sm:$0xff] }
 0x319   :  { %5142 = vrot.lane.b32.xlu0 %v5141_v59, %s5600_s26  ;;  %v7710_v44 = vsel %vm2390_vm11, %v10384_v3, %v10383_v50  ;;  %v3275_v50 = vsel %vm2621_vm12, %v7293_v24, %v10670_v34  ;;  %v10386_v3 = vrot.slane %v7688_v49, 4 }
 0x31a   :  { %v7703_v15 = vpop.permute.xlu1 %1822  ;;  %10666 = vst [vmem:[#allocation42_spill] sm:$0xff] %v7710_v44 }
 0x31b   :  { %v1966_v53 = vpop.permute.xlu2 %1965  ;;  %3606 = vmatmul.f32.gmra.mxu1 %v7223_v12  ;;  %v1870_v35 = vsel %vm1848_vm9, %v1821_v17, %v7703_v15 }
 0x31c   :  { %v2034_v40 = vsel %vm2017_vm10, %v10668_v11, %v1966_v53  ;;  %v7729_v53 = vmax.f32 %v7214_v1, %v1870_v35  ;;  %v10674_v11 = vrot.slane %v7368_v48, 6 }
 0x31d   :  { %v7718_v59 = vmax.f32 %v10669_v19, %v2034_v40  ;;  %v10677_v40 = vrot.slane %v7290_v31, 6 }
 0x31e   :  { %3659 = vmatmul.f32.gmra.mxu3 %v3275_v50  ;;  %v7745_v50 = vpop.permute.xlu0 %5077  ;;  %v2240_v27 = vrot.slane %v7729_v53, 2 }
 0x31f   :  { %v10385_v36 = vrot.slane %v7718_v59, 4  ;;  %10672 = vst [vmem:[#allocation38_spill] sm:$0xff] %v7745_v50  ;;  %v2408_v44 = vsel %vm2390_vm11, %v10677_v40, %v10676_v41 }
 0x320   :  { %v2241_v41 = vsel %vm200_vm2, %v10679_v32, %v2240_v27 }
 0x321   :  { %3112 = vrot.lane.b32.xlu0 %v7342_v60, %s5601_s27  ;;  %v7739_v17 = vsel %vm318_vm3, %v10386_v3, %v10385_v36  ;;  %v10675_v36 = vrot.slane %v7342_v60, 6  ;;  %v10395_v60 = vrot.slane %v7729_v53, 4 }
 0x322   :  { %10671 = vst [vmem:[#allocation44_spill] sm:$0xff] %v7739_v17  ;;  %v7741_v34 = vpop.permute.xlu1 %1826 }
 0x323   :  { %v1871_v35 = vsel %vm1848_vm9, %v1825_v55, %v7741_v34  ;;  %3609 = vmatmul.f32.gmra.mxu1 %v7548_v54  ;;  %v2406_v3 = vsel %vm2390_vm11, %v10675_v36, %v10674_v11  ;;  %v10678_v55 = vunpack.i.h.bf16 %v7654_v0  ;;  %v7771_v17 = vpop.permute.xlu2 %1830 }
 0x324   :  { %v7750_v19 = vmax.f32 %v7227_v38, %v1871_v35  ;;  %v5161_v11 = vpack.i.bf16 %v2408_v44, %v2406_v3 }
 0x325   :  { %v3276_v38 = vsel %vm2621_vm12, %v7290_v31, %v10678_v55 }
 0x326   :  { %10673 = vst [vmem:[#allocation48_spill] sm:$0xff] %v7750_v19  ;;  %3662 = vmatmul.f32.gmra.mxu3 %v3276_v38  ;;  %v2244_v35 = vrot.slane %v7750_v19, 2  ;;  %v10394_v36 = vrot.slane %v7750_v19, 4 }
 0x328   :  { %v2245_v40 = vsel %vm200_vm2, %v2240_v27, %v2244_v35  ;;  %v7782_v55 = vsel %vm318_vm3, %v10395_v60, %v10394_v36 }
 0x329   :  { %10680 = vst [vmem:[#allocation50_spill] sm:$0xff] %v7782_v55  ;;  %5162 = vrot.lane.b32.xlu0 %v5161_v11, %s5602_s19  ;;  %v5096_v38 = vpack.i.bf16 %v2245_v40, %v2241_v41  ;;  %v10399_v41 = vrot.slane %v7750_v19, 6 }
 0x32a   :  { %v1829_v0 = vpop.permute.xlu1 %1828  ;;  %v7785_v3 = vpop.permute.xlu0 %5082 }
 0x32b   :  { %10681 = vst [vmem:[#allocation51_spill] sm:$0xff] %v7785_v3  ;;  %v1872_v44 = vsel %vm1848_vm9, %v1829_v0, %v7771_v17  ;;  %5097 = vrot.lane.b32.xlu2 %v5096_v38, %s5592_s30  ;;  %v10393_v27 = vunpack.i.l.bf16 %v7785_v3  ;;  %3612 = vmatmul.f32.gmra.mxu1 %v7539_v18  ;;  %v7810_v38 = vpop.permute.xlu2 %1834 }
 0x32c   :  { %v7792_v32 = vmax.f32 %v6806_v33, %v1872_v44 }
 0x32d   :  { %v3277_v11 = vsel %vm2621_vm12, %v7371_v9, %v10393_v27 }
 0x32e   :  { %10682 = vst [vmem:[#allocation10_spill] sm:$0xff] %v7792_v32  ;;  %3665 = vmatmul.f32.gmra.mxu3 %v3277_v11  ;;  %v10398_v40 = vrot.slane %v7792_v32, 6  ;;  %v10404_v30 = vrot.slane %v7792_v32, 4 }
 0x330   :  { %v7808_v0 = vsel %vm2390_vm11, %v10399_v41, %v10398_v40  ;;  %v2248_v40 = vrot.slane %v7792_v32, 2  ;;  %v10685_v41 = vld [vmem:[#allocation13_spill] sm:$0xff] }
 0x331   :  { %3120 = vrot.lane.b32.xlu0 %v7414_v29, %s5601_s27  ;;  %10683 = vst [vmem:[#allocation11_spill] sm:$0xff] %v7808_v0  ;;  %v10686_v0 = vunpack.i.h.bf16 %v7785_v3 }
 0x332   :  { %v1833_v27 = vpop.permute.xlu1 %1832  ;;  %v1968_v11 = vpop.permute.xlu0 %1967 }
 0x333   :  { %v1873_v36 = vsel %vm1848_vm9, %v1833_v27, %v7810_v38  ;;  %1975 = vrot.lane.b32.xlu2 %v7214_v1, %s5598_s2  ;;  %v2035_v60 = vsel %vm2017_vm10, %v7132_v56, %v1968_v11  ;;  %3615 = vmatmul.f32.gmra.mxu1 %v7729_v53  ;;  %v3278_v27 = vsel %vm2621_vm12, %v7421_v43, %v10686_v0 }
 0x334   :  { %v7820_v16 = vmax.f32 %v7500_v58, %v1873_v36  ;;  %v7825_v44 = vmax.f32 %v10685_v41, %v2035_v60  ;;  %v10406_v58 = vrot.slane %v7718_v59, 6  ;;  %v2249_v11 = vsel %vm200_vm2, %v2244_v35, %v2248_v40 }
 0x336   :  { %10684 = vst [vmem:[#allocation54_spill] sm:$0xff] %v7820_v16  ;;  %v10402_v1 = vrot.slane %v7820_v16, 2  ;;  %v10403_v56 = vrot.slane %v7820_v16, 4  ;;  %3668 = vmatmul.f32.gmra.mxu3 %v3278_v27  ;;  %v10405_v36 = vrot.slane %v7825_v44, 6 }
 0x338   :  { %v2253_v60 = vsel %vm200_vm2, %v2248_v40, %v10402_v1  ;;  %v7845_v41 = vsel %vm318_vm3, %v10404_v30, %v10403_v56  ;;  %v7854_v35 = vsel %vm2390_vm11, %v10406_v58, %v10405_v36  ;;  %v10691_v30 = vrot.slane %v6813_v14, 6  ;;  %v10692_v40 = vld [vmem:[#allocation25_spill] sm:$0xff] }
 0x339   :  { %10687 = vst [vmem:[#allocation12_spill] sm:$0xff] %v7845_v41  ;;  %3128 = vrot.lane.b32.xlu0 %v6813_v14, %s5601_s27  ;;  %v5101_v0 = vpack.i.bf16 %v2253_v60, %v2249_v11  ;;  %v10690_v60 = vrot.slane %v10635_v2, 6  ;;  %v10693_v58 = vrot.slane %v10692_v40, 6  ;;  %v10694_v56 = vrot.slane %v6824_v5, 6  ;;  %v1837_v41 = vpop.permute.xlu2 %1836 }
 0x33a   :  { %10688 = vst [vmem:[#allocation13_spill] sm:$0xff] %v7854_v35  ;;  %v7856_v27 = vpop.permute.xlu1 %5087  ;;  %v1970_v1 = vpop.permute.xlu0 %1969 }
 0x33b   :  { %10689 = vst [vmem:[#allocation76_spill] sm:$0xff] %v7856_v27  ;;  %1979 = vrot.lane.b32.xlu2 %v6806_v33, %s5598_s2  ;;  %5102 = vrot.lane.b32.xlu1 %v5101_v0, %s5592_s30  ;;  %v2036_v11 = vsel %vm2017_vm10, %v7216_v10, %v1970_v1  ;;  %v2422_v36 = vsel %vm2390_vm11, %v10691_v30, %v10690_v60  ;;  %v10695_v33 = vld [vmem:[#allocation14_spill] sm:$0xff]  ;;  %v10697_v0 = vunpack.i.l.bf16 %v7856_v27  ;;  %v10414_v1 = vrot.slane %v7223_v12, 4 }
 0x33c   :  { %3618 = vmatmul.f32.gmra.mxu1 %v7750_v19  ;;  %v2424_v3 = vsel %vm2390_vm11, %v10694_v56, %v10693_v58  ;;  %v7878_v39 = vmax.f32 %v10695_v33, %v2036_v11  ;;  %v10416_v30 = vrot.slane %v7139_v7, 4  ;;  %v10417_v60 = vrot.slane %v7825_v44, 4 }
 0x33d   :  { %v3279_v10 = vsel %vm2621_vm12, %v7428_v51, %v10697_v0  ;;  %v5171_v35 = vpack.i.bf16 %v2424_v3, %v2422_v36  ;;  %v10702_v0 = vrot.slane %v6842_v61, 4 }
 0x33e   :  { %10696 = vst [vmem:[#allocation25_spill] sm:$0xff] %v7878_v39  ;;  %3671 = vmatmul.f32.gmra.mxu3 %v3279_v10  ;;  %v10415_v19 = vrot.slane %v7878_v39, 4  ;;  %v7894_v56 = vsel %vm318_vm3, %v10416_v30, %v10414_v1  ;;  %v10703_v10 = vrot.slane %v10635_v2, 4 }
 0x33f   :  { %10698 = vst [vmem:[#allocation14_spill] sm:$0xff] %v7894_v56  ;;  %v10708_v56 = vunpack.i.h.bf16 %v7856_v27 }
 0x340   :  { %v7901_v3 = vsel %vm318_vm3, %v10417_v60, %v10415_v19  ;;  %v2309_v1 = vsel %vm318_vm3, %v10703_v10, %v10702_v0  ;;  %v10704_v19 = vld [vmem:[#allocation29_spill] sm:$0xff] }
 0x341   :  { %5172 = vrot.lane.b32.xlu0 %v5171_v35, %s5602_s19  ;;  %10699 = vst [vmem:[#allocation77_spill] sm:$0xff] %v7901_v3  ;;  %v10705_v30 = vrot.slane %v10704_v19, 4  ;;  %v10706_v35 = vrot.slane %v10692_v40, 4  ;;  %v10709_v10 = vld [vmem:[#allocation61_spill] sm:$0xff] }
 0x342   :  { %v7904_v36 = vpop.permute.xlu1 %5092  ;;  %v7908_v11 = vpop.permute.xlu0 %1838 }
 0x343   :  { %10700 = vst [vmem:[#allocation78_spill] sm:$0xff] %v7904_v36  ;;  %1983 = vrot.lane.b32.xlu2 %v7592_v4, %s5598_s2  ;;  %v1874_v33 = vsel %vm1848_vm9, %v1837_v41, %v7908_v11  ;;  %v2311_v60 = vsel %vm318_vm3, %v10706_v35, %v10705_v30  ;;  %v3280_v41 = vsel %vm2621_vm12, %v6824_v5, %v10708_v56  ;;  %v7943_v30 = vpop.f32.mrf.mxu1 }
 0x344   :  { %10701 = vst [vmem:[#allocation79_spill] sm:$0xff] %v7908_v11  ;;  %3621 = vmatmul.f32.gmra.mxu1 %v7792_v32  ;;  %v7926_v58 = vmax.f32 %v7592_v4, %v1874_v33  ;;  %v5176_v3 = vpack.i.bf16 %v2311_v60, %v2309_v1  ;;  %v10425_v32 = vrot.slane %v7820_v16, 6  ;;  %v1841_v60 = vpop.permute.xlu2 %1840  ;;  %v10437_v1 = vrot.slane %v7878_v39, 6 }
 0x345   :  { %10711 = vst [vmem:[#allocation81_spill] sm:$0xff] %v7943_v30  ;;  %v10717_v11 = vrot.slane %v7223_v12, 6 }
 0x346   :  { %10707 = vst [vmem:[#allocation29_spill] sm:$0xff] %v7926_v58  ;;  %3674 = vmatmul.f32.gmra.mxu3 %v3280_v41  ;;  %v10424_v0 = vrot.slane %v7926_v58, 6  ;;  %v10712_v41 = vld [vmem:[#allocation16_spill] sm:$0xff]  ;;  %v2256_v27 = vrot.slane %v7926_v58, 2  ;;  %v10723_v39 = vrot.slane %v7926_v58, 4 }
 0x348   :  { %v7941_v4 = vsel %vm2390_vm11, %v10425_v32, %v10424_v0  ;;  %v2162_v32 = vrot.slane %v7259_v23, 2 }
 0x349   :  { %5177 = vrot.lane.b32.xlu0 %v5176_v3, %s5600_s26  ;;  %10710 = vst [vmem:[#allocation80_spill] sm:$0xff] %v7941_v4  ;;  %v10716_v4 = vrot.slane %v7548_v54, 6 }
 0x34a   :  { %v1972_v56 = vpop.permute.xlu1 %1971  ;;  %v7946_v35 = vpop.permute.xlu0 %1842 }
 0x34b   :  { %v2037_v33 = vsel %vm2017_vm10, %v7443_v22, %v1972_v56  ;;  %1987 = vrot.lane.b32.xlu2 %v7608_v6, %s5598_s2  ;;  %v1875_v3 = vsel %vm1848_vm9, %v1841_v60, %v7946_v35  ;;  %v10714_v22 = vunpack.i.l.bf16 %v10709_v10  ;;  %v8004_v12 = vpop.f32.mrf.mxu1 }
 0x34c   :  { %v7955_v0 = vmax.f32 %v10712_v41, %v2037_v33  ;;  %3624 = vmatmul.f32.gmra.mxu1 %v7820_v16  ;;  %v7961_v7 = vmax.f32 %v7606_v47, %v1875_v3  ;;  %v10431_v33 = vrot.slane %v7251_v62, 2  ;;  %v10715_v41 = vrot.slane %v7293_v24, 2  ;;  %10721 = vst [vmem:[#allocation84_spill] sm:$0xff] %v8004_v12 }
 0x34d   :  { %v3281_v56 = vsel %vm2621_vm12, %v10692_v40, %v10714_v22  ;;  %v10730_v12 = vrot.slane %v10704_v19, 6 }
 0x34e   :  { %10713 = vst [vmem:[#allocation16_spill] sm:$0xff] %v7961_v7  ;;  %v2167_v30 = vsel %vm200_vm2, %v2162_v32, %v10715_v41  ;;  %v10436_v47 = vrot.slane %v7955_v0, 6  ;;  %3677 = vmatmul.f32.gmra.mxu3 %v3281_v56  ;;  %v2260_v3 = vrot.slane %v7961_v7, 2  ;;  %v2163_v22 = vsel %vm200_vm2, %v10431_v33, %v2162_v32 }
 0x34f   :  { %v7986_v41 = vsel %vm2390_vm11, %v10717_v11, %v10716_v4  ;;  %v5126_v32 = vpack.i.bf16 %v2167_v30, %v2163_v22  ;;  %v10720_v33 = vrot.slane %v7820_v16, 2 }
 0x350   :  { %10718 = vst [vmem:[#allocation82_spill] sm:$0xff] %v7986_v41  ;;  %v7993_v56 = vsel %vm2390_vm11, %v10437_v1, %v10436_v47  ;;  %v2261_v2 = vsel %vm200_vm2, %v2256_v27, %v2260_v3  ;;  %v10722_v1 = vrot.slane %v7961_v7, 4 }
 0x351   :  { %10719 = vst [vmem:[#allocation83_spill] sm:$0xff] %v7993_v56  ;;  %3136 = vrot.lane.b32.xlu0 %v6842_v61, %s5601_s27  ;;  %v2257_v60 = vsel %vm200_vm2, %v10720_v33, %v2256_v27  ;;  %v10725_v33 = vld [vmem:[#allocation59_spill] sm:$0xff] }
 0x352   :  { %v1974_v62 = vpop.permute.xlu1 %1973  ;;  %v5106_v47 = vpack.i.bf16 %v2261_v2, %v2257_v60  ;;  %v8011_v30 = vsel %vm318_vm3, %v10723_v39, %v10722_v1  ;;  %v1845_v22 = vpop.permute.xlu0 %1844  ;;  %v10726_v2 = vrot.slane %v10643_v63, 6  ;;  %v10727_v60 = vrot.slane %v6842_v61, 6  ;;  %v10728_v1 = vld [vmem:[#allocation35_spill] sm:$0xff] }
 0x353   :  { %10724 = vst [vmem:[#allocation85_spill] sm:$0xff] %v8011_v30  ;;  %v2038_v27 = vsel %vm2017_vm10, %v7506_v28, %v1974_v62  ;;  %5127 = vrot.lane.b32.xlu2 %v5126_v32, %s5592_s30  ;;  %v10729_v4 = vrot.slane %v10728_v1, 6  ;;  %v10441_v28 = vrot.slane %v7539_v18, 4  ;;  %v10731_v32 = vunpack.i.h.bf16 %v10709_v10  ;;  %v10736_v56 = vld [vmem:[#allocation67_spill] sm:$0xff] }
 0x354   :  { %v8017_v11 = vmax.f32 %v10725_v33, %v2038_v27  ;;  %3627 = vmatmul.f32.gmra.mxu1 %v7926_v58  ;;  %5107 = vrot.lane.b32.xlu1 %v5106_v47, %s5592_s30  ;;  %v2430_v39 = vsel %vm2390_vm11, %v10727_v60, %v10726_v2  ;;  %v3474_v47 = vld [vmem:[#allocation4 + $0x2c8] sm:$0xff]  ;;  %v10442_v33 = vrot.slane %v7548_v54, 4  ;;  %v10445_v61 = vrot.slane %v7955_v0, 4 }
 0x355   :  { %v2432_v62 = vsel %vm2390_vm11, %v10730_v12, %v10729_v4  ;;  %v3282_v27 = vsel %vm2621_vm12, %v10704_v19, %v10731_v32  ;;  %4047 = vmatpush.msra.mxu3 %v3474_v47  ;;  %v3464_v47 = vld [vmem:[#allocation4 + $0x278] sm:$0xff]  ;;  %v10740_v32 = vrot.slane %v10643_v63, 4  ;;  %v10743_v58 = vrot.slane %v10728_v1, 4 }
 0x356   :  { %v10444_v2 = vrot.slane %v8017_v11, 4  ;;  %3680 = vmatmul.f32.gmra.mxu3 %v3282_v27  ;;  %v5196_v60 = vpack.i.bf16 %v2432_v62, %v2430_v39  ;;  %v8044_v12 = vsel %vm318_vm3, %v10442_v33, %v10441_v28  ;;  %v10734_v62 = vld [vmem:[#allocation63_spill] sm:$0xff]  ;;  %v10735_v33 = vld [vmem:[#allocation68_spill] sm:$0xff]  ;;  %3940 = vmatpush.msra.mxu1 %v3464_v47 }
 0x357   :  { %10732 = vst [vmem:[#allocation59_spill] sm:$0xff] %v8044_v12 }
 0x358   :  { %v8051_v4 = vsel %vm318_vm3, %v10445_v61, %v10444_v2  ;;  %v10737_v2 = vpack.i.bf16 %v10735_v33, %v10736_v56  ;;  %v10739_v61 = vrot.slane %v10646_v21, 4  ;;  %v10744_v33 = vunpack.i.l.bf16 %v10734_v62 }
 0x359   :  { %10733 = vst [vmem:[#allocation35_spill] sm:$0xff] %v8051_v4  ;;  %5197 = vrot.lane.b32.xlu0 %v5196_v60, %s5602_s19  ;;  %v8067_v60 = vpop.f32.mrf.mxu1 }
 0x35a   :  { %v8057_v27 = vpop.permute.xlu1 %1846  ;;  %v8059_v41 = vpop.permute.xlu0 %1977  ;;  %10738 = vst [vmem:[#allocation68_spill] sm:$0xff] %v8067_v60  ;;  %v2317_v12 = vsel %vm318_vm3, %v10740_v32, %v10739_v61  ;;  %v10453_v60 = vrot.slane %v7961_v7, 6  ;;  %v10745_v32 = vrot.slane %v7244_v8, 2 }
 0x35b   :  { %v1876_v28 = vsel %vm1848_vm9, %v1845_v22, %v8057_v27  ;;  %5132 = vrot.lane.b32.xlu2 %v10737_v2, %s5600_s26  ;;  %v10741_v22 = vld [vmem:[#allocation37_spill] sm:$0xff] }
 0x35c   :  { %v8070_v39 = vmax.f32 %v7608_v6, %v1876_v28  ;;  %3630 = vmatmul.f32.gmra.mxu1 %v7961_v7  ;;  %v10742_v4 = vrot.slane %v10741_v22, 4  ;;  %v3283_v6 = vsel %vm2621_vm12, %v10728_v1, %v10744_v33  ;;  %v10751_v7 = vld [vmem:[#allocation69_spill] sm:$0xff] }
 0x35e   :  { %v2319_v56 = vsel %vm318_vm3, %v10743_v58, %v10742_v4  ;;  %v2264_v28 = vrot.slane %v8070_v39, 2  ;;  %v10452_v2 = vrot.slane %v8070_v39, 6  ;;  %3683 = vmatmul.f32.gmra.mxu3 %v3283_v6 }
 0x35f   :  { %v5201_v47 = vpack.i.bf16 %v2319_v56, %v2317_v12  ;;  %v10454_v12 = vunpack.i.h.bf16 %v10734_v62  ;;  %v10458_v56 = vrot.slane %v7371_v9, 2  ;;  %v3473_v62 = vld [vmem:[#allocation4 + $0x2c0] sm:$0xff] }
 0x360   :  { %v2265_v61 = vsel %vm200_vm2, %v2260_v3, %v2264_v28  ;;  %v2272_v16 = vsel %vm200_vm2, %v2264_v28, %v10745_v32  ;;  %v8100_v4 = vsel %vm2390_vm11, %v10453_v60, %v10452_v2  ;;  %v10750_v60 = vld [vmem:[#allocation45_spill] sm:$0xff]  ;;  %4048 = vmatpush.msra.mxu3 %v3473_v62  ;;  %v3432_v62 = vld [vmem:[#allocation4 + $0x178] sm:$0xff] }
 0x361   :  { %5202 = vrot.lane.b32.xlu0 %v5201_v47, %s5600_s26  ;;  %v5111_v58 = vpack.i.bf16 %v2272_v16, %v2265_v61  ;;  %10746 = vst [vmem:[#allocation67_spill] sm:$0xff] %v8100_v4  ;;  %v8109_v3 = vpop.f32.mrf.mxu1  ;;  %v2170_v16 = vrot.slane %v7290_v31, 2  ;;  %v3284_v6 = vsel %vm2621_vm12, %v10741_v22, %v10454_v12  ;;  %v3463_v47 = vld [vmem:[#allocation4 + $0x270] sm:$0xff]  ;;  %v10748_v61 = vrot.slane %v7293_v24, 2  ;;  %3738 = vmatpush.msra.mxu0 %v3432_v62  ;;  %v3429_v62 = vld [vmem:[#allocation4 + $0x160] sm:$0xff] }
 0x362   :  { %v8104_v33 = vpop.permute.xlu0 %1981  ;;  %10747 = vst [vmem:[#allocation37_spill] sm:$0xff] %v8109_v3  ;;  %3941 = vmatpush.msra.mxu1 %v3463_v47  ;;  %v2031_v3 = vsel %vm2017_vm10, %v10750_v60, %v7645_v25  ;;  %v10755_v47 = vld [vmem:[#allocation9_spill] sm:$0xff]  ;;  %v10756_v25 = vrot.slane %v6964_v42, 6  ;;  %v10757_v60 = vrot.slane %v10646_v21, 6 }
 0x363   :  { %3110 = vrot.lane.b32.xlu2 %v7293_v24, %s5601_s27  ;;  %5112 = vrot.lane.b32.xlu1 %v5111_v58, %s5592_s30  ;;  %v2175_v28 = vsel %vm200_vm2, %v2170_v16, %v10458_v56  ;;  %v2171_v32 = vsel %vm200_vm2, %v10748_v61, %v2170_v16  ;;  %v10749_v58 = vld [vmem:[#allocation43_spill] sm:$0xff]  ;;  %v10752_v24 = vld [vmem:[#allocation66_spill] sm:$0xff]  ;;  %v10753_v16 = vld [vmem:[#allocation65_spill] sm:$0xff]  ;;  %v8138_v61 = vmax.f32 %v10755_v47, %v2031_v3 }
 0x364   :  { %3633 = vmatmul.f32.gmra.mxu1 %v8070_v39  ;;  %v10459_v2 = vrot.slane %v10749_v58, 6  ;;  %v5151_v12 = vpack.i.bf16 %v2175_v28, %v2171_v32  ;;  %v2438_v28 = vsel %vm2390_vm11, %v10757_v60, %v10756_v25  ;;  %v10758_v32 = vrot.slane %v10741_v22, 6  ;;  %v10760_v25 = vld [vmem:[#allocation17_spill] sm:$0xff]  ;;  %v10761_v60 = vld [vmem:[#allocation18_spill] sm:$0xff] }
 0x366   :  { %3686 = vmatmul.f32.gmra.mxu3 %v3284_v6  ;;  %v10754_v6 = vpack.i.bf16 %v10752_v24, %v10753_v16  ;;  %v10759_v24 = vunpack.i.l.bf16 %v10751_v7 }
 0x368   :  { %v3285_v3 = vsel %vm2621_vm12, %v10749_v58, %v10759_v24  ;;  %v3431_v24 = vld [vmem:[#allocation4 + $0x170] sm:$0xff] }
 0x369   :  { %3144 = vrot.lane.b32.xlu0 %v10646_v21, %s5601_s27  ;;  %v10463_v21 = vrot.slane %v10648_v37, 4  ;;  %3739 = vmatpush.msra.mxu0 %v3431_v24  ;;  %v8180_v10 = vpop.f32.mrf.mxu1  ;;  %v3428_v24 = vld [vmem:[#allocation4 + $0x158] sm:$0xff] }
 0x36a   :  { %v8130_v56 = vpop.permute.xlu0 %1985  ;;  %10765 = vst [vmem:[#allocation43_spill] sm:$0xff] %v8180_v10  ;;  %v3423_v10 = vld [vmem:[#allocation4 + $0x130] sm:$0xff] }
 0x36b   :  { %5152 = vrot.lane.b32.xlu2 %v5151_v12, %s5592_s30  ;;  %5122 = vrot.lane.b32.xlu1 %v10754_v6, %s5602_s19  ;;  %v2440_v12 = vsel %vm2390_vm11, %v10758_v32, %v10459_v2  ;;  %v10464_v6 = vrot.slane %v8138_v61, 4  ;;  %v10762_v32 = vpack.i.bf16 %v10760_v25, %v10761_v60  ;;  %v3430_v2 = vld [vmem:[#allocation4 + $0x168] sm:$0xff] }
 0x36c   :  { %v5221_v16 = vpack.i.bf16 %v2440_v12, %v2438_v28  ;;  %v10462_v28 = vunpack.i.h.bf16 %v10751_v7  ;;  %v10763_v12 = vrot.slane %v10749_v58, 4  ;;  %3740 = vmatpush.msra.mxu0 %v3430_v2 }
 0x36e   :  { %3689 = vmatmul.f32.gmra.mxu3 %v3285_v3  ;;  %v3462_v3 = vld [vmem:[#allocation4 + $0x268] sm:$0xff]  ;;  %v3286_v25 = vsel %vm2621_vm12, %v8138_v61, %v10462_v28  ;;  %3741 = vmatpush.msra.mxu0 %v3429_v62  ;;  %v3461_v28 = vld [vmem:[#allocation4 + $0x260] sm:$0xff] }
 0x36f   :  { %3942 = vmatpush.msra.mxu1 %v3462_v3 }
 0x370   :  { %3742 = vmatpush.msra.mxu0 %v3428_v24  ;;  %v10767_v24 = vld [vmem:[#allocation70_spill] sm:$0xff] }
 0x371   :  { %5222 = vrot.lane.b32.xlu0 %v5221_v16, %s5602_s19  ;;  %v2327_v16 = vsel %vm318_vm3, %v10763_v12, %v10464_v6  ;;  %v10461_v12 = vunpack.i.l.bf16 %v7647_v57  ;;  %v10770_v6 = vrot.slane %v7679_v46, 6  ;;  %3943 = vmatpush.msra.mxu1 %v3461_v28  ;;  %v3421_v28 = vld [vmem:[#allocation4 + $0x120] sm:$0xff] }
 0x372   :  { %v8157_v47 = vpop.permute.xlu0 %5117 }
 0x373   :  { %5157 = vrot.lane.b32.xlu2 %v10762_v32, %s5600_s26  ;;  %3106 = vrot.lane.b32.xlu1 %v7259_v23, %s5601_s27  ;;  %v10764_v23 = vrot.slane %v6964_v42, 4  ;;  %v3287_v2 = vsel %vm2621_vm12, %v7679_v46, %v10461_v12 }
 0x375   :  { %v2325_v60 = vsel %vm318_vm3, %v10764_v23, %v10463_v21  ;;  %v8196_v23 = vpop.f32.mrf.mxu1  ;;  %v10467_v21 = vunpack.i.h.bf16 %v7647_v57 }
 0x376   :  { %3692 = vmatmul.f32.gmra.mxu3 %v3286_v25  ;;  %v5226_v32 = vpack.i.bf16 %v2327_v16, %v2325_v60  ;;  %v3427_v16 = vld [vmem:[#allocation4 + $0x150] sm:$0xff]  ;;  %v3426_v25 = vld [vmem:[#allocation4 + $0x148] sm:$0xff]  ;;  %10766 = vst [vmem:[#allocation45_spill] sm:$0xff] %v8196_v23  ;;  %v3425_v60 = vld [vmem:[#allocation4 + $0x140] sm:$0xff] }
 0x377   :  { %3743 = vmatpush.msra.mxu0 %v3427_v16  ;;  %v3424_v16 = vld [vmem:[#allocation4 + $0x138] sm:$0xff] }
 0x379   :  { %5227 = vrot.lane.b32.xlu0 %v5226_v32, %s5600_s26  ;;  %3744 = vmatpush.msra.mxu0 %v3426_v25  ;;  %v3472_v32 = vld [vmem:[#allocation4 + $0x2b8] sm:$0xff] }
 0x37a   :  { %v8183_v3 = vpop.permute.xlu0 %3104  ;;  %4049 = vmatpush.msra.mxu3 %v3472_v32 }
 0x37b   :  { %3118 = vrot.lane.b32.xlu2 %v7371_v9, %s5601_s27  ;;  %3108 = vrot.lane.b32.xlu1 %v7285_v45, %s5601_s27  ;;  %v10466_v45 = vrot.slane %v8138_v61, 6 }
 0x37c   :  { %3745 = vmatpush.msra.mxu0 %v3425_v60  ;;  %v3422_v60 = vld [vmem:[#allocation4 + $0x128] sm:$0xff] }
 0x37d   :  { %v2448_v25 = vsel %vm2390_vm11, %v10466_v45, %v10770_v6  ;;  %v10774_v45 = vld [vmem:[#allocation28_spill] sm:$0xff] }
 0x37e   :  { %3695 = vmatmul.f32.gmra.mxu3 %v3287_v2  ;;  %v10768_v2 = vld [vmem:[#allocation71_spill] sm:$0xff]  ;;  %3746 = vmatpush.msra.mxu0 %v3424_v16  ;;  %v10470_v16 = vunpack.i.l.bf16 %v7745_v50 }
 0x37f   :  { %v10769_v12 = vpack.i.bf16 %v10767_v24, %v10768_v2  ;;  %v10772_v24 = vrot.slane %v7061_v20, 6  ;;  %v10773_v2 = vrot.slane %v10648_v37, 6 }
 0x380   :  { %3747 = vmatpush.msra.mxu0 %v3423_v10  ;;  %v2040_v10 = vsel %vm2017_vm10, %v7741_v34, %v8059_v41  ;;  %v3289_v34 = vsel %vm2621_vm12, %v7718_v59, %v10470_v16  ;;  %v10782_v41 = vld [vmem:[#allocation23_spill] sm:$0xff]  ;;  %v2042_v16 = vsel %vm2017_vm10, %v7810_v38, %v8104_v33 }
 0x381   :  { %3152 = vrot.lane.b32.xlu0 %v10648_v37, %s5601_s27  ;;  %v2446_v7 = vsel %vm2390_vm11, %v10773_v2, %v10772_v24  ;;  %v3420_v24 = vld [vmem:[#allocation4 + $0x118] sm:$0xff] }
 0x382   :  { %v8199_v62 = vpop.permute.xlu0 %5137  ;;  %v5246_v6 = vpack.i.bf16 %v2448_v25, %v2446_v7  ;;  %3748 = vmatpush.msra.mxu0 %v3422_v60  ;;  %v8234_v7 = vpop.f32.mrf.mxu1  ;;  %v10778_v25 = vrot.slane %v7414_v29, 4 }
 0x383   :  { %3126 = vrot.lane.b32.xlu2 %v7428_v51, %s5601_s27  ;;  %5147 = vrot.lane.b32.xlu1 %v10769_v12, %s5602_s19  ;;  %v3288_v12 = vsel %vm2621_vm12, %v7688_v49, %v10467_v21  ;;  %v10775_v21 = vld [vmem:[#allocation27_spill] sm:$0xff]  ;;  %10777 = vst [vmem:[#allocation65_spill] sm:$0xff] %v8234_v7 }
 0x384   :  { %v10776_v57 = vpack.i.bf16 %v10774_v45, %v10775_v21  ;;  %v10781_v21 = vrot.slane %v7371_v9, 4  ;;  %3749 = vmatpush.msra.mxu0 %v3421_v28  ;;  %v3418_v28 = vld [vmem:[#allocation4 + $0x108] sm:$0xff] }
 0x385   :  { %v8213_v23 = vpop.permute.xlu2 %5097 }
 0x386   :  { %10771 = vst [vmem:[#allocation66_spill] sm:$0xff] %v8213_v23  ;;  %3698 = vmatmul.f32.gmra.mxu3 %v3288_v12  ;;  %v10779_v12 = vrot.slane %v7368_v48, 4  ;;  %3750 = vmatpush.msra.mxu0 %v3420_v24 }
 0x388   :  { %v2293_v2 = vsel %vm318_vm3, %v10779_v12, %v10778_v25  ;;  %v8256_v25 = vmax.f32 %v10782_v41, %v2040_v10  ;;  %v10783_v12 = vld [vmem:[#allocation19_spill] sm:$0xff]  ;;  %v10786_v41 = vld [vmem:[#allocation21_spill] sm:$0xff] }
 0x389   :  { %5247 = vrot.lane.b32.xlu0 %v5246_v6, %s5602_s19  ;;  %v3419_v6 = vld [vmem:[#allocation4 + $0x110] sm:$0xff]  ;;  %v10787_v10 = vrot.slane %v10786_v41, 6 }
 0x38a   :  { %3751 = vmatpush.msra.mxu0 %v3419_v6  ;;  %v3460_v6 = vld [vmem:[#allocation4 + $0x258] sm:$0xff]  ;;  %v10791_v38 = vrot.slane %v8256_v25, 4 }
 0x38b   :  { %v8225_v32 = vpop.permute.xlu0 %5142  ;;  %5167 = vrot.lane.b32.xlu2 %v10776_v57, %s5600_s26  ;;  %3114 = vrot.lane.b32.xlu1 %v7290_v31, %s5601_s27  ;;  %v10780_v57 = vrot.slane %v7421_v43, 4 }
 0x38c   :  { %3752 = vmatpush.msra.mxu0 %v3418_v28  ;;  %3944 = vmatpush.msra.mxu1 %v3460_v6  ;;  %v10798_v6 = vrot.slane %v8017_v11, 6 }
 0x38d   :  { %v2295_v31 = vsel %vm318_vm3, %v10781_v21, %v10780_v57  ;;  %v1976_v45 = vpop.permute.xlu2 %1975 }
 0x38e   :  { %v2039_v60 = vsel %vm2017_vm10, %v7703_v15, %v1976_v45  ;;  %3701 = vmatmul.f32.gmra.mxu3 %v3289_v34  ;;  %v5251_v57 = vpack.i.bf16 %v2295_v31, %v2293_v2  ;;  %v10471_v15 = vrot.slane %v10728_v1, 2  ;;  %v2194_v2 = vrot.slane %v10704_v19, 2  ;;  %v3417_v31 = vld [vmem:[#allocation4 + $0x100] sm:$0xff] }
 0x38f   :  { %v8259_v7 = vmax.f32 %v10783_v12, %v2039_v60  ;;  %v10789_v45 = vrot.slane %v7428_v51, 6  ;;  %v10790_v34 = vrot.slane %v7421_v43, 6  ;;  %3753 = vmatpush.msra.mxu0 %v3417_v31 }
 0x390   :  { %v2199_v28 = vsel %vm200_vm2, %v2194_v2, %v10471_v15  ;;  %v8317_v15 = vpop.f32.mrf.mxu1 }
 0x391   :  { %5252 = vrot.lane.b32.xlu0 %v5251_v57, %s5600_s26  ;;  %v8262_v21 = vpop.f32.mrf.mxu3  ;;  %v2416_v12 = vsel %vm2390_vm11, %v10790_v34, %v10789_v45  ;;  %v10792_v33 = vrot.slane %v8259_v7, 4  ;;  %v10797_v31 = vrot.slane %v8259_v7, 6  ;;  %10800 = vst [vmem:[#allocation28_spill] sm:$0xff] %v8317_v15 }
 0x392   :  { %10784 = vst [vmem:[#allocation9_spill] sm:$0xff] %v8262_v21 }
 0x393   :  { %v8269_v60 = vpop.permute.xlu0 %3112  ;;  %3134 = vrot.lane.b32.xlu2 %v10692_v40, %s5601_s27  ;;  %3116 = vrot.lane.b32.xlu1 %v7368_v48, %s5601_s27  ;;  %v10788_v48 = vrot.slane %v7414_v29, 6  ;;  %v8301_v29 = vsel %vm318_vm3, %v10792_v33, %v10791_v38  ;;  %v8315_v34 = vsel %vm2390_vm11, %v10798_v6, %v10797_v31  ;;  %v10801_v33 = vunpack.i.h.bf16 %v7745_v50 }
 0x394   :  { %10785 = vst [vmem:[#allocation17_spill] sm:$0xff] %v8269_v60  ;;  %v8330_v60 = vmax.f32 %v7577_v13, %v2042_v16  ;;  %v10479_v13 = vunpack.i.l.bf16 %v7904_v36 }
 0x395   :  { %v2414_v24 = vsel %vm2390_vm11, %v10788_v48, %v10787_v10  ;;  %v1980_v57 = vpop.permute.xlu2 %1979  ;;  %10793 = vst [vmem:[#allocation18_spill] sm:$0xff] %v8301_v29  ;;  %v10794_v10 = vrot.slane %v7729_v53, 6  ;;  %v10795_v48 = vrot.slane %v7539_v18, 6  ;;  %v3290_v21 = vsel %vm2621_vm12, %v7825_v44, %v10801_v33 }
 0x396   :  { %10799 = vst [vmem:[#allocation71_spill] sm:$0xff] %v8315_v34  ;;  %v2041_v38 = vsel %vm2017_vm10, %v7771_v17, %v1980_v57  ;;  %3704 = vmatmul.f32.gmra.mxu3 %v3290_v21  ;;  %v5271_v6 = vpack.i.bf16 %v2416_v12, %v2414_v24  ;;  %v10802_v17 = vrot.slane %v10692_v40, 2  ;;  %v3471_v21 = vld [vmem:[#allocation4 + $0x2b0] sm:$0xff]  ;;  %v10478_v24 = vrot.slane %v8256_v25, 6 }
 0x397   :  { %v8308_v45 = vsel %vm2390_vm11, %v10795_v48, %v10794_v10  ;;  %v8333_v31 = vmax.f32 %v7555_v26, %v2041_v38  ;;  %v2044_v26 = vsel %vm2017_vm10, %v7946_v35, %v8130_v56  ;;  %v10804_v12 = vrot.slane %v6813_v14, 4  ;;  %4050 = vmatpush.msra.mxu3 %v3471_v21  ;;  %v10810_v21 = vld [vmem:[#allocation79_spill] sm:$0xff] }
 0x398   :  { %10796 = vst [vmem:[#allocation70_spill] sm:$0xff] %v8308_v45  ;;  %v2195_v57 = vsel %vm200_vm2, %v10802_v17, %v2194_v2  ;;  %v10473_v2 = vrot.slane %v8330_v60, 4  ;;  %v10806_v56 = vrot.slane %v6824_v5, 4  ;;  %v3454_v45 = vld [vmem:[#allocation4 + $0x228] sm:$0xff] }
 0x399   :  { %5272 = vrot.lane.b32.xlu0 %v5271_v6, %s5602_s19  ;;  %v8339_v33 = vpop.f32.mrf.mxu3  ;;  %v5186_v10 = vpack.i.bf16 %v2199_v28, %v2195_v57  ;;  %v10474_v15 = vrot.slane %v8333_v31, 4  ;;  %v10477_v48 = vrot.slane %v8333_v31, 6  ;;  %v10805_v28 = vrot.slane %v10786_v41, 4 }
 0x39a   :  { %10803 = vst [vmem:[#allocation27_spill] sm:$0xff] %v8339_v33  ;;  %v8379_v57 = vmax.f32 %v7594_v52, %v2044_v26  ;;  %v8394_v26 = vpop.f32.mrf.mxu1  ;;  %v10829_v33 = vrot.slane %v7061_v20, 4 }
 0x39b   :  { %v8347_v16 = vpop.permute.xlu0 %5162  ;;  %5187 = vrot.lane.b32.xlu2 %v5186_v10, %s5592_s30  ;;  %3122 = vrot.lane.b32.xlu1 %v7421_v43, %s5601_s27  ;;  %v2301_v38 = vsel %vm318_vm3, %v10805_v28, %v10804_v12  ;;  %v10807_v10 = vrot.slane %v7428_v51, 4  ;;  %v8369_v17 = vsel %vm318_vm3, %v10474_v15, %v10473_v2  ;;  %v8376_v14 = vsel %vm2390_vm11, %v10478_v24, %v10477_v48  ;;  %v10811_v28 = vld [vmem:[#allocation25_spill] sm:$0xff]  ;;  %v10813_v15 = vld [vmem:[#allocation26_spill] sm:$0xff] }
 0x39c   :  { %10808 = vst [vmem:[#allocation23_spill] sm:$0xff] %v8369_v17  ;;  %v3459_v24 = vld [vmem:[#allocation4 + $0x250] sm:$0xff]  ;;  %v10483_v2 = vrot.slane %v8330_v60, 6 }
 0x39d   :  { %v1984_v35 = vpop.permute.xlu2 %1983  ;;  %v2303_v6 = vsel %vm318_vm3, %v10807_v10, %v10806_v56  ;;  %10809 = vst [vmem:[#allocation19_spill] sm:$0xff] %v8376_v14  ;;  %v3291_v56 = vsel %vm2621_vm12, %v10811_v28, %v10479_v13  ;;  %3945 = vmatpush.msra.mxu1 %v3459_v24  ;;  %v3448_v24 = vld [vmem:[#allocation4 + $0x1f8] sm:$0xff]  ;;  %v10487_v14 = vrot.slane %v8070_v39, 4 }
 0x39e   :  { %v2043_v12 = vsel %vm2017_vm10, %v10810_v21, %v1984_v35  ;;  %3707 = vmatmul.f32.gmra.mxu3 %v3291_v56  ;;  %v5276_v48 = vpack.i.bf16 %v2303_v6, %v2301_v38  ;;  %10815 = vst [vmem:[#allocation21_spill] sm:$0xff] %v8394_v26  ;;  %v10480_v35 = vrot.slane %v7679_v46, 4  ;;  %v10817_v6 = vld [vmem:[#allocation39_spill] sm:$0xff]  ;;  %v10818_v56 = vld [vmem:[#allocation36_spill] sm:$0xff]  ;;  %3839 = vmatpush.msra.mxu2 %v3448_v24  ;;  %v10826_v24 = vunpack.i.h.bf16 %v7904_v36  ;;  %v10844_v10 = vld [vmem:[#allocation30_spill] sm:$0xff] }
 0x39f   :  { %v8390_v50 = vmax.f32 %v10813_v15, %v2043_v12  ;;  %v10819_v52 = vpack.i.bf16 %v10817_v6, %v10818_v56  ;;  %v10820_v12 = vrot.slane %v7688_v49, 4  ;;  %v3445_v36 = vld [vmem:[#allocation4 + $0x1e0] sm:$0xff] }
 0x3a1   :  { %5277 = vrot.lane.b32.xlu0 %v5276_v48, %s5600_s26  ;;  %v8398_v21 = vpop.f32.mrf.mxu3  ;;  %v3447_v48 = vld [vmem:[#allocation4 + $0x1f0] sm:$0xff]  ;;  %v2335_v26 = vsel %vm318_vm3, %v10480_v35, %v10820_v12  ;;  %v10822_v6 = vrot.slane %v8390_v50, 4  ;;  %v10824_v15 = vrot.slane %v8390_v50, 6 }
 0x3a2   :  { %10816 = vst [vmem:[#allocation79_spill] sm:$0xff] %v8398_v21  ;;  %3840 = vmatpush.msra.mxu2 %v3447_v48  ;;  %v8457_v48 = vpop.f32.mrf.mxu1 }
 0x3a3   :  { %v8403_v38 = vpop.permute.xlu0 %3120  ;;  %5192 = vrot.lane.b32.xlu2 %v10819_v52, %s5600_s26  ;;  %3124 = vrot.lane.b32.xlu1 %v10786_v41, %s5601_s27  ;;  %v10821_v52 = vrot.slane %v8379_v57, 4  ;;  %v8433_v21 = vsel %vm2390_vm11, %v10483_v2, %v10824_v15  ;;  %v10831_v15 = vld [vmem:[#allocation33_spill] sm:$0xff]  ;;  %10833 = vst [vmem:[#allocation36_spill] sm:$0xff] %v8457_v48 }
 0x3a4   :  { %10825 = vst [vmem:[#allocation26_spill] sm:$0xff] %v8433_v21 }
 0x3a5   :  { %v8424_v41 = vsel %vm318_vm3, %v10822_v6, %v10821_v52  ;;  %v1988_v56 = vpop.permute.xlu2 %1987  ;;  %v3292_v52 = vsel %vm2621_vm12, %v7955_v0, %v10826_v24  ;;  %v10827_v6 = vld [vmem:[#allocation52_spill] sm:$0xff] }
 0x3a6   :  { %10823 = vst [vmem:[#allocation25_spill] sm:$0xff] %v8424_v41  ;;  %v2045_v12 = vsel %vm2017_vm10, %v8057_v27, %v1988_v56  ;;  %v10828_v35 = vrot.slane %v10827_v6, 4  ;;  %3710 = vmatmul.f32.gmra.mxu3 %v3292_v52  ;;  %v3446_v56 = vld [vmem:[#allocation4 + $0x1e8] sm:$0xff] }
 0x3a7   :  { %v8449_v2 = vmax.f32 %v10831_v15, %v2045_v12  ;;  %3841 = vmatpush.msra.mxu2 %v3446_v56  ;;  %v3444_v15 = vld [vmem:[#allocation4 + $0x1d8] sm:$0xff]  ;;  %v10836_v41 = vld [vmem:[#allocation64_spill] sm:$0xff]  ;;  %v2202_v12 = vrot.slane %v10741_v22, 2 }
 0x3a8   :  { %v2333_v13 = vsel %vm318_vm3, %v10829_v33, %v10828_v35  ;;  %v3458_v35 = vld [vmem:[#allocation4 + $0x248] sm:$0xff] }
 0x3a9   :  { %v5291_v27 = vpack.i.bf16 %v2335_v26, %v2333_v13  ;;  %v8453_v24 = vpop.f32.mrf.mxu3  ;;  %v10488_v33 = vrot.slane %v8449_v2, 4  ;;  %3842 = vmatpush.msra.mxu2 %v3445_v36  ;;  %v10837_v36 = vrot.slane %v10836_v41, 4  ;;  %v3443_v13 = vld [vmem:[#allocation4 + $0x1d0] sm:$0xff]  ;;  %v10839_v48 = vrot.slane %v8449_v2, 6  ;;  %3946 = vmatpush.msra.mxu1 %v3458_v35  ;;  %v3441_v35 = vld [vmem:[#allocation4 + $0x1c0] sm:$0xff] }
 0x3aa   :  { %10832 = vst [vmem:[#allocation39_spill] sm:$0xff] %v8453_v24  ;;  %v10843_v24 = vrot.slane %v10749_v58, 2  ;;  %v10503_v41 = vrot.slane %v7679_v46, 2 }
 0x3ab   :  { %5292 = vrot.lane.b32.xlu0 %v5291_v27, %s5600_s26  ;;  %v8462_v26 = vpop.permute.xlu0 %3128  ;;  %3142 = vrot.lane.b32.xlu2 %v10728_v1, %s5601_s27  ;;  %v10834_v27 = vrot.slane %v7244_v8, 4  ;;  %v8480_v52 = vsel %vm318_vm3, %v10488_v33, %v10837_v36  ;;  %v10845_v36 = vunpack.i.l.bf16 %v10844_v10 }
 0x3ac   :  { %3130 = vrot.lane.b32.xlu1 %v6824_v5, %s5601_s27  ;;  %10838 = vst [vmem:[#allocation33_spill] sm:$0xff] %v8480_v52  ;;  %3843 = vmatpush.msra.mxu2 %v3444_v15  ;;  %v10842_v15 = vunpack.i.l.bf16 %v8213_v23  ;;  %v10495_v52 = vunpack.i.l.bf16 %v8157_v47 }
 0x3ad   :  { %v8473_v56 = vsel %vm318_vm3, %v10487_v14, %v10834_v27  ;;  %v10840_v27 = vrot.slane %v8379_v57, 6  ;;  %v5128_v30 = vpop.permute.xlu2 %5127 }
 0x3ae   :  { %10835 = vst [vmem:[#allocation52_spill] sm:$0xff] %v8473_v56  ;;  %v5129_v33 = vunpack.i.l.bf16 %v5128_v30  ;;  %v3293_v21 = vsel %vm2621_vm12, %v8017_v11, %v10842_v15  ;;  %v2207_v56 = vsel %vm200_vm2, %v2202_v12, %v10843_v24  ;;  %3844 = vmatpush.msra.mxu2 %v3443_v13  ;;  %v5130_v17 = vunpack.i.h.bf16 %v5128_v30  ;;  %v3456_v30 = vld [vmem:[#allocation4 + $0x238] sm:$0xff] }
 0x3af   :  { %v8490_v14 = vsel %vm2390_vm11, %v10840_v27, %v10839_v48  ;;  %3713 = vmatmul.f32.gmra.mxu3 %v3293_v21  ;;  %v3442_v48 = vld [vmem:[#allocation4 + $0x1c8] sm:$0xff] }
 0x3b0   :  { %10841 = vst [vmem:[#allocation86_spill] sm:$0xff] %v8490_v14  ;;  %v3470_v27 = vld [vmem:[#allocation4 + $0x2a8] sm:$0xff]  ;;  %v2622_v4 = vsel %vm2621_vm12, %v10845_v36, %v5129_v33  ;;  %v10846_v14 = vrot.slane %v10728_v1, 2  ;;  %3845 = vmatpush.msra.mxu2 %v3442_v48  ;;  %v8520_v36 = vpop.f32.mrf.mxu1  ;;  %v10851_v48 = vrot.slane %v7688_v49, 6 }
 0x3b1   :  { %v3301_v21 = vsel %vm2820_vm13, %v2622_v4, %v10495_v52  ;;  %4051 = vmatpush.msra.mxu3 %v3470_v27  ;;  %v8513_v13 = vpop.f32.mrf.mxu3  ;;  %v10848_v1 = vld [vmem:[#allocation24_spill] sm:$0xff]  ;;  %v10499_v4 = vunpack.i.h.bf16 %v8213_v23  ;;  %v10852_v52 = vld [vmem:[#allocation55_spill] sm:$0xff] }
 0x3b2   :  { %v2203_v15 = vsel %vm200_vm2, %v10846_v14, %v2202_v12  ;;  %10847 = vst [vmem:[#allocation30_spill] sm:$0xff] %v8513_v13  ;;  %3754 = vmatmul.f32.vlgmr.msra.gmra.mxu0 %v3301_v21  ;;  %3846 = vmatpush.msra.mxu2 %v3441_v35  ;;  %v3457_v14 = vld [vmem:[#allocation4 + $0x240] sm:$0xff]  ;;  %v3440_v12 = vld [vmem:[#allocation4 + $0x1b8] sm:$0xff]  ;;  %v3439_v35 = vld [vmem:[#allocation4 + $0x1b0] sm:$0xff]  ;;  %v10853_v13 = vrot.slane %v10852_v52, 6 }
 0x3b3   :  { %3160 = vrot.lane.b32.xlu0 %v10827_v6, %s5601_s27  ;;  %v5211_v24 = vpack.i.bf16 %v2207_v56, %v2203_v15  ;;  %v8515_v33 = vpop.permute.xlu0 %5172  ;;  %10849 = vst [vmem:[#allocation24_spill] sm:$0xff] %v8520_v36  ;;  %v10850_v56 = vrot.slane %v7718_v59, 6  ;;  %3947 = vmatpush.msra.mxu1 %v3457_v14  ;;  %v3455_v21 = vld [vmem:[#allocation4 + $0x230] sm:$0xff]  ;;  %v10854_v36 = vrot.slane %v10827_v6, 6  ;;  %v8540_v14 = vpop.permute.xlu1 %5102  ;;  %v3438_v23 = vld [vmem:[#allocation4 + $0x1a8] sm:$0xff] }
 0x3b4   :  { %3132 = vrot.lane.b32.xlu1 %v10848_v1, %s5601_s27  ;;  %3847 = vmatpush.msra.mxu2 %v3440_v12  ;;  %v3294_v1 = vsel %vm2621_vm12, %v8259_v7, %v10499_v4  ;;  %10855 = vst [vmem:[#allocation55_spill] sm:$0xff] %v8540_v14  ;;  %v10501_v6 = vunpack.i.l.bf16 %v8540_v14 }
 0x3b5   :  { %5212 = vrot.lane.b32.xlu2 %v5211_v24, %s5592_s30  ;;  %v2456_v27 = vsel %vm2390_vm11, %v10851_v48, %v10850_v56  ;;  %v8528_v15 = vpop.permute.xlu2 %5132  ;;  %v2454_v56 = vsel %vm2390_vm11, %v10854_v36, %v10853_v13  ;;  %3948 = vmatpush.msra.mxu1 %v3456_v30  ;;  %v10856_v48 = vunpack.i.h.bf16 %v10844_v10  ;;  %v3437_v36 = vld [vmem:[#allocation4 + $0x1a0] sm:$0xff] }
 0x3b6   :  { %3848 = vmatpush.msra.mxu2 %v3439_v35  ;;  %v5311_v12 = vpack.i.bf16 %v2456_v27, %v2454_v56  ;;  %v10857_v4 = vunpack.i.l.bf16 %v8528_v15  ;;  %v10860_v27 = vld [vmem:[#allocation46_spill] sm:$0xff]  ;;  %v10863_v35 = vld [vmem:[#allocation31_spill] sm:$0xff]  ;;  %v10865_v56 = vrot.slane %v7825_v44, 4 }
 0x3b7   :  { %3716 = vmatmul.f32.gmra.mxu3 %v3294_v1  ;;  %v2623_v24 = vsel %vm2621_vm12, %v10856_v48, %v5130_v17  ;;  %3949 = vmatpush.msra.mxu1 %v3455_v21  ;;  %v10859_v17 = vld [vmem:[#allocation47_spill] sm:$0xff]  ;;  %v3452_v1 = vld [vmem:[#allocation4 + $0x218] sm:$0xff]  ;;  %v3435_v48 = vld [vmem:[#allocation4 + $0x190] sm:$0xff] }
 0x3b8   :  { %v3302_v34 = vsel %vm2820_vm13, %v2623_v24, %v10857_v4  ;;  %3849 = vmatpush.msra.mxu2 %v3438_v23  ;;  %v10861_v30 = vpack.i.bf16 %v10859_v17, %v10860_v27  ;;  %v10862_v4 = vld [vmem:[#allocation34_spill] sm:$0xff]  ;;  %v3453_v21 = vld [vmem:[#allocation4 + $0x220] sm:$0xff]  ;;  %v3451_v17 = vld [vmem:[#allocation4 + $0x210] sm:$0xff]  ;;  %v8569_v27 = vpop.f32.mrf.mxu1 }
 0x3b9   :  { %v8550_v13 = vpop.f32.mrf.mxu3  ;;  %3950 = vmatpush.msra.mxu1 %v3454_v45  ;;  %v10864_v23 = vpack.i.bf16 %v10862_v4, %v10863_v35  ;;  %v3436_v24 = vld [vmem:[#allocation4 + $0x198] sm:$0xff]  ;;  %v10866_v45 = vrot.slane %v7718_v59, 4  ;;  %10867 = vst [vmem:[#allocation47_spill] sm:$0xff] %v8569_v27  ;;  %v10868_v4 = vld [vmem:[#allocation57_spill] sm:$0xff]  ;;  %v10502_v27 = vunpack.i.h.bf16 %v8540_v14 }
 0x3ba   :  { %10858 = vst [vmem:[#allocation87_spill] sm:$0xff] %v8550_v13  ;;  %3757 = vmatmul.f32.gmra.mxu0 %v3302_v34  ;;  %3850 = vmatpush.msra.mxu2 %v3437_v36  ;;  %v10869_v35 = vrot.slane %v10868_v4, 4 }
 0x3bb   :  { %5312 = vrot.lane.b32.xlu0 %v5311_v12, %s5602_s19  ;;  %v8552_v10 = vpop.permute.xlu0 %5177  ;;  %v2343_v34 = vsel %vm318_vm3, %v10866_v45, %v10865_v56  ;;  %3951 = vmatpush.msra.mxu1 %v3453_v21  ;;  %v3434_v21 = vld [vmem:[#allocation4 + $0x188] sm:$0xff]  ;;  %v3433_v45 = vld [vmem:[#allocation4 + $0x180] sm:$0xff] }
 0x3bc   :  { %5182 = vrot.lane.b32.xlu1 %v10864_v23, %s5602_s19  ;;  %v10870_v23 = vrot.slane %v10852_v52, 4  ;;  %3851 = vmatpush.msra.mxu2 %v3436_v24  ;;  %v3450_v56 = vld [vmem:[#allocation4 + $0x208] sm:$0xff]  ;;  %v2210_v24 = vrot.slane %v8138_v61, 2 }
 0x3bd   :  { %5217 = vrot.lane.b32.xlu2 %v10861_v30, %s5600_s26  ;;  %v8567_v12 = vpop.permute.xlu2 %3110  ;;  %v3295_v30 = vsel %vm2621_vm12, %v8256_v25, %v10501_v6  ;;  %3952 = vmatpush.msra.mxu1 %v3452_v1  ;;  %v3469_v1 = vld [vmem:[#allocation4 + $0x2a0] sm:$0xff] }
 0x3be   :  { %v2341_v13 = vsel %vm318_vm3, %v10870_v23, %v10869_v35  ;;  %3852 = vmatpush.msra.mxu2 %v3435_v48  ;;  %4052 = vmatpush.msra.mxu3 %v3469_v1  ;;  %v10876_v1 = vrot.slane %v10749_v58, 2 }
 0x3bf   :  { %3719 = vmatmul.f32.gmra.mxu3 %v3295_v30  ;;  %v5316_v36 = vpack.i.bf16 %v2343_v34, %v2341_v13  ;;  %3953 = vmatpush.msra.mxu1 %v3451_v17  ;;  %v3449_v13 = vld [vmem:[#allocation4 + $0x200] sm:$0xff]  ;;  %v3296_v17 = vsel %vm2621_vm12, %v8333_v31, %v10502_v27  ;;  %v2215_v30 = vsel %vm200_vm2, %v2210_v24, %v10503_v41 }
 0x3c0   :  { %3853 = vmatpush.msra.mxu2 %v3434_v21  ;;  %v8602_v21 = vpop.f32.mrf.mxu1  ;;  %v2211_v27 = vsel %vm200_vm2, %v10876_v1, %v2210_v24  ;;  %v3467_v24 = vld [vmem:[#allocation4 + $0x290] sm:$0xff]  ;;  %v10880_v1 = vld [vmem:[#allocation60_spill] sm:$0xff] }
 0x3c1   :  { %v8582_v6 = vpop.f32.mrf.mxu3  ;;  %3954 = vmatpush.msra.mxu1 %v3450_v56  ;;  %10873 = vst [vmem:[#allocation31_spill] sm:$0xff] %v8602_v21  ;;  %v10874_v56 = vld [vmem:[#allocation32_spill] sm:$0xff] }
 0x3c2   :  { %10871 = vst [vmem:[#allocation46_spill] sm:$0xff] %v8582_v6  ;;  %3854 = vmatpush.msra.mxu2 %v3433_v45  ;;  %v10875_v45 = vunpack.i.l.bf16 %v10874_v56  ;;  %v10885_v55 = vunpack.i.h.bf16 %v10874_v56 }
 0x3c3   :  { %5317 = vrot.lane.b32.xlu0 %v5316_v36, %s5600_s26  ;;  %v8585_v35 = vpop.permute.xlu0 %3136  ;;  %3955 = vmatpush.msra.mxu1 %v3449_v13  ;;  %v3468_v36 = vld [vmem:[#allocation4 + $0x298] sm:$0xff] }
 0x3c4   :  { %3138 = vrot.lane.b32.xlu1 %v10704_v19, %s5601_s27  ;;  %v10506_v19 = vunpack.i.l.bf16 %v8225_v32  ;;  %4053 = vmatpush.msra.mxu3 %v3468_v36  ;;  %v10878_v36 = vrot.slane %v10811_v28, 6 }
 0x3c5   :  { %3150 = vrot.lane.b32.xlu2 %v10749_v58, %s5601_s27  ;;  %v5153_v34 = vpop.permute.xlu2 %5152 }
 0x3c6   :  { %v5154_v48 = vunpack.i.l.bf16 %v5153_v34  ;;  %v8600_v23 = vpop.permute.xlu1 %5107  ;;  %v5155_v14 = vunpack.i.h.bf16 %v5153_v34  ;;  %4054 = vmatpush.msra.mxu3 %v3467_v24  ;;  %v10884_v24 = vrot.slane %v8138_v61, 4 }
 0x3c7   :  { %10872 = vst [vmem:[#allocation34_spill] sm:$0xff] %v8600_v23  ;;  %3722 = vmatmul.f32.gmra.mxu3 %v3296_v17  ;;  %v5236_v17 = vpack.i.bf16 %v2215_v30, %v2211_v27  ;;  %v10509_v6 = vunpack.i.l.bf16 %v8600_v23  ;;  %v3466_v30 = vld [vmem:[#allocation4 + $0x288] sm:$0xff] }
 0x3c8   :  { %v2624_v13 = vsel %vm2621_vm12, %v10875_v45, %v5154_v48  ;;  %v10879_v45 = vrot.slane %v7825_v44, 6  ;;  %4055 = vmatpush.msra.mxu3 %v3466_v30  ;;  %v2625_v29 = vsel %vm2621_vm12, %v10885_v55, %v5155_v14  ;;  %v2178_v55 = vrot.slane %v7421_v43, 2 }
 0x3c9   :  { %v3303_v41 = vsel %vm2820_vm13, %v2624_v13, %v10506_v19  ;;  %v8616_v21 = vpop.f32.mrf.mxu3  ;;  %v10882_v19 = vrot.slane %v10868_v4, 6 }
 0x3ca   :  { %10877 = vst [vmem:[#allocation57_spill] sm:$0xff] %v8616_v21  ;;  %3760 = vmatmul.f32.gmra.mxu0 %v3303_v41  ;;  %v2464_v27 = vsel %vm2390_vm11, %v10879_v45, %v10878_v36  ;;  %v3465_v41 = vld [vmem:[#allocation4 + $0x280] sm:$0xff]  ;;  %v10883_v36 = vrot.slane %v7679_v46, 4 }
 0x3cb   :  { %3168 = vrot.lane.b32.xlu0 %v10868_v4, %s5601_s27  ;;  %v8621_v48 = vpop.permute.xlu0 %5197  ;;  %v10887_v4 = vrot.slane %v7061_v20, 4  ;;  %4056 = vmatpush.msra.mxu3 %v3465_v41 }
 0x3cc   :  { %3140 = vrot.lane.b32.xlu1 %v10643_v63, %s5601_s27  ;;  %v3297_v63 = vsel %vm2621_vm12, %v8330_v60, %v10509_v6  ;;  %v2331_v45 = vsel %vm318_vm3, %v10884_v24, %v10883_v36 }
 0x3cd   :  { %5237 = vrot.lane.b32.xlu2 %v5236_v17, %s5592_s30  ;;  %v8628_v13 = vpop.permute.xlu2 %5157  ;;  %v10881_v17 = vrot.slane %v10880_v1, 6 }
 0x3ce   :  { %v10886_v6 = vunpack.i.l.bf16 %v8628_v13 }
 0x3cf   :  { %v2462_v21 = vsel %vm2390_vm11, %v10882_v19, %v10881_v17  ;;  %3725 = vmatmul.f32.gmra.mxu3 %v3297_v63  ;;  %v10888_v19 = vrot.slane %v10648_v37, 4  ;;  %v8657_v63 = vpop.f32.mrf.mxu1  ;;  %v10892_v37 = vld [vmem:[#allocation40_spill] sm:$0xff] }
 0x3d0   :  { %v5336_v34 = vpack.i.bf16 %v2464_v27, %v2462_v21  ;;  %v3304_v8 = vsel %vm2820_vm13, %v2625_v29, %v10886_v6  ;;  %10889 = vst [vmem:[#allocation32_spill] sm:$0xff] %v8657_v63  ;;  %v10513_v21 = vunpack.i.h.bf16 %v8600_v23  ;;  %v10891_v29 = vld [vmem:[#allocation41_spill] sm:$0xff]  ;;  %v10894_v6 = vrot.slane %v7955_v0, 4 }
 0x3d1   :  { %v2329_v17 = vsel %vm318_vm3, %v10888_v19, %v10887_v4  ;;  %v8660_v56 = vpop.f32.mrf.mxu3  ;;  %v10893_v14 = vpack.i.bf16 %v10891_v29, %v10892_v37  ;;  %v10895_v27 = vrot.slane %v10811_v28, 4  ;;  %v10898_v4 = vrot.slane %v10880_v1, 4  ;;  %v10917_v63 = vld [vmem:[#allocation49_spill] sm:$0xff] }
 0x3d2   :  { %v5241_v30 = vpack.i.bf16 %v2331_v45, %v2329_v17  ;;  %10890 = vst [vmem:[#allocation60_spill] sm:$0xff] %v8660_v56  ;;  %3763 = vmatmul.f32.gmra.mxu0 %v3304_v8  ;;  %v3298_v24 = vsel %vm2621_vm12, %v8390_v50, %v10513_v21  ;;  %v10897_v45 = vrot.slane %v7548_v54, 4  ;;  %v10899_v17 = vrot.slane %v7371_v9, 2 }
 0x3d3   :  { %5337 = vrot.lane.b32.xlu0 %v5336_v34, %s5602_s19  ;;  %v2351_v41 = vsel %vm318_vm3, %v10895_v27, %v10894_v6  ;;  %v2182_v34 = vrot.slane %v7428_v51, 2  ;;  %v8678_v43 = vpop.permute.xlu0 %5202  ;;  %v5120_v27 = vunpack.i.h.bf16 %v8157_v47  ;;  %v10910_v21 = vrot.slane %v7548_v54, 6 }
 0x3d4   :  { %5207 = vrot.lane.b32.xlu1 %v10893_v14, %s5602_s19  ;;  %v2349_v19 = vsel %vm318_vm3, %v10898_v4, %v10897_v45  ;;  %v2179_v51 = vsel %vm200_vm2, %v10899_v17, %v2178_v55 }
 0x3d5   :  { %5242 = vrot.lane.b32.xlu2 %v5241_v30, %s5600_s26  ;;  %v8674_v36 = vpop.permute.xlu2 %3118  ;;  %v8676_v8 = vpop.permute.xlu1 %5112  ;;  %v2183_v30 = vsel %vm200_vm2, %v2178_v55, %v2182_v34  ;;  %v5341_v29 = vpack.i.bf16 %v2351_v41, %v2349_v19  ;;  %v10902_v19 = vunpack.i.l.bf16 %v8157_v47  ;;  %v10913_v47 = vrot.slane %v10749_v58, 6 }
 0x3d6   :  { %10896 = vst [vmem:[#allocation41_spill] sm:$0xff] %v8676_v8  ;;  %v5261_v37 = vpack.i.bf16 %v2183_v30, %v2179_v51  ;;  %v10512_v14 = vunpack.i.l.bf16 %v8676_v8 }
 0x3d7   :  { %3728 = vmatmul.f32.gmra.mxu3 %v3298_v24  ;;  %v8701_v9 = vpop.f32.mrf.mxu1  ;;  %v2821_v17 = vsel %vm2820_vm13, %v10902_v19, %v5120_v27  ;;  %v10907_v19 = vrot.slane %v8017_v11, 6 }
 0x3d8   :  { %10901 = vst [vmem:[#allocation88_spill] sm:$0xff] %v8701_v9  ;;  %v3299_v4 = vsel %vm2621_vm12, %v8379_v57, %v10512_v14  ;;  %v5139_v9 = vunpack.i.l.bf16 %v8199_v62 }
 0x3d9   :  { %v8695_v6 = vpop.f32.mrf.mxu3 }
 0x3da   :  { %10900 = vst [vmem:[#allocation40_spill] sm:$0xff] %v8695_v6 }
 0x3db   :  { %5342 = vrot.lane.b32.xlu0 %v5341_v29, %s5600_s26  ;;  %v5135_v29 = vunpack.i.h.bf16 %v8528_v15 }
 0x3dc   :  { %3146 = vrot.lane.b32.xlu1 %v10741_v22, %s5601_s27  ;;  %v8712_v22 = vpop.permute.xlu0 %3144 }
 0x3dd   :  { %5262 = vrot.lane.b32.xlu2 %v5261_v37, %s5592_s30  ;;  %v8703_v45 = vpop.permute.xlu2 %3126  ;;  %v5123_v55 = vpop.permute.xlu1 %5122 }
 0x3de   :  { %v5125_v41 = vunpack.i.h.bf16 %v5123_v55  ;;  %v5124_v24 = vunpack.i.l.bf16 %v5123_v55  ;;  %v10904_v55 = vld [vmem:[#allocation72_spill] sm:$0xff] }
 0x3df   :  { %3731 = vmatmul.f32.gmra.mxu3 %v3299_v4  ;;  %v10905_v4 = vld [vmem:[#allocation22_spill] sm:$0xff] }
 0x3e0   :  { %v3020_v51 = vsel %vm3019_vm15, %v5124_v24, %v5125_v41  ;;  %v3329_v30 = vsel %vm3019_vm15, %v2821_v17, %v5124_v24  ;;  %v10906_v41 = vpack.i.bf16 %v10904_v55, %v10905_v4  ;;  %v2186_v24 = vrot.slane %v6824_v5, 2 }
 0x3e1   :  { %3855 = vmatmul.f32.vlgmr.msra.gmra.mxu2 %v3329_v30  ;;  %v3357_v37 = vsel %vm3216_vm14, %v3020_v51, %v8183_v3  ;;  %v8722_v27 = vpop.f32.mrf.mxu3  ;;  %v10908_v17 = vrot.slane %v7955_v0, 6  ;;  %v10911_v4 = vunpack.i.l.bf16 %v8528_v15  ;;  %v10915_v15 = vunpack.i.h.bf16 %v8676_v8 }
 0x3e2   :  { %10903 = vst [vmem:[#allocation89_spill] sm:$0xff] %v8722_v27  ;;  %3956 = vmatmul.f32.vlgmr.msra.gmra.mxu1 %v3357_v37  ;;  %v10909_v37 = vrot.slane %v7539_v18, 6  ;;  %v2187_v5 = vsel %vm200_vm2, %v2182_v34, %v2186_v24 }
 0x3e3   :  { %3176 = vrot.lane.b32.xlu0 %v7548_v54, %s5601_s27  ;;  %v2472_v51 = vsel %vm2390_vm11, %v10908_v17, %v10907_v19  ;;  %v8752_v17 = vpop.f32.mrf.mxu1 }
 0x3e4   :  { %3148 = vrot.lane.b32.xlu1 %v6964_v42, %s5601_s27  ;;  %v2470_v55 = vsel %vm2390_vm11, %v10910_v21, %v10909_v37  ;;  %v2822_v42 = vsel %vm2820_vm13, %v10911_v4, %v5135_v29  ;;  %10914 = vst [vmem:[#allocation72_spill] sm:$0xff] %v8752_v17  ;;  %v3300_v29 = vsel %vm2621_vm12, %v8449_v2, %v10915_v15  ;;  %v5140_v17 = vunpack.i.h.bf16 %v8199_v62 }
 0x3e5   :  { %5267 = vrot.lane.b32.xlu2 %v10906_v41, %s5600_s26  ;;  %v8736_v30 = vpop.permute.xlu2 %5167  ;;  %v3107_v14 = vpop.permute.xlu1 %3106  ;;  %v10912_v41 = vrot.slane %v8138_v61, 6  ;;  %v5361_v37 = vpack.i.bf16 %v2472_v51, %v2470_v55  ;;  %v3330_v58 = vsel %vm3019_vm15, %v2822_v42, %v5139_v9  ;;  %v10918_v51 = vunpack.i.l.bf16 %v8515_v33 }
 0x3e6   :  { %v5170_v54 = vunpack.i.h.bf16 %v8736_v30  ;;  %v10514_v21 = vunpack.i.l.bf16 %v8736_v30  ;;  %v10920_v62 = vrot.slane %v8259_v7, 4  ;;  %v10921_v42 = vrot.slane %v8017_v11, 4 }
 0x3e7   :  { %v2444_v19 = vsel %vm2390_vm11, %v10913_v47, %v10912_v41  ;;  %3734 = vmatmul.f32.gmra.mxu3 %v3300_v29  ;;  %v10916_v47 = vrot.slane %v10692_v40, 2  ;;  %v8777_v40 = vpop.permute.xlu0 %5222  ;;  %v3217_v29 = vsel %vm3216_vm14, %v8183_v3, %v3107_v14  ;;  %v5145_v3 = vunpack.i.h.bf16 %v8225_v32 }
 0x3e8   :  { %v2828_v41 = vsel %vm2820_vm13, %v10514_v21, %v5170_v54  ;;  %v5231_v34 = vpack.i.bf16 %v2444_v19, %v10917_v63  ;;  %v2359_v63 = vsel %vm318_vm3, %v10921_v42, %v10920_v62  ;;  %v3021_v54 = vsel %vm3019_vm15, %v5139_v9, %v5140_v17 }
 0x3e9   :  { %v2191_v4 = vsel %vm200_vm2, %v2186_v24, %v10916_v47  ;;  %3858 = vmatmul.f32.gmra.mxu2 %v3330_v58  ;;  %v8775_v55 = vsel %vm3019_vm15, %v2828_v41, %v10918_v51  ;;  %v8779_v24 = vpop.f32.mrf.mxu3  ;;  %v10922_v58 = vrot.slane %v7729_v53, 4  ;;  %v10515_v9 = vrot.slane %v7718_v59, 2 }
 0x3ea   :  { %v5286_v15 = vpack.i.bf16 %v2191_v4, %v2187_v5  ;;  %10919 = vst [vmem:[#allocation22_spill] sm:$0xff] %v8779_v24  ;;  %v2218_v14 = vrot.slane %v7688_v49, 2  ;;  %v10927_v21 = vrot.slane %v7679_v46, 2 }
 0x3eb   :  { %5362 = vrot.lane.b32.xlu0 %v5361_v37, %s5602_s19  ;;  %v8800_v41 = vpop.f32.mrf.mxu1 }
 0x3ec   :  { %5232 = vrot.lane.b32.xlu1 %v5231_v34, %s5602_s19  ;;  %v10923_v34 = vrot.slane %v7539_v18, 4  ;;  %10924 = vst [vmem:[#allocation49_spill] sm:$0xff] %v8800_v41  ;;  %v2223_v42 = vsel %vm200_vm2, %v2218_v14, %v10515_v9  ;;  %v2219_v9 = vsel %vm200_vm2, %v10927_v21, %v2218_v14 }
 0x3ed   :  { %5287 = vrot.lane.b32.xlu2 %v5286_v15, %s5592_s30  ;;  %v8788_v5 = vpop.permute.xlu2 %3134  ;;  %v3109_v19 = vpop.permute.xlu1 %3108 }
 0x3ee   :  { %v3358_v37 = vsel %vm3216_vm14, %v3021_v54, %v3109_v19  ;;  %v2357_v47 = vsel %vm318_vm3, %v10923_v34, %v10922_v58  ;;  %v5160_v58 = vunpack.i.h.bf16 %v8628_v13 }
 0x3ef   :  { %4788 = vmatmul.msk.f32.vlgmr.msra.gmra.mxu3 %vm3479_vm0, %v3217_v29  ;;  %3959 = vmatmul.f32.gmra.mxu1 %v3358_v37  ;;  %v5366_v4 = vpack.i.bf16 %v2359_v63, %v2357_v47  ;;  %v8812_v15 = vpop.permute.xlu0 %5227  ;;  %v3218_v63 = vsel %vm3216_vm14, %v3109_v19, %v8567_v12  ;;  %v10928_v12 = vld [vmem:[#allocation61_spill] sm:$0xff] }
 0x3f0   :  { %v10929_v19 = vunpack.i.l.bf16 %v10928_v12 }
 0x3f1   :  { %v8804_v17 = vpop.f32.mrf.mxu3 }
 0x3f2   :  { %10925 = vst [vmem:[#allocation90_spill] sm:$0xff] %v8804_v17  ;;  %v5180_v17 = vunpack.i.h.bf16 %v8552_v10 }
 0x3f3   :  { %5367 = vrot.lane.b32.xlu0 %v5366_v4, %s5600_s26  ;;  %v8842_v21 = vpop.f32.mrf.mxu1 }
 0x3f4   :  { %3154 = vrot.lane.b32.xlu1 %v8138_v61, %s5601_s27  ;;  %v10926_v61 = vunpack.i.l.bf16 %v8225_v32  ;;  %v10930_v32 = vld [vmem:[#allocation17_spill] sm:$0xff]  ;;  %10932 = vst [vmem:[#allocation61_spill] sm:$0xff] %v8842_v21 }
 0x3f5   :  { %3158 = vrot.lane.b32.xlu2 %v7679_v46, %s5601_s27  ;;  %v5188_v51 = vpop.permute.xlu2 %5187  ;;  %v5148_v62 = vpop.permute.xlu1 %5147 }
 0x3f6   :  { %v5189_v54 = vunpack.i.l.bf16 %v5188_v51  ;;  %v5150_v29 = vunpack.i.h.bf16 %v5148_v62  ;;  %v5149_v37 = vunpack.i.l.bf16 %v5148_v62  ;;  %v2823_v34 = vsel %vm2820_vm13, %v10926_v61, %v5145_v3  ;;  %v10935_v61 = vld [vmem:[#allocation73_spill] sm:$0xff] }
 0x3f7   :  { %4789 = vmatmul.msk.f32.gmra.mxu3 %vm3479_vm0, %v3218_v63  ;;  %v5301_v63 = vpack.i.bf16 %v2223_v42, %v2219_v9  ;;  %v10937_v9 = vrot.slane %v8256_v25, 6  ;;  %v10938_v42 = vrot.slane %v8259_v7, 6 }
 0x3f8   :  { %v3331_v47 = vsel %vm3019_vm15, %v2823_v34, %v5149_v37  ;;  %v3022_v4 = vsel %vm3019_vm15, %v5149_v37, %v5150_v29  ;;  %v2630_v62 = vsel %vm2621_vm12, %v10929_v19, %v5189_v54  ;;  %v10931_v29 = vunpack.i.l.bf16 %v8552_v10  ;;  %v10934_v37 = vld [vmem:[#allocation74_spill] sm:$0xff] }
 0x3f9   :  { %3861 = vmatmul.f32.gmra.mxu2 %v3331_v47  ;;  %v3359_v3 = vsel %vm3216_vm14, %v3022_v4, %v10930_v32  ;;  %v8844_v14 = vpop.f32.mrf.mxu3  ;;  %v5190_v54 = vunpack.i.h.bf16 %v5188_v51  ;;  %v10936_v34 = vpack.i.bf16 %v10934_v37, %v10935_v61  ;;  %v2480_v47 = vsel %vm2390_vm11, %v10938_v42, %v10937_v9  ;;  %v8865_v61 = vpop.permute.xlu0 %3152 }
 0x3fa   :  { %v8840_v46 = vsel %vm2820_vm13, %v2630_v62, %v10931_v29  ;;  %10933 = vst [vmem:[#allocation17_spill] sm:$0xff] %v8844_v14  ;;  %3962 = vmatmul.f32.gmra.mxu1 %v3359_v3  ;;  %v10939_v62 = vld [vmem:[#allocation48_spill] sm:$0xff]  ;;  %v10941_v3 = vrot.slane %v7729_v53, 6  ;;  %v5164_v37 = vunpack.i.l.bf16 %v8347_v16  ;;  %v10516_v42 = vunpack.i.l.bf16 %v8621_v48 }
 0x3fb   :  { %3184 = vrot.lane.b32.xlu0 %v7729_v53, %s5601_s27  ;;  %v10940_v29 = vrot.slane %v10939_v62, 6 }
 0x3fc   :  { %5257 = vrot.lane.b32.xlu1 %v10936_v34, %s5602_s19 }
 0x3fd   :  { %5302 = vrot.lane.b32.xlu2 %v5301_v63, %s5592_s30  ;;  %v5193_v4 = vpop.permute.xlu2 %5192  ;;  %v3115_v19 = vpop.permute.xlu1 %3114  ;;  %v2478_v51 = vsel %vm2390_vm11, %v10941_v3, %v10940_v29  ;;  %v10942_v63 = vunpack.i.l.bf16 %v8628_v13  ;;  %v10943_v29 = vunpack.i.h.bf16 %v10928_v12 }
 0x3fe   :  { %v5195_v34 = vunpack.i.h.bf16 %v5193_v4  ;;  %v5194_v41 = vunpack.i.l.bf16 %v5193_v4  ;;  %v3219_v9 = vsel %vm3216_vm14, %v10930_v32, %v3115_v19  ;;  %v5386_v53 = vpack.i.bf16 %v2480_v47, %v2478_v51 }
 0x3ff   :  { %v2824_v21 = vsel %vm2820_vm13, %v10942_v63, %v5160_v58  ;;  %4790 = vmatmul.msk.f32.gmra.mxu3 %vm3479_vm0, %v3219_v9  ;;  %v2631_v13 = vsel %vm2621_vm12, %v10943_v29, %v5190_v54  ;;  %v5165_v4 = vunpack.i.h.bf16 %v8347_v16  ;;  %v10946_v54 = vld [vmem:[#allocation44_spill] sm:$0xff]  ;;  %v10950_v16 = vrot.slane %v8333_v31, 4 }
 0x400   :  { %v3332_v58 = vsel %vm3019_vm15, %v2824_v21, %v5164_v37  ;;  %v8876_v3 = vsel %vm2820_vm13, %v2631_v13, %v5194_v41  ;;  %v2830_v63 = vsel %vm2820_vm13, %v5194_v41, %v5195_v34  ;;  %v10947_v21 = vld [vmem:[#allocation56_spill] sm:$0xff]  ;;  %v8894_v41 = vpop.f32.mrf.mxu1  ;;  %v10951_v19 = vrot.slane %v8256_v25, 4 }
 0x401   :  { %3864 = vmatmul.f32.gmra.mxu2 %v3332_v58  ;;  %v8884_v32 = vsel %vm3019_vm15, %v2830_v63, %v10516_v42  ;;  %v8886_v12 = vpop.f32.mrf.mxu3  ;;  %v10948_v47 = vpack.i.bf16 %v10946_v54, %v10947_v21  ;;  %10949 = vst [vmem:[#allocation48_spill] sm:$0xff] %v8894_v41  ;;  %v10952_v58 = vld [vmem:[#allocation10_spill] sm:$0xff]  ;;  %v10954_v63 = vrot.slane %v10939_v62, 4 }
 0x402   :  { %10944 = vst [vmem:[#allocation74_spill] sm:$0xff] %v8884_v32  ;;  %v2367_v51 = vsel %vm318_vm3, %v10951_v19, %v10950_v16  ;;  %v10957_v16 = vld [vmem:[#allocation20_spill] sm:$0xff] }
 0x403   :  { %5387 = vrot.lane.b32.xlu0 %v5386_v53, %s5602_s19  ;;  %10945 = vst [vmem:[#allocation73_spill] sm:$0xff] %v8886_v12  ;;  %v3023_v53 = vsel %vm3019_vm15, %v5164_v37, %v5165_v4  ;;  %v10956_v4 = vld [vmem:[#allocation75_spill] sm:$0xff] }
 0x404   :  { %3156 = vrot.lane.b32.xlu1 %v7061_v20, %s5601_s27  ;;  %v10953_v20 = vrot.slane %v10952_v58, 4  ;;  %v10958_v19 = vpack.i.bf16 %v10956_v4, %v10957_v16  ;;  %v10961_v16 = vld [vmem:[#allocation63_spill] sm:$0xff] }
 0x405   :  { %5307 = vrot.lane.b32.xlu2 %v10948_v47, %s5600_s26  ;;  %v8901_v34 = vpop.permute.xlu2 %3142  ;;  %v3117_v9 = vpop.permute.xlu1 %3116 }
 0x406   :  { %v3220_v29 = vsel %vm3216_vm14, %v3117_v9, %v8674_v36  ;;  %v3360_v13 = vsel %vm3216_vm14, %v3023_v53, %v3117_v9  ;;  %v2365_v54 = vsel %vm318_vm3, %v10954_v63, %v10953_v20  ;;  %v8913_v47 = vpop.permute.xlu0 %5247  ;;  %v10517_v36 = vrot.slane %v10811_v28, 2 }
 0x407   :  { %3965 = vmatmul.f32.gmra.mxu1 %v3360_v13  ;;  %4791 = vmatmul.msk.f32.gmra.mxu3 %vm3479_vm0, %v3220_v29  ;;  %v5391_v21 = vpack.i.bf16 %v2367_v51, %v2365_v54  ;;  %v2226_v9 = vrot.slane %v7825_v44, 2  ;;  %v10518_v54 = vunpack.i.l.bf16 %v8678_v43 }
 0x408   :  { %v8926_v29 = vpop.f32.mrf.mxu1 }
 0x409   :  { %v8916_v37 = vpop.f32.mrf.mxu3  ;;  %10959 = vst [vmem:[#allocation56_spill] sm:$0xff] %v8926_v29  ;;  %v2231_v63 = vsel %vm200_vm2, %v2226_v9, %v10517_v36 }
 0x40a   :  { %10955 = vst [vmem:[#allocation44_spill] sm:$0xff] %v8916_v37 }
 0x40b   :  { %5392 = vrot.lane.b32.xlu0 %v5391_v21, %s5600_s26  ;;  %v10960_v21 = vrot.slane %v7718_v59, 2 }
 0x40c   :  { %5282 = vrot.lane.b32.xlu1 %v10958_v19, %s5602_s19  ;;  %v10962_v19 = vunpack.i.l.bf16 %v10961_v16 }
 0x40d   :  { %3166 = vrot.lane.b32.xlu2 %v7718_v59, %s5601_s27  ;;  %v3123_v51 = vpop.permute.xlu1 %3122  ;;  %v2227_v4 = vsel %vm200_vm2, %v10960_v21, %v2226_v9  ;;  %v10964_v9 = vld [vmem:[#allocation42_spill] sm:$0xff]  ;;  %v10965_v21 = vld [vmem:[#allocation53_spill] sm:$0xff] }
 0x40e   :  { %v3221_v20 = vsel %vm3216_vm14, %v8403_v38, %v3123_v51  ;;  %v5326_v51 = vpack.i.bf16 %v2231_v63, %v2227_v4  ;;  %v8948_v29 = vpop.permute.xlu0 %5252  ;;  %v10968_v63 = vrot.slane %v8333_v31, 6 }
 0x40f   :  { %v5213_v53 = vpop.permute.xlu2 %5212  ;;  %4792 = vmatmul.msk.f32.gmra.mxu3 %vm3479_vm0, %v3221_v20 }
 0x410   :  { %v5214_v13 = vunpack.i.l.bf16 %v5213_v53  ;;  %v5215_v59 = vunpack.i.h.bf16 %v5213_v53 }
 0x411   :  { %v8950_v20 = vpop.f32.mrf.mxu3 }
 0x412   :  { %v2632_v42 = vsel %vm2621_vm12, %v10962_v19, %v5214_v13  ;;  %10963 = vst [vmem:[#allocation10_spill] sm:$0xff] %v8950_v20  ;;  %v10966_v13 = vpack.i.bf16 %v10964_v9, %v10965_v21  ;;  %v10967_v19 = vrot.slane %v8330_v60, 6  ;;  %v10971_v9 = vrot.slane %v10952_v58, 6 }
 0x413   :  { %3192 = vrot.lane.b32.xlu0 %v10952_v58, %s5601_s27  ;;  %v8946_v36 = vsel %vm2820_vm13, %v2632_v42, %v10518_v54 }
 0x414   :  { %5297 = vrot.lane.b32.xlu1 %v10966_v13, %s5602_s19  ;;  %v2488_v4 = vsel %vm2390_vm11, %v10968_v63, %v10967_v19  ;;  %v10519_v13 = vunpack.i.l.bf16 %v8777_v40  ;;  %v10972_v63 = vunpack.i.h.bf16 %v10961_v16  ;;  %v10976_v16 = vld [vmem:[#allocation77_spill] sm:$0xff] }
 0x415   :  { %5327 = vrot.lane.b32.xlu2 %v5326_v51, %s5592_s30  ;;  %v8962_v54 = vpop.permute.xlu1 %3124  ;;  %v10969_v51 = vld [vmem:[#allocation54_spill] sm:$0xff] }
 0x416   :  { %v3222_v53 = vsel %vm3216_vm14, %v8962_v54, %v8703_v45  ;;  %v10970_v20 = vrot.slane %v10969_v51, 6  ;;  %v2633_v12 = vsel %vm2621_vm12, %v10972_v63, %v5215_v59  ;;  %v10981_v63 = vld [vmem:[#allocation29_spill] sm:$0xff] }
 0x417   :  { %v5218_v42 = vpop.permute.xlu2 %5217  ;;  %4793 = vmatmul.msk.f32.gmra.mxu3 %vm3479_vm0, %v3222_v53  ;;  %v11002_v8 = vrot.slane %v10981_v63, 6 }
 0x418   :  { %v5220_v41 = vunpack.i.h.bf16 %v5218_v42  ;;  %v5219_v37 = vunpack.i.l.bf16 %v5218_v42  ;;  %v2486_v21 = vsel %vm2390_vm11, %v10971_v9, %v10970_v20  ;;  %v8977_v42 = vpop.f32.mrf.mxu1 }
 0x419   :  { %v5411_v19 = vpack.i.bf16 %v2488_v4, %v2486_v21  ;;  %10973 = vst [vmem:[#allocation75_spill] sm:$0xff] %v8977_v42  ;;  %v8989_v20 = vpop.f32.mrf.mxu3  ;;  %v10977_v4 = vld [vmem:[#allocation14_spill] sm:$0xff] }
 0x41a   :  { %v8980_v14 = vsel %vm2820_vm13, %v2633_v12, %v5219_v37  ;;  %v2832_v45 = vsel %vm2820_vm13, %v5219_v37, %v5220_v41  ;;  %10975 = vst [vmem:[#allocation63_spill] sm:$0xff] %v8989_v20  ;;  %v10978_v59 = vpack.i.bf16 %v10976_v16, %v10977_v4  ;;  %v8997_v12 = vpop.permute.xlu0 %5272  ;;  %v10979_v41 = vrot.slane %v8390_v50, 4 }
 0x41b   :  { %5412 = vrot.lane.b32.xlu0 %v5411_v19, %s5602_s19  ;;  %v8987_v58 = vsel %vm3019_vm15, %v2832_v45, %v10519_v13  ;;  %v10980_v37 = vrot.slane %v8330_v60, 4  ;;  %v10982_v45 = vrot.slane %v10981_v63, 4  ;;  %v10983_v16 = vrot.slane %v10969_v51, 4 }
 0x41c   :  { %10974 = vst [vmem:[#allocation20_spill] sm:$0xff] %v8987_v58  ;;  %3162 = vrot.lane.b32.xlu1 %v7688_v49, %s5601_s27 }
 0x41d   :  { %5332 = vrot.lane.b32.xlu2 %v10978_v59, %s5600_s26  ;;  %v2375_v53 = vsel %vm318_vm3, %v10980_v37, %v10979_v41  ;;  %v2373_v49 = vsel %vm318_vm3, %v10983_v16, %v10982_v45  ;;  %v5175_v59 = vunpack.i.h.bf16 %v8515_v33  ;;  %v10986_v45 = vunpack.i.l.bf16 %v8515_v33  ;;  %v9044_v33 = vld [vmem:[%s10237_s4] ss:$0 sm:$0xff] }
 0x41e   :  { %v3131_v21 = vpop.permute.xlu1 %3130  ;;  %v5416_v4 = vpack.i.bf16 %v2375_v53, %v2373_v49 }
 0x41f   :  { %v9004_v9 = vpop.permute.xlu2 %3150  ;;  %v3223_v19 = vsel %vm3216_vm14, %v8462_v26, %v3131_v21  ;;  %v2234_v21 = vrot.slane %v7955_v0, 2  ;;  %v3027_v16 = vsel %vm3019_vm15, %v10986_v45, %v5175_v59  ;;  %v10989_v59 = vrot.slane %v10811_v28, 2  ;;  %v10990_v45 = vld [vmem:[#allocation69_spill] sm:$0xff] }
 0x420   :  { %4794 = vmatmul.msk.f32.gmra.mxu3 %vm3479_vm0, %v3223_v19  ;;  %v9016_v41 = vpop.f32.mrf.mxu1  ;;  %v10991_v20 = vunpack.i.l.bf16 %v10990_v45  ;;  %v11004_v58 = vunpack.i.h.bf16 %v10990_v45  ;;  %v11008_v45 = vld [vmem:[#allocation59_spill] sm:$0xff] }
 0x421   :  { %10984 = vst [vmem:[#allocation42_spill] sm:$0xff] %v9016_v41  ;;  %v9018_v37 = vpop.f32.mrf.mxu3  ;;  %v10987_v41 = vrot.slane %v8017_v11, 2 }
 0x422   :  { %10985 = vst [vmem:[#allocation53_spill] sm:$0xff] %v9018_v37  ;;  %v9029_v49 = vpop.permute.xlu0 %5277  ;;  %v10520_v37 = vunpack.i.l.bf16 %v8812_v15 }
 0x423   :  { %5417 = vrot.lane.b32.xlu0 %v5416_v4, %s5600_s26  ;;  %v2239_v42 = vsel %vm200_vm2, %v2234_v21, %v10987_v41 }
 0x424   :  { %3164 = vrot.lane.b32.xlu1 %v10852_v52, %s5601_s27 }
 0x425   :  { %3174 = vrot.lane.b32.xlu2 %v10811_v28, %s5601_s27 }
 0x426   :  { %v3133_v53 = vpop.permute.xlu1 %3132 }
 0x427   :  { %v5238_v19 = vpop.permute.xlu2 %5237  ;;  %v3224_v13 = vsel %vm3216_vm14, %v3133_v53, %v8788_v5  ;;  %v9037_v52 = vsel %vm3216_vm14, %v3027_v16, %v3133_v53  ;;  %v2235_v5 = vsel %vm200_vm2, %v10989_v59, %v2234_v21  ;;  %v10993_v21 = vld [vmem:[#allocation13_spill] sm:$0xff]  ;;  %v10994_v59 = vld [vmem:[#allocation58_spill] sm:$0xff] }
 0x428   :  { %v5239_v4 = vunpack.i.l.bf16 %v5238_v19  ;;  %10988 = vst [vmem:[#allocation54_spill] sm:$0xff] %v9037_v52  ;;  %4795 = vmatmul.msk.f32.gmra.mxu3 %vm3479_vm0, %v3224_v13  ;;  %v5351_v53 = vpack.i.bf16 %v2239_v42, %v2235_v5  ;;  %v5240_v28 = vunpack.i.h.bf16 %v5238_v19  ;;  %v9069_v5 = vpop.f32.mrf.mxu1 }
 0x429   :  { %v9059_v16 = vpop.f32.mrf.mxu3  ;;  %10997 = vst [vmem:[#allocation14_spill] sm:$0xff] %v9069_v5 }
 0x42a   :  { %v2634_v41 = vsel %vm2621_vm12, %v10991_v20, %v5239_v4  ;;  %10992 = vst [vmem:[#allocation77_spill] sm:$0xff] %v9059_v16  ;;  %v10995_v20 = vpack.i.bf16 %v10993_v21, %v10994_v59  ;;  %v10996_v4 = vld [vmem:[#allocation81_spill] sm:$0xff]  ;;  %v9092_v52 = vpop.permute.xlu0 %5292 }
 0x42b   :  { %3200 = vrot.lane.b32.xlu0 %v10981_v63, %s5601_s27  ;;  %v9057_v13 = vsel %vm2820_vm13, %v2634_v41, %v10520_v37  ;;  %v3554_v42 = vadd.f32 %v9044_v33, %v10996_v4  ;;  %v10998_v41 = vrot.slane %v8379_v57, 6  ;;  %v10999_v37 = vrot.slane %v8390_v50, 6  ;;  %v11003_v59 = vld [vmem:[#allocation9_spill] sm:$0xff] }
 0x42c   :  { %5322 = vrot.lane.b32.xlu1 %v10995_v20, %s5602_s19  ;;  %v10526_v63 = vunpack.i.l.bf16 %v8913_v47 }
 0x42d   :  { %5352 = vrot.lane.b32.xlu2 %v5351_v53, %s5592_s30  ;;  %v2496_v16 = vsel %vm2390_vm11, %v10999_v37, %v10998_v41  ;;  %v11000_v53 = vld [vmem:[#allocation16_spill] sm:$0xff]  ;;  %v3655_v20 = vadd.f32 %v11003_v59, %v3554_v42  ;;  %v2635_v37 = vsel %vm2621_vm12, %v11004_v58, %v5240_v28  ;;  %v11005_v41 = vunpack.i.l.bf16 %v8552_v10 }
 0x42e   :  { %v9076_v19 = vpop.permute.xlu1 %5182  ;;  %v11001_v56 = vrot.slane %v11000_v53, 6 }
 0x42f   :  { %v5243_v24 = vpop.permute.xlu2 %5242  ;;  %v10525_v5 = vunpack.i.l.bf16 %v9076_v19  ;;  %v3755_v6 = vpop.f32.mrf.mxu0  ;;  %v2829_v32 = vsel %vm2820_vm13, %v11005_v41, %v5180_v17  ;;  %v10527_v41 = vunpack.i.l.bf16 %v8948_v29 }
 0x430   :  { %v2494_v21 = vsel %vm2390_vm11, %v11002_v8, %v11001_v56  ;;  %v5245_v4 = vunpack.i.h.bf16 %v5243_v24  ;;  %v5244_v27 = vunpack.i.l.bf16 %v5243_v24  ;;  %v9094_v56 = vadd.f32 %v3755_v6, %v3655_v20  ;;  %v11007_v6 = vld [vmem:[#allocation35_spill] sm:$0xff] }
 0x431   :  { %v5436_v23 = vpack.i.bf16 %v2496_v16, %v2494_v21  ;;  %v9102_v24 = vsel %vm3019_vm15, %v2829_v32, %v10525_v5  ;;  %v11009_v16 = vpack.i.bf16 %v11007_v6, %v11008_v45  ;;  %v11010_v32 = vrot.slane %v8449_v2, 4  ;;  %v9124_v21 = vpop.f32.mrf.mxu1  ;;  %v11015_v6 = vld [vmem:[#allocation51_spill] sm:$0xff] }
 0x432   :  { %v9097_v8 = vsel %vm2820_vm13, %v2635_v37, %v5244_v27  ;;  %v2834_v10 = vsel %vm2820_vm13, %v5244_v27, %v5245_v4  ;;  %v9106_v58 = vpop.f32.mrf.mxu3  ;;  %11012 = vst [vmem:[#allocation69_spill] sm:$0xff] %v9124_v21  ;;  %v11013_v4 = vrot.slane %v8070_v39, 4  ;;  %v11014_v37 = vrot.slane %v11000_v53, 4 }
 0x433   :  { %5437 = vrot.lane.b32.xlu0 %v5436_v23, %s5602_s19  ;;  %11006 = vst [vmem:[#allocation29_spill] sm:$0xff] %v9106_v58  ;;  %v9111_v17 = vsel %vm3019_vm15, %v2834_v10, %v10526_v63  ;;  %v11011_v23 = vrot.slane %v8379_v57, 4  ;;  %v11016_v45 = vunpack.i.l.bf16 %v11015_v6  ;;  %v11029_v21 = vrot.slane %v8070_v39, 6 }
 0x434   :  { %3170 = vrot.lane.b32.xlu1 %v7825_v44, %s5601_s27  ;;  %v2381_v44 = vsel %vm318_vm3, %v11014_v37, %v11013_v4  ;;  %v9144_v4 = vpop.permute.xlu0 %3160 }
 0x435   :  { %5357 = vrot.lane.b32.xlu2 %v11009_v16, %s5600_s26  ;;  %v2383_v27 = vsel %vm318_vm3, %v11011_v23, %v11010_v32  ;;  %v5200_v32 = vunpack.i.h.bf16 %v8621_v48  ;;  %vm4434_vm3 = vcmask 1043459  }
 0x436   :  { %v3139_v42 = vpop.permute.xlu1 %3138  ;;  %v5441_v10 = vpack.i.bf16 %v2383_v27, %v2381_v44 }
 0x437   :  { %v5263_v28 = vpop.permute.xlu2 %5262  ;;  %v3225_v20 = vsel %vm3216_vm14, %v8585_v35, %v3139_v42  ;;  %v2242_v42 = vrot.slane %v8259_v7, 2 }
 0x438   :  { %v5264_v59 = vunpack.i.l.bf16 %v5263_v28  ;;  %4796 = vmatmul.msk.f32.gmra.mxu3 %vm3479_vm0, %v3225_v20  ;;  %v5265_v27 = vunpack.i.h.bf16 %v5263_v28 }
 0x43a   :  { %v2626_v16 = vsel %vm2621_vm12, %v11016_v45, %v5264_v59  ;;  %v9146_v37 = vpop.f32.mrf.mxu3  ;;  %v2246_v59 = vrot.slane %v8256_v25, 2 }
 0x43b   :  { %5442 = vrot.lane.b32.xlu0 %v5441_v10, %s5600_s26  ;;  %v3305_v23 = vsel %vm2820_vm13, %v2626_v16, %v10527_v41  ;;  %11017 = vst [vmem:[#allocation13_spill] sm:$0xff] %v9146_v37  ;;  %v11018_v10 = vrot.slane %v8017_v11, 2  ;;  %v11019_v16 = vunpack.i.l.bf16 %v8621_v48  ;;  %v9172_v41 = vpop.f32.mrf.mxu1  ;;  %v3758_v37 = vpop.f32.mrf.mxu0 }
 0x43c   :  { %3766 = vmatmul.f32.gmra.mxu0 %v3305_v23  ;;  %3172 = vrot.lane.b32.xlu1 %v10880_v1, %s5601_s27  ;;  %v2247_v1 = vsel %vm200_vm2, %v2242_v42, %v2246_v59  ;;  %11021 = vst [vmem:[#allocation58_spill] sm:$0xff] %v9172_v41 }
 0x43d   :  { %3182 = vrot.lane.b32.xlu2 %v8017_v11, %s5601_s27  ;;  %v2243_v45 = vsel %vm200_vm2, %v11018_v10, %v2242_v42  ;;  %v3029_v23 = vsel %vm3019_vm15, %v11019_v16, %v5200_v32  ;;  %v11020_v11 = vunpack.i.h.bf16 %v11015_v6  ;;  %v5205_v42 = vunpack.i.h.bf16 %v8678_v43  ;;  %v11024_v6 = vld [vmem:[#allocation82_spill] sm:$0xff] }
 0x43e   :  { %v3141_v44 = vpop.permute.xlu1 %3140 }
 0x43f   :  { %v9153_v20 = vpop.permute.xlu2 %5267  ;;  %v3226_v5 = vsel %vm3216_vm14, %v3141_v44, %v8901_v34  ;;  %v9166_v63 = vsel %vm3216_vm14, %v3029_v23, %v3141_v44  ;;  %v2627_v10 = vsel %vm2621_vm12, %v11020_v11, %v5265_v27  ;;  %v5376_v34 = vpack.i.bf16 %v2247_v1, %v2243_v45  ;;  %v9187_v44 = vpop.permute.xlu0 %5312 }
 0x440   :  { %v10528_v28 = vunpack.i.l.bf16 %v9153_v20  ;;  %4797 = vmatmul.msk.f32.gmra.mxu3 %vm3479_vm0, %v3226_v5  ;;  %v11023_v5 = vld [vmem:[#allocation83_spill] sm:$0xff]  ;;  %v10530_v1 = vunpack.i.l.bf16 %v9029_v49 }
 0x441   :  { %v11025_v27 = vpack.i.bf16 %v11023_v5, %v11024_v6  ;;  %v11030_v6 = vld [vmem:[#allocation76_spill] sm:$0xff] }
 0x442   :  { %v3306_v48 = vsel %vm2820_vm13, %v2627_v10, %v10528_v28  ;;  %v9179_v32 = vpop.f32.mrf.mxu3  ;;  %v11026_v10 = vunpack.i.l.bf16 %v8678_v43 }
 0x443   :  { %3208 = vrot.lane.b32.xlu0 %v8070_v39, %s5601_s27  ;;  %11022 = vst [vmem:[#allocation81_spill] sm:$0xff] %v9179_v32 }
 0x444   :  { %3769 = vmatmul.f32.gmra.mxu0 %v3306_v48  ;;  %5347 = vrot.lane.b32.xlu1 %v11025_v27, %s5602_s19  ;;  %v2831_v48 = vsel %vm2820_vm13, %v11026_v10, %v5205_v42  ;;  %v11031_v27 = vunpack.i.l.bf16 %v11030_v6  ;;  %v9213_v42 = vpop.f32.mrf.mxu1 }
 0x445   :  { %5377 = vrot.lane.b32.xlu2 %v5376_v34, %s5592_s30  ;;  %v11027_v34 = vld [vmem:[#allocation62_spill] sm:$0xff]  ;;  %11032 = vst [vmem:[#allocation16_spill] sm:$0xff] %v9213_v42  ;;  %v11057_v42 = vld [vmem:[#allocation27_spill] sm:$0xff] }
 0x446   :  { %v9189_v23 = vpop.permute.xlu1 %5207  ;;  %v11028_v28 = vrot.slane %v11027_v34, 6 }
 0x447   :  { %v5288_v16 = vpop.permute.xlu2 %5287  ;;  %v10529_v45 = vunpack.i.l.bf16 %v9189_v23 }
 0x448   :  { %v5289_v11 = vunpack.i.l.bf16 %v5288_v16  ;;  %v2505_v5 = vsel %vm2390_vm11, %v11029_v21, %v11028_v28  ;;  %v5290_v39 = vunpack.i.h.bf16 %v5288_v16  ;;  %v11034_v21 = vld [vmem:[#allocation18_spill] sm:$0xff]  ;;  %v11037_v16 = vunpack.i.h.bf16 %v11030_v6 }
 0x449   :  { %v9207_v32 = vsel %vm3019_vm15, %v2831_v48, %v10529_v45  ;;  %v11035_v28 = vld [vmem:[#allocation50_spill] sm:$0xff] }
 0x44a   :  { %v2628_v41 = vsel %vm2621_vm12, %v11031_v27, %v5289_v11  ;;  %v9215_v10 = vpop.f32.mrf.mxu3  ;;  %v11036_v11 = vpack.i.bf16 %v11034_v21, %v11035_v28  ;;  %v9225_v27 = vpop.permute.xlu0 %5317  ;;  %v5225_v21 = vunpack.i.h.bf16 %v8777_v40  ;;  %v11038_v28 = vld [vmem:[#allocation64_spill] sm:$0xff] }
 0x44b   :  { %3015 = vrot.lane.b32.xlu0 %v2505_v5, %s5602_s19  ;;  %v3307_v43 = vsel %vm2820_vm13, %v2628_v41, %v10530_v1  ;;  %11033 = vst [vmem:[#allocation9_spill] sm:$0xff] %v9215_v10 }
 0x44c   :  { %3772 = vmatmul.f32.gmra.mxu0 %v3307_v43  ;;  %3178 = vrot.lane.b32.xlu1 %v7955_v0, %s5601_s27  ;;  %v2629_v43 = vsel %vm2621_vm12, %v11037_v16, %v5290_v39  ;;  %v11039_v0 = vunpack.i.l.bf16 %v8736_v30  ;;  %v9246_v6 = vpop.f32.mrf.mxu1  ;;  %v2254_v39 = vrot.slane %v8330_v60, 2  ;;  %v11042_v16 = vunpack.i.l.bf16 %v8777_v40 }
 0x44d   :  { %5382 = vrot.lane.b32.xlu2 %v11036_v11, %s5600_s26  ;;  %11041 = vst [vmem:[#allocation59_spill] sm:$0xff] %v9246_v6  ;;  %v5230_v40 = vunpack.i.h.bf16 %v8812_v15 }
 0x44e   :  { %v3147_v5 = vpop.permute.xlu1 %3146  ;;  %v3308_v11 = vsel %vm2820_vm13, %v2629_v43, %v11039_v0  ;;  %v3031_v43 = vsel %vm3019_vm15, %v11042_v16, %v5225_v21 }
 0x44f   :  { %v9223_v48 = vpop.permute.xlu2 %3158  ;;  %v3227_v41 = vsel %vm3216_vm14, %v8712_v22, %v3147_v5  ;;  %v2250_v5 = vrot.slane %v8333_v31, 2 }
 0x450   :  { %4798 = vmatmul.msk.f32.gmra.mxu3 %vm3479_vm0, %v3227_v41 }
 0x452   :  { %v9239_v45 = vpop.f32.mrf.mxu3  ;;  %v9262_v1 = vpop.permute.xlu0 %3168 }
 0x453   :  { %3214 = vrot.lane.b32.xlu0 %v11038_v28, %s5601_s27  ;;  %11040 = vst [vmem:[#allocation35_spill] sm:$0xff] %v9239_v45 }
 0x454   :  { %3775 = vmatmul.f32.gmra.mxu0 %v3308_v11  ;;  %3180 = vrot.lane.b32.xlu1 %v7539_v18, %s5601_s27  ;;  %v2251_v11 = vsel %vm200_vm2, %v2246_v59, %v2250_v5  ;;  %v11045_v59 = vld [vmem:[#allocation70_spill] sm:$0xff]  ;;  %v9277_v16 = vpop.f32.mrf.mxu1 }
 0x455   :  { %3190 = vrot.lane.b32.xlu2 %v8256_v25, %s5601_s27  ;;  %v2255_v25 = vsel %vm200_vm2, %v2250_v5, %v2254_v39  ;;  %11047 = vst [vmem:[#allocation83_spill] sm:$0xff] %v9277_v16 }
 0x456   :  { %v3149_v30 = vpop.permute.xlu1 %3148  ;;  %v5401_v6 = vpack.i.bf16 %v2255_v25, %v2251_v11  ;;  %v10532_v11 = vunpack.i.l.bf16 %v9187_v44 }
 0x457   :  { %v9249_v41 = vpop.permute.xlu2 %5302  ;;  %v3228_v0 = vsel %vm3216_vm14, %v3149_v30, %v9004_v9  ;;  %v9259_v18 = vsel %vm3216_vm14, %v3031_v43, %v3149_v30  ;;  %v11044_v9 = vld [vmem:[#allocation71_spill] sm:$0xff] }
 0x458   :  { %4799 = vmatmul.msk.f32.gmra.mxu3 %vm3479_vm0, %v3228_v0  ;;  %v11046_v21 = vpack.i.bf16 %v11044_v9, %v11045_v59 }
 0x45a   :  { %v9264_v10 = vpop.f32.mrf.mxu3  ;;  %v9299_v16 = vpop.permute.xlu0 %5337 }
 0x45b   :  { %11043 = vst [vmem:[#allocation51_spill] sm:$0xff] %v9264_v10 }
 0x45c   :  { %3778 = vmatmul.f32.gmra.mxu0 %v8840_v46  ;;  %5372 = vrot.lane.b32.xlu1 %v11046_v21, %s5602_s19 }
 0x45d   :  { %5402 = vrot.lane.b32.xlu2 %v5401_v6, %s5592_s30  ;;  %v11048_v6 = vunpack.i.l.bf16 %v8812_v15  ;;  %v11051_v15 = vld [vmem:[#allocation23_spill] sm:$0xff] }
 0x45e   :  { %v9275_v30 = vpop.permute.xlu1 %5232 }
 0x45f   :  { %v9273_v5 = vpop.permute.xlu2 %5307  ;;  %v10531_v46 = vunpack.i.l.bf16 %v9275_v30  ;;  %v2833_v25 = vsel %vm2820_vm13, %v11048_v6, %v5230_v40  ;;  %v11052_v40 = vld [vmem:[#allocation12_spill] sm:$0xff] }
 0x460   :  { %v5310_v43 = vunpack.i.h.bf16 %v9273_v5  ;;  %v10533_v0 = vunpack.i.l.bf16 %v9273_v5  ;;  %v11053_v6 = vpack.i.bf16 %v11051_v15, %v11052_v40  ;;  %v2258_v15 = vrot.slane %v8390_v50, 2 }
 0x461   :  { %v9289_v9 = vsel %vm3019_vm15, %v2833_v25, %v10531_v46  ;;  %v10534_v40 = vrot.slane %v8379_v57, 2 }
 0x462   :  { %v2836_v59 = vsel %vm2820_vm13, %v10533_v0, %v5310_v43  ;;  %v9301_v10 = vpop.f32.mrf.mxu3 }
 0x463   :  { %v9297_v21 = vsel %vm3019_vm15, %v2836_v59, %v10532_v11  ;;  %11050 = vst [vmem:[#allocation62_spill] sm:$0xff] %v9301_v10  ;;  %v3957_v11 = vpop.f32.mrf.mxu1 }
 0x464   :  { %11049 = vst [vmem:[#allocation82_spill] sm:$0xff] %v9297_v21  ;;  %3781 = vmatmul.f32.gmra.mxu0 %v8876_v3  ;;  %3186 = vrot.lane.b32.xlu1 %v8259_v7, %s5601_s27  ;;  %v3856_v43 = vpop.f32.mrf.mxu2  ;;  %v5255_v7 = vunpack.i.h.bf16 %v8948_v29  ;;  %v5250_v21 = vunpack.i.h.bf16 %v8913_v47 }
 0x465   :  { %5407 = vrot.lane.b32.xlu2 %v11053_v6, %s5600_s26  ;;  %v3857_v25 = vadd.f32 %v3856_v43, %v9094_v56  ;;  %v9325_v56 = vpop.permute.xlu0 %5342 }
 0x466   :  { %v3155_v59 = vpop.permute.xlu1 %3154 }
 0x467   :  { %v9311_v46 = vpop.permute.xlu2 %3166  ;;  %v3229_v0 = vsel %vm3216_vm14, %v8865_v61, %v3155_v59  ;;  %v3958_v3 = vadd.f32 %v3957_v11, %v3857_v25  ;;  %v2259_v59 = vsel %vm200_vm2, %v2254_v39, %v2258_v15 }
 0x468   :  { %4800 = vmatmul.msk.f32.gmra.mxu3 %vm3479_vm0, %v3229_v0  ;;  %v11055_v0 = vld [vmem:[#allocation84_spill] sm:$0xff] }
 0x469   :  { %v3557_v11 = vadd.f32 %v9044_v33, %v11055_v0 }
 0x46a   :  { %v9316_v10 = vpop.f32.mrf.mxu3 }
 0x46b   :  { %11054 = vst [vmem:[#allocation76_spill] sm:$0xff] %v9316_v10  ;;  %v3658_v45 = vadd.f32 %v11057_v42, %v3557_v11  ;;  %v11059_v11 = vld [vmem:[#allocation11_spill] sm:$0xff] }
 0x46c   :  { %3784 = vmatmul.f32.gmra.mxu0 %v8946_v36  ;;  %3188 = vrot.lane.b32.xlu1 %v10939_v62, %s5601_s27  ;;  %v11056_v62 = vunpack.i.l.bf16 %v8948_v29 }
 0x46d   :  { %3198 = vrot.lane.b32.xlu2 %v8330_v60, %s5601_s27  ;;  %v2263_v60 = vsel %vm200_vm2, %v2258_v15, %v10534_v40  ;;  %v3859_v40 = vpop.f32.mrf.mxu2  ;;  %v3759_v42 = vadd.f32 %v3758_v37, %v3658_v45  ;;  %v11062_v45 = vunpack.i.l.bf16 %v8913_v47  ;;  %v3761_v47 = vpop.f32.mrf.mxu0 }
 0x46e   :  { %v5258_v36 = vpop.permute.xlu1 %5257  ;;  %v2825_v10 = vsel %vm2820_vm13, %v11056_v62, %v5255_v7  ;;  %v5426_v15 = vpack.i.bf16 %v2263_v60, %v2259_v59  ;;  %v5274_v62 = vunpack.i.l.bf16 %v8997_v12  ;;  %v9362_v60 = vpop.permute.xlu0 %3176 }
 0x46f   :  { %v9330_v6 = vpop.permute.xlu2 %5327  ;;  %v5260_v43 = vunpack.i.h.bf16 %v5258_v36  ;;  %v5259_v25 = vunpack.i.l.bf16 %v5258_v36  ;;  %v5270_v36 = vunpack.i.h.bf16 %v9153_v20 }
 0x471   :  { %v3333_v0 = vsel %vm3019_vm15, %v2825_v10, %v5259_v25  ;;  %v3024_v58 = vsel %vm3019_vm15, %v5259_v25, %v5260_v43  ;;  %v11058_v10 = vld [vmem:[#allocation19_spill] sm:$0xff]  ;;  %v5275_v25 = vunpack.i.h.bf16 %v8997_v12 }
 0x472   :  { %3867 = vmatmul.f32.gmra.mxu2 %v3333_v0  ;;  %v3361_v39 = vsel %vm3216_vm14, %v3024_v58, %v8403_v38  ;;  %v4058_v29 = vpop.f32.mrf.mxu3  ;;  %v11060_v43 = vpack.i.bf16 %v11058_v10, %v11059_v11  ;;  %v3860_v38 = vadd.f32 %v3859_v40, %v3759_v42  ;;  %v11064_v10 = vld [vmem:[#allocation79_spill] sm:$0xff] }
 0x473   :  { %3968 = vmatmul.f32.gmra.mxu1 %v3361_v39  ;;  %v4059_v7 = vadd.f32 %v4058_v29, %v3958_v3  ;;  %v3033_v3 = vsel %vm3019_vm15, %v11062_v45, %v5250_v21  ;;  %v3960_v21 = vpop.f32.mrf.mxu1  ;;  %v3025_v42 = vsel %vm3019_vm15, %v5274_v62, %v5275_v25  ;;  %v5280_v25 = vunpack.i.h.bf16 %v9029_v49 }
 0x474   :  { %3787 = vmatmul.f32.gmra.mxu0 %v8980_v14  ;;  %5397 = vrot.lane.b32.xlu1 %v11060_v43, %s5602_s19  ;;  %v11061_v14 = vunpack.i.l.bf16 %v9153_v20  ;;  %v3961_v43 = vadd.f32 %v3960_v21, %v3860_v38  ;;  %v11065_v38 = vld [vmem:[#allocation25_spill] sm:$0xff] }
 0x475   :  { %5427 = vrot.lane.b32.xlu2 %v5426_v15, %s5592_s30  ;;  %v11063_v15 = vld [vmem:[#allocation68_spill] sm:$0xff] }
 0x476   :  { %v3157_v59 = vpop.permute.xlu1 %3156  ;;  %v2826_v37 = vsel %vm2820_vm13, %v11061_v14, %v5270_v36  ;;  %v3560_v20 = vadd.f32 %v9044_v33, %v11063_v15  ;;  %v5339_v36 = vunpack.i.l.bf16 %v9299_v16 }
 0x477   :  { %v9354_v58 = vpop.permute.xlu2 %5332  ;;  %v3230_v12 = vsel %vm3216_vm14, %v3157_v59, %v9223_v48  ;;  %v9369_v40 = vsel %vm3216_vm14, %v3033_v3, %v3157_v59  ;;  %v3334_v29 = vsel %vm3019_vm15, %v2826_v37, %v5274_v62  ;;  %v3362_v59 = vsel %vm3216_vm14, %v3025_v42, %v8962_v54 }
 0x478   :  { %v5335_v0 = vunpack.i.h.bf16 %v9354_v58  ;;  %v5334_v39 = vunpack.i.l.bf16 %v9354_v58  ;;  %4801 = vmatmul.msk.f32.gmra.mxu3 %vm3479_vm0, %v3230_v12  ;;  %v3661_v11 = vadd.f32 %v11064_v10, %v3560_v20  ;;  %v4142_v37 = vmax.f32 %v4059_v7, 0.0 }
 0x479   :  { %v11068_v7 = vunpack.i.l.bf16 %v9029_v49 }
 0x47a   :  { %v2838_v48 = vsel %vm2820_vm13, %v5334_v39, %v5335_v0  ;;  %3870 = vmatmul.f32.gmra.mxu2 %v3334_v29  ;;  %v4061_v45 = vpop.f32.mrf.mxu3  ;;  %v3762_v62 = vadd.f32 %v3761_v47, %v3661_v11  ;;  %v11066_v0 = vld [vmem:[#allocation85_spill] sm:$0xff]  ;;  %v9401_v11 = vpop.permute.xlu0 %5362 }
 0x47b   :  { %v9386_v14 = vsel %vm3019_vm15, %v2838_v48, %v5339_v36  ;;  %3971 = vmatmul.f32.gmra.mxu1 %v3362_v59  ;;  %v4062_v3 = vadd.f32 %v4061_v45, %v3961_v43  ;;  %v11067_v12 = vpack.i.bf16 %v11065_v38, %v11066_v0  ;;  %v4198_v48 = vrot.slane %v4142_v37, 2  ;;  %v3963_v43 = vpop.f32.mrf.mxu1 }
 0x47c   :  { %3790 = vmatmul.f32.gmra.mxu0 %v9057_v13  ;;  %3194 = vrot.lane.b32.xlu1 %v8333_v31, %s5601_s27  ;;  %v3862_v54 = vpop.f32.mrf.mxu2  ;;  %v2827_v10 = vsel %vm2820_vm13, %v11068_v7, %v5280_v25  ;;  %v5304_v38 = vunpack.i.l.bf16 %v9249_v41  ;;  %v5185_v7 = vunpack.i.h.bf16 %v9076_v19 }
 0x47d   :  { %5432 = vrot.lane.b32.xlu2 %v11067_v12, %s5600_s26  ;;  %v4143_v15 = vmax.f32 %v4062_v3, 0.0  ;;  %v3863_v20 = vadd.f32 %v3862_v54, %v3762_v62 }
 0x47e   :  { %v5283_v13 = vpop.permute.xlu1 %5282 }
 0x47f   :  { %v9396_v21 = vpop.permute.xlu2 %3174  ;;  %v5285_v29 = vunpack.i.h.bf16 %v5283_v13  ;;  %v5284_v42 = vunpack.i.l.bf16 %v5283_v13  ;;  %v4199_v47 = vrot.slane %v4143_v15, 2  ;;  %v3964_v3 = vadd.f32 %v3963_v43, %v3863_v20  ;;  %v11069_v20 = vld [vmem:[#allocation15_spill] sm:$0xff] }
 0x480   :  { %v11070_v13 = vunpack.i.l.bf16 %v11069_v20 }
 0x481   :  { %v3335_v59 = vsel %vm3019_vm15, %v2827_v10, %v5284_v42  ;;  %v3026_v31 = vsel %vm3019_vm15, %v5284_v42, %v5285_v29  ;;  %v4200_v45 = vsel %vm200_vm2, %v4198_v48, %v4199_v47  ;;  %v2266_v29 = vrot.slane %v8449_v2, 2 }
 0x482   :  { %3873 = vmatmul.f32.gmra.mxu2 %v3335_v59  ;;  %v3363_v62 = vsel %vm3216_vm14, %v3026_v31, %v8462_v26  ;;  %v4064_v49 = vpop.f32.mrf.mxu3  ;;  %v9410_v25 = vmax.f32 %v4142_v37, %v4200_v45  ;;  %v5294_v37 = vunpack.i.l.bf16 %v9092_v52  ;;  %v9431_v10 = vpop.permute.xlu0 %5367  ;;  %v11071_v59 = vld [vmem:[#allocation54_spill] sm:$0xff]  ;;  %v11072_v31 = vrot.slane %v8379_v57, 2  ;;  %v11074_v45 = vld [vmem:[#allocation80_spill] sm:$0xff] }
 0x483   :  { %3974 = vmatmul.f32.gmra.mxu1 %v3363_v62  ;;  %v4065_v0 = vadd.f32 %v4064_v49, %v3964_v3  ;;  %v5305_v3 = vunpack.i.h.bf16 %v9249_v41  ;;  %v11077_v41 = vunpack.i.h.bf16 %v11069_v20  ;;  %v5329_v20 = vunpack.i.l.bf16 %v9330_v6 }
 0x484   :  { %3793 = vmatmul.f32.gmra.mxu0 %v9097_v8  ;;  %3196 = vrot.lane.b32.xlu1 %v10969_v51, %s5601_s27  ;;  %v2636_v8 = vsel %vm2621_vm12, %v11070_v13, %v5304_v38 }
 0x485   :  { %3206 = vrot.lane.b32.xlu2 %v8379_v57, %s5601_s27  ;;  %v4144_v12 = vmax.f32 %v4065_v0, 0.0  ;;  %v3315_v51 = vsel %vm2820_vm13, %v2636_v8, %v5294_v37  ;;  %v5364_v8 = vunpack.i.l.bf16 %v9401_v11 }
 0x486   :  { %v9418_v26 = vpop.permute.xlu1 %5297 }
 0x487   :  { %v9416_v54 = vpop.permute.xlu2 %5352  ;;  %v4201_v42 = vrot.slane %v4144_v12, 2  ;;  %v11076_v12 = vunpack.i.l.bf16 %v9076_v19 }
 0x489   :  { %v4202_v48 = vsel %vm200_vm2, %v4199_v47, %v4201_v42  ;;  %v2267_v47 = vsel %vm200_vm2, %v11072_v31, %v2266_v29  ;;  %v3028_v13 = vsel %vm3019_vm15, %v11076_v12, %v5185_v7  ;;  %v2637_v42 = vsel %vm2621_vm12, %v11077_v41, %v5305_v3  ;;  %v11079_v31 = vld [vmem:[#allocation33_spill] sm:$0xff] }
 0x48a   :  { %3876 = vmatmul.f32.gmra.mxu2 %v8775_v55  ;;  %v9433_v43 = vmax.f32 %v4143_v15, %v4202_v48  ;;  %v11073_v55 = vld [vmem:[#allocation26_spill] sm:$0xff]  ;;  %v3365_v7 = vsel %vm3216_vm14, %v3028_v13, %v8585_v35  ;;  %v5210_v12 = vunpack.i.h.bf16 %v9189_v23 }
 0x48b   :  { %3977 = vmatmul.f32.gmra.mxu1 %v11071_v59  ;;  %v11075_v62 = vpack.i.bf16 %v11073_v55, %v11074_v45 }
 0x48c   :  { %3796 = vmatmul.f32.gmra.mxu0 %v3315_v51  ;;  %v11078_v51 = vunpack.i.l.bf16 %v9273_v5  ;;  %v9482_v5 = vpop.permute.xlu0 %3184 }
 0x48d   :  { %2615 = vrot.lane.b32.xlu2 %v2267_v47, %s5592_s30  ;;  %5422 = vrot.lane.b32.xlu1 %v11075_v62, %s5602_s19  ;;  %v11080_v47 = vld [vmem:[#allocation52_spill] sm:$0xff]  ;;  %v11082_v62 = vld [vmem:[#allocation38_spill] sm:$0xff] }
 0x48e   :  { %v3163_v38 = vpop.permute.xlu1 %3162  ;;  %v3316_v19 = vsel %vm2820_vm13, %v2637_v42, %v11078_v51  ;;  %v11083_v3 = vunpack.i.l.bf16 %v11082_v62 }
 0x48f   :  { %v9447_v15 = vpop.permute.xlu2 %5357  ;;  %v3231_v57 = vsel %vm3216_vm14, %v9144_v4, %v3163_v38 }
 0x490   :  { %v5360_v49 = vunpack.i.h.bf16 %v9447_v15  ;;  %v5359_v0 = vunpack.i.l.bf16 %v9447_v15  ;;  %4802 = vmatmul.msk.f32.gmra.mxu3 %vm3479_vm0, %v3231_v57  ;;  %v2638_v38 = vsel %vm2621_vm12, %v11083_v3, %v5329_v20  ;;  %v11084_v57 = vld [vmem:[#allocation74_spill] sm:$0xff] }
 0x492   :  { %v2840_v48 = vsel %vm2820_vm13, %v5359_v0, %v5360_v49  ;;  %3879 = vmatmul.f32.gmra.mxu2 %v9102_v24  ;;  %v11081_v24 = vpack.i.bf16 %v11079_v31, %v11080_v47  ;;  %v5319_v49 = vunpack.i.l.bf16 %v9225_v27 }
 0x493   :  { %v9473_v59 = vsel %vm3019_vm15, %v2840_v48, %v5364_v8  ;;  %3980 = vmatmul.f32.gmra.mxu1 %v3365_v7  ;;  %v11085_v48 = vunpack.i.l.bf16 %v9189_v23  ;;  %v11087_v23 = vld [vmem:[#allocation86_spill] sm:$0xff]  ;;  %v11088_v7 = vld [vmem:[#allocation67_spill] sm:$0xff] }
 0x494   :  { %3799 = vmatmul.f32.gmra.mxu0 %v3316_v19  ;;  %v9511_v42 = vpop.permute.xlu0 %5387  ;;  %v11089_v20 = vpack.i.bf16 %v11087_v23, %v11088_v7  ;;  %v9569_v23 = vpop.f32.mrf.mxu0 }
 0x495   :  { %5452 = vrot.lane.b32.xlu2 %v11081_v24, %s5600_s26  ;;  %3202 = vrot.lane.b32.xlu1 %v8390_v50, %s5601_s27  ;;  %v3317_v50 = vsel %vm2820_vm13, %v2638_v38, %v5319_v49  ;;  %v3030_v51 = vsel %vm3019_vm15, %v11085_v48, %v5210_v12  ;;  %v5389_v3 = vunpack.i.l.bf16 %v9511_v42  ;;  %v5235_v48 = vunpack.i.h.bf16 %v9275_v30 }
 0x496   :  { %v9486_v55 = vpop.permute.xlu1 %3164 }
 0x497   :  { %v9484_v35 = vpop.permute.xlu2 %3182  ;;  %v3232_v45 = vsel %vm3216_vm14, %v9486_v55, %v9311_v46  ;;  %v5330_v46 = vunpack.i.h.bf16 %v9330_v6  ;;  %v5354_v6 = vunpack.i.l.bf16 %v9416_v54 }
 0x498   :  { %4803 = vmatmul.msk.f32.gmra.mxu3 %vm3479_vm0, %v3232_v45 }
 0x49a   :  { %3882 = vmatmul.f32.gmra.mxu2 %v11084_v57 }
 0x49b   :  { %3983 = vmatmul.f32.gmra.mxu1 %v9166_v63  ;;  %v11086_v63 = vunpack.i.h.bf16 %v11082_v62  ;;  %v5344_v62 = vunpack.i.l.bf16 %v9325_v56 }
 0x49c   :  { %3802 = vmatmul.f32.gmra.mxu0 %v3317_v50  ;;  %v9542_v38 = vpop.permute.xlu0 %5392  ;;  %v11092_v50 = vld [vmem:[#allocation20_spill] sm:$0xff] }
 0x49d   :  { %3212 = vrot.lane.b32.xlu2 %v11027_v34, %s5601_s27  ;;  %3204 = vrot.lane.b32.xlu1 %v11000_v53, %s5601_s27  ;;  %v2639_v19 = vsel %vm2621_vm12, %v11086_v63, %v5330_v46  ;;  %v3367_v34 = vsel %vm3216_vm14, %v3030_v51, %v8712_v22  ;;  %v11090_v22 = vld [vmem:[#allocation78_spill] sm:$0xff]  ;;  %v5355_v51 = vunpack.i.h.bf16 %v9416_v54 }
 0x49e   :  { %v9509_v41 = vpop.permute.xlu1 %5322  ;;  %v3318_v53 = vsel %vm2820_vm13, %v2639_v19, %v5334_v39  ;;  %v11091_v24 = vunpack.i.l.bf16 %v11090_v22 }
 0x49f   :  { %v9507_v13 = vpop.permute.xlu2 %5377 }
 0x4a0   :  { %v2640_v45 = vsel %vm2621_vm12, %v11091_v24, %v5354_v6 }
 0x4a1   :  { %v3319_v12 = vsel %vm2820_vm13, %v2640_v45, %v5344_v62  ;;  %v5299_v45 = vunpack.i.l.bf16 %v9418_v26 }
 0x4a2   :  { %3885 = vmatmul.f32.gmra.mxu2 %v9207_v32 }
 0x4a3   :  { %3986 = vmatmul.f32.gmra.mxu1 %v3367_v34  ;;  %v11093_v34 = vunpack.i.l.bf16 %v9275_v30 }
 0x4a4   :  { %3805 = vmatmul.f32.gmra.mxu0 %v3318_v53  ;;  %v9581_v30 = vpop.permute.xlu0 %3192 }
 0x4a5   :  { %5447 = vrot.lane.b32.xlu1 %v11089_v20, %s5602_s19  ;;  %v3032_v6 = vsel %vm3019_vm15, %v11093_v34, %v5235_v48  ;;  %v5379_v20 = vunpack.i.l.bf16 %v9507_v13  ;;  %v5295_v48 = vunpack.i.h.bf16 %v9092_v52 }
 0x4a6   :  { %v3171_v47 = vpop.permute.xlu1 %3170 }
 0x4a7   :  { %v9530_v31 = vpop.permute.xlu2 %5382  ;;  %v3233_v39 = vsel %vm3216_vm14, %v9262_v1, %v3171_v47 }
 0x4a8   :  { %v5385_v32 = vunpack.i.h.bf16 %v9530_v31  ;;  %v5384_v58 = vunpack.i.l.bf16 %v9530_v31  ;;  %4804 = vmatmul.msk.f32.gmra.mxu3 %vm3479_vm0, %v3233_v39  ;;  %v11095_v31 = vrot.slane %v11038_v28, 2  ;;  %v5369_v39 = vunpack.i.l.bf16 %v9431_v10 }
 0x4aa   :  { %v2842_v57 = vsel %vm2820_vm13, %v5384_v58, %v5385_v32  ;;  %3888 = vmatmul.f32.gmra.mxu2 %v11092_v50  ;;  %v2273_v47 = vsel %vm200_vm2, %v2266_v29, %v11095_v31  ;;  %v5300_v29 = vunpack.i.h.bf16 %v9418_v26  ;;  %v11099_v50 = vrot.slane %v8449_v2, 6 }
 0x4ab   :  { %v9552_v46 = vsel %vm3019_vm15, %v2842_v57, %v5389_v3  ;;  %3989 = vmatmul.f32.gmra.mxu1 %v9259_v18  ;;  %v11094_v18 = vunpack.i.h.bf16 %v11090_v22  ;;  %v11098_v57 = vrot.slane %v11038_v28, 6 }
 0x4ac   :  { %3808 = vmatmul.f32.gmra.mxu0 %v3319_v12  ;;  %v3034_v28 = vsel %vm3019_vm15, %v5299_v45, %v5300_v29 }
 0x4ad   :  { %3210 = vrot.lane.b32.xlu1 %v8449_v2, %s5601_s27  ;;  %v2641_v54 = vsel %vm2621_vm12, %v11094_v18, %v5355_v51  ;;  %v2506_v12 = vsel %vm2390_vm11, %v11099_v50, %v11098_v57  ;;  %v5380_v51 = vunpack.i.h.bf16 %v9507_v13  ;;  %v2835_v2 = vsel %vm2820_vm13, %v5294_v37, %v5295_v48 }
 0x4ae   :  { %v9561_v19 = vpop.permute.xlu1 %3172  ;;  %v3320_v7 = vsel %vm2820_vm13, %v2641_v54, %v5359_v0  ;;  %v11096_v0 = vld [vmem:[#allocation66_spill] sm:$0xff]  ;;  %v5325_v50 = vunpack.i.h.bf16 %v9509_v41  ;;  %v5320_v48 = vunpack.i.h.bf16 %v9225_v27  ;;  %v5340_v27 = vunpack.i.h.bf16 %v9299_v16 }
 0x4af   :  { %v9559_v63 = vpop.permute.xlu2 %3190  ;;  %v3234_v53 = vsel %vm3216_vm14, %v9561_v19, %v9396_v21  ;;  %v3369_v21 = vsel %vm3216_vm14, %v3032_v6, %v8865_v61  ;;  %v11097_v32 = vunpack.i.l.bf16 %v11096_v0  ;;  %v3343_v6 = vsel %vm3019_vm15, %v2835_v2, %v5299_v45  ;;  %v11104_v45 = vld [vmem:[#allocation82_spill] sm:$0xff] }
 0x4b0   :  { %4805 = vmatmul.msk.f32.gmra.mxu3 %vm3479_vm0, %v3234_v53  ;;  %v11100_v13 = vunpack.i.h.bf16 %v11096_v0  ;;  %v11101_v0 = vld [vmem:[#allocation55_spill] sm:$0xff]  ;;  %v5345_v16 = vunpack.i.h.bf16 %v9325_v56 }
 0x4b1   :  { %v2642_v61 = vsel %vm2621_vm12, %v11097_v32, %v5379_v20  ;;  %v5315_v20 = vunpack.i.h.bf16 %v9187_v44 }
 0x4b2   :  { %3891 = vmatmul.f32.gmra.mxu2 %v9289_v9  ;;  %v3321_v24 = vsel %vm2820_vm13, %v2642_v61, %v5369_v39  ;;  %v2643_v18 = vsel %vm2621_vm12, %v11100_v13, %v5380_v51  ;;  %v11105_v13 = vunpack.i.h.bf16 %v11101_v0 }
 0x4b3   :  { %3992 = vmatmul.f32.gmra.mxu1 %v3369_v21  ;;  %v3322_v54 = vsel %vm2820_vm13, %v2643_v18, %v5384_v58  ;;  %v11102_v58 = vunpack.i.l.bf16 %v11101_v0  ;;  %v11106_v0 = vld [vmem:[#allocation34_spill] sm:$0xff] }
 0x4b4   :  { %3811 = vmatmul.f32.gmra.mxu0 %v3320_v7  ;;  %v3371_v7 = vsel %vm3216_vm14, %v3034_v28, %v9144_v4  ;;  %v5394_v4 = vunpack.i.l.bf16 %v9542_v38 }
 0x4b5   :  { %2619 = vrot.lane.b32.xlu1 %v2273_v47, %s5592_s30 }
 0x4b6   :  { %v9590_v15 = vpop.permute.xlu1 %5347 }
 0x4b7   :  { %v5403_v9 = vpop.permute.xlu2 %5402 }
 0x4b8   :  { %v5404_v21 = vunpack.i.l.bf16 %v5403_v9 }
 0x4b9   :  { %v9596_v22 = vpop.f32.mrf.mxu0 }
 0x4ba   :  { %3894 = vmatmul.f32.gmra.mxu2 %v9111_v17  ;;  %v9612_v17 = vpop.permute.xlu0 %5412  ;;  %v2644_v32 = vsel %vm2621_vm12, %v11102_v58, %v5404_v21  ;;  %v11107_v58 = vunpack.i.l.bf16 %v11106_v0 }
 0x4bb   :  { %3995 = vmatmul.f32.gmra.mxu1 %v9369_v40 }
 0x4bc   :  { %3814 = vmatmul.f32.gmra.mxu0 %v3321_v24  ;;  %v11103_v24 = vunpack.i.l.bf16 %v9187_v44  ;;  %v5405_v44 = vunpack.i.h.bf16 %v5403_v9 }
 0x4bd   :  { %3017 = vrot.lane.b32.xlu1 %v2506_v12, %s5602_s19  ;;  %v5324_v12 = vunpack.i.l.bf16 %v9509_v41 }
 0x4be   :  { %v3179_v26 = vpop.permute.xlu1 %3178  ;;  %v3035_v29 = vsel %vm3019_vm15, %v11103_v24, %v5315_v20  ;;  %v2645_v9 = vsel %vm2621_vm12, %v11105_v13, %v5405_v44  ;;  %v9685_v20 = vpop.f32.mrf.mxu3 }
 0x4bf   :  { %v9615_v53 = vpop.permute.xlu2 %5407  ;;  %v3235_v40 = vsel %vm3216_vm14, %v9362_v60, %v3179_v26  ;;  %v3372_v57 = vsel %vm3216_vm14, %v3035_v29, %v9486_v55  ;;  %v3036_v28 = vsel %vm3019_vm15, %v5324_v12, %v5325_v50  ;;  %v2837_v55 = vsel %vm2820_vm13, %v5319_v49, %v5320_v48 }
 0x4c0   :  { %4806 = vmatmul.msk.f32.gmra.mxu3 %vm3479_vm0, %v3235_v40  ;;  %v5409_v51 = vunpack.i.l.bf16 %v9615_v53  ;;  %v3345_v41 = vsel %vm3019_vm15, %v2837_v55, %v5324_v12  ;;  %v3037_v29 = vsel %vm3019_vm15, %v5339_v36, %v5340_v27  ;;  %v5350_v50 = vunpack.i.h.bf16 %v9590_v15  ;;  %v11108_v36 = vld [vmem:[#allocation36_spill] sm:$0xff] }
 0x4c1   :  { %v9620_v34 = vpop.f32.mrf.mxu0  ;;  %v5349_v12 = vunpack.i.l.bf16 %v9590_v15  ;;  %v11110_v27 = vunpack.i.h.bf16 %v11106_v0 }
 0x4c2   :  { %3897 = vmatmul.f32.gmra.mxu2 %v3343_v6  ;;  %v9638_v31 = vpop.permute.xlu0 %5417  ;;  %v3324_v18 = vsel %vm2820_vm13, %v2645_v9, %v5409_v51 }
 0x4c3   :  { %3998 = vmatmul.f32.gmra.mxu1 %v3371_v7  ;;  %v5419_v24 = vunpack.i.l.bf16 %v9638_v31  ;;  %v3038_v13 = vsel %vm3019_vm15, %v5349_v12, %v5350_v50  ;;  %v11113_v50 = vld [vmem:[#allocation41_spill] sm:$0xff] }
 0x4c4   :  { %3817 = vmatmul.f32.gmra.mxu0 %v3322_v54  ;;  %v3373_v54 = vsel %vm3216_vm14, %v3036_v28, %v9262_v1  ;;  %v3375_v56 = vsel %vm3216_vm14, %v3038_v13, %v9362_v60 }
 0x4c6   :  { %v9636_v37 = vpop.permute.xlu1 %3180 }
 0x4c7   :  { %v9634_v52 = vpop.permute.xlu2 %3198  ;;  %v3236_v47 = vsel %vm3216_vm14, %v9636_v37, %v9484_v35  ;;  %v3323_v35 = vsel %vm2820_vm13, %v2644_v32, %v5394_v4 }
 0x4c8   :  { %4807 = vmatmul.msk.f32.gmra.mxu3 %vm3479_vm0, %v3236_v47 }
 0x4c9   :  { %v9647_v61 = vpop.f32.mrf.mxu0 }
 0x4ca   :  { %3900 = vmatmul.f32.gmra.mxu2 %v11104_v45  ;;  %v9671_v6 = vpop.permute.xlu0 %3200 }
 0x4cb   :  { %4001 = vmatmul.f32.gmra.mxu1 %v3372_v57 }
 0x4cc   :  { %3820 = vmatmul.f32.gmra.mxu0 %v3323_v35  ;;  %v3374_v35 = vsel %vm3216_vm14, %v3037_v29, %v9561_v19  ;;  %v11109_v19 = vld [vmem:[#allocation40_spill] sm:$0xff] }
 0x4ce   :  { %v9663_v40 = vpop.permute.xlu1 %5372 }
 0x4cf   :  { %v5428_v26 = vpop.permute.xlu2 %5427 }
 0x4d0   :  { %v5429_v7 = vunpack.i.l.bf16 %v5428_v26  ;;  %v5430_v48 = vunpack.i.h.bf16 %v5428_v26  ;;  %v2839_v26 = vsel %vm2820_vm13, %v5344_v62, %v5345_v16  ;;  %v11111_v62 = vld [vmem:[#allocation24_spill] sm:$0xff] }
 0x4d1   :  { %v9666_v2 = vpop.f32.mrf.mxu0 }
 0x4d2   :  { %3903 = vmatmul.f32.gmra.mxu2 %v3345_v41  ;;  %v2646_v32 = vsel %vm2621_vm12, %v11107_v58, %v5429_v7  ;;  %v9705_v57 = vpop.permute.xlu0 %5437  ;;  %v3347_v7 = vsel %vm3019_vm15, %v2839_v26, %v5349_v12  ;;  %v5365_v58 = vunpack.i.h.bf16 %v9401_v11  ;;  %v11114_v12 = vunpack.i.l.bf16 %v11113_v50 }
 0x4d3   :  { %4004 = vmatmul.f32.gmra.mxu1 %v3373_v54  ;;  %v3325_v45 = vsel %vm2820_vm13, %v2646_v32, %v5419_v24  ;;  %v5374_v11 = vunpack.i.l.bf16 %v9663_v40 }
 0x4d4   :  { %3823 = vmatmul.f32.gmra.mxu0 %v3324_v18  ;;  %v9726_v18 = vpop.f32.mrf.mxu3 }
 0x4d6   :  { %v3187_v21 = vpop.permute.xlu1 %3186 }
 0x4d7   :  { %v9683_v49 = vpop.permute.xlu2 %5432  ;;  %v3237_v47 = vsel %vm3216_vm14, %v9482_v5, %v3187_v21  ;;  %v2647_v21 = vsel %vm2621_vm12, %v11110_v27, %v5430_v48 }
 0x4d8   :  { %4808 = vmatmul.msk.f32.gmra.mxu3 %vm3479_vm0, %v3237_v47  ;;  %v5434_v44 = vunpack.i.l.bf16 %v9683_v49  ;;  %v3584_v47 = vadd.f32 %v9044_v33, %v11111_v62 }
 0x4d9   :  { %v9693_v1 = vpop.f32.mrf.mxu0 }
 0x4da   :  { %3906 = vmatmul.f32.gmra.mxu2 %v9386_v14  ;;  %v3581_v14 = vadd.f32 %v9044_v33, %v11108_v36  ;;  %v9742_v32 = vpop.permute.xlu0 %5442  ;;  %v3966_v36 = vpop.f32.mrf.mxu1 }
 0x4db   :  { %4007 = vmatmul.f32.gmra.mxu1 %v3374_v35  ;;  %v5444_v60 = vunpack.i.l.bf16 %v9742_v32 }
 0x4dc   :  { %3826 = vmatmul.f32.gmra.mxu0 %v3325_v45  ;;  %v3682_v41 = vadd.f32 %v11109_v19, %v3581_v14  ;;  %v11112_v45 = vld [vmem:[#allocation89_spill] sm:$0xff]  ;;  %v3039_v19 = vsel %vm3019_vm15, %v5364_v8, %v5365_v58  ;;  %v9764_v26 = vpop.f32.mrf.mxu3  ;;  %v11116_v8 = vld [vmem:[#allocation39_spill] sm:$0xff] }
 0x4dd   :  { %v3685_v35 = vadd.f32 %v11112_v45, %v3584_v47  ;;  %v11117_v47 = vld [vmem:[#allocation43_spill] sm:$0xff] }
 0x4de   :  { %v9715_v55 = vpop.permute.xlu1 %3188  ;;  %v3566_v58 = vadd.f32 %v9044_v33, %v11117_v47 }
 0x4df   :  { %v9713_v28 = vpop.permute.xlu2 %3206  ;;  %v3238_v15 = vsel %vm3216_vm14, %v9715_v55, %v9559_v63  ;;  %v3326_v63 = vsel %vm2820_vm13, %v2647_v21, %v5434_v44  ;;  %v5370_v21 = vunpack.i.h.bf16 %v9431_v10 }
 0x4e0   :  { %4809 = vmatmul.msk.f32.gmra.mxu3 %vm3479_vm0, %v3238_v15 }
 0x4e1   :  { %v3782_v9 = vpop.f32.mrf.mxu0  ;;  %v2841_v45 = vsel %vm2820_vm13, %v5369_v39, %v5370_v21 }
 0x4e2   :  { %v9728_v54 = vadd.f32 %v3782_v9, %v3682_v41  ;;  %3909 = vmatmul.f32.gmra.mxu2 %v3347_v7  ;;  %v11115_v41 = vld [vmem:[#allocation37_spill] sm:$0xff]  ;;  %v3376_v9 = vsel %vm3216_vm14, %v3039_v19, %v9636_v37  ;;  %v5375_v7 = vunpack.i.h.bf16 %v9663_v40 }
 0x4e3   :  { %4010 = vmatmul.f32.gmra.mxu1 %v3375_v56  ;;  %v3563_v15 = vadd.f32 %v9044_v33, %v11115_v41  ;;  %v5390_v41 = vunpack.i.h.bf16 %v9511_v42 }
 0x4e4   :  { %3829 = vmatmul.f32.gmra.mxu0 %v3326_v63  ;;  %v3040_v37 = vsel %vm3019_vm15, %v5374_v11, %v5375_v7 }
 0x4e5   :  { %v3664_v27 = vadd.f32 %v11116_v8, %v3563_v15  ;;  %v9786_v15 = vpop.f32.mrf.mxu3 }
 0x4e6   :  { %v9744_v29 = vpop.permute.xlu1 %5397 }
 0x4e7   :  { %v2616_v0 = vpop.permute.xlu2 %2615  ;;  %v3765_v63 = vadd.f32 %v9569_v23, %v3664_v27  ;;  %v11118_v23 = vld [vmem:[#allocation30_spill] sm:$0xff]  ;;  %v11120_v27 = vld [vmem:[#allocation87_spill] sm:$0xff] }
 0x4e8   :  { %v2648_v16 = vsel %vm2621_vm12, %v11114_v12, %v2616_v0  ;;  %v3667_v12 = vadd.f32 %v11118_v23, %v3566_v58 }
 0x4e9   :  { %v3785_v14 = vpop.f32.mrf.mxu0  ;;  %v3327_v13 = vsel %vm2820_vm13, %v2648_v16, %v5444_v60  ;;  %v3377_v16 = vsel %vm3216_vm14, %v3040_v37, %v9482_v5 }
 0x4ea   :  { %v9751_v48 = vadd.f32 %v3785_v14, %v3685_v35  ;;  %3912 = vmatmul.f32.gmra.mxu2 %v9473_v59  ;;  %v3865_v59 = vpop.f32.mrf.mxu2  ;;  %v3349_v35 = vsel %vm3019_vm15, %v2841_v45, %v5374_v11  ;;  %v3768_v19 = vadd.f32 %v9596_v22, %v3667_v12  ;;  %v11119_v11 = vld [vmem:[#allocation45_spill] sm:$0xff]  ;;  %v3041_v22 = vsel %vm3019_vm15, %v5389_v3, %v5390_v41 }
 0x4eb   :  { %4013 = vmatmul.f32.gmra.mxu1 %v3376_v9  ;;  %v3866_v0 = vadd.f32 %v3865_v59, %v3765_v63  ;;  %v3569_v5 = vadd.f32 %v9044_v33, %v11119_v11  ;;  %v5400_v33 = vunpack.i.h.bf16 %v9744_v29  ;;  %v5399_v63 = vunpack.i.l.bf16 %v9744_v29  ;;  %v11121_v29 = vld [vmem:[#allocation65_spill] sm:$0xff] }
 0x4ec   :  { %3832 = vmatmul.f32.gmra.mxu0 %v3327_v13  ;;  %v5410_v41 = vunpack.i.h.bf16 %v9615_v53 }
 0x4ed   :  { %v3967_v14 = vadd.f32 %v3966_v36, %v3866_v0  ;;  %v9809_v0 = vpop.f32.mrf.mxu3 }
 0x4ee   :  { %v3195_v56 = vpop.permute.xlu1 %3194 }
 0x4ef   :  { %v3239_v62 = vsel %vm3216_vm14, %v9581_v30, %v3195_v56  ;;  %v4068_v10 = vadd.f32 %v9685_v20, %v3967_v14  ;;  %v3670_v20 = vadd.f32 %v11120_v27, %v3569_v5  ;;  %v5395_v56 = vunpack.i.h.bf16 %v9542_v38  ;;  %v11122_v14 = vld [vmem:[#allocation46_spill] sm:$0xff]  ;;  %v11123_v27 = vld [vmem:[#allocation28_spill] sm:$0xff] }
 0x4f0   :  { %v3969_v40 = vpop.f32.mrf.mxu1  ;;  %4810 = vmatmul.msk.f32.gmra.mxu3 %vm3479_vm0, %v3239_v62 }
 0x4f1   :  { %v4145_v21 = vmax.f32 %v4068_v10, 0.0  ;;  %v3771_v42 = vadd.f32 %v9620_v34, %v3670_v20 }
 0x4f2   :  { %3915 = vmatmul.f32.gmra.mxu2 %v3349_v35  ;;  %v2843_v35 = vsel %vm2820_vm13, %v5394_v4, %v5395_v56 }
 0x4f3   :  { %4016 = vmatmul.f32.gmra.mxu1 %v3377_v16  ;;  %v4203_v37 = vrot.slane %v4145_v21, 2  ;;  %v3351_v12 = vsel %vm3019_vm15, %v2843_v35, %v5399_v63  ;;  %v11125_v35 = vld [vmem:[#allocation21_spill] sm:$0xff] }
 0x4f5   :  { %v3868_v13 = vpop.f32.mrf.mxu2 }
 0x4f6   :  { %v3869_v39 = vadd.f32 %v3868_v13, %v3768_v19  ;;  %v9789_v9 = vpop.permute.xlu1 %3196 }
 0x4f7   :  { %v3240_v7 = vsel %vm3216_vm14, %v9789_v9, %v9634_v52  ;;  %v3378_v52 = vsel %vm3216_vm14, %v3041_v22, %v9715_v55  ;;  %v9815_v55 = vld [vmem:[%s10237_s4] ss:$0 sm:$0xff]  ;;  %v4082_v22 = vpop.f32.mrf.mxu3 }
 0x4f8   :  { %v3970_v36 = vadd.f32 %v3969_v40, %v3869_v39  ;;  %v3972_v8 = vpop.f32.mrf.mxu1  ;;  %4811 = vmatmul.msk.f32.gmra.mxu3 %vm3479_vm0, %v3240_v7  ;;  %v3572_v40 = vadd.f32 %v9815_v55, %v11121_v29  ;;  %v5415_v39 = vunpack.i.h.bf16 %v9612_v17  ;;  %v5414_v7 = vunpack.i.l.bf16 %v9612_v17 }
 0x4fa   :  { %v4071_v59 = vadd.f32 %v9726_v18, %v3970_v36  ;;  %3918 = vmatmul.f32.gmra.mxu2 %v9552_v46  ;;  %v3042_v46 = vsel %vm3019_vm15, %v5399_v63, %v5400_v33  ;;  %v3673_v19 = vadd.f32 %v11122_v14, %v3572_v40  ;;  %v9848_v63 = vpop.f32.mrf.mxu0 }
 0x4fb   :  { %4019 = vmatmul.f32.gmra.mxu1 %v3378_v52  ;;  %v3379_v10 = vsel %vm3216_vm14, %v3042_v46, %v9581_v30  ;;  %v3043_v52 = vsel %vm3019_vm15, %v5414_v7, %v5415_v39 }
 0x4fc   :  { %v4146_v3 = vmax.f32 %v4071_v59, 0.0  ;;  %v3774_v38 = vadd.f32 %v9647_v61, %v3673_v19  ;;  %v3575_v61 = vadd.f32 %v9815_v55, %v11123_v27 }
 0x4fd   :  { %v3871_v62 = vpop.f32.mrf.mxu2 }
 0x4fe   :  { %v4204_v47 = vrot.slane %v4146_v3, 2  ;;  %v3872_v58 = vadd.f32 %v3871_v62, %v3771_v42  ;;  %v3380_v42 = vsel %vm3216_vm14, %v3043_v52, %v9789_v9  ;;  %v3578_v9 = vadd.f32 %v9815_v55, %v11125_v35 }
 0x4ff   :  { %v5423_v18 = vpop.permute.xlu1 %5422 }
 0x500   :  { %v3973_v45 = vadd.f32 %v3972_v8, %v3872_v58  ;;  %v3975_v34 = vpop.f32.mrf.mxu1  ;;  %v4205_v23 = vsel %vm200_vm2, %v4203_v37, %v4204_v47  ;;  %v5425_v62 = vunpack.i.h.bf16 %v5423_v18  ;;  %v5424_v37 = vunpack.i.l.bf16 %v5423_v18 }
 0x501   :  { %v9824_v16 = vmax.f32 %v4145_v21, %v4205_v23 }
 0x502   :  { %v4074_v13 = vadd.f32 %v9764_v26, %v3973_v45  ;;  %3921 = vmatmul.f32.gmra.mxu2 %v3351_v12  ;;  %v2844_v26 = vsel %vm2820_vm13, %v5409_v51, %v5410_v41  ;;  %v11124_v51 = vld [vmem:[#allocation57_spill] sm:$0xff]  ;;  %v4085_v12 = vpop.f32.mrf.mxu3 }
 0x503   :  { %4022 = vmatmul.f32.gmra.mxu1 %v3379_v10  ;;  %v3352_v59 = vsel %vm3019_vm15, %v2844_v26, %v5414_v7  ;;  %v3676_v33 = vadd.f32 %v11124_v51, %v3575_v61  ;;  %v5435_v10 = vunpack.i.h.bf16 %v9683_v49  ;;  %v5440_v7 = vunpack.i.h.bf16 %v9705_v57 }
 0x504   :  { %v4147_v4 = vmax.f32 %v4074_v13, 0.0  ;;  %v3209_v13 = vpop.permute.xlu0 %3208  ;;  %v5445_v49 = vunpack.i.h.bf16 %v9742_v32 }
 0x505   :  { %v3874_v11 = vpop.f32.mrf.mxu2  ;;  %v3777_v58 = vadd.f32 %v9666_v2, %v3676_v33  ;;  %v2846_v26 = vsel %vm2820_vm13, %v5434_v44, %v5435_v10 }
 0x506   :  { %v4206_v5 = vrot.slane %v4147_v4, 2  ;;  %v3875_v36 = vadd.f32 %v3874_v11, %v3774_v38 }
 0x507   :  { %v3203_v8 = vpop.permute.xlu1 %3202 }
 0x508   :  { %v3241_v30 = vsel %vm3216_vm14, %v9671_v6, %v3203_v8  ;;  %v3976_v20 = vadd.f32 %v3975_v34, %v3875_v36  ;;  %v3978_v21 = vpop.f32.mrf.mxu1  ;;  %v4207_v17 = vsel %vm200_vm2, %v4204_v47, %v4206_v5  ;;  %v5420_v47 = vunpack.i.h.bf16 %v9638_v31 }
 0x509   :  { %4812 = vmatmul.msk.f32.gmra.mxu3 %vm3479_vm0, %v3241_v30  ;;  %v9845_v53 = vmax.f32 %v4146_v3, %v4207_v17 }
 0x50a   :  { %v4077_v56 = vadd.f32 %v9786_v15, %v3976_v20  ;;  %3924 = vmatmul.f32.gmra.mxu2 %v3352_v59  ;;  %v3044_v15 = vsel %vm3019_vm15, %v5424_v37, %v5425_v62  ;;  %v2845_v2 = vsel %vm2820_vm13, %v5419_v24, %v5420_v47  ;;  %v9873_v24 = vpop.f32.mrf.mxu0  ;;  %v9881_v27 = vpop.f32.mrf.mxu3 }
 0x50b   :  { %4025 = vmatmul.f32.gmra.mxu1 %v3380_v42  ;;  %v3353_v14 = vsel %vm3019_vm15, %v2845_v2, %v5424_v37  ;;  %v3381_v39 = vsel %vm3216_vm14, %v3044_v15, %v9671_v6  ;;  %v5453_v20 = vpop.permute.xlu2 %5452 }
 0x50c   :  { %v4148_v46 = vmax.f32 %v4077_v56, 0.0  ;;  %v3016_v44 = vpop.permute.xlu0 %3015 }
 0x50d   :  { %v3877_v3 = vpop.f32.mrf.mxu2 }
 0x50e   :  { %v4208_v29 = vrot.slane %v4148_v46, 2  ;;  %v3878_v40 = vadd.f32 %v3877_v3, %v3777_v58  ;;  %v2847_v3 = vsel %vm2820_vm13, %v5444_v60, %v5445_v49 }
 0x50f   :  { %v3205_v45 = vpop.permute.xlu1 %3204 }
 0x510   :  { %v3242_v34 = vsel %vm3216_vm14, %v3205_v45, %v9713_v28  ;;  %v3981_v23 = vpop.f32.mrf.mxu1  ;;  %v4209_v18 = vsel %vm200_vm2, %v4206_v5, %v4208_v29  ;;  %v11126_v28 = vld [vmem:[#allocation60_spill] sm:$0xff]  ;;  %v3979_v38 = vadd.f32 %v3978_v21, %v3878_v40 }
 0x511   :  { %4813 = vmatmul.msk.f32.gmra.mxu3 %vm3479_vm0, %v3242_v34  ;;  %v9866_v19 = vmax.f32 %v4147_v4, %v4209_v18  ;;  %v3679_v41 = vadd.f32 %v11126_v28, %v3578_v9  ;;  %v5439_v4 = vunpack.i.l.bf16 %v9705_v57  ;;  %v5454_v34 = vunpack.i.l.bf16 %v5453_v20 }
 0x512   :  { %3927 = vmatmul.f32.gmra.mxu2 %v3353_v14  ;;  %v4080_v5 = vadd.f32 %v9809_v0, %v3979_v38  ;;  %v9887_v33 = vpop.f32.mrf.mxu0  ;;  %v4091_v9 = vpop.f32.mrf.mxu3 }
 0x513   :  { %4028 = vmatmul.f32.gmra.mxu1 %v3381_v39  ;;  %v3780_v31 = vadd.f32 %v9693_v1, %v3679_v41  ;;  %v3354_v1 = vsel %vm3019_vm15, %v2846_v26, %v5439_v4  ;;  %v3045_v61 = vsel %vm3019_vm15, %v5439_v4, %v5440_v7  ;;  %v3213_v32 = vpop.permute.xlu2 %3212  ;;  %v11128_v39 = vld [vmem:[#allocation47_spill] sm:$0xff] }
 0x514   :  { %v4149_v21 = vmax.f32 %v4080_v5, 0.0  ;;  %v3382_v0 = vsel %vm3216_vm14, %v3045_v61, %v3205_v45  ;;  %v3215_v18 = vpop.permute.xlu0 %3214 }
 0x515   :  { %v3880_v11 = vpop.f32.mrf.mxu2  ;;  %v3244_v10 = vsel %vm3216_vm14, %v3213_v32, %v3215_v18 }
 0x516   :  { %v3881_v36 = vadd.f32 %v3880_v11, %v3780_v31  ;;  %v4210_v56 = vrot.slane %v4149_v21, 2  ;;  %v3587_v31 = vadd.f32 %v9815_v55, %v11128_v39 }
 0x517   :  { %v5448_v8 = vpop.permute.xlu1 %5447 }
 0x518   :  { %v3982_v30 = vadd.f32 %v3981_v23, %v3881_v36  ;;  %v3984_v6 = vpop.f32.mrf.mxu1  ;;  %v5450_v17 = vunpack.i.h.bf16 %v5448_v8  ;;  %v5449_v59 = vunpack.i.l.bf16 %v5448_v8 }
 0x51a   :  { %v4083_v57 = vadd.f32 %v4082_v22, %v3982_v30  ;;  %3930 = vmatmul.f32.gmra.mxu2 %v3354_v1  ;;  %v3046_v47 = vsel %vm3019_vm15, %v5449_v59, %v5450_v17  ;;  %v3355_v40 = vsel %vm3019_vm15, %v2847_v3, %v5449_v59  ;;  %v3797_v7 = vpop.f32.mrf.mxu0  ;;  %v4094_v30 = vpop.f32.mrf.mxu3  ;;  %v4524_v3 = vld [vmem:[#allocation6 + $0xf8] sm:$0xff] }
 0x51b   :  { %4031 = vmatmul.f32.gmra.mxu1 %v3382_v0  ;;  %v3383_v35 = vsel %vm3216_vm14, %v3046_v47, %v3209_v13  ;;  %v11130_v0 = vld [vmem:[#allocation31_spill] sm:$0xff]  ;;  %4581 = vmatpush.msrb.mxu2 %v4524_v3  ;;  %v11139_v3 = vld [vmem:[#allocation10_spill] sm:$0xff] }
 0x51c   :  { %v4150_v52 = vmax.f32 %v4083_v57, 0.0  ;;  %v3590_v17 = vadd.f32 %v9815_v55, %v11130_v0 }
 0x51d   :  { %v3883_v51 = vpop.f32.mrf.mxu2 }
 0x51e   :  { %v4211_v42 = vrot.slane %v4150_v52, 2  ;;  %v3884_v62 = vadd.f32 %v3883_v51, %v9728_v54  ;;  %v5455_v54 = vunpack.i.h.bf16 %v5453_v20  ;;  %v11131_v51 = vld [vmem:[#allocation90_spill] sm:$0xff] }
 0x51f   :  { %v3211_v37 = vpop.permute.xlu1 %3210 }
 0x520   :  { %v3243_v22 = vsel %vm3216_vm14, %v3209_v13, %v3211_v37  ;;  %v3985_v58 = vadd.f32 %v3984_v6, %v3884_v62  ;;  %v3987_v46 = vpop.f32.mrf.mxu1  ;;  %v4212_v29 = vsel %vm200_vm2, %v4210_v56, %v4211_v42  ;;  %v11127_v13 = vunpack.i.h.bf16 %v11113_v50  ;;  %v11129_v50 = vld [vmem:[#allocation22_spill] sm:$0xff] }
 0x521   :  { %4814 = vmatmul.msk.f32.gmra.mxu3 %vm3479_vm0, %v3243_v22  ;;  %v9898_v45 = vmax.f32 %v4149_v21, %v4212_v29  ;;  %v3688_v26 = vadd.f32 %v11129_v50, %v3587_v31  ;;  %v3691_v56 = vadd.f32 %v11131_v51, %v3590_v17  ;;  %v11132_v29 = vld [vmem:[#allocation32_spill] sm:$0xff] }
 0x522   :  { %v4086_v15 = vadd.f32 %v4085_v12, %v3985_v58  ;;  %3933 = vmatmul.f32.gmra.mxu2 %v3355_v40  ;;  %v2848_v12 = vsel %vm2820_vm13, %v5454_v34, %v5455_v54  ;;  %v4097_v37 = vpop.f32.mrf.mxu3  ;;  %v3593_v40 = vadd.f32 %v9815_v55, %v11132_v29  ;;  %v4508_v31 = vld [vmem:[#allocation6 + $0x78] sm:$0xff] }
 0x523   :  { %4034 = vmatmul.f32.gmra.mxu1 %v3383_v35  ;;  %v5456_v23 = vpack.i.bf16 %v9898_v45, %v9410_v25  ;;  %v3356_v36 = vsel %vm3019_vm15, %v2848_v12, %v3016_v44  ;;  %v3789_v6 = vadd.f32 %v9848_v63, %v3688_v26  ;;  %v11134_v12 = vld [vmem:[#allocation88_spill] sm:$0xff]  ;;  %4561 = vmatpush.msrb.mxu0 %v4508_v31 }
 0x524   :  { %v4151_v2 = vmax.f32 %v4086_v15, 0.0 }
 0x525   :  { %v3886_v60 = vpop.f32.mrf.mxu2  ;;  %5457 = vrot.lane.b32.xlu2 %v5456_v23, %s5599_s21 }
 0x526   :  { %v4213_v14 = vrot.slane %v4151_v2, 2  ;;  %v3887_v28 = vadd.f32 %v3886_v60, %v9751_v48 }
 0x527   :  { %v2620_v41 = vpop.permute.xlu1 %2619 }
 0x528   :  { %v2649_v38 = vsel %vm2621_vm12, %v11127_v13, %v2620_v41  ;;  %v4214_v4 = vsel %vm200_vm2, %v4211_v42, %v4213_v14  ;;  %v3988_v11 = vadd.f32 %v3987_v46, %v3887_v28  ;;  %v3990_v5 = vpop.f32.mrf.mxu1  ;;  %v3800_v42 = vpop.f32.mrf.mxu0 }
 0x529   :  { %4815 = vmatmul.msk.f32.gmra.mxu3 %vm3479_vm0, %v3244_v10  ;;  %v3328_v48 = vsel %vm2820_vm13, %v2649_v38, %v5454_v34  ;;  %v9916_v8 = vmax.f32 %v4150_v52, %v4214_v4  ;;  %v3596_v10 = vadd.f32 %v9815_v55, %v11134_v12 }
 0x52a   :  { %3835 = vmatmul.f32.gmra.mxu0 %v3328_v48  ;;  %3936 = vmatmul.f32.gmra.mxu2 %v3356_v36  ;;  %v4089_v61 = vadd.f32 %v9881_v27, %v3988_v11  ;;  %v3792_v27 = vadd.f32 %v9873_v24, %v3691_v56  ;;  %v4100_v24 = vpop.f32.mrf.mxu3  ;;  %v11135_v11 = vld [vmem:[#allocation73_spill] sm:$0xff] }
 0x52c   :  { %v4152_v62 = vmax.f32 %v4089_v61, 0.0 }
 0x52d   :  { %v3889_v1 = vpop.f32.mrf.mxu2 }
 0x52e   :  { %v3890_v20 = vadd.f32 %v3889_v1, %v3789_v6  ;;  %v4215_v58 = vrot.slane %v4152_v62, 2 }
 0x52f   :  { %v3018_v21 = vpop.permute.xlu1 %3017 }
 0x530   :  { %v3047_v57 = vsel %vm3019_vm15, %v3016_v44, %v3018_v21  ;;  %v3991_v59 = vadd.f32 %v3990_v5, %v3890_v20  ;;  %v3993_v49 = vpop.f32.mrf.mxu1  ;;  %v3803_v60 = vpop.f32.mrf.mxu0  ;;  %v3697_v5 = vadd.f32 %v11135_v11, %v3596_v10  ;;  %v4523_v20 = vld [vmem:[#allocation6 + $0xf0] sm:$0xff]  ;;  %v11136_v21 = vld [vmem:[#allocation72_spill] sm:$0xff] }
 0x531   :  { %v3384_v52 = vsel %vm3216_vm14, %v3047_v57, %v3213_v32  ;;  %4582 = vmatpush.msrb.mxu2 %v4523_v20  ;;  %v3599_v57 = vadd.f32 %v9815_v55, %v11136_v21 }
 0x532   :  { %4037 = vmatmul.f32.gmra.mxu1 %v3384_v52  ;;  %v4092_v63 = vadd.f32 %v4091_v9, %v3991_v59  ;;  %v11133_v9 = vld [vmem:[#allocation17_spill] sm:$0xff]  ;;  %v3798_v36 = vadd.f32 %v3797_v7, %v3697_v5  ;;  %v4103_v26 = vpop.f32.mrf.mxu3 }
 0x533   :  { %v3694_v23 = vadd.f32 %v11133_v9, %v3593_v40 }
 0x534   :  { %v4153_v22 = vmax.f32 %v4092_v63, 0.0 }
 0x535   :  { %v3892_v47 = vpop.f32.mrf.mxu2  ;;  %v3795_v2 = vadd.f32 %v9887_v33, %v3694_v23 }
 0x536   :  { %v4216_v44 = vrot.slane %v4153_v22, 2  ;;  %v3893_v46 = vadd.f32 %v3892_v47, %v3792_v27  ;;  %v4507_v27 = vld [vmem:[#allocation6 + $0x70] sm:$0xff] }
 0x537   :  { %4562 = vmatpush.msrb.mxu0 %v4507_v27 }
 0x538   :  { %v3994_v54 = vadd.f32 %v3993_v49, %v3893_v46  ;;  %v3996_v34 = vpop.f32.mrf.mxu1  ;;  %v4217_v15 = vsel %vm200_vm2, %v4215_v58, %v4216_v44  ;;  %v3806_v6 = vpop.f32.mrf.mxu0  ;;  %v11137_v49 = vld [vmem:[#allocation44_spill] sm:$0xff] }
 0x539   :  { %v9930_v35 = vmax.f32 %v4152_v62, %v4217_v15  ;;  %v3700_v7 = vadd.f32 %v11137_v49, %v3599_v57 }
 0x53a   :  { %v4095_v32 = vadd.f32 %v4094_v30, %v3994_v54  ;;  %v4106_v56 = vpop.f32.mrf.mxu3 }
 0x53b   :  { %v3801_v51 = vadd.f32 %v3800_v42, %v3700_v7 }
 0x53c   :  { %v4154_v18 = vmax.f32 %v4095_v32, 0.0 }
 0x53d   :  { %v3895_v14 = vpop.f32.mrf.mxu2 }
 0x53e   :  { %v4218_v28 = vrot.slane %v4154_v18, 2  ;;  %v3896_v41 = vadd.f32 %v3895_v14, %v3795_v2  ;;  %v4506_v2 = vld [vmem:[#allocation6 + $0x68] sm:$0xff]  ;;  %v11140_v14 = vld [vmem:[#allocation61_spill] sm:$0xff] }
 0x53f   :  { %4563 = vmatpush.msrb.mxu0 %v4506_v2 }
 0x540   :  { %v3997_v13 = vadd.f32 %v3996_v34, %v3896_v41  ;;  %v3999_v38 = vpop.f32.mrf.mxu1  ;;  %v4219_v39 = vsel %vm200_vm2, %v4216_v44, %v4218_v28  ;;  %v3809_v58 = vpop.f32.mrf.mxu0 }
 0x541   :  { %v9937_v4 = vmax.f32 %v4153_v22, %v4219_v39  ;;  %v11138_v22 = vld [vmem:[#allocation49_spill] sm:$0xff] }
 0x542   :  { %v4098_v48 = vadd.f32 %v4097_v37, %v3997_v13  ;;  %v3602_v47 = vadd.f32 %v9815_v55, %v11138_v22 }
 0x543   :  { %v5461_v33 = vpack.i.bf16 %v9937_v4, %v9824_v16 }
 0x544   :  { %v4155_v50 = vmax.f32 %v4098_v48, 0.0  ;;  %v3703_v29 = vadd.f32 %v11139_v3, %v3602_v47  ;;  %v11145_v47 = vld [vmem:[#allocation77_spill] sm:$0xff] }
 0x545   :  { %v3898_v30 = vpop.f32.mrf.mxu2  ;;  %5462 = vrot.lane.b32.xlu1 %v5461_v33, %s5599_s21 }
 0x546   :  { %v4220_v1 = vrot.slane %v4155_v50, 2  ;;  %v3899_v61 = vadd.f32 %v3898_v30, %v3798_v36  ;;  %v3804_v34 = vadd.f32 %v3803_v60, %v3703_v29  ;;  %v11141_v60 = vld [vmem:[#allocation63_spill] sm:$0xff]  ;;  %v11142_v30 = vld [vmem:[#allocation48_spill] sm:$0xff] }
 0x548   :  { %v4221_v0 = vsel %vm200_vm2, %v4218_v28, %v4220_v1  ;;  %v4002_v17 = vpop.f32.mrf.mxu1  ;;  %v4000_v52 = vadd.f32 %v3999_v38, %v3899_v61  ;;  %v3605_v28 = vadd.f32 %v9815_v55, %v11140_v14  ;;  %v3812_v39 = vpop.f32.mrf.mxu0  ;;  %v3608_v1 = vadd.f32 %v9815_v55, %v11142_v30 }
 0x549   :  { %v9946_v59 = vmax.f32 %v4154_v18, %v4221_v0  ;;  %v4109_v18 = vpop.f32.mrf.mxu3  ;;  %v11143_v0 = vld [vmem:[#allocation53_spill] sm:$0xff] }
 0x54a   :  { %v4101_v63 = vadd.f32 %v4100_v24, %v4000_v52  ;;  %v4522_v24 = vld [vmem:[#allocation6 + $0xe8] sm:$0xff]  ;;  %v3706_v38 = vadd.f32 %v11141_v60, %v3605_v28 }
 0x54b   :  { %4583 = vmatpush.msrb.mxu2 %v4522_v24  ;;  %v11147_v24 = vld [vmem:[#allocation29_spill] sm:$0xff] }
 0x54c   :  { %v4156_v40 = vmax.f32 %v4101_v63, 0.0  ;;  %v3807_v5 = vadd.f32 %v3806_v6, %v3706_v38  ;;  %v11144_v63 = vld [vmem:[#allocation56_spill] sm:$0xff] }
 0x54d   :  { %v3901_v62 = vpop.f32.mrf.mxu2 }
 0x54e   :  { %v3902_v37 = vadd.f32 %v3901_v62, %v3801_v51  ;;  %v4222_v42 = vrot.slane %v4156_v40, 2  ;;  %v4505_v62 = vld [vmem:[#allocation6 + $0x60] sm:$0xff] }
 0x54f   :  { %4564 = vmatpush.msrb.mxu0 %v4505_v62 }
 0x550   :  { %v4003_v44 = vadd.f32 %v4002_v17, %v3902_v37  ;;  %v4005_v46 = vpop.f32.mrf.mxu1  ;;  %v3709_v17 = vadd.f32 %v11143_v0, %v3608_v1  ;;  %v3815_v7 = vpop.f32.mrf.mxu0  ;;  %v3611_v37 = vadd.f32 %v9815_v55, %v11144_v63 }
 0x552   :  { %v4104_v54 = vadd.f32 %v4103_v26, %v4003_v44  ;;  %v4112_v26 = vpop.f32.mrf.mxu3  ;;  %v3810_v6 = vadd.f32 %v3809_v58, %v3709_v17  ;;  %v3712_v44 = vadd.f32 %v11145_v47, %v3611_v37 }
 0x554   :  { %v4157_v15 = vmax.f32 %v4104_v54, 0.0  ;;  %v3813_v3 = vadd.f32 %v3812_v39, %v3712_v44  ;;  %v11148_v39 = vld [vmem:[#allocation42_spill] sm:$0xff] }
 0x555   :  { %v3904_v9 = vpop.f32.mrf.mxu2 }
 0x556   :  { %v4223_v23 = vrot.slane %v4157_v15, 2  ;;  %v3905_v32 = vadd.f32 %v3904_v9, %v3804_v34  ;;  %v4520_v34 = vld [vmem:[#allocation6 + $0xd8] sm:$0xff] }
 0x558   :  { %v4006_v41 = vadd.f32 %v4005_v46, %v3905_v32  ;;  %v4008_v12 = vpop.f32.mrf.mxu1  ;;  %v4224_v10 = vsel %vm200_vm2, %v4222_v42, %v4223_v23 }
 0x559   :  { %v9955_v13 = vmax.f32 %v4156_v40, %v4224_v10  ;;  %v3818_v40 = vpop.f32.mrf.mxu0 }
 0x55a   :  { %v4107_v31 = vadd.f32 %v4106_v56, %v4006_v41  ;;  %v4521_v56 = vld [vmem:[#allocation6 + $0xe0] sm:$0xff]  ;;  %v4115_v22 = vpop.f32.mrf.mxu3 }
 0x55b   :  { %v5466_v11 = vpack.i.bf16 %v9955_v13, %v9845_v53  ;;  %4584 = vmatpush.msrb.mxu2 %v4521_v56 }
 0x55c   :  { %v4158_v48 = vmax.f32 %v4107_v31, 0.0  ;;  %v3617_v31 = vadd.f32 %v9815_v55, %v11148_v39 }
 0x55d   :  { %v3907_v33 = vpop.f32.mrf.mxu2  ;;  %5467 = vrot.lane.b32.xlu0 %v5466_v11, %s5599_s21  ;;  %4585 = vmatpush.msrb.mxu2 %v4520_v34 }
 0x55e   :  { %v4225_v36 = vrot.slane %v4158_v48, 2  ;;  %v3908_v50 = vadd.f32 %v3907_v33, %v3807_v5 }
 0x560   :  { %v4226_v61 = vsel %vm200_vm2, %v4223_v23, %v4225_v36  ;;  %v4009_v20 = vadd.f32 %v4008_v12, %v3908_v50  ;;  %v4011_v21 = vpop.f32.mrf.mxu1  ;;  %v4504_v36 = vld [vmem:[#allocation6 + $0x58] sm:$0xff] }
 0x561   :  { %v9964_v57 = vmax.f32 %v4157_v15, %v4226_v61  ;;  %v11146_v15 = vld [vmem:[#allocation75_spill] sm:$0xff]  ;;  %v3821_v11 = vpop.f32.mrf.mxu0  ;;  %4565 = vmatpush.msrb.mxu0 %v4504_v36 }
 0x562   :  { %v9967_v49 = vadd.f32 %v4109_v18, %v4009_v20  ;;  %v3614_v9 = vadd.f32 %v9815_v55, %v11146_v15  ;;  %v4118_v32 = vpop.f32.mrf.mxu3 }
 0x564   :  { %v3715_v2 = vadd.f32 %v11147_v24, %v3614_v9 }
 0x565   :  { %v3910_v52 = vpop.f32.mrf.mxu2 }
 0x566   :  { %v3911_v51 = vadd.f32 %v3910_v52, %v3810_v6  ;;  %v3816_v28 = vadd.f32 %v3815_v7, %v3715_v2  ;;  %v4519_v52 = vld [vmem:[#allocation6 + $0xd0] sm:$0xff] }
 0x567   :  { %4586 = vmatpush.msrb.mxu2 %v4519_v52 }
 0x568   :  { %v4014_v27 = vpop.f32.mrf.mxu1  ;;  %v4012_v46 = vadd.f32 %v4011_v21, %v3911_v51  ;;  %v11150_v51 = vld [vmem:[#allocation14_spill] sm:$0xff] }
 0x569   :  { %v3620_v56 = vadd.f32 %v9815_v55, %v11150_v51  ;;  %v3824_v47 = vpop.f32.mrf.mxu0  ;;  %v5481_v51 = vpack.i.bf16 %v9866_v19, %v9916_v8 }
 0x56a   :  { %v4113_v54 = vadd.f32 %v4112_v26, %v4012_v46  ;;  %v11149_v26 = vld [vmem:[#allocation13_spill] sm:$0xff]  ;;  %v4121_v61 = vpop.f32.mrf.mxu3 }
 0x56b   :  { %v3718_v30 = vadd.f32 %v11149_v26, %v3617_v31  ;;  %v11153_v31 = vld [vmem:[#allocation35_spill] sm:$0xff] }
 0x56c   :  { %v4160_v18 = vmax.f32 %v4113_v54, 0.0 }
 0x56d   :  { %v3913_v29 = vpop.f32.mrf.mxu2  ;;  %v3819_v21 = vadd.f32 %v3818_v40, %v3718_v30 }
 0x56e   :  { %v3914_v58 = vadd.f32 %v3913_v29, %v3813_v3  ;;  %v9975_v10 = vrot.slane %v4160_v18, 2 }
 0x570   :  { %v4015_v42 = vadd.f32 %v4014_v27, %v3914_v58  ;;  %v4017_v23 = vpop.f32.mrf.mxu1  ;;  %v11151_v27 = vld [vmem:[#allocation81_spill] sm:$0xff]  ;;  %v4503_v58 = vld [vmem:[#allocation6 + $0x50] sm:$0xff] }
 0x571   :  { %4566 = vmatpush.msrb.mxu0 %v4503_v58 }
 0x572   :  { %v4116_v14 = vadd.f32 %v4115_v22, %v4015_v42  ;;  %v3721_v22 = vadd.f32 %v11151_v27, %v3620_v56  ;;  %v11157_v56 = vld [vmem:[#allocation9_spill] sm:$0xff] }
 0x573   :  { %v4124_v46 = vpop.f32.mrf.mxu3 }
 0x574   :  { %v4161_v41 = vmax.f32 %v4116_v14, 0.0  ;;  %v3822_v3 = vadd.f32 %v3821_v11, %v3721_v22 }
 0x575   :  { %v3916_v12 = vpop.f32.mrf.mxu2 }
 0x576   :  { %v4230_v60 = vrot.slane %v4161_v41, 2  ;;  %v3917_v38 = vadd.f32 %v3916_v12, %v3816_v28  ;;  %v4518_v28 = vld [vmem:[#allocation6 + $0xc8] sm:$0xff] }
 0x577   :  { %4587 = vmatpush.msrb.mxu2 %v4518_v28  ;;  %v11152_v12 = vld [vmem:[#allocation58_spill] sm:$0xff] }
 0x578   :  { %v4018_v5 = vadd.f32 %v4017_v23, %v3917_v38  ;;  %v4020_v48 = vpop.f32.mrf.mxu1  ;;  %v4231_v33 = vsel %vm200_vm2, %v9975_v10, %v4230_v60  ;;  %v3827_v23 = vpop.f32.mrf.mxu0 }
 0x579   :  { %v9981_v50 = vmax.f32 %v4160_v18, %v4231_v33 }
 0x57a   :  { %v4119_v1 = vadd.f32 %v4118_v32, %v4018_v5 }
 0x57b   :  { %v5471_v20 = vpack.i.bf16 %v9433_v43, %v9981_v50  ;;  %v4127_v24 = vpop.f32.mrf.mxu3 }
 0x57c   :  { %v4162_v0 = vmax.f32 %v4119_v1, 0.0 }
 0x57d   :  { %v3919_v17 = vpop.f32.mrf.mxu2  ;;  %5472 = vrot.lane.b32.xlu0 %v5471_v20, %s5599_s21 }
 0x57e   :  { %v4232_v6 = vrot.slane %v4162_v0, 2  ;;  %v3920_v7 = vadd.f32 %v3919_v17, %v3819_v21  ;;  %v4517_v21 = vld [vmem:[#allocation6 + $0xc0] sm:$0xff] }
 0x57f   :  { %v11155_v0 = vld [vmem:[#allocation69_spill] sm:$0xff]  ;;  %4588 = vmatpush.msrb.mxu2 %v4517_v21 }
 0x580   :  { %v4233_v62 = vsel %vm200_vm2, %v4230_v60, %v4232_v6  ;;  %v4023_v63 = vpop.f32.mrf.mxu1  ;;  %v4021_v44 = vadd.f32 %v4020_v48, %v3920_v7  ;;  %v3626_v60 = vadd.f32 %v9815_v55, %v11152_v12  ;;  %v3830_v1 = vpop.f32.mrf.mxu0  ;;  %v3623_v17 = vadd.f32 %v9815_v55, %v11155_v0  ;;  %v11156_v6 = vld [vmem:[#allocation51_spill] sm:$0xff] }
 0x581   :  { %v9990_v37 = vmax.f32 %v4161_v41, %v4233_v62  ;;  %v4502_v41 = vld [vmem:[#allocation6 + $0x48] sm:$0xff] }
 0x582   :  { %v4122_v40 = vadd.f32 %v4121_v61, %v4021_v44  ;;  %4567 = vmatpush.msrb.mxu0 %v4502_v41  ;;  %v3727_v11 = vadd.f32 %v11153_v31, %v3626_v60  ;;  %v11154_v61 = vld [vmem:[#allocation16_spill] sm:$0xff]  ;;  %v3724_v62 = vadd.f32 %v11157_v56, %v3623_v17  ;;  %v11159_v41 = vld [vmem:[#allocation62_spill] sm:$0xff] }
 0x583   :  { %v3629_v20 = vadd.f32 %v9815_v55, %v11154_v61  ;;  %v4159_v61 = vmax.f32 %v9967_v49, 0.0 }
 0x584   :  { %v4163_v9 = vmax.f32 %v4122_v40, 0.0  ;;  %v3828_v33 = vadd.f32 %v3827_v23, %v3727_v11  ;;  %v3825_v44 = vadd.f32 %v3824_v47, %v3724_v62  ;;  %v11158_v40 = vld [vmem:[#allocation59_spill] sm:$0xff]  ;;  %v4516_v23 = vld [vmem:[#allocation6 + $0xb8] sm:$0xff] }
 0x585   :  { %v3922_v29 = vpop.f32.mrf.mxu2  ;;  %v3730_v7 = vadd.f32 %v11156_v6, %v3629_v20  ;;  %4589 = vmatpush.msrb.mxu2 %v4516_v23  ;;  %v4227_v56 = vrot.slane %v4159_v61, 2 }
 0x586   :  { %v3923_v54 = vadd.f32 %v3922_v29, %v3822_v3  ;;  %v4234_v18 = vrot.slane %v4163_v9, 2 }
 0x588   :  { %v4024_v34 = vadd.f32 %v4023_v63, %v3923_v54  ;;  %v4026_v15 = vpop.f32.mrf.mxu1  ;;  %v3831_v63 = vadd.f32 %v3830_v1, %v3730_v7  ;;  %v3632_v54 = vadd.f32 %v9815_v55, %v11158_v40  ;;  %v3833_v28 = vpop.f32.mrf.mxu0 }
 0x58a   :  { %v9993_v42 = vadd.f32 %v4124_v46, %v4024_v34  ;;  %v3733_v12 = vadd.f32 %v11159_v41, %v3632_v54 }
 0x58c   :  { %v4164_v32 = vmax.f32 %v9993_v42, 0.0  ;;  %v4130_v36 = vpop.f32.mrf.mxu3  ;;  %v3834_v47 = vadd.f32 %v3833_v28, %v3733_v12  ;;  %v4497_v42 = vld [vmem:[#allocation6 + $0x20] sm:$0xff] }
 0x58d   :  { %v3925_v2 = vpop.f32.mrf.mxu2 }
 0x58e   :  { %v9998_v14 = vrot.slane %v4164_v32, 2  ;;  %v3926_v58 = vadd.f32 %v3925_v2, %v3825_v44  ;;  %v4229_v44 = vsel %vm200_vm2, %v4227_v56, %v9975_v10  ;;  %v4552_v56 = vld [vmem:[#allocation6 + $0x1d8] sm:$0xff] }
 0x58f   :  { %v10035_v54 = vmax.f32 %v4159_v61, %v4229_v44  ;;  %v4540_v61 = vld [vmem:[#allocation6 + $0x178] sm:$0xff]  ;;  %v4550_v44 = vld [vmem:[#allocation6 + $0x1c8] sm:$0xff] }
 0x590   :  { %v4236_v38 = vsel %vm200_vm2, %v4234_v18, %v9998_v14  ;;  %v4029_v5 = vpop.f32.mrf.mxu1  ;;  %v4500_v18 = vld [vmem:[#allocation6 + $0x38] sm:$0xff]  ;;  %v4027_v31 = vadd.f32 %v4026_v15, %v3926_v58 }
 0x591   :  { %v10004_v39 = vmax.f32 %v4163_v9, %v4236_v38  ;;  %v4501_v9 = vld [vmem:[#allocation6 + $0x40] sm:$0xff]  ;;  %v11161_v15 = vld [vmem:[#allocation76_spill] sm:$0xff] }
 0x592   :  { %4568 = vmatpush.msrb.mxu0 %v4501_v9  ;;  %v4128_v20 = vadd.f32 %v4127_v24, %v4027_v31  ;;  %v4498_v31 = vld [vmem:[#allocation6 + $0x28] sm:$0xff] }
 0x593   :  { %v5476_v48 = vpack.i.bf16 %v9930_v35, %v10004_v39 }
 0x594   :  { %v4133_v29 = vpop.f32.mrf.mxu3  ;;  %4569 = vmatpush.msrb.mxu0 %v4500_v18  ;;  %v4165_v62 = vmax.f32 %v4128_v20, 0.0  ;;  %v4556_v20 = vld [vmem:[#allocation6 + $0x1f8] sm:$0xff] }
 0x595   :  { %v3928_v26 = vpop.f32.mrf.mxu2  ;;  %5477 = vrot.lane.b32.xlu2 %v5476_v48, %s5599_s21 }
 0x596   :  { %v3929_v30 = vadd.f32 %v3928_v26, %v3828_v33  ;;  %v11160_v26 = vld [vmem:[#allocation83_spill] sm:$0xff] }
 0x598   :  { %v4030_v52 = vadd.f32 %v4029_v5, %v3929_v30  ;;  %v4032_v27 = vpop.f32.mrf.mxu1  ;;  %v3635_v30 = vadd.f32 %v9815_v55, %v11160_v26  ;;  %v4494_v26 = vld [vmem:[#allocation6 + $0x8] sm:$0xff] }
 0x59a   :  { %v4131_v46 = vadd.f32 %v4130_v36, %v4030_v52  ;;  %v3736_v7 = vadd.f32 %v11161_v15, %v3635_v30  ;;  %v4493_v30 = vld [vmem:[#allocation6] sm:$0xff]  ;;  %v4554_v15 = vld [vmem:[#allocation6 + $0x1e8] sm:$0xff] }
 0x59c   :  { %v4166_v60 = vmax.f32 %v4131_v46, 0.0  ;;  %v4237_v46 = vrot.slane %v4165_v62, 2  ;;  %v4535_v62 = vld [vmem:[#allocation6 + $0x150] sm:$0xff] }
 0x59d   :  { %v3931_v22 = vpop.f32.mrf.mxu2  ;;  %5482 = vrot.lane.b32.xlu2 %v5481_v51, %s5599_s21 }
 0x59e   :  { %v3932_v3 = vadd.f32 %v3931_v22, %v3831_v63  ;;  %v4239_v48 = vrot.slane %v4166_v60, 2  ;;  %v4238_v23 = vsel %vm200_vm2, %v9998_v14, %v4237_v46  ;;  %v4533_v46 = vld [vmem:[#allocation6 + $0x140] sm:$0xff] }
 0x59f   :  { %v10046_v28 = vmax.f32 %v4164_v32, %v4238_v23  ;;  %v4512_v32 = vld [vmem:[#allocation6 + $0x98] sm:$0xff] }
 0x5a0   :  { %v4033_v34 = vadd.f32 %v4032_v27, %v3932_v3  ;;  %v4035_v36 = vpop.f32.mrf.mxu1  ;;  %v4548_v23 = vld [vmem:[#allocation6 + $0x1b8] sm:$0xff] }
 0x5a2   :  { %v4134_v38 = vadd.f32 %v4133_v29, %v4033_v34 }
 0x5a4   :  { %v4167_v11 = vmax.f32 %v4134_v38, 0.0  ;;  %v4136_v1 = vpop.f32.mrf.mxu3  ;;  %v4499_v38 = vld [vmem:[#allocation6 + $0x30] sm:$0xff] }
 0x5a5   :  { %v3934_v5 = vpop.f32.mrf.mxu2  ;;  %4570 = vmatpush.msrb.mxu0 %v4499_v38 }
 0x5a6   :  { %v4240_v33 = vrot.slane %v4167_v11, 2  ;;  %v3935_v2 = vadd.f32 %v3934_v5, %v3834_v47  ;;  %v4514_v47 = vld [vmem:[#allocation6 + $0xa8] sm:$0xff]  ;;  %v4513_v5 = vld [vmem:[#allocation6 + $0xa0] sm:$0xff] }
 0x5a7   :  { %v3836_v17 = vpop.f32.mrf.mxu0  ;;  %4571 = vmatpush.msrb.mxu0 %v4498_v31 }
 0x5a8   :  { %v4036_v21 = vadd.f32 %v4035_v36, %v3935_v2  ;;  %v4241_v0 = vsel %vm200_vm2, %v4239_v48, %v4240_v33  ;;  %v3837_v55 = vadd.f32 %v3836_v17, %v3736_v7  ;;  %v4496_v48 = vld [vmem:[#allocation6 + $0x18] sm:$0xff]  ;;  %v4495_v36 = vld [vmem:[#allocation6 + $0x10] sm:$0xff]  ;;  %v4510_v2 = vld [vmem:[#allocation6 + $0x88] sm:$0xff] }
 0x5a9   :  { %v10026_v6 = vmax.f32 %v4166_v60, %v4241_v0  ;;  %v4515_v60 = vld [vmem:[#allocation6 + $0xb0] sm:$0xff]  ;;  %4572 = vmatpush.msrb.mxu0 %v4497_v42  ;;  %v4538_v17 = vld [vmem:[#allocation6 + $0x168] sm:$0xff]  ;;  %v4537_v7 = vld [vmem:[#allocation6 + $0x160] sm:$0xff] }
 0x5aa   :  { %v4137_v52 = vadd.f32 %v4136_v1, %v4036_v21  ;;  %4590 = vmatpush.msrb.mxu2 %v4515_v60  ;;  %v4509_v1 = vld [vmem:[#allocation6 + $0x80] sm:$0xff]  ;;  %v4555_v21 = vld [vmem:[#allocation6 + $0x1f0] sm:$0xff] }
 0x5ab   :  { %v5491_v51 = vpack.i.bf16 %v9964_v57, %v10026_v6  ;;  %4573 = vmatpush.msrb.mxu0 %v4496_v48  ;;  %v4539_v0 = vld [vmem:[#allocation6 + $0x170] sm:$0xff]  ;;  %v4545_v48 = vld [vmem:[#allocation6 + $0x1a0] sm:$0xff] }
 0x5ac   :  { %v4168_v63 = vmax.f32 %v4137_v52, 0.0  ;;  %v4139_v40 = vpop.f32.mrf.mxu3  ;;  %4591 = vmatpush.msrb.mxu2 %v4514_v47  ;;  %v4553_v52 = vld [vmem:[#allocation6 + $0x1e0] sm:$0xff] }
 0x5ad   :  { %v3937_v27 = vpop.f32.mrf.mxu2  ;;  %5492 = vrot.lane.b32.xlu0 %v5491_v51, %s5599_s21  ;;  %4574 = vmatpush.msrb.mxu0 %v4495_v36  ;;  %v4536_v51 = vld [vmem:[#allocation6 + $0x158] sm:$0xff] }
 0x5ae   :  { %v4242_v49 = vrot.slane %v4168_v63, 2  ;;  %v3938_v24 = vadd.f32 %v3937_v27, %v3837_v55  ;;  %4592 = vmatpush.msrb.mxu2 %v4513_v5  ;;  %v5458_v55 = vpop.permute.xlu2 %5457  ;;  %v4546_v5 = vld [vmem:[#allocation6 + $0x1a8] sm:$0xff] }
 0x5af   :  { %v4038_v22 = vpop.f32.mrf.mxu1  ;;  %4575 = vmatpush.msrb.mxu0 %v4494_v26  ;;  %v4544_v26 = vld [vmem:[#allocation6 + $0x198] sm:$0xff] }
 0x5b0   :  { %v4039_v3 = vadd.f32 %v4038_v22, %v3938_v24  ;;  %v4243_v29 = vsel %vm200_vm2, %v4240_v33, %v4242_v49  ;;  %v4511_v33 = vld [vmem:[#allocation6 + $0x90] sm:$0xff]  ;;  %4593 = vmatpush.msrb.mxu2 %v4512_v32  ;;  %v5459_v24 = vunpack.i.l.bf16 %v5458_v55  ;;  %v4534_v22 = vld [vmem:[#allocation6 + $0x148] sm:$0xff]  ;;  %v4529_v32 = vld [vmem:[#allocation6 + $0x120] sm:$0xff] }
 0x5b1   :  { %v10037_v58 = vmax.f32 %v4167_v11, %v4243_v29  ;;  %v5496_v11 = vpack.i.bf16 %v10046_v28, %v9946_v59  ;;  %4576 = vmatpush.msrb.mxu0 %v4493_v30 }
 0x5b2   :  { %v4140_v34 = vadd.f32 %v4139_v40, %v4039_v3  ;;  %4594 = vmatpush.msrb.mxu2 %v4511_v33  ;;  %v4549_v40 = vld [vmem:[#allocation6 + $0x1c0] sm:$0xff] }
 0x5b3   :  { %v5486_v9 = vpack.i.bf16 %v10037_v58, %v10035_v54  ;;  %4601 = vmatpush.msra.mxu0 %v4540_v61 }
 0x5b4   :  { %v4169_v18 = vmax.f32 %v4140_v34, 0.0  ;;  %4595 = vmatpush.msrb.mxu2 %v4510_v2  ;;  %v5460_v34 = vunpack.i.h.bf16 %v5458_v55  ;;  %v4528_v2 = vld [vmem:[#allocation6 + $0x118] sm:$0xff] }
 0x5b5   :  { %5487 = vrot.lane.b32.xlu1 %v5486_v9, %s5599_s21  ;;  %4602 = vmatpush.msra.mxu0 %v4539_v0  ;;  %v4532_v9 = vld [vmem:[#allocation6 + $0x138] sm:$0xff] }
 0x5b6   :  { %v4244_v10 = vrot.slane %v4169_v18, 2  ;;  %4596 = vmatpush.msrb.mxu2 %v4509_v1  ;;  %v4366_v18 = vmax.f32 %v9410_v25, %v5459_v24  ;;  %v10063_v31 = vmax.f32 %v9898_v45, %v5460_v34  ;;  %v4530_v25 = vld [vmem:[#allocation6 + $0x128] sm:$0xff]  ;;  %v4525_v24 = vld [vmem:[#allocation6 + $0x100] sm:$0xff] }
 0x5b7   :  { %4603 = vmatpush.msra.mxu0 %v4538_v17  ;;  %v5463_v27 = vpop.permute.xlu1 %5462 }
 0x5b8   :  { %v4245_v41 = vsel %vm200_vm2, %v4242_v49, %v4244_v10  ;;  %4621 = vmatpush.msra.mxu2 %v4556_v20  ;;  %v5464_v3 = vunpack.i.l.bf16 %v5463_v27  ;;  %v4531_v10 = vld [vmem:[#allocation6 + $0x130] sm:$0xff]  ;;  %v5465_v42 = vunpack.i.h.bf16 %v5463_v27  ;;  %v4410_v36 = vrot.slane %v10063_v31, 4 }
 0x5b9   :  { %v10049_v12 = vmax.f32 %v4168_v63, %v4245_v41  ;;  %4604 = vmatpush.msra.mxu0 %v4537_v7  ;;  %v4551_v63 = vld [vmem:[#allocation6 + $0x1d0] sm:$0xff]  ;;  %vm4432_vm2 = vcmask 1042434  }
 0x5ba   :  { %4622 = vmatpush.msra.mxu2 %v4555_v21  ;;  %v4547_v41 = vld [vmem:[#allocation6 + $0x1b0] sm:$0xff]  ;;  %v4368_v60 = vmax.f32 %v9824_v16, %v5464_v3  ;;  %v4374_v1 = vmax.f32 %v9937_v4, %v5465_v42  ;;  %v4447_v7 = vperm.slane %v4410_v36, 0 }
 0x5bb   :  { %v5501_v14 = vpack.i.bf16 %v10049_v12, %v9990_v37  ;;  %4605 = vmatpush.msra.mxu0 %v4536_v51  ;;  %v4527_v20 = vld [vmem:[#allocation6 + $0x110] sm:$0xff]  ;;  %v4526_v51 = vld [vmem:[#allocation6 + $0x108] sm:$0xff] }
 0x5bc   :  { %4623 = vmatpush.msra.mxu2 %v4554_v15  ;;  %v4408_v33 = vrot.slane %v4368_v60, 4  ;;  %v4543_v21 = vld [vmem:[#allocation6 + $0x190] sm:$0xff]  ;;  %v4413_v55 = vrot.slane %v4374_v1, 4 }
 0x5bd   :  { %5502 = vrot.lane.b32.xlu2 %v5501_v14, %s5599_s21  ;;  %5497 = vrot.lane.b32.xlu1 %v5496_v11, %s5599_s21  ;;  %v4406_v11 = vrot.slane %v4366_v18, 4 }
 0x5be   :  { %4624 = vmatpush.msra.mxu2 %v4553_v52  ;;  %4606 = vmatpush.msra.mxu0 %v4535_v62  ;;  %v4423_v0 = vperm.slane %v4408_v33, 0  ;;  %v4424_v62 = vperm.slane %v10063_v31, 0 }
 0x5bf   :  { %v4445_v30 = vperm.slane %v4406_v11, 0 }
 0x5c0   :  { %4625 = vmatpush.msra.mxu2 %v4552_v56  ;;  %4607 = vmatpush.msra.mxu0 %v4534_v22  ;;  %v4542_v56 = vld [vmem:[#allocation6 + $0x188] sm:$0xff]  ;;  %v4541_v22 = vld [vmem:[#allocation6 + $0x180] sm:$0xff] }
 0x5c2   :  { %4626 = vmatpush.msra.mxu2 %v4551_v63  ;;  %4608 = vmatpush.msra.mxu0 %v4533_v46  ;;  %v4422_v63 = vperm.slane %v4366_v18, 0 }
 0x5c4   :  { %4627 = vmatpush.msra.mxu2 %v4550_v44  ;;  %4609 = vmatpush.msra.mxu0 %v4532_v9  ;;  %v4448_v44 = vperm.slane %v4374_v1, 0  ;;  %v4431_v46 = vsel %vm4430_vm1, %v4423_v0, %v4422_v63 }
 0x5c6   :  { %4628 = vmatpush.msra.mxu2 %v4549_v40  ;;  %4610 = vmatpush.msra.mxu0 %v4531_v10  ;;  %v4464_v10 = vperm.slane %v4413_v55, 0 }
 0x5c8   :  { %4629 = vmatpush.msra.mxu2 %v4548_v23  ;;  %4611 = vmatpush.msra.mxu0 %v4530_v25 }
 0x5ca   :  { %4630 = vmatpush.msra.mxu2 %v4547_v41  ;;  %4612 = vmatpush.msra.mxu0 %v4529_v32 }
 0x5cc   :  { %4631 = vmatpush.msra.mxu2 %v4546_v5  ;;  %4613 = vmatpush.msra.mxu0 %v4528_v2 }
 0x5ce   :  { %4632 = vmatpush.msra.mxu2 %v4545_v48  ;;  %4614 = vmatpush.msra.mxu0 %v4527_v20 }
 0x5cf   :  { %v5468_v49 = vpop.permute.xlu0 %5467 }
 0x5d0   :  { %v5469_v29 = vunpack.i.l.bf16 %v5468_v49  ;;  %v5470_v14 = vunpack.i.h.bf16 %v5468_v49  ;;  %4633 = vmatpush.msra.mxu2 %v4544_v26  ;;  %4615 = vmatpush.msra.mxu0 %v4526_v51 }
 0x5d2   :  { %v10060_v38 = vmax.f32 %v9845_v53, %v5469_v29  ;;  %v10068_v45 = vmax.f32 %v9955_v13, %v5470_v14  ;;  %4634 = vmatpush.msra.mxu2 %v4543_v21  ;;  %4616 = vmatpush.msra.mxu0 %v4525_v24 }
 0x5d4   :  { %v4446_v16 = vperm.slane %v10060_v38, 0  ;;  %v4414_v13 = vrot.slane %v10068_v45, 4  ;;  %4635 = vmatpush.msra.mxu2 %v4542_v56  ;;  %v4409_v9 = vrot.slane %v10060_v38, 4 }
 0x5d6   :  { %v4453_v17 = vsel %vm4430_vm1, %v4446_v16, %v4445_v30  ;;  %v4449_v34 = vperm.slane %v4414_v13, 0  ;;  %4636 = vmatpush.msra.mxu2 %v4541_v22  ;;  %v4462_v11 = vperm.slane %v4409_v9, 0  ;;  %v4657_v9 = vld [vmem:[%s10240_s7 + $0x78] sm:$0xff] }
 0x5d7   :  { %v4454_v27 = vsel %vm4432_vm2, %v4447_v7, %v4453_v17 }
 0x5ef   :  { %v5478_v47 = vpop.permute.xlu2 %5477  ;;  %v5473_v53 = vpop.permute.xlu0 %5472 }
 0x5f0   :  { %v5480_v61 = vunpack.i.h.bf16 %v5478_v47  ;;  %v5479_v15 = vunpack.i.l.bf16 %v5478_v47  ;;  %v5474_v52 = vunpack.i.l.bf16 %v5473_v53  ;;  %v5475_v29 = vunpack.i.h.bf16 %v5473_v53 }
 0x5f1   :  { %v4426_v47 = vperm.slane %v10068_v45, 0 }
 0x5f2   :  { %v4373_v49 = vmax.f32 %v9930_v35, %v5480_v61  ;;  %v10078_v3 = vmax.f32 %v10004_v39, %v5479_v15  ;;  %v10082_v23 = vmax.f32 %v9981_v50, %v5474_v52  ;;  %v4455_v35 = vsel %vm4434_vm3, %v4448_v44, %v4454_v27 }
 0x5f3   :  { %v4433_v39 = vsel %vm4432_vm2, %v4424_v62, %v4431_v46  ;;  %v4367_v38 = vmax.f32 %v9433_v43, %v5475_v29  ;;  %v4456_v50 = vsel %vm4436_vm4, %v4449_v34, %v4455_v35 }
 0x5f4   :  { %v4412_v41 = vrot.slane %v4373_v49, 4  ;;  %v4418_v31 = vrot.slane %v10078_v3, 4  ;;  %v4450_v25 = vperm.slane %v10082_v23, 0  ;;  %v4428_v42 = vperm.slane %v10078_v3, 0 }
 0x5f5   :  { %v4407_v45 = vrot.slane %v4367_v38, 4  ;;  %v4461_v2 = vperm.slane %v4367_v38, 0  ;;  %v4417_v20 = vrot.slane %v10082_v23, 4 }
 0x5f6   :  { %v4425_v33 = vperm.slane %v4412_v41, 0  ;;  %v4451_v43 = vperm.slane %v4418_v31, 0  ;;  %v4457_v61 = vsel %vm4438_vm5, %v4450_v25, %v4456_v50  ;;  %v4655_v50 = vld [vmem:[%s10240_s7 + $0x68] sm:$0xff] }
 0x5f7   :  { %v5483_v4 = vpop.permute.xlu2 %5482  ;;  %v4469_v52 = vsel %vm4430_vm1, %v4462_v11, %v4461_v2 }
 0x5f8   :  { %v5484_v18 = vunpack.i.l.bf16 %v5483_v4  ;;  %v5485_v14 = vunpack.i.h.bf16 %v5483_v4  ;;  %v4435_v17 = vsel %vm4434_vm3, %v4425_v33, %v4433_v39  ;;  %v4466_v39 = vperm.slane %v4417_v20, 0  ;;  %v4647_v20 = vld [vmem:[%s10240_s7 + $0x28] sm:$0xff] }
 0x5f9   :  { %v4437_v27 = vsel %vm4436_vm4, %v4426_v47, %v4435_v17  ;;  %v4643_v17 = vld [vmem:[%s10240_s7 + $0x8] sm:$0xff] }
 0x5fa   :  { %v4372_v5 = vmax.f32 %v9916_v8, %v5484_v18  ;;  %v4370_v26 = vmax.f32 %v9866_v19, %v5485_v14  ;;  %v4477_v19 = vperm.slane %v4407_v45, 0 }
 0x5fc   :  { %v4463_v30 = vperm.slane %v4372_v5, 0  ;;  %v4411_v21 = vrot.slane %v4372_v5, 4 }
 0x5fe   :  { %v4470_v51 = vsel %vm4432_vm2, %v4463_v30, %v4469_v52  ;;  %v4479_v4 = vperm.slane %v4411_v21, 0  ;;  %v4651_v30 = vld [vmem:[%s10240_s7 + $0x48] sm:$0xff]  ;;  %v4646_v21 = vld [vmem:[%s10240_s7 + $0x20] sm:$0xff] }
 0x5ff   :  { %v4695_v52 = vld [vmem:[%s10242_s9 + $0x60] sm:$0xff] }
 0x617   :  { %v5503_v0 = vpop.permute.xlu2 %5502 }
 0x618   :  { %v5504_v56 = vunpack.i.l.bf16 %v5503_v0 }
 0x61a   :  { %v4380_v23 = vmax.f32 %v9990_v37, %v5504_v56  ;;  %v4691_v56 = vld [vmem:[%s10242_s9 + $0x40] sm:$0xff] }
 0x61f   :  { %v5493_v40 = vpop.permute.xlu0 %5492 }
 0x620   :  { %v5494_v60 = vunpack.i.l.bf16 %v5493_v40  ;;  %v5495_v32 = vunpack.i.h.bf16 %v5493_v40  ;;  %v4471_v40 = vsel %vm4434_vm3, %v4464_v10, %v4470_v51  ;;  %v4656_v10 = vld [vmem:[%s10240_s7 + $0x70] sm:$0xff]  ;;  %v4692_v51 = vld [vmem:[%s10242_s9 + $0x48] sm:$0xff] }
 0x622   :  { %v4383_v16 = vmax.f32 %v10026_v6, %v5494_v60  ;;  %v4377_v6 = vmax.f32 %v9964_v57, %v5495_v32  ;;  %v5505_v57 = vunpack.i.h.bf16 %v5503_v0  ;;  %v4645_v0 = vld [vmem:[%s10240_s7 + $0x18] sm:$0xff] }
 0x624   :  { %v4420_v15 = vrot.slane %v4383_v16, 4  ;;  %v4465_v55 = vperm.slane %v4377_v6, 0  ;;  %v4415_v29 = vrot.slane %v4377_v6, 4  ;;  %v4385_v60 = vmax.f32 %v10049_v12, %v5505_v57  ;;  %v4644_v6 = vld [vmem:[%s10240_s7 + $0x10] sm:$0xff] }
 0x625   :  { %v4482_v12 = vperm.slane %v4380_v23, 0  ;;  %v4689_v57 = vld [vmem:[%s10242_s9 + $0x30] sm:$0xff]  ;;  %v4684_v23 = vld [vmem:[%s10242_s9 + $0x8] sm:$0xff] }
 0x626   :  { %v4429_v24 = vperm.slane %v4420_v15, 0  ;;  %v4472_v47 = vsel %vm4436_vm4, %v4465_v55, %v4471_v40  ;;  %v4484_v33 = vperm.slane %v4385_v60, 0  ;;  %v4642_v15 = vld [vmem:[%s10240_s7] sm:$0xff]  ;;  %v4688_v55 = vld [vmem:[%s10242_s9 + $0x28] sm:$0xff] }
 0x627   :  { %v5488_v48 = vpop.permute.xlu1 %5487  ;;  %v4473_v5 = vsel %vm4438_vm5, %v4466_v39, %v4472_v47  ;;  %v5509_v47 = vld [vmem:[%s10243_s10] ss:$0 sm:$0xff] }
 0x628   :  { %v5490_v53 = vunpack.i.h.bf16 %v5488_v48  ;;  %v5489_v36 = vunpack.i.l.bf16 %v5488_v48  ;;  %v4654_v48 = vld [vmem:[%s10240_s7 + $0x60] sm:$0xff] }
 0x62a   :  { %v4384_v1 = vmax.f32 %v10037_v58, %v5490_v53  ;;  %v4378_v8 = vmax.f32 %v10035_v54, %v5489_v36  ;;  %v4478_v58 = vperm.slane %v4370_v26, 0  ;;  %v4458_v54 = vsel %vm4440_vm6, %v4451_v43, %v4457_v61  ;;  %v4653_v43 = vld [vmem:[%s10240_s7 + $0x58] sm:$0xff]  ;;  %v4652_v26 = vld [vmem:[%s10240_s7 + $0x50] sm:$0xff] }
 0x62b   :  { %v4648_v61 = vld [vmem:[%s10240_s7 + $0x30] sm:$0xff] }
 0x62c   :  { %v4452_v7 = vperm.slane %v4384_v1, 0  ;;  %v4416_v13 = vrot.slane %v4378_v8, 4  ;;  %v4485_v3 = vsel %vm4430_vm1, %v4478_v58, %v4477_v19  ;;  %v4421_v31 = vrot.slane %v4384_v1, 4  ;;  %v4650_v1 = vld [vmem:[%s10240_s7 + $0x40] sm:$0xff]  ;;  %v4649_v8 = vld [vmem:[%s10240_s7 + $0x38] sm:$0xff]  ;;  %v4696_v19 = vld [vmem:[%s10242_s9 + $0x68] sm:$0xff] }
 0x62d   :  { %v4694_v58 = vld [vmem:[%s10242_s9 + $0x58] sm:$0xff] }
 0x62e   :  { %v4427_v62 = vperm.slane %v4416_v13, 0  ;;  %v4459_v63 = vsel %vm4442_vm7, %v4452_v7, %v4458_v54  ;;  %v4468_v16 = vperm.slane %v4421_v31, 0  ;;  %v4698_v7 = vld [vmem:[%s10242_s9 + $0x78] sm:$0xff]  ;;  %v4697_v13 = vld [vmem:[%s10242_s9 + $0x70] sm:$0xff] }
 0x62f   :  { %v5498_v49 = vpop.permute.xlu1 %5497  ;;  %4597 = vmatmul.f32.vlgmr.msrb.gmra.mxu2 %v4459_v63  ;;  %v4693_v54 = vld [vmem:[%s10242_s9 + $0x50] sm:$0xff]  ;;  %v4690_v63 = vld [vmem:[%s10242_s9 + $0x38] sm:$0xff] }
 0x630   :  { %v4439_v22 = vsel %vm4438_vm5, %v4427_v62, %v4437_v27  ;;  %v5500_v44 = vunpack.i.h.bf16 %v5498_v49  ;;  %v5499_v46 = vunpack.i.l.bf16 %v5498_v49  ;;  %4703 = vmatpush.msrb.mxu2 %v4698_v7 }
 0x631   :  { %v4441_v34 = vsel %vm4440_vm6, %v4428_v42, %v4439_v22  ;;  %v4686_v22 = vld [vmem:[%s10242_s9 + $0x18] sm:$0xff] }
 0x632   :  { %v4382_v18 = vmax.f32 %v10046_v28, %v5500_v44  ;;  %v4375_v35 = vmax.f32 %v9946_v59, %v5499_v46  ;;  %v4443_v41 = vsel %vm4442_vm7, %v4429_v24, %v4441_v34  ;;  %v4481_v28 = vperm.slane %v4415_v29, 0  ;;  %4704 = vmatpush.msrb.mxu2 %v4697_v13  ;;  %v4687_v24 = vld [vmem:[%s10242_s9 + $0x20] sm:$0xff] }
 0x633   :  { %4577 = vmatmul.f32.vlgmr.msrb.gmra.mxu0 %v4443_v41  ;;  %v4486_v59 = vsel %vm4432_vm2, %v4479_v4, %v4485_v3  ;;  %v5507_v4 = vld [vmem:[%s10239_s6] ss:$0 sm:$0xff] }
 0x634   :  { %v4419_v38 = vrot.slane %v4382_v18, 4  ;;  %v4467_v14 = vperm.slane %v4382_v18, 0  ;;  %v4480_v37 = vperm.slane %v4375_v35, 0  ;;  %4662 = vmatpush.msrb.mxu0 %v4657_v9  ;;  %4705 = vmatpush.msrb.mxu2 %v4696_v19  ;;  %v4685_v9 = vld [vmem:[%s10242_s9 + $0x10] sm:$0xff]  ;;  %v4683_v18 = vld [vmem:[%s10242_s9] sm:$0xff] }
 0x635   :  { %v5508_v35 = vld [vmem:[%s10241_s8] ss:$0 sm:$0xff] }
 0x636   :  { %v4483_v11 = vperm.slane %v4419_v38, 0  ;;  %v4487_v25 = vsel %vm4434_vm3, %v4480_v37, %v4486_v59  ;;  %4663 = vmatpush.msrb.mxu0 %v4656_v10  ;;  %v4474_v32 = vsel %vm4440_vm6, %v4467_v14, %v4473_v5  ;;  %4706 = vmatpush.msrb.mxu2 %v4695_v52 }
 0x637   :  { %v4488_v42 = vsel %vm4436_vm4, %v4481_v28, %v4487_v25  ;;  %v4475_v45 = vsel %vm4442_vm7, %v4468_v16, %v4474_v32 }
 0x638   :  { %v4489_v53 = vsel %vm4438_vm5, %v4482_v12, %v4488_v42  ;;  %4664 = vmatpush.msrb.mxu0 %v4655_v50  ;;  %4707 = vmatpush.msrb.mxu2 %v4694_v58 }
 0x639   :  { %v4490_v36 = vsel %vm4440_vm6, %v4483_v11, %v4489_v53 }
 0x63a   :  { %v4491_v2 = vsel %vm4442_vm7, %v4484_v33, %v4490_v36  ;;  %4665 = vmatpush.msrb.mxu0 %v4654_v48  ;;  %4708 = vmatpush.msrb.mxu2 %v4693_v54 }
 0x63b   :  { %4617 = vmatmul.f32.vlgmr.msra.gmra.mxu0 %v4475_v45  ;;  %4637 = vmatmul.f32.vlgmr.msra.gmra.mxu2 %v4491_v2 }
 0x63c   :  { %4666 = vmatpush.msrb.mxu0 %v4653_v43  ;;  %4709 = vmatpush.msrb.mxu2 %v4692_v51 }
 0x63e   :  { %4667 = vmatpush.msrb.mxu0 %v4652_v26  ;;  %4710 = vmatpush.msrb.mxu2 %v4691_v56 }
 0x640   :  { %4668 = vmatpush.msrb.mxu0 %v4651_v30  ;;  %4711 = vmatpush.msrb.mxu2 %v4690_v63 }
 0x642   :  { %4669 = vmatpush.msrb.mxu0 %v4650_v1  ;;  %4712 = vmatpush.msrb.mxu2 %v4689_v57 }
 0x644   :  { %4670 = vmatpush.msrb.mxu0 %v4649_v8  ;;  %4713 = vmatpush.msrb.mxu2 %v4688_v55 }
 0x646   :  { %4671 = vmatpush.msrb.mxu0 %v4648_v61  ;;  %4714 = vmatpush.msrb.mxu2 %v4687_v24 }
 0x648   :  { %4672 = vmatpush.msrb.mxu0 %v4647_v20  ;;  %4715 = vmatpush.msrb.mxu2 %v4686_v22 }
 0x64a   :  { %4673 = vmatpush.msrb.mxu0 %v4646_v21  ;;  %4716 = vmatpush.msrb.mxu2 %v4685_v9 }
 0x64c   :  { %4674 = vmatpush.msrb.mxu0 %v4645_v0  ;;  %4717 = vmatpush.msrb.mxu2 %v4684_v23 }
 0x64e   :  { %4675 = vmatpush.msrb.mxu0 %v4644_v6  ;;  %4718 = vmatpush.msrb.mxu2 %v4683_v18 }
 0x650   :  { %4676 = vmatpush.msrb.mxu0 %v4643_v17 }
 0x652   :  { %4677 = vmatpush.msrb.mxu0 %v4642_v15 }
 0x6b0   :  { %v4578_v62 = vpop.f32.mrf.mxu0 }
 0x6b1   :  { %v4579_v49 = vadd.f32 %v5507_v4, %v4578_v62 }
 0x6b2   :  { %v4598_v27 = vpop.f32.mrf.mxu2 }
 0x6b3   :  { %v4599_v46 = vadd.f32 %v4598_v27, %v4579_v49 }
 0x6b8   :  { %v4618_v44 = vpop.f32.mrf.mxu0 }
 0x6b9   :  { %v4619_v3 = vadd.f32 %v4618_v44, %v4599_v46 }
 0x6be   :  { %v4638_v29 = vpop.f32.mrf.mxu2 }
 0x6bf   :  { %v4639_v40 = vadd.f32 %v4638_v29, %v4619_v3 }
 0x6c1   :  { %v4641_v34 = vmax.f32 %v4639_v40, 0.0 }
 0x6c3   :  { %4678 = vmatmul.f32.vlgmr.msrb.gmra.mxu0 %v4641_v34 }
 0x740   :  { %v4679_v41 = vpop.f32.mrf.mxu0 }
 0x741   :  { %v4680_v39 = vadd.f32 %v5508_v35, %v4679_v41 }
 0x743   :  { %v4682_v60 = vmax.f32 %v4680_v39, 0.0 }
 0x745   :  { %4719 = vmatmul.f32.vlgmr.msrb.gmra.mxu2 %v4682_v60 }
 0x7c8   :  { %v4720_v10 = vpop.f32.mrf.mxu2 }
 0x7c9   :  { %v4721_v31 = vadd.f32 %v5509_v47, %v4720_v10 }
 0x7cb   :  { %4723 = vst [vmem:[%s10244_s11] sm:$0xff] %v4721_v31 }
 0x7cc   :  { %4728 = vsyncpa [#allocation3], 1 }
 0x7cd   :  { %4729 = vsyncpa [#allocation5], 1 }

</bundles_post_ra>
